<compile_context>
chip_gen: v6e
topology: v6e:2x2x1
jax: 0.10.0
libtpu: 0.0.40
codegen_flags: <defaults>
</compile_context>

<pallas_src>
import functools

import jax
import jax.numpy as jnp
from jax import lax
from jax.experimental import pallas as pl
from jax.experimental.pallas import tpu as pltpu

C_IN = 3      # input image channels
C1 = 64       # conv1 / deconv1 channels
C2 = 128      # conv2 (bottleneck) channels
C_OUT = 3     # output image channels
K1 = 9 * C_IN     # 27  (conv1 im2col K)
K1P = 32          # conv1 im2col K padded to a lane-friendly 32
K2 = 9 * C1       # 576 (conv2 im2col K)


# -----------------------------------------------------------------------------
# Fused whole-model kernel: one batch element (person + clothing) per grid step.
# -----------------------------------------------------------------------------
def _tryon_kernel(x1_ref, w1_ref, b1_ref, w2_ref, b2_ref,
                  d1w_ref, d1b_ref, d2w_ref, d2b_ref,
                  o_ref, h1p_ref, *, H, W):
    # x1_ref : (1, 2*H*W, 32)   pre-packed conv1 im2col, person rows then clothing rows
    # w1_ref : (32, C1)         conv1 weight (im2col rows zero-padded 27->32); b1: (1, C1)
    # w2_ref : (576, C2)        conv2 weight, im2col layout;                   b2: (1, C2)
    # d1w_ref: (C2, 4*C1)       deconv1 weight, 4 phases fused along N;        d1b: (1, 4*C1)
    # d2w_ref: (C1, 4*C_OUT)    deconv2 weight, 4 phases fused along N;        d2b: (1, 4*C_OUT)
    # o_ref  : (1, C_OUT, H//4, 4, W)  output, row phase split out (wrapper reshapes to NCHW)
    # h1p_ref: VMEM scratch (2, H//2+2, W//2+2, C1) — zero-padded pool1 output (conv2 halo)
    H2, W2 = H // 2, W // 2
    H4, W4 = H // 4, W // 4
    M2 = 2 * H2 * W2

    # ------------------- encoder (person + clothing as ONE matmul stream) ----------
    # conv1: single im2col matmul, M = 2*H*W, K = 32, + bias + ReLU
    h = jnp.dot(x1_ref[0], w1_ref[...], preferred_element_type=jnp.float32)
    h = jnp.maximum(h + b1_ref[...], 0.0).reshape(2 * H, W, C1)

    # fused 2x2/2 max-pool (reshape + max; the image boundary sits at an even row, so
    # row pairs never straddle the two stacked images)
    h = jnp.max(h.reshape(2 * H, W2, 2, C1), axis=2)
    h = jnp.max(h.reshape(2 * H2, 2, W2, C1), axis=1)            # (2*H2, W2, C1)

    # conv2 halo scratch: zero ONLY the 1-pixel border ring; interior is fully
    # overwritten below.  Runs every grid step (scratch is uninitialized per core).
    h1p_ref[:, 0:1, :, :] = jnp.zeros((2, 1, W2 + 2, C1), jnp.float32)
    h1p_ref[:, H2 + 1:H2 + 2, :, :] = jnp.zeros((2, 1, W2 + 2, C1), jnp.float32)
    h1p_ref[:, :, 0:1, :] = jnp.zeros((2, H2 + 2, 1, C1), jnp.float32)
    h1p_ref[:, :, W2 + 1:W2 + 2, :] = jnp.zeros((2, H2 + 2, 1, C1), jnp.float32)
    h1p_ref[:, 1:1 + H2, 1:1 + W2, :] = h.reshape(2, H2, W2, C1)

    # conv2: chunked-K im2col (taps grouped 4+4+1 -> K = 256, 256, 64), accumulated.
    acc = None
    for group in ((0, 1, 2, 3), (4, 5, 6, 7), (8,)):
        cols = []
        for t in group:
            dh, dw = t // 3, t % 3
            cols.append(h1p_ref[:, dh:dh + H2, dw:dw + W2, :].reshape(M2, C1))
        lhs = cols[0] if len(cols) == 1 else jnp.concatenate(cols, axis=-1)
        part = jnp.dot(lhs, w2_ref[C1 * group[0]:C1 * (group[-1] + 1), :],
                       preferred_element_type=jnp.float32)
        acc = part if acc is None else acc + part
    h = jnp.maximum(acc + b2_ref[...], 0.0).reshape(2 * H2, W2, C2)

    # fused 2x2/2 max-pool
    h = jnp.max(h.reshape(2 * H2, W4, 2, C2), axis=2)
    h = jnp.max(h.reshape(2 * H4, 2, W4, C2), axis=1)            # (2*H4, W4, C2)

    # feature fusion: person features + clothing features
    comb = (h[0:H4] + h[H4:2 * H4]).reshape(H4 * W4, C2)         # (H4*W4, C2)

    # ------------------- decoder (fused wide-N matmuls) -----------------------------
    # deconv1: ONE matmul, N = 4*C1 = 256 (all four stride-2/kernel-2 phases fused)
    y = jnp.dot(comb, d1w_ref[...], preferred_element_type=jnp.float32)
    y = jnp.maximum(y + d1b_ref[...], 0.0)                       # (H4*W4, 256)

    # deconv2: 4 matmuls (one per deconv1 phase p = 2*kh + kw), N = 4*C_OUT = 12.
    # Bias folded here; tanh deferred to the lane-dense assembled output.
    z = []
    for p in range(4):
        zp = jnp.dot(y[:, C1 * p:C1 * (p + 1)], d2w_ref[...],
                     preferred_element_type=jnp.float32) + d2b_ref[...]
        z.append(zp.reshape(H4, W4, 4 * C_OUT))                  # q = 2*lh+lw blocks of 3

    # Assemble (C_OUT, H4, 4, W): output pixel (4i + a, 4j + b) with row phase
    # a = 2*kh + lh and column phase b = 2*kw + lw comes from
    # z[2*kh + b//2][i, j, 3*(2*lh + b%2) + c].
    slabs = []
    for a in range(4):
        kh, lh = a // 2, a % 2
        chans = []
        for c in range(C_OUT):
            cols = [z[2 * kh + b // 2][:, :, C_OUT * (2 * lh + b % 2) + c]
                    for b in range(4)]
            chans.append(jnp.stack(cols, axis=-1).reshape(H4, W))
        slabs.append(jnp.stack(chans, axis=0))                   # (C_OUT, H4, W)
    # Single wide, W-lane-dense store; tanh applied ONCE on lane-dense data.
    o_ref[0] = jnp.tanh(jnp.stack(slabs, axis=2))                # (C_OUT, H4, 4, W)


# -----------------------------------------------------------------------------
# Wrapper
# -----------------------------------------------------------------------------
def tryon_forward(params, person_nchw, clothing_nchw):
    N, _, H, W = person_nchw.shape
    assert H % 4 == 0 and W % 4 == 0, "two stride-2 pools need H, W divisible by 4"
    H4 = H // 4

    # conv1 is K=27 (negligible FLOPs): pre-pack its im2col in XLA so the kernel input
    # is lane-dense (last dim 32) instead of a C=3 NHWC block that lane-pads ~42x.
    def im2col_conv1(x_nchw):
        x = jnp.transpose(x_nchw, (0, 2, 3, 1))                  # NHWC
        xp = jnp.pad(x, ((0, 0), (1, 1), (1, 1), (0, 0)))
        cols = [xp[:, dh:dh + H, dw:dw + W, :] for dh in range(3) for dw in range(3)]
        c = jnp.concatenate(cols, axis=-1).reshape(N, H * W, K1)
        return jnp.pad(c, ((0, 0), (0, 0), (0, K1P - K1)))       # (N, H*W, 32)

    # Both encoders as one matmul stream: person rows then clothing rows along M.
    x1 = jnp.concatenate([im2col_conv1(person_nchw), im2col_conv1(clothing_nchw)],
                         axis=1)                                 # (N, 2*H*W, 32)

    w1 = jnp.pad(params["conv1_w"].reshape(K1, C1), ((0, K1P - K1), (0, 0)))   # (32, 64)
    w2 = params["conv2_w"].reshape(K2, C2)                                      # (576, 128)
    # Fused decoder weights: phase p = 2*kh+kw (deconv1), q = 2*lh+lw (deconv2).
    d1w = jnp.transpose(params["deconv1_w"], (2, 0, 1, 3)).reshape(C2, 4 * C1)  # (128, 256)
    d1b = jnp.tile(params["deconv1_b"], (1, 4))                                 # (1, 256)
    d2w = jnp.transpose(params["deconv2_w"], (2, 0, 1, 3)).reshape(C1, 4 * C_OUT)  # (64, 12)
    d2b = jnp.tile(params["deconv2_b"], (1, 4))                                 # (1, 12)

    kernel = functools.partial(_tryon_kernel, H=H, W=W)

    def full(shape):  # whole-array block, replicated over the batch grid
        zeros = (0,) * len(shape)
        return pl.BlockSpec(shape, lambda n: zeros)

    # NOTE: for production resolutions add an H-tiled "parallel" grid axis (1-row halo
    # for conv1, pooled-row halo for conv2) so per-step VMEM fits v7x's 64 MiB and a
    # single image shards across both v7x TensorCores; store activations in bf16 there.
    out5 = pl.pallas_call(
        kernel,
        out_shape=jax.ShapeDtypeStruct((N, C_OUT, H4, 4, W), jnp.float32),
        grid=(N,),
        in_specs=[
            pl.BlockSpec((1, 2 * H * W, K1P), lambda n: (n, 0, 0)),
            full((K1P, C1)), full((1, C1)),
            full((K2, C2)), full((1, C2)),
            full((C2, 4 * C1)), full((1, 4 * C1)),
            full((C1, 4 * C_OUT)), full((1, 4 * C_OUT)),
        ],
        out_specs=pl.BlockSpec((1, C_OUT, H4, 4, W), lambda n: (n, 0, 0, 0, 0)),
        scratch_shapes=[pltpu.VMEM((2, H // 2 + 2, W // 2 + 2, C1), jnp.float32)],
        compiler_params=pltpu.CompilerParams(
            dimension_semantics=("parallel",),
            vmem_limit_bytes=64 * 1024 * 1024,
        ),
    )(x1, w1, params["conv1_b"], w2, params["conv2_b"], d1w, d1b, d2w, d2b)

    # (H4, 4) -> H is a contiguous merge (row = 4*i + a): no data movement.
    return out5.reshape(N, C_OUT, H, W)


# -----------------------------------------------------------------------------
# Parameter init (HWIO conv weights; (kh, kw, cin, cout) deconv weights)
# -----------------------------------------------------------------------------
def init_params(key):
    ks = jax.random.split(key, 8)

    def w(k, shape, fan_in):
        return jax.random.normal(k, shape, jnp.float32) / jnp.sqrt(fan_in)

    return dict(
        conv1_w=w(ks[0], (3, 3, C_IN, C1), 27.0),
        conv1_b=0.01 * jax.random.normal(ks[1], (1, C1), jnp.float32),
        conv2_w=w(ks[2], (3, 3, C1, C2), 576.0),
        conv2_b=0.01 * jax.random.normal(ks[3], (1, C2), jnp.float32),
        deconv1_w=w(ks[4], (2, 2, C2, C1), 512.0),
        deconv1_b=0.01 * jax.random.normal(ks[5], (1, C1), jnp.float32),
        deconv2_w=w(ks[6], (2, 2, C1, C_OUT), 256.0),
        deconv2_b=0.01 * jax.random.normal(ks[7], (1, C_OUT), jnp.float32),
    )


# -----------------------------------------------------------------------------
# Pure-JAX reference (numerical verification)
# -----------------------------------------------------------------------------
def _ref_encoder(params, x):
    dn = ("NHWC", "HWIO", "NHWC")
    h = lax.conv_general_dilated(x, params["conv1_w"], (1, 1), "SAME",
                                 dimension_numbers=dn)
    h = jnp.maximum(h + params["conv1_b"].reshape(1, 1, 1, -1), 0.0)
    h = lax.reduce_window(h, -jnp.inf, lax.max, (1, 2, 2, 1), (1, 2, 2, 1), "VALID")
    h = lax.conv_general_dilated(h, params["conv2_w"], (1, 1), "SAME",
                                 dimension_numbers=dn)
    h = jnp.maximum(h + params["conv2_b"].reshape(1, 1, 1, -1), 0.0)
    h = lax.reduce_window(h, -jnp.inf, lax.max, (1, 2, 2, 1), (1, 2, 2, 1), "VALID")
    return h


def _ref_convT(x, w, b):
    y = jnp.einsum("nhwi,pqio->nhpwqo", x, w)
    N, H, _, W, _, cout = y.shape
    return y.reshape(N, 2 * H, 2 * W, cout) + b.reshape(1, 1, 1, -1)


def tryon_reference(params, person_nchw, clothing_nchw):
    p = jnp.transpose(person_nchw, (0, 2, 3, 1))
    c = jnp.transpose(clothing_nchw, (0, 2, 3, 1))
    h = _ref_encoder(params, p) + _ref_encoder(params, c)
    h = jnp.maximum(_ref_convT(h, params["deconv1_w"], params["deconv1_b"]), 0.0)
    h = jnp.tanh(_ref_convT(h, params["deconv2_w"], params["deconv2_b"]))
    return jnp.transpose(h, (0, 3, 1, 2))


if __name__ == "__main__":
    key = jax.random.PRNGKey(0)
    k_p, k_c, k_w = jax.random.split(key, 3)
    N, H, W = 2, 16, 16
    person = jax.random.normal(k_p, (N, 3, H, W), jnp.float32)      # NCHW inputs
    clothing = jax.random.normal(k_c, (N, 3, H, W), jnp.float32)
    params = init_params(k_w)

    fwd = jax.jit(tryon_forward)
    out = jax.block_until_ready(fwd(params, person, clothing))
    assert out.shape == (N, 3, H, W), out.shape

    ref = jax.block_until_ready(tryon_reference(params, person, clothing))
    err = float(jnp.max(jnp.abs(out - ref)))
    # Tolerance allows TPU default-precision (bf16-pass) MXU matmuls on the Pallas
    # path vs. XLA's conv path; in interpret/CPU mode the error is ~1e-6.
    assert err < 2e-2, err

    print("KERNEL_OK")
</pallas_src>

<mosaic_0001>
module attributes {stable_mosaic.version = 11 : i64} {
  func.func @_tryon_kernel(%arg0: i32, %arg1: memref<1x512x32xf32, #tpu.memory_space<vmem>>, %arg2: memref<32x64xf32, #tpu.memory_space<vmem>>, %arg3: memref<1x64xf32, #tpu.memory_space<vmem>>, %arg4: memref<576x128xf32, #tpu.memory_space<vmem>>, %arg5: memref<1x128xf32, #tpu.memory_space<vmem>>, %arg6: memref<128x256xf32, #tpu.memory_space<vmem>>, %arg7: memref<1x256xf32, #tpu.memory_space<vmem>>, %arg8: memref<64x12xf32, #tpu.memory_space<vmem>>, %arg9: memref<1x12xf32, #tpu.memory_space<vmem>>, %arg10: memref<1x3x4x4x16xf32, #tpu.memory_space<vmem>>, %arg11: memref<2x10x10x64xf32, #tpu.memory_space<vmem>>) attributes {dimension_semantics = [#tpu.dimension_semantics<parallel>], iteration_bounds = array<i64: 2>, scalar_prefetch = 0 : i64, scratch_operands = 1 : i64, tpu.core_type = #tpu.core_type<tc>, window_params = [{transform_indices = @transform_0, window_bounds = array<i64: 1, 512, 32>}, {pipeline_mode = #tpu.pipeline_mode<synchronous>, transform_indices = @transform_1, window_bounds = array<i64: 32, 64>}, {pipeline_mode = #tpu.pipeline_mode<synchronous>, transform_indices = @transform_2, window_bounds = array<i64: 1, 64>}, {pipeline_mode = #tpu.pipeline_mode<synchronous>, transform_indices = @transform_3, window_bounds = array<i64: 576, 128>}, {pipeline_mode = #tpu.pipeline_mode<synchronous>, transform_indices = @transform_4, window_bounds = array<i64: 1, 128>}, {pipeline_mode = #tpu.pipeline_mode<synchronous>, transform_indices = @transform_5, window_bounds = array<i64: 128, 256>}, {pipeline_mode = #tpu.pipeline_mode<synchronous>, transform_indices = @transform_6, window_bounds = array<i64: 1, 256>}, {pipeline_mode = #tpu.pipeline_mode<synchronous>, transform_indices = @transform_7, window_bounds = array<i64: 64, 12>}, {pipeline_mode = #tpu.pipeline_mode<synchronous>, transform_indices = @transform_8, window_bounds = array<i64: 1, 12>}, {transform_indices = @transform_9, window_bounds = array<i64: 1, 3, 4, 4, 16>}]} {
    %c0 = arith.constant 0 : index
    %c0_0 = arith.constant 0 : index
    %c0_1 = arith.constant 0 : index
    %0 = vector.load %arg1[%c0, %c0_0, %c0_1] : memref<1x512x32xf32, #tpu.memory_space<vmem>>, vector<1x512x32xf32>
    %1 = vector.shape_cast %0 : vector<1x512x32xf32> to vector<512x32xf32>
    %c0_2 = arith.constant 0 : index
    %c0_3 = arith.constant 0 : index
    %2 = vector.load %arg2[%c0_2, %c0_3] : memref<32x64xf32, #tpu.memory_space<vmem>>, vector<32x64xf32>
    %cst = arith.constant dense<0.000000e+00> : vector<512x64xf32>
    %3 = tpu.matmul %1, %2, %cst {dimension_numbers = #tpu.dot_dimension_numbers<[1], [0], [0], [1], [0, 0, 1, 1], [], []>} : vector<512x32xf32>, vector<32x64xf32>, vector<512x64xf32> -> vector<512x64xf32>
    %c0_4 = arith.constant 0 : index
    %c0_5 = arith.constant 0 : index
    %4 = vector.load %arg3[%c0_4, %c0_5] : memref<1x64xf32, #tpu.memory_space<vmem>>, vector<1x64xf32>
    %5 = vector.broadcast %4 : vector<1x64xf32> to vector<512x64xf32>
    %6 = arith.addf %3, %5 : vector<512x64xf32>
    %cst_6 = arith.constant 0.000000e+00 : f32
    %7 = vector.broadcast %cst_6 : f32 to vector<512x64xf32>
    %8 = arith.maximumf %6, %7 : vector<512x64xf32>
    %9 = vector.shape_cast %8 : vector<512x64xf32> to vector<32x16x64xf32>
    %10 = vector.shape_cast %9 : vector<32x16x64xf32> to vector<32x8x2x64xf32>
    %cst_7 = arith.constant dense<0xFF800000> : vector<32x8x64xf32>
    %11 = vector.multi_reduction <maximumf>, %10, %cst_7 [2] : vector<32x8x2x64xf32> to vector<32x8x64xf32>
    %12 = vector.shape_cast %11 : vector<32x8x64xf32> to vector<16x2x8x64xf32>
    %cst_8 = arith.constant dense<0xFF800000> : vector<16x8x64xf32>
    %13 = vector.multi_reduction <maximumf>, %12, %cst_8 [1] : vector<16x2x8x64xf32> to vector<16x8x64xf32>
    %cst_9 = arith.constant 0.000000e+00 : f32
    %14 = vector.broadcast %cst_9 : f32 to vector<2x1x10x64xf32>
    %c0_10 = arith.constant 0 : index
    %c0_11 = arith.constant 0 : index
    %c0_12 = arith.constant 0 : index
    %c0_13 = arith.constant 0 : index
    %15 = vector.load %arg11[%c0_10, %c0_11, %c0_12, %c0_13] : memref<2x10x10x64xf32, #tpu.memory_space<vmem>>, vector<2x1x10x64xf32>
    tpu.vector_store %arg11[%c0_10, %c0_11, %c0_12, %c0_13], %14 {strides = array<i32>} : memref<2x10x10x64xf32, #tpu.memory_space<vmem>>, vector<2x1x10x64xf32>,
    %cst_14 = arith.constant 0.000000e+00 : f32
    %16 = vector.broadcast %cst_14 : f32 to vector<2x1x10x64xf32>
    %c0_15 = arith.constant 0 : index
    %c9 = arith.constant 9 : index
    %c0_16 = arith.constant 0 : index
    %c0_17 = arith.constant 0 : index
    %17 = vector.load %arg11[%c0_15, %c9, %c0_16, %c0_17] : memref<2x10x10x64xf32, #tpu.memory_space<vmem>>, vector<2x1x10x64xf32>
    tpu.vector_store %arg11[%c0_15, %c9, %c0_16, %c0_17], %16 {strides = array<i32>} : memref<2x10x10x64xf32, #tpu.memory_space<vmem>>, vector<2x1x10x64xf32>,
    %cst_18 = arith.constant 0.000000e+00 : f32
    %18 = vector.broadcast %cst_18 : f32 to vector<2x10x1x64xf32>
    %c0_19 = arith.constant 0 : index
    %c0_20 = arith.constant 0 : index
    %c0_21 = arith.constant 0 : index
    %c0_22 = arith.constant 0 : index
    %19 = vector.load %arg11[%c0_19, %c0_20, %c0_21, %c0_22] : memref<2x10x10x64xf32, #tpu.memory_space<vmem>>, vector<2x10x1x64xf32>
    tpu.vector_store %arg11[%c0_19, %c0_20, %c0_21, %c0_22], %18 {strides = array<i32>} : memref<2x10x10x64xf32, #tpu.memory_space<vmem>>, vector<2x10x1x64xf32>,
    %cst_23 = arith.constant 0.000000e+00 : f32
    %20 = vector.broadcast %cst_23 : f32 to vector<2x10x1x64xf32>
    %c0_24 = arith.constant 0 : index
    %c0_25 = arith.constant 0 : index
    %c9_26 = arith.constant 9 : index
    %c0_27 = arith.constant 0 : index
    %21 = vector.load %arg11[%c0_24, %c0_25, %c9_26, %c0_27] : memref<2x10x10x64xf32, #tpu.memory_space<vmem>>, vector<2x10x1x64xf32>
    tpu.vector_store %arg11[%c0_24, %c0_25, %c9_26, %c0_27], %20 {strides = array<i32>} : memref<2x10x10x64xf32, #tpu.memory_space<vmem>>, vector<2x10x1x64xf32>,
    %22 = vector.shape_cast %13 : vector<16x8x64xf32> to vector<2x8x8x64xf32>
    %c0_28 = arith.constant 0 : index
    %c1 = arith.constant 1 : index
    %c1_29 = arith.constant 1 : index
    %c0_30 = arith.constant 0 : index
    %23 = vector.load %arg11[%c0_28, %c1, %c1_29, %c0_30] : memref<2x10x10x64xf32, #tpu.memory_space<vmem>>, vector<2x8x8x64xf32>
    tpu.vector_store %arg11[%c0_28, %c1, %c1_29, %c0_30], %22 {strides = array<i32>} : memref<2x10x10x64xf32, #tpu.memory_space<vmem>>, vector<2x8x8x64xf32>,
    %c0_31 = arith.constant 0 : index
    %c0_32 = arith.constant 0 : index
    %c0_33 = arith.constant 0 : index
    %c0_34 = arith.constant 0 : index
    %24 = vector.load %arg11[%c0_31, %c0_32, %c0_33, %c0_34] : memref<2x10x10x64xf32, #tpu.memory_space<vmem>>, vector<2x8x8x64xf32>
    %25 = vector.shape_cast %24 : vector<2x8x8x64xf32> to vector<128x64xf32>
    %c0_35 = arith.constant 0 : index
    %c0_36 = arith.constant 0 : index
    %c1_37 = arith.constant 1 : index
    %c0_38 = arith.constant 0 : index
    %26 = vector.load %arg11[%c0_35, %c0_36, %c1_37, %c0_38] : memref<2x10x10x64xf32, #tpu.memory_space<vmem>>, vector<2x8x8x64xf32>
    %27 = vector.shape_cast %26 : vector<2x8x8x64xf32> to vector<128x64xf32>
    %c0_39 = arith.constant 0 : index
    %c0_40 = arith.constant 0 : index
    %c2 = arith.constant 2 : index
    %c0_41 = arith.constant 0 : index
    %28 = vector.load %arg11[%c0_39, %c0_40, %c2, %c0_41] : memref<2x10x10x64xf32, #tpu.memory_space<vmem>>, vector<2x8x8x64xf32>
    %29 = vector.shape_cast %28 : vector<2x8x8x64xf32> to vector<128x64xf32>
    %c0_42 = arith.constant 0 : index
    %c1_43 = arith.constant 1 : index
    %c0_44 = arith.constant 0 : index
    %c0_45 = arith.constant 0 : index
    %30 = vector.load %arg11[%c0_42, %c1_43, %c0_44, %c0_45] : memref<2x10x10x64xf32, #tpu.memory_space<vmem>>, vector<2x8x8x64xf32>
    %31 = vector.shape_cast %30 : vector<2x8x8x64xf32> to vector<128x64xf32>
    %32 = tpu.concatenate %25, %27, %29, %31 in 1 : vector<128x64xf32>, vector<128x64xf32>, vector<128x64xf32>, vector<128x64xf32> -> vector<128x256xf32>
    %c0_46 = arith.constant 0 : index
    %c0_47 = arith.constant 0 : index
    %33 = vector.load %arg4[%c0_46, %c0_47] : memref<576x128xf32, #tpu.memory_space<vmem>>, vector<256x128xf32>
    %cst_48 = arith.constant dense<0.000000e+00> : vector<128x128xf32>
    %34 = tpu.matmul %32, %33, %cst_48 {dimension_numbers = #tpu.dot_dimension_numbers<[1], [0], [0], [1], [0, 0, 1, 1], [], []>} : vector<128x256xf32>, vector<256x128xf32>, vector<128x128xf32> -> vector<128x128xf32>
    %c0_49 = arith.constant 0 : index
    %c1_50 = arith.constant 1 : index
    %c1_51 = arith.constant 1 : index
    %c0_52 = arith.constant 0 : index
    %35 = vector.load %arg11[%c0_49, %c1_50, %c1_51, %c0_52] : memref<2x10x10x64xf32, #tpu.memory_space<vmem>>, vector<2x8x8x64xf32>
    %36 = vector.shape_cast %35 : vector<2x8x8x64xf32> to vector<128x64xf32>
    %c0_53 = arith.constant 0 : index
    %c1_54 = arith.constant 1 : index
    %c2_55 = arith.constant 2 : index
    %c0_56 = arith.constant 0 : index
    %37 = vector.load %arg11[%c0_53, %c1_54, %c2_55, %c0_56] : memref<2x10x10x64xf32, #tpu.memory_space<vmem>>, vector<2x8x8x64xf32>
    %38 = vector.shape_cast %37 : vector<2x8x8x64xf32> to vector<128x64xf32>
    %c0_57 = arith.constant 0 : index
    %c2_58 = arith.constant 2 : index
    %c0_59 = arith.constant 0 : index
    %c0_60 = arith.constant 0 : index
    %39 = vector.load %arg11[%c0_57, %c2_58, %c0_59, %c0_60] : memref<2x10x10x64xf32, #tpu.memory_space<vmem>>, vector<2x8x8x64xf32>
    %40 = vector.shape_cast %39 : vector<2x8x8x64xf32> to vector<128x64xf32>
    %c0_61 = arith.constant 0 : index
    %c2_62 = arith.constant 2 : index
    %c1_63 = arith.constant 1 : index
    %c0_64 = arith.constant 0 : index
    %41 = vector.load %arg11[%c0_61, %c2_62, %c1_63, %c0_64] : memref<2x10x10x64xf32, #tpu.memory_space<vmem>>, vector<2x8x8x64xf32>
    %42 = vector.shape_cast %41 : vector<2x8x8x64xf32> to vector<128x64xf32>
    %43 = tpu.concatenate %36, %38, %40, %42 in 1 : vector<128x64xf32>, vector<128x64xf32>, vector<128x64xf32>, vector<128x64xf32> -> vector<128x256xf32>
    %c256 = arith.constant 256 : index
    %c0_65 = arith.constant 0 : index
    %44 = vector.load %arg4[%c256, %c0_65] : memref<576x128xf32, #tpu.memory_space<vmem>>, vector<256x128xf32>
    %cst_66 = arith.constant dense<0.000000e+00> : vector<128x128xf32>
    %45 = tpu.matmul %43, %44, %cst_66 {dimension_numbers = #tpu.dot_dimension_numbers<[1], [0], [0], [1], [0, 0, 1, 1], [], []>} : vector<128x256xf32>, vector<256x128xf32>, vector<128x128xf32> -> vector<128x128xf32>
    %46 = arith.addf %34, %45 : vector<128x128xf32>
    %c0_67 = arith.constant 0 : index
    %c2_68 = arith.constant 2 : index
    %c2_69 = arith.constant 2 : index
    %c0_70 = arith.constant 0 : index
    %47 = vector.load %arg11[%c0_67, %c2_68, %c2_69, %c0_70] : memref<2x10x10x64xf32, #tpu.memory_space<vmem>>, vector<2x8x8x64xf32>
    %48 = vector.shape_cast %47 : vector<2x8x8x64xf32> to vector<128x64xf32>
    %c512 = arith.constant 512 : index
    %c0_71 = arith.constant 0 : index
    %49 = vector.load %arg4[%c512, %c0_71] : memref<576x128xf32, #tpu.memory_space<vmem>>, vector<64x128xf32>
    %cst_72 = arith.constant dense<0.000000e+00> : vector<128x128xf32>
    %50 = tpu.matmul %48, %49, %cst_72 {dimension_numbers = #tpu.dot_dimension_numbers<[1], [0], [0], [1], [0, 0, 1, 1], [], []>} : vector<128x64xf32>, vector<64x128xf32>, vector<128x128xf32> -> vector<128x128xf32>
    %51 = arith.addf %46, %50 : vector<128x128xf32>
    %c0_73 = arith.constant 0 : index
    %c0_74 = arith.constant 0 : index
    %52 = vector.load %arg5[%c0_73, %c0_74] : memref<1x128xf32, #tpu.memory_space<vmem>>, vector<1x128xf32>
    %53 = vector.broadcast %52 : vector<1x128xf32> to vector<128x128xf32>
    %54 = arith.addf %51, %53 : vector<128x128xf32>
    %cst_75 = arith.constant 0.000000e+00 : f32
    %55 = vector.broadcast %cst_75 : f32 to vector<128x128xf32>
    %56 = arith.maximumf %54, %55 : vector<128x128xf32>
    %57 = vector.shape_cast %56 : vector<128x128xf32> to vector<16x8x128xf32>
    %58 = vector.shape_cast %57 : vector<16x8x128xf32> to vector<16x4x2x128xf32>
    %cst_76 = arith.constant dense<0xFF800000> : vector<16x4x128xf32>
    %59 = vector.multi_reduction <maximumf>, %58, %cst_76 [2] : vector<16x4x2x128xf32> to vector<16x4x128xf32>
    %60 = vector.shape_cast %59 : vector<16x4x128xf32> to vector<8x2x4x128xf32>
    %cst_77 = arith.constant dense<0xFF800000> : vector<8x4x128xf32>
    %61 = vector.multi_reduction <maximumf>, %60, %cst_77 [1] : vector<8x2x4x128xf32> to vector<8x4x128xf32>
    %62 = vector.extract_strided_slice %61 {offsets = [0, 0, 0], sizes = [4, 4, 128], strides = [1, 1, 1]} : vector<8x4x128xf32> to vector<4x4x128xf32>
    %63 = vector.extract_strided_slice %61 {offsets = [4, 0, 0], sizes = [4, 4, 128], strides = [1, 1, 1]} : vector<8x4x128xf32> to vector<4x4x128xf32>
    %64 = arith.addf %62, %63 : vector<4x4x128xf32>
    %65 = vector.shape_cast %64 : vector<4x4x128xf32> to vector<16x128xf32>
    %c0_78 = arith.constant 0 : index
    %c0_79 = arith.constant 0 : index
    %66 = vector.load %arg6[%c0_78, %c0_79] : memref<128x256xf32, #tpu.memory_space<vmem>>, vector<128x256xf32>
    %cst_80 = arith.constant dense<0.000000e+00> : vector<16x256xf32>
    %67 = tpu.matmul %65, %66, %cst_80 {dimension_numbers = #tpu.dot_dimension_numbers<[1], [0], [0], [1], [0, 0, 1, 1], [], []>} : vector<16x128xf32>, vector<128x256xf32>, vector<16x256xf32> -> vector<16x256xf32>
    %c0_81 = arith.constant 0 : index
    %c0_82 = arith.constant 0 : index
    %68 = vector.load %arg7[%c0_81, %c0_82] : memref<1x256xf32, #tpu.memory_space<vmem>>, vector<1x256xf32>
    %69 = vector.broadcast %68 : vector<1x256xf32> to vector<16x256xf32>
    %70 = arith.addf %67, %69 : vector<16x256xf32>
    %cst_83 = arith.constant 0.000000e+00 : f32
    %71 = vector.broadcast %cst_83 : f32 to vector<16x256xf32>
    %72 = arith.maximumf %70, %71 : vector<16x256xf32>
    %73 = vector.extract_strided_slice %72 {offsets = [0, 0], sizes = [16, 64], strides = [1, 1]} : vector<16x256xf32> to vector<16x64xf32>
    %c0_84 = arith.constant 0 : index
    %c0_85 = arith.constant 0 : index
    %74 = vector.load %arg8[%c0_84, %c0_85] : memref<64x12xf32, #tpu.memory_space<vmem>>, vector<64x12xf32>
    %cst_86 = arith.constant dense<0.000000e+00> : vector<16x12xf32>
    %75 = tpu.matmul %73, %74, %cst_86 {dimension_numbers = #tpu.dot_dimension_numbers<[1], [0], [0], [1], [0, 0, 1, 1], [], []>} : vector<16x64xf32>, vector<64x12xf32>, vector<16x12xf32> -> vector<16x12xf32>
    %c0_87 = arith.constant 0 : index
    %c0_88 = arith.constant 0 : index
    %76 = vector.load %arg9[%c0_87, %c0_88] : memref<1x12xf32, #tpu.memory_space<vmem>>, vector<1x12xf32>
    %77 = vector.broadcast %76 : vector<1x12xf32> to vector<16x12xf32>
    %78 = arith.addf %75, %77 : vector<16x12xf32>
    %79 = vector.shape_cast %78 : vector<16x12xf32> to vector<4x4x12xf32>
    %80 = vector.extract_strided_slice %72 {offsets = [0, 64], sizes = [16, 64], strides = [1, 1]} : vector<16x256xf32> to vector<16x64xf32>
    %c0_89 = arith.constant 0 : index
    %c0_90 = arith.constant 0 : index
    %81 = vector.load %arg8[%c0_89, %c0_90] : memref<64x12xf32, #tpu.memory_space<vmem>>, vector<64x12xf32>
    %cst_91 = arith.constant dense<0.000000e+00> : vector<16x12xf32>
    %82 = tpu.matmul %80, %81, %cst_91 {dimension_numbers = #tpu.dot_dimension_numbers<[1], [0], [0], [1], [0, 0, 1, 1], [], []>} : vector<16x64xf32>, vector<64x12xf32>, vector<16x12xf32> -> vector<16x12xf32>
    %c0_92 = arith.constant 0 : index
    %c0_93 = arith.constant 0 : index
    %83 = vector.load %arg9[%c0_92, %c0_93] : memref<1x12xf32, #tpu.memory_space<vmem>>, vector<1x12xf32>
    %84 = vector.broadcast %83 : vector<1x12xf32> to vector<16x12xf32>
    %85 = arith.addf %82, %84 : vector<16x12xf32>
    %86 = vector.shape_cast %85 : vector<16x12xf32> to vector<4x4x12xf32>
    %87 = vector.extract_strided_slice %72 {offsets = [0, 128], sizes = [16, 64], strides = [1, 1]} : vector<16x256xf32> to vector<16x64xf32>
    %c0_94 = arith.constant 0 : index
    %c0_95 = arith.constant 0 : index
    %88 = vector.load %arg8[%c0_94, %c0_95] : memref<64x12xf32, #tpu.memory_space<vmem>>, vector<64x12xf32>
    %cst_96 = arith.constant dense<0.000000e+00> : vector<16x12xf32>
    %89 = tpu.matmul %87, %88, %cst_96 {dimension_numbers = #tpu.dot_dimension_numbers<[1], [0], [0], [1], [0, 0, 1, 1], [], []>} : vector<16x64xf32>, vector<64x12xf32>, vector<16x12xf32> -> vector<16x12xf32>
    %c0_97 = arith.constant 0 : index
    %c0_98 = arith.constant 0 : index
    %90 = vector.load %arg9[%c0_97, %c0_98] : memref<1x12xf32, #tpu.memory_space<vmem>>, vector<1x12xf32>
    %91 = vector.broadcast %90 : vector<1x12xf32> to vector<16x12xf32>
    %92 = arith.addf %89, %91 : vector<16x12xf32>
    %93 = vector.shape_cast %92 : vector<16x12xf32> to vector<4x4x12xf32>
    %94 = vector.extract_strided_slice %72 {offsets = [0, 192], sizes = [16, 64], strides = [1, 1]} : vector<16x256xf32> to vector<16x64xf32>
    %c0_99 = arith.constant 0 : index
    %c0_100 = arith.constant 0 : index
    %95 = vector.load %arg8[%c0_99, %c0_100] : memref<64x12xf32, #tpu.memory_space<vmem>>, vector<64x12xf32>
    %cst_101 = arith.constant dense<0.000000e+00> : vector<16x12xf32>
    %96 = tpu.matmul %94, %95, %cst_101 {dimension_numbers = #tpu.dot_dimension_numbers<[1], [0], [0], [1], [0, 0, 1, 1], [], []>} : vector<16x64xf32>, vector<64x12xf32>, vector<16x12xf32> -> vector<16x12xf32>
    %c0_102 = arith.constant 0 : index
    %c0_103 = arith.constant 0 : index
    %97 = vector.load %arg9[%c0_102, %c0_103] : memref<1x12xf32, #tpu.memory_space<vmem>>, vector<1x12xf32>
    %98 = vector.broadcast %97 : vector<1x12xf32> to vector<16x12xf32>
    %99 = arith.addf %96, %98 : vector<16x12xf32>
    %100 = vector.shape_cast %99 : vector<16x12xf32> to vector<4x4x12xf32>
    %101 = vector.extract_strided_slice %79 {offsets = [0, 0, 0], sizes = [4, 4, 1], strides = [1, 1, 1]} : vector<4x4x12xf32> to vector<4x4x1xf32>
    %102 = vector.shape_cast %101 : vector<4x4x1xf32> to vector<4x4xf32>
    %103 = vector.extract_strided_slice %79 {offsets = [0, 0, 3], sizes = [4, 4, 1], strides = [1, 1, 1]} : vector<4x4x12xf32> to vector<4x4x1xf32>
    %104 = vector.shape_cast %103 : vector<4x4x1xf32> to vector<4x4xf32>
    %105 = vector.extract_strided_slice %86 {offsets = [0, 0, 0], sizes = [4, 4, 1], strides = [1, 1, 1]} : vector<4x4x12xf32> to vector<4x4x1xf32>
    %106 = vector.shape_cast %105 : vector<4x4x1xf32> to vector<4x4xf32>
    %107 = vector.extract_strided_slice %86 {offsets = [0, 0, 3], sizes = [4, 4, 1], strides = [1, 1, 1]} : vector<4x4x12xf32> to vector<4x4x1xf32>
    %108 = vector.shape_cast %107 : vector<4x4x1xf32> to vector<4x4xf32>
    %109 = vector.shape_cast %102 : vector<4x4xf32> to vector<4x4x1xf32>
    %110 = vector.shape_cast %104 : vector<4x4xf32> to vector<4x4x1xf32>
    %111 = vector.shape_cast %106 : vector<4x4xf32> to vector<4x4x1xf32>
    %112 = vector.shape_cast %108 : vector<4x4xf32> to vector<4x4x1xf32>
    %113 = tpu.concatenate %109, %110, %111, %112 in 2 : vector<4x4x1xf32>, vector<4x4x1xf32>, vector<4x4x1xf32>, vector<4x4x1xf32> -> vector<4x4x4xf32>
    %114 = vector.shape_cast %113 : vector<4x4x4xf32> to vector<4x16xf32>
    %115 = vector.extract_strided_slice %79 {offsets = [0, 0, 1], sizes = [4, 4, 1], strides = [1, 1, 1]} : vector<4x4x12xf32> to vector<4x4x1xf32>
    %116 = vector.shape_cast %115 : vector<4x4x1xf32> to vector<4x4xf32>
    %117 = vector.extract_strided_slice %79 {offsets = [0, 0, 4], sizes = [4, 4, 1], strides = [1, 1, 1]} : vector<4x4x12xf32> to vector<4x4x1xf32>
    %118 = vector.shape_cast %117 : vector<4x4x1xf32> to vector<4x4xf32>
    %119 = vector.extract_strided_slice %86 {offsets = [0, 0, 1], sizes = [4, 4, 1], strides = [1, 1, 1]} : vector<4x4x12xf32> to vector<4x4x1xf32>
    %120 = vector.shape_cast %119 : vector<4x4x1xf32> to vector<4x4xf32>
    %121 = vector.extract_strided_slice %86 {offsets = [0, 0, 4], sizes = [4, 4, 1], strides = [1, 1, 1]} : vector<4x4x12xf32> to vector<4x4x1xf32>
    %122 = vector.shape_cast %121 : vector<4x4x1xf32> to vector<4x4xf32>
    %123 = vector.shape_cast %116 : vector<4x4xf32> to vector<4x4x1xf32>
    %124 = vector.shape_cast %118 : vector<4x4xf32> to vector<4x4x1xf32>
    %125 = vector.shape_cast %120 : vector<4x4xf32> to vector<4x4x1xf32>
    %126 = vector.shape_cast %122 : vector<4x4xf32> to vector<4x4x1xf32>
    %127 = tpu.concatenate %123, %124, %125, %126 in 2 : vector<4x4x1xf32>, vector<4x4x1xf32>, vector<4x4x1xf32>, vector<4x4x1xf32> -> vector<4x4x4xf32>
    %128 = vector.shape_cast %127 : vector<4x4x4xf32> to vector<4x16xf32>
    %129 = vector.extract_strided_slice %79 {offsets = [0, 0, 2], sizes = [4, 4, 1], strides = [1, 1, 1]} : vector<4x4x12xf32> to vector<4x4x1xf32>
    %130 = vector.shape_cast %129 : vector<4x4x1xf32> to vector<4x4xf32>
    %131 = vector.extract_strided_slice %79 {offsets = [0, 0, 5], sizes = [4, 4, 1], strides = [1, 1, 1]} : vector<4x4x12xf32> to vector<4x4x1xf32>
    %132 = vector.shape_cast %131 : vector<4x4x1xf32> to vector<4x4xf32>
    %133 = vector.extract_strided_slice %86 {offsets = [0, 0, 2], sizes = [4, 4, 1], strides = [1, 1, 1]} : vector<4x4x12xf32> to vector<4x4x1xf32>
    %134 = vector.shape_cast %133 : vector<4x4x1xf32> to vector<4x4xf32>
    %135 = vector.extract_strided_slice %86 {offsets = [0, 0, 5], sizes = [4, 4, 1], strides = [1, 1, 1]} : vector<4x4x12xf32> to vector<4x4x1xf32>
    %136 = vector.shape_cast %135 : vector<4x4x1xf32> to vector<4x4xf32>
    %137 = vector.shape_cast %130 : vector<4x4xf32> to vector<4x4x1xf32>
    %138 = vector.shape_cast %132 : vector<4x4xf32> to vector<4x4x1xf32>
    %139 = vector.shape_cast %134 : vector<4x4xf32> to vector<4x4x1xf32>
    %140 = vector.shape_cast %136 : vector<4x4xf32> to vector<4x4x1xf32>
    %141 = tpu.concatenate %137, %138, %139, %140 in 2 : vector<4x4x1xf32>, vector<4x4x1xf32>, vector<4x4x1xf32>, vector<4x4x1xf32> -> vector<4x4x4xf32>
    %142 = vector.shape_cast %141 : vector<4x4x4xf32> to vector<4x16xf32>
    %143 = vector.shape_cast %114 : vector<4x16xf32> to vector<1x4x16xf32>
    %144 = vector.shape_cast %128 : vector<4x16xf32> to vector<1x4x16xf32>
    %145 = vector.shape_cast %142 : vector<4x16xf32> to vector<1x4x16xf32>
    %146 = tpu.concatenate %143, %144, %145 in 0 : vector<1x4x16xf32>, vector<1x4x16xf32>, vector<1x4x16xf32> -> vector<3x4x16xf32>
    %147 = vector.extract_strided_slice %79 {offsets = [0, 0, 6], sizes = [4, 4, 1], strides = [1, 1, 1]} : vector<4x4x12xf32> to vector<4x4x1xf32>
    %148 = vector.shape_cast %147 : vector<4x4x1xf32> to vector<4x4xf32>
    %149 = vector.extract_strided_slice %79 {offsets = [0, 0, 9], sizes = [4, 4, 1], strides = [1, 1, 1]} : vector<4x4x12xf32> to vector<4x4x1xf32>
    %150 = vector.shape_cast %149 : vector<4x4x1xf32> to vector<4x4xf32>
    %151 = vector.extract_strided_slice %86 {offsets = [0, 0, 6], sizes = [4, 4, 1], strides = [1, 1, 1]} : vector<4x4x12xf32> to vector<4x4x1xf32>
    %152 = vector.shape_cast %151 : vector<4x4x1xf32> to vector<4x4xf32>
    %153 = vector.extract_strided_slice %86 {offsets = [0, 0, 9], sizes = [4, 4, 1], strides = [1, 1, 1]} : vector<4x4x12xf32> to vector<4x4x1xf32>
    %154 = vector.shape_cast %153 : vector<4x4x1xf32> to vector<4x4xf32>
    %155 = vector.shape_cast %148 : vector<4x4xf32> to vector<4x4x1xf32>
    %156 = vector.shape_cast %150 : vector<4x4xf32> to vector<4x4x1xf32>
    %157 = vector.shape_cast %152 : vector<4x4xf32> to vector<4x4x1xf32>
    %158 = vector.shape_cast %154 : vector<4x4xf32> to vector<4x4x1xf32>
    %159 = tpu.concatenate %155, %156, %157, %158 in 2 : vector<4x4x1xf32>, vector<4x4x1xf32>, vector<4x4x1xf32>, vector<4x4x1xf32> -> vector<4x4x4xf32>
    %160 = vector.shape_cast %159 : vector<4x4x4xf32> to vector<4x16xf32>
    %161 = vector.extract_strided_slice %79 {offsets = [0, 0, 7], sizes = [4, 4, 1], strides = [1, 1, 1]} : vector<4x4x12xf32> to vector<4x4x1xf32>
    %162 = vector.shape_cast %161 : vector<4x4x1xf32> to vector<4x4xf32>
    %163 = vector.extract_strided_slice %79 {offsets = [0, 0, 10], sizes = [4, 4, 1], strides = [1, 1, 1]} : vector<4x4x12xf32> to vector<4x4x1xf32>
    %164 = vector.shape_cast %163 : vector<4x4x1xf32> to vector<4x4xf32>
    %165 = vector.extract_strided_slice %86 {offsets = [0, 0, 7], sizes = [4, 4, 1], strides = [1, 1, 1]} : vector<4x4x12xf32> to vector<4x4x1xf32>
    %166 = vector.shape_cast %165 : vector<4x4x1xf32> to vector<4x4xf32>
    %167 = vector.extract_strided_slice %86 {offsets = [0, 0, 10], sizes = [4, 4, 1], strides = [1, 1, 1]} : vector<4x4x12xf32> to vector<4x4x1xf32>
    %168 = vector.shape_cast %167 : vector<4x4x1xf32> to vector<4x4xf32>
    %169 = vector.shape_cast %162 : vector<4x4xf32> to vector<4x4x1xf32>
    %170 = vector.shape_cast %164 : vector<4x4xf32> to vector<4x4x1xf32>
    %171 = vector.shape_cast %166 : vector<4x4xf32> to vector<4x4x1xf32>
    %172 = vector.shape_cast %168 : vector<4x4xf32> to vector<4x4x1xf32>
    %173 = tpu.concatenate %169, %170, %171, %172 in 2 : vector<4x4x1xf32>, vector<4x4x1xf32>, vector<4x4x1xf32>, vector<4x4x1xf32> -> vector<4x4x4xf32>
    %174 = vector.shape_cast %173 : vector<4x4x4xf32> to vector<4x16xf32>
    %175 = vector.extract_strided_slice %79 {offsets = [0, 0, 8], sizes = [4, 4, 1], strides = [1, 1, 1]} : vector<4x4x12xf32> to vector<4x4x1xf32>
    %176 = vector.shape_cast %175 : vector<4x4x1xf32> to vector<4x4xf32>
    %177 = vector.extract_strided_slice %79 {offsets = [0, 0, 11], sizes = [4, 4, 1], strides = [1, 1, 1]} : vector<4x4x12xf32> to vector<4x4x1xf32>
    %178 = vector.shape_cast %177 : vector<4x4x1xf32> to vector<4x4xf32>
    %179 = vector.extract_strided_slice %86 {offsets = [0, 0, 8], sizes = [4, 4, 1], strides = [1, 1, 1]} : vector<4x4x12xf32> to vector<4x4x1xf32>
    %180 = vector.shape_cast %179 : vector<4x4x1xf32> to vector<4x4xf32>
    %181 = vector.extract_strided_slice %86 {offsets = [0, 0, 11], sizes = [4, 4, 1], strides = [1, 1, 1]} : vector<4x4x12xf32> to vector<4x4x1xf32>
    %182 = vector.shape_cast %181 : vector<4x4x1xf32> to vector<4x4xf32>
    %183 = vector.shape_cast %176 : vector<4x4xf32> to vector<4x4x1xf32>
    %184 = vector.shape_cast %178 : vector<4x4xf32> to vector<4x4x1xf32>
    %185 = vector.shape_cast %180 : vector<4x4xf32> to vector<4x4x1xf32>
    %186 = vector.shape_cast %182 : vector<4x4xf32> to vector<4x4x1xf32>
    %187 = tpu.concatenate %183, %184, %185, %186 in 2 : vector<4x4x1xf32>, vector<4x4x1xf32>, vector<4x4x1xf32>, vector<4x4x1xf32> -> vector<4x4x4xf32>
    %188 = vector.shape_cast %187 : vector<4x4x4xf32> to vector<4x16xf32>
    %189 = vector.shape_cast %160 : vector<4x16xf32> to vector<1x4x16xf32>
    %190 = vector.shape_cast %174 : vector<4x16xf32> to vector<1x4x16xf32>
    %191 = vector.shape_cast %188 : vector<4x16xf32> to vector<1x4x16xf32>
    %192 = tpu.concatenate %189, %190, %191 in 0 : vector<1x4x16xf32>, vector<1x4x16xf32>, vector<1x4x16xf32> -> vector<3x4x16xf32>
    %193 = vector.extract_strided_slice %93 {offsets = [0, 0, 0], sizes = [4, 4, 1], strides = [1, 1, 1]} : vector<4x4x12xf32> to vector<4x4x1xf32>
    %194 = vector.shape_cast %193 : vector<4x4x1xf32> to vector<4x4xf32>
    %195 = vector.extract_strided_slice %93 {offsets = [0, 0, 3], sizes = [4, 4, 1], strides = [1, 1, 1]} : vector<4x4x12xf32> to vector<4x4x1xf32>
    %196 = vector.shape_cast %195 : vector<4x4x1xf32> to vector<4x4xf32>
    %197 = vector.extract_strided_slice %100 {offsets = [0, 0, 0], sizes = [4, 4, 1], strides = [1, 1, 1]} : vector<4x4x12xf32> to vector<4x4x1xf32>
    %198 = vector.shape_cast %197 : vector<4x4x1xf32> to vector<4x4xf32>
    %199 = vector.extract_strided_slice %100 {offsets = [0, 0, 3], sizes = [4, 4, 1], strides = [1, 1, 1]} : vector<4x4x12xf32> to vector<4x4x1xf32>
    %200 = vector.shape_cast %199 : vector<4x4x1xf32> to vector<4x4xf32>
    %201 = vector.shape_cast %194 : vector<4x4xf32> to vector<4x4x1xf32>
    %202 = vector.shape_cast %196 : vector<4x4xf32> to vector<4x4x1xf32>
    %203 = vector.shape_cast %198 : vector<4x4xf32> to vector<4x4x1xf32>
    %204 = vector.shape_cast %200 : vector<4x4xf32> to vector<4x4x1xf32>
    %205 = tpu.concatenate %201, %202, %203, %204 in 2 : vector<4x4x1xf32>, vector<4x4x1xf32>, vector<4x4x1xf32>, vector<4x4x1xf32> -> vector<4x4x4xf32>
    %206 = vector.shape_cast %205 : vector<4x4x4xf32> to vector<4x16xf32>
    %207 = vector.extract_strided_slice %93 {offsets = [0, 0, 1], sizes = [4, 4, 1], strides = [1, 1, 1]} : vector<4x4x12xf32> to vector<4x4x1xf32>
    %208 = vector.shape_cast %207 : vector<4x4x1xf32> to vector<4x4xf32>
    %209 = vector.extract_strided_slice %93 {offsets = [0, 0, 4], sizes = [4, 4, 1], strides = [1, 1, 1]} : vector<4x4x12xf32> to vector<4x4x1xf32>
    %210 = vector.shape_cast %209 : vector<4x4x1xf32> to vector<4x4xf32>
    %211 = vector.extract_strided_slice %100 {offsets = [0, 0, 1], sizes = [4, 4, 1], strides = [1, 1, 1]} : vector<4x4x12xf32> to vector<4x4x1xf32>
    %212 = vector.shape_cast %211 : vector<4x4x1xf32> to vector<4x4xf32>
    %213 = vector.extract_strided_slice %100 {offsets = [0, 0, 4], sizes = [4, 4, 1], strides = [1, 1, 1]} : vector<4x4x12xf32> to vector<4x4x1xf32>
    %214 = vector.shape_cast %213 : vector<4x4x1xf32> to vector<4x4xf32>
    %215 = vector.shape_cast %208 : vector<4x4xf32> to vector<4x4x1xf32>
    %216 = vector.shape_cast %210 : vector<4x4xf32> to vector<4x4x1xf32>
    %217 = vector.shape_cast %212 : vector<4x4xf32> to vector<4x4x1xf32>
    %218 = vector.shape_cast %214 : vector<4x4xf32> to vector<4x4x1xf32>
    %219 = tpu.concatenate %215, %216, %217, %218 in 2 : vector<4x4x1xf32>, vector<4x4x1xf32>, vector<4x4x1xf32>, vector<4x4x1xf32> -> vector<4x4x4xf32>
    %220 = vector.shape_cast %219 : vector<4x4x4xf32> to vector<4x16xf32>
    %221 = vector.extract_strided_slice %93 {offsets = [0, 0, 2], sizes = [4, 4, 1], strides = [1, 1, 1]} : vector<4x4x12xf32> to vector<4x4x1xf32>
    %222 = vector.shape_cast %221 : vector<4x4x1xf32> to vector<4x4xf32>
    %223 = vector.extract_strided_slice %93 {offsets = [0, 0, 5], sizes = [4, 4, 1], strides = [1, 1, 1]} : vector<4x4x12xf32> to vector<4x4x1xf32>
    %224 = vector.shape_cast %223 : vector<4x4x1xf32> to vector<4x4xf32>
    %225 = vector.extract_strided_slice %100 {offsets = [0, 0, 2], sizes = [4, 4, 1], strides = [1, 1, 1]} : vector<4x4x12xf32> to vector<4x4x1xf32>
    %226 = vector.shape_cast %225 : vector<4x4x1xf32> to vector<4x4xf32>
    %227 = vector.extract_strided_slice %100 {offsets = [0, 0, 5], sizes = [4, 4, 1], strides = [1, 1, 1]} : vector<4x4x12xf32> to vector<4x4x1xf32>
    %228 = vector.shape_cast %227 : vector<4x4x1xf32> to vector<4x4xf32>
    %229 = vector.shape_cast %222 : vector<4x4xf32> to vector<4x4x1xf32>
    %230 = vector.shape_cast %224 : vector<4x4xf32> to vector<4x4x1xf32>
    %231 = vector.shape_cast %226 : vector<4x4xf32> to vector<4x4x1xf32>
    %232 = vector.shape_cast %228 : vector<4x4xf32> to vector<4x4x1xf32>
    %233 = tpu.concatenate %229, %230, %231, %232 in 2 : vector<4x4x1xf32>, vector<4x4x1xf32>, vector<4x4x1xf32>, vector<4x4x1xf32> -> vector<4x4x4xf32>
    %234 = vector.shape_cast %233 : vector<4x4x4xf32> to vector<4x16xf32>
    %235 = vector.shape_cast %206 : vector<4x16xf32> to vector<1x4x16xf32>
    %236 = vector.shape_cast %220 : vector<4x16xf32> to vector<1x4x16xf32>
    %237 = vector.shape_cast %234 : vector<4x16xf32> to vector<1x4x16xf32>
    %238 = tpu.concatenate %235, %236, %237 in 0 : vector<1x4x16xf32>, vector<1x4x16xf32>, vector<1x4x16xf32> -> vector<3x4x16xf32>
    %239 = vector.extract_strided_slice %93 {offsets = [0, 0, 6], sizes = [4, 4, 1], strides = [1, 1, 1]} : vector<4x4x12xf32> to vector<4x4x1xf32>
    %240 = vector.shape_cast %239 : vector<4x4x1xf32> to vector<4x4xf32>
    %241 = vector.extract_strided_slice %93 {offsets = [0, 0, 9], sizes = [4, 4, 1], strides = [1, 1, 1]} : vector<4x4x12xf32> to vector<4x4x1xf32>
    %242 = vector.shape_cast %241 : vector<4x4x1xf32> to vector<4x4xf32>
    %243 = vector.extract_strided_slice %100 {offsets = [0, 0, 6], sizes = [4, 4, 1], strides = [1, 1, 1]} : vector<4x4x12xf32> to vector<4x4x1xf32>
    %244 = vector.shape_cast %243 : vector<4x4x1xf32> to vector<4x4xf32>
    %245 = vector.extract_strided_slice %100 {offsets = [0, 0, 9], sizes = [4, 4, 1], strides = [1, 1, 1]} : vector<4x4x12xf32> to vector<4x4x1xf32>
    %246 = vector.shape_cast %245 : vector<4x4x1xf32> to vector<4x4xf32>
    %247 = vector.shape_cast %240 : vector<4x4xf32> to vector<4x4x1xf32>
    %248 = vector.shape_cast %242 : vector<4x4xf32> to vector<4x4x1xf32>
    %249 = vector.shape_cast %244 : vector<4x4xf32> to vector<4x4x1xf32>
    %250 = vector.shape_cast %246 : vector<4x4xf32> to vector<4x4x1xf32>
    %251 = tpu.concatenate %247, %248, %249, %250 in 2 : vector<4x4x1xf32>, vector<4x4x1xf32>, vector<4x4x1xf32>, vector<4x4x1xf32> -> vector<4x4x4xf32>
    %252 = vector.shape_cast %251 : vector<4x4x4xf32> to vector<4x16xf32>
    %253 = vector.extract_strided_slice %93 {offsets = [0, 0, 7], sizes = [4, 4, 1], strides = [1, 1, 1]} : vector<4x4x12xf32> to vector<4x4x1xf32>
    %254 = vector.shape_cast %253 : vector<4x4x1xf32> to vector<4x4xf32>
    %255 = vector.extract_strided_slice %93 {offsets = [0, 0, 10], sizes = [4, 4, 1], strides = [1, 1, 1]} : vector<4x4x12xf32> to vector<4x4x1xf32>
    %256 = vector.shape_cast %255 : vector<4x4x1xf32> to vector<4x4xf32>
    %257 = vector.extract_strided_slice %100 {offsets = [0, 0, 7], sizes = [4, 4, 1], strides = [1, 1, 1]} : vector<4x4x12xf32> to vector<4x4x1xf32>
    %258 = vector.shape_cast %257 : vector<4x4x1xf32> to vector<4x4xf32>
    %259 = vector.extract_strided_slice %100 {offsets = [0, 0, 10], sizes = [4, 4, 1], strides = [1, 1, 1]} : vector<4x4x12xf32> to vector<4x4x1xf32>
    %260 = vector.shape_cast %259 : vector<4x4x1xf32> to vector<4x4xf32>
    %261 = vector.shape_cast %254 : vector<4x4xf32> to vector<4x4x1xf32>
    %262 = vector.shape_cast %256 : vector<4x4xf32> to vector<4x4x1xf32>
    %263 = vector.shape_cast %258 : vector<4x4xf32> to vector<4x4x1xf32>
    %264 = vector.shape_cast %260 : vector<4x4xf32> to vector<4x4x1xf32>
    %265 = tpu.concatenate %261, %262, %263, %264 in 2 : vector<4x4x1xf32>, vector<4x4x1xf32>, vector<4x4x1xf32>, vector<4x4x1xf32> -> vector<4x4x4xf32>
    %266 = vector.shape_cast %265 : vector<4x4x4xf32> to vector<4x16xf32>
    %267 = vector.extract_strided_slice %93 {offsets = [0, 0, 8], sizes = [4, 4, 1], strides = [1, 1, 1]} : vector<4x4x12xf32> to vector<4x4x1xf32>
    %268 = vector.shape_cast %267 : vector<4x4x1xf32> to vector<4x4xf32>
    %269 = vector.extract_strided_slice %93 {offsets = [0, 0, 11], sizes = [4, 4, 1], strides = [1, 1, 1]} : vector<4x4x12xf32> to vector<4x4x1xf32>
    %270 = vector.shape_cast %269 : vector<4x4x1xf32> to vector<4x4xf32>
    %271 = vector.extract_strided_slice %100 {offsets = [0, 0, 8], sizes = [4, 4, 1], strides = [1, 1, 1]} : vector<4x4x12xf32> to vector<4x4x1xf32>
    %272 = vector.shape_cast %271 : vector<4x4x1xf32> to vector<4x4xf32>
    %273 = vector.extract_strided_slice %100 {offsets = [0, 0, 11], sizes = [4, 4, 1], strides = [1, 1, 1]} : vector<4x4x12xf32> to vector<4x4x1xf32>
    %274 = vector.shape_cast %273 : vector<4x4x1xf32> to vector<4x4xf32>
    %275 = vector.shape_cast %268 : vector<4x4xf32> to vector<4x4x1xf32>
    %276 = vector.shape_cast %270 : vector<4x4xf32> to vector<4x4x1xf32>
    %277 = vector.shape_cast %272 : vector<4x4xf32> to vector<4x4x1xf32>
    %278 = vector.shape_cast %274 : vector<4x4xf32> to vector<4x4x1xf32>
    %279 = tpu.concatenate %275, %276, %277, %278 in 2 : vector<4x4x1xf32>, vector<4x4x1xf32>, vector<4x4x1xf32>, vector<4x4x1xf32> -> vector<4x4x4xf32>
    %280 = vector.shape_cast %279 : vector<4x4x4xf32> to vector<4x16xf32>
    %281 = vector.shape_cast %252 : vector<4x16xf32> to vector<1x4x16xf32>
    %282 = vector.shape_cast %266 : vector<4x16xf32> to vector<1x4x16xf32>
    %283 = vector.shape_cast %280 : vector<4x16xf32> to vector<1x4x16xf32>
    %284 = tpu.concatenate %281, %282, %283 in 0 : vector<1x4x16xf32>, vector<1x4x16xf32>, vector<1x4x16xf32> -> vector<3x4x16xf32>
    %285 = vector.shape_cast %146 : vector<3x4x16xf32> to vector<3x4x1x16xf32>
    %286 = vector.shape_cast %192 : vector<3x4x16xf32> to vector<3x4x1x16xf32>
    %287 = vector.shape_cast %238 : vector<3x4x16xf32> to vector<3x4x1x16xf32>
    %288 = vector.shape_cast %284 : vector<3x4x16xf32> to vector<3x4x1x16xf32>
    %289 = tpu.concatenate %285, %286, %287, %288 in 2 : vector<3x4x1x16xf32>, vector<3x4x1x16xf32>, vector<3x4x1x16xf32>, vector<3x4x1x16xf32> -> vector<3x4x4x16xf32>
    %290 = math.tanh %289 : vector<3x4x4x16xf32>
    %c0_104 = arith.constant 0 : index
    %c0_105 = arith.constant 0 : index
    %c0_106 = arith.constant 0 : index
    %c0_107 = arith.constant 0 : index
    %c0_108 = arith.constant 0 : index
    %291 = vector.load %arg10[%c0_104, %c0_105, %c0_106, %c0_107, %c0_108] : memref<1x3x4x4x16xf32, #tpu.memory_space<vmem>>, vector<1x3x4x4x16xf32>
    %292 = vector.shape_cast %291 : vector<1x3x4x4x16xf32> to vector<3x4x4x16xf32>
    %293 = vector.shape_cast %290 : vector<3x4x4x16xf32> to vector<1x3x4x4x16xf32>
    tpu.vector_store %arg10[%c0_104, %c0_105, %c0_106, %c0_107, %c0_108], %293 {strides = array<i32>} : memref<1x3x4x4x16xf32, #tpu.memory_space<vmem>>, vector<1x3x4x4x16xf32>,
    return
  }
  func.func @transform_0(%arg0: i32) -> (i32, i32, i32) {
    %c0_i32 = arith.constant 0 : i32
    %c0_i32_0 = arith.constant 0 : i32
    %c0_i32_1 = arith.constant 0 : i32
    return %arg0, %c0_i32, %c0_i32_0 : i32, i32, i32
  }
  func.func @transform_1(%arg0: i32) -> (i32, i32) {
    %c0_i32 = arith.constant 0 : i32
    %c0_i32_0 = arith.constant 0 : i32
    %c0_i32_1 = arith.constant 0 : i32
    return %c0_i32, %c0_i32_0 : i32, i32
  }
  func.func @transform_2(%arg0: i32) -> (i32, i32) {
    %c0_i32 = arith.constant 0 : i32
    %c0_i32_0 = arith.constant 0 : i32
    %c0_i32_1 = arith.constant 0 : i32
    return %c0_i32, %c0_i32_0 : i32, i32
  }
  func.func @transform_3(%arg0: i32) -> (i32, i32) {
    %c0_i32 = arith.constant 0 : i32
    %c0_i32_0 = arith.constant 0 : i32
    %c0_i32_1 = arith.constant 0 : i32
    return %c0_i32, %c0_i32_0 : i32, i32
  }
  func.func @transform_4(%arg0: i32) -> (i32, i32) {
    %c0_i32 = arith.constant 0 : i32
    %c0_i32_0 = arith.constant 0 : i32
    %c0_i32_1 = arith.constant 0 : i32
    return %c0_i32, %c0_i32_0 : i32, i32
  }
  func.func @transform_5(%arg0: i32) -> (i32, i32) {
    %c0_i32 = arith.constant 0 : i32
    %c0_i32_0 = arith.constant 0 : i32
    %c0_i32_1 = arith.constant 0 : i32
    return %c0_i32, %c0_i32_0 : i32, i32
  }
  func.func @transform_6(%arg0: i32) -> (i32, i32) {
    %c0_i32 = arith.constant 0 : i32
    %c0_i32_0 = arith.constant 0 : i32
    %c0_i32_1 = arith.constant 0 : i32
    return %c0_i32, %c0_i32_0 : i32, i32
  }
  func.func @transform_7(%arg0: i32) -> (i32, i32) {
    %c0_i32 = arith.constant 0 : i32
    %c0_i32_0 = arith.constant 0 : i32
    %c0_i32_1 = arith.constant 0 : i32
    return %c0_i32, %c0_i32_0 : i32, i32
  }
  func.func @transform_8(%arg0: i32) -> (i32, i32) {
    %c0_i32 = arith.constant 0 : i32
    %c0_i32_0 = arith.constant 0 : i32
    %c0_i32_1 = arith.constant 0 : i32
    return %c0_i32, %c0_i32_0 : i32, i32
  }
  func.func @transform_9(%arg0: i32) -> (i32, i32, i32, i32, i32) {
    %c0_i32 = arith.constant 0 : i32
    %c0_i32_0 = arith.constant 0 : i32
    %c0_i32_1 = arith.constant 0 : i32
    %c0_i32_2 = arith.constant 0 : i32
    %c0_i32_3 = arith.constant 0 : i32
    return %arg0, %c0_i32, %c0_i32_0, %c0_i32_1, %c0_i32_2 : i32, i32, i32, i32, i32
  }
}

</mosaic_0001>

<bundles_post_ra>
// kernel: tryon_forward.1
= control target key start
LH: loop header
LB: loop body
LE: loop exit
PB: predicated region body
PF: predicated region fallthrough
CT: control target
= control target key end

     0   :  { %14 = vsyncpa [#allocation4], 0  ;;  %s14752_s0 = inlined_call_operand.vmem [shape: f32[2,512,32], index: 0, kind: input, shape index: {}]   ;;  %s14753_s1 = inlined_call_operand.vmem [shape: f32[32,64], index: 1, kind: input, shape index: {}]   ;;  %s14754_s2 = inlined_call_operand.vmem [shape: f32[1,64], index: 2, kind: input, shape index: {}]   ;;  %s14755_s3 = inlined_call_operand.vmem [shape: f32[576,128], index: 3, kind: input, shape index: {}]   ;;  %s14756_s4 = inlined_call_operand.vmem [shape: f32[1,128], index: 4, kind: input, shape index: {}]   ;;  %s14757_s5 = inlined_call_operand.vmem [shape: f32[128,256], index: 5, kind: input, shape index: {}]   ;;  %s14758_s6 = inlined_call_operand.vmem [shape: f32[1,256], index: 6, kind: input, shape index: {}]   ;;  %s14759_s7 = inlined_call_operand.vmem [shape: f32[64,12], index: 7, kind: input, shape index: {}]   ;;  %s14760_s8 = inlined_call_operand.vmem [shape: f32[1,12], index: 8, kind: input, shape index: {}]   ;;  %s14761_s9 = inlined_call_operand.hbm [shape: f32[2,3,4,4,16], index: 9, kind: output, shape index: {}]  }
   0x1   :  { %16 = vsyncpa [#allocation4 + $0x1], 0  ;;  %s10223_s30 = smov 0   ;;  %s10225_s10 = smov 0  }
   0x2   :  { %s10227_s11 = smov 0   ;;  %s10229_s12 = smov 0  }
   0x3 LB: > { %s10244_s13 = sadd.s32 4294967295, %s10150_s12   ;;  %s9213_s14 = sadd.s32 4294967294, %s10150_s12   ;;  %s10150_s12 = sphi %s10229_s12, %s15001_s12   ;;  %s10146_s11 = sphi %s10227_s11, %s15000_s11   ;;  %s10142_s10 = sphi %s10225_s10, %s14999_s10   ;;  %s10138_s30 = sphi %s10223_s30, %s14998_s30  }
   0x4   : > { %s10248_s15 = sadd.s32 1, %s10150_s12   ;;  %s223_s16 = sadd.s32 1, %s10146_s11 }
   0x5   : > { %s220_s17 = ssub.s32 %s10150_s12, %s10248_s15  ;;  %p233_p0 = scmp.ne.s32.totalorder %s10146_s11, %s10142_s10 }
   0x6   : > { %p221_p1 = scmp.eq.s32.totalorder %s220_s17, 0  ;;  %p234_p2 = scmp.eq.s32.totalorder %s10244_s13, 1 }
   0x7   : > { %p239_p3 = scmp.ne.s32.totalorder %s10142_s10, %s10138_s30  ;;  %p240_p4 = scmp.eq.s32.totalorder %s9213_s14, 1 }
   0x8   : > { %s10259_s18 = scalar_select %p221_p1, %s10146_s11, %s223_s16  }
   0x9   : > { %p10261_p5 = por %p234_p2, %p233_p0  ;;  %p10265_p6 = por %p240_p4, %p239_p3 }
   0xa   : > { %p9216_p7 = scmp.ge.s32.totalorder %s10150_s12, 1  ;;  %p290_p8 = scmp.lt.s32.totalorder %s10150_s12, 3 }
   0xc   : > { %p291_p9 = pnand %p9216_p7, %p290_p8 }
   0xe   : > { %294 = sbr.rel (%p291_p9) target bundleno = 2422 (0x976), region = 56 }
  0x13   : > { %v398_v0 = vld [vmem:[%s14753_s1 + $0x18] sm:$0xff]  ;;  %v397_v1 = vld [vmem:[%s14753_s1 + $0x10] sm:$0xff]  ;;  %p326_p10 = scmp.lt.s32.totalorder %s10244_s13, 1  ;;  %v396_v2 = vld [vmem:[%s14753_s1 + $0x8] sm:$0xff]  ;;  %vm406_vm0 = vcmask 261120   ;;  %vm2456_vm1 = vcmask 517120  }
  0x14   : > { %9606 = vmatprep.subr.mxu0 %v398_v0  ;;  %v395_v3 = vld [vmem:[%s14753_s1] sm:$0xff]  ;;  %vm4249_vm2 = vcmask 523264   ;;  %vm4812_vm3 = vcmask 1041409   ;;  %vm4814_vm4 = vcmask 1042434   ;;  %vm4816_vm5 = vcmask 1043459   ;;  %s14809_s17 = smov 64  }
  0x15   : > { %9607 = vmatpush3.msra.mxu0 %v398_v0  ;;  %s327_s27 = scalar_select %p326_p10, %s10244_s13, 1  ;;  %vm4818_vm6 = vcmask 1044484   ;;  %vm4820_vm7 = vcmask 1045509   ;;  %vm4822_vm8 = vcmask 1046534   ;;  %vm4824_vm9 = vcmask 1047559  }
  0x16   : > { %9608 = vmatprep.subr.mxu0 %v397_v1  ;;  %vm4643_vm10 = vcmask 516096   ;;  %vm6391_vm11 = vcmask 1041408   ;;  %s10155_s29 = smov 122   ;;  %s10157_s16 = smov 120   ;;  %vm7436_vm12 = vcmask 7168   ;;  %vm7441_vm13 = vcmask 15360  }
  0x17   : > { %9609 = vmatpush3.msra.mxu0 %v397_v1  ;;  %s9313_s14 = sshll.u32 %s327_s27, 9  ;;  %s10159_s22 = smov 121   ;;  %vm7446_vm14 = vcmask 23552   ;;  %vm7593_vm15 = vcmask 31744  }
  0x18   : > { %9610 = vmatprep.subr.mxu0 %v396_v2  ;;  %s10288_s21 = scalar_lea.vmem %s14752_s0, %s9313_s14  ;;  %s10156_s14 = smov 126  }
  0x19   : > { %9611 = vmatpush3.msra.mxu0 %v396_v2  ;;  %v331_v4 = vld [vmem:[%s10288_s21] sm:$0xff]  ;;  %v332_v5 = vld [vmem:[%s10288_s21 + $0x8] sm:$0xff]  ;;  %v333_v6 = vld [vmem:[%s10288_s21 + $0x10] sm:$0xff]  ;;  %s10160_s23 = smov 125   ;;  %s10161_s24 = smov 119  }
  0x1a   : > { %9612 = vmatprep.subr.mxu0 %v395_v3  ;;  %9614 = vmatprep.mubr.msk.f32.mxu0 %vm406_vm0, %v331_v4  ;;  %v334_v7 = vld [vmem:[%s10288_s21 + $0x18] sm:$0xff]  ;;  %v335_v8 = vld [vmem:[%s10288_s21 + $0x20] sm:$0xff]  ;;  %v336_v9 = vld [vmem:[%s10288_s21 + $0x28] sm:$0xff]  ;;  %v10152_v4 = vmov 1983009808   ;;  %s10162_s25 = smov 124  }
  0x1b   : > { %9613 = vmatpush3.msra.mxu0 %v395_v3  ;;  %v337_v10 = vld [vmem:[%s10288_s21 + $0x30] sm:$0xff]  ;;  %v338_v11 = vld [vmem:[%s10288_s21 + $0x38] sm:$0xff]  ;;  %v339_v12 = vld [vmem:[%s10288_s21 + $0x40] sm:$0xff]  ;;  %s10163_s26 = smov 118   ;;  %s10164_s27 = smov 2  }
  0x1c   : > { %9615 = vmatmul.mubr.msk.f32.vlgmr.msra.gmra.mxu0 %vm406_vm0, %v332_v5  ;;  %v340_v13 = vld [vmem:[%s10288_s21 + $0x48] sm:$0xff]  ;;  %v341_v14 = vld [vmem:[%s10288_s21 + $0x50] sm:$0xff]  ;;  %v342_v15 = vld [vmem:[%s10288_s21 + $0x58] sm:$0xff]  ;;  %v1114_v5 = vunpack.c.l.s4 %v10152_v4  ;;  %s10165_s28 = smov 1  }
  0x1d   : > { %9617 = vmatprep.mubr.msk.f32.mxu0 %vm406_vm0, %v333_v6  ;;  %v343_v16 = vld [vmem:[%s10288_s21 + $0x60] sm:$0xff]  ;;  %v344_v17 = vld [vmem:[%s10288_s21 + $0x68] sm:$0xff]  ;;  %v345_v18 = vld [vmem:[%s10288_s21 + $0x70] sm:$0xff]  ;;  %v1116_v6 = vlaneseq }
  0x1e   : > { %v346_v19 = vld [vmem:[%s10288_s21 + $0x78] sm:$0xff]  ;;  %v347_v20 = vld [vmem:[%s10288_s21 + $0x80] sm:$0xff]  ;;  %v348_v21 = vld [vmem:[%s10288_s21 + $0x88] sm:$0xff] }
  0x1f   : > { %v349_v22 = vld [vmem:[%s10288_s21 + $0x90] sm:$0xff]  ;;  %v350_v23 = vld [vmem:[%s10288_s21 + $0x98] sm:$0xff]  ;;  %v351_v24 = vld [vmem:[%s10288_s21 + $0xa0] sm:$0xff] }
  0x20   : > { %9618 = vmatmul.mubr.msk.f32.gmra.mxu0 %vm406_vm0, %v334_v7  ;;  %v352_v25 = vld [vmem:[%s10288_s21 + $0xa8] sm:$0xff]  ;;  %v353_v26 = vld [vmem:[%s10288_s21 + $0xb0] sm:$0xff]  ;;  %v354_v27 = vld [vmem:[%s10288_s21 + $0xb8] sm:$0xff]  ;;  %v1115_v7 = vunpack.c.0.s8 %v1114_v5 }
  0x21   : > { %9620 = vmatprep.mubr.msk.f32.mxu0 %vm406_vm0, %v335_v8  ;;  %v355_v28 = vld [vmem:[%s10288_s21 + $0xc0] sm:$0xff]  ;;  %v356_v29 = vld [vmem:[%s10288_s21 + $0xc8] sm:$0xff]  ;;  %v357_v30 = vld [vmem:[%s10288_s21 + $0xd0] sm:$0xff]  ;;  %v10418_v8 = vshrl.u32 %v1116_v6, 7 }
  0x22   : > { %v358_v31 = vld [vmem:[%s10288_s21 + $0xd8] sm:$0xff]  ;;  %v359_v32 = vld [vmem:[%s10288_s21 + $0xe0] sm:$0xff]  ;;  %v360_v33 = vld [vmem:[%s10288_s21 + $0xe8] sm:$0xff] }
  0x23   : > { %v361_v34 = vld [vmem:[%s10288_s21 + $0xf0] sm:$0xff]  ;;  %v362_v35 = vld [vmem:[%s10288_s21 + $0xf8] sm:$0xff]  ;;  %v363_v36 = vld [vmem:[%s10288_s21 + $0x100] sm:$0xff]  ;;  %14812 = vst [vmem:[#allocation6_spill] sm:$0xff] %v10418_v8 }
  0x24   : > { %9621 = vmatmul.mubr.msk.f32.gmra.mxu0 %vm406_vm0, %v336_v9  ;;  %v364_v37 = vld [vmem:[%s10288_s21 + $0x108] sm:$0xff]  ;;  %v365_v38 = vld [vmem:[%s10288_s21 + $0x110] sm:$0xff]  ;;  %v366_v39 = vld [vmem:[%s10288_s21 + $0x118] sm:$0xff] }
  0x25   : > { %9623 = vmatprep.mubr.msk.f32.mxu0 %vm406_vm0, %v337_v10  ;;  %v367_v40 = vld [vmem:[%s10288_s21 + $0x120] sm:$0xff]  ;;  %v368_v41 = vld [vmem:[%s10288_s21 + $0x128] sm:$0xff]  ;;  %v369_v42 = vld [vmem:[%s10288_s21 + $0x130] sm:$0xff] }
  0x26   : > { %v370_v43 = vld [vmem:[%s10288_s21 + $0x138] sm:$0xff]  ;;  %v371_v44 = vld [vmem:[%s10288_s21 + $0x140] sm:$0xff]  ;;  %v372_v45 = vld [vmem:[%s10288_s21 + $0x148] sm:$0xff] }
  0x27   : > { %v373_v46 = vld [vmem:[%s10288_s21 + $0x150] sm:$0xff]  ;;  %v374_v47 = vld [vmem:[%s10288_s21 + $0x158] sm:$0xff]  ;;  %v375_v48 = vld [vmem:[%s10288_s21 + $0x160] sm:$0xff] }
  0x28   : > { %9624 = vmatmul.mubr.msk.f32.gmra.mxu0 %vm406_vm0, %v338_v11  ;;  %v376_v49 = vld [vmem:[%s10288_s21 + $0x168] sm:$0xff]  ;;  %v377_v50 = vld [vmem:[%s10288_s21 + $0x170] sm:$0xff]  ;;  %v378_v51 = vld [vmem:[%s10288_s21 + $0x178] sm:$0xff] }
  0x29   : > { %9626 = vmatprep.mubr.msk.f32.mxu0 %vm406_vm0, %v339_v12  ;;  %v379_v52 = vld [vmem:[%s10288_s21 + $0x180] sm:$0xff]  ;;  %v380_v53 = vld [vmem:[%s10288_s21 + $0x188] sm:$0xff]  ;;  %v381_v54 = vld [vmem:[%s10288_s21 + $0x190] sm:$0xff]  ;;  %v10427_v12 = vsub.s32 %v1115_v7, %v10418_v8 }
  0x2a   : > { %v382_v55 = vld [vmem:[%s10288_s21 + $0x198] sm:$0xff]  ;;  %v383_v56 = vld [vmem:[%s10288_s21 + $0x1a0] sm:$0xff]  ;;  %v384_v57 = vld [vmem:[%s10288_s21 + $0x1a8] sm:$0xff] }
  0x2b   : > { %v385_v58 = vld [vmem:[%s10288_s21 + $0x1b0] sm:$0xff]  ;;  %v386_v59 = vld [vmem:[%s10288_s21 + $0x1b8] sm:$0xff]  ;;  %v387_v60 = vld [vmem:[%s10288_s21 + $0x1c0] sm:$0xff]  ;;  %14813 = vst [vmem:[#allocation7_spill] sm:$0xff] %v10427_v12 }
  0x2c   : > { %9627 = vmatmul.mubr.msk.f32.gmra.mxu0 %vm406_vm0, %v340_v13  ;;  %v388_v61 = vld [vmem:[%s10288_s21 + $0x1c8] sm:$0xff]  ;;  %v389_v62 = vld [vmem:[%s10288_s21 + $0x1d0] sm:$0xff]  ;;  %v390_v63 = vld [vmem:[%s10288_s21 + $0x1d8] sm:$0xff] }
  0x2d   : > { %9629 = vmatprep.mubr.msk.f32.mxu0 %vm406_vm0, %v341_v14  ;;  %v391_v0 = vld [vmem:[%s10288_s21 + $0x1e0] sm:$0xff]  ;;  %v392_v1 = vld [vmem:[%s10288_s21 + $0x1e8] sm:$0xff]  ;;  %v393_v2 = vld [vmem:[%s10288_s21 + $0x1f0] sm:$0xff] }
  0x2e   : > { %v394_v3 = vld [vmem:[%s10288_s21 + $0x1f8] sm:$0xff]  ;;  %v10423_v9 = vld [vmem:[%s14754_s2] ss:$0 sm:$0xff]  ;;  %s10158_s21 = smov 127  }
  0x30   : > { %9630 = vmatmul.mubr.msk.f32.gmra.mxu0 %vm406_vm0, %v342_v15 }
  0x31   : > { %9632 = vmatprep.mubr.msk.f32.mxu0 %vm406_vm0, %v343_v16 }
  0x34   : > { %9633 = vmatmul.mubr.msk.f32.gmra.mxu0 %vm406_vm0, %v344_v17 }
  0x35   : > { %9635 = vmatprep.mubr.msk.f32.mxu0 %vm406_vm0, %v345_v18 }
  0x38   : > { %9636 = vmatmul.mubr.msk.f32.gmra.mxu0 %vm406_vm0, %v346_v19 }
  0x39   : > { %9638 = vmatprep.mubr.msk.f32.mxu0 %vm406_vm0, %v347_v20 }
  0x3c   : > { %9639 = vmatmul.mubr.msk.f32.gmra.mxu0 %vm406_vm0, %v348_v21 }
  0x3d   : > { %9641 = vmatprep.mubr.msk.f32.mxu0 %vm406_vm0, %v349_v22 }
  0x40   : > { %9642 = vmatmul.mubr.msk.f32.gmra.mxu0 %vm406_vm0, %v350_v23 }
  0x41   : > { %9644 = vmatprep.mubr.msk.f32.mxu0 %vm406_vm0, %v351_v24 }
  0x44   : > { %9645 = vmatmul.mubr.msk.f32.gmra.mxu0 %vm406_vm0, %v352_v25 }
  0x45   : > { %9647 = vmatprep.mubr.msk.f32.mxu0 %vm406_vm0, %v353_v26 }
  0x48   : > { %9648 = vmatmul.mubr.msk.f32.gmra.mxu0 %vm406_vm0, %v354_v27 }
  0x49   : > { %9650 = vmatprep.mubr.msk.f32.mxu0 %vm406_vm0, %v355_v28 }
  0x4c   : > { %9651 = vmatmul.mubr.msk.f32.gmra.mxu0 %vm406_vm0, %v356_v29 }
  0x4d   : > { %9653 = vmatprep.mubr.msk.f32.mxu0 %vm406_vm0, %v357_v30 }
  0x50   : > { %9654 = vmatmul.mubr.msk.f32.gmra.mxu0 %vm406_vm0, %v358_v31 }
  0x51   : > { %9656 = vmatprep.mubr.msk.f32.mxu0 %vm406_vm0, %v359_v32 }
  0x54   : > { %9657 = vmatmul.mubr.msk.f32.gmra.mxu0 %vm406_vm0, %v360_v33 }
  0x55   : > { %9659 = vmatprep.mubr.msk.f32.mxu0 %vm406_vm0, %v361_v34 }
  0x58   : > { %9660 = vmatmul.mubr.msk.f32.gmra.mxu0 %vm406_vm0, %v362_v35 }
  0x59   : > { %9662 = vmatprep.mubr.msk.f32.mxu0 %vm406_vm0, %v363_v36 }
  0x5c   : > { %9663 = vmatmul.mubr.msk.f32.gmra.mxu0 %vm406_vm0, %v364_v37 }
  0x5d   : > { %9665 = vmatprep.mubr.msk.f32.mxu0 %vm406_vm0, %v365_v38 }
  0x60   : > { %9666 = vmatmul.mubr.msk.f32.gmra.mxu0 %vm406_vm0, %v366_v39 }
  0x61   : > { %9668 = vmatprep.mubr.msk.f32.mxu0 %vm406_vm0, %v367_v40 }
  0x64   : > { %9669 = vmatmul.mubr.msk.f32.gmra.mxu0 %vm406_vm0, %v368_v41 }
  0x65   : > { %9671 = vmatprep.mubr.msk.f32.mxu0 %vm406_vm0, %v369_v42 }
  0x68   : > { %9672 = vmatmul.mubr.msk.f32.gmra.mxu0 %vm406_vm0, %v370_v43 }
  0x69   : > { %9674 = vmatprep.mubr.msk.f32.mxu0 %vm406_vm0, %v371_v44 }
  0x6c   : > { %9675 = vmatmul.mubr.msk.f32.gmra.mxu0 %vm406_vm0, %v372_v45 }
  0x6d   : > { %9677 = vmatprep.mubr.msk.f32.mxu0 %vm406_vm0, %v373_v46 }
  0x70   : > { %9678 = vmatmul.mubr.msk.f32.gmra.mxu0 %vm406_vm0, %v374_v47 }
  0x71   : > { %9680 = vmatprep.mubr.msk.f32.mxu0 %vm406_vm0, %v375_v48 }
  0x74   : > { %9681 = vmatmul.mubr.msk.f32.gmra.mxu0 %vm406_vm0, %v376_v49 }
  0x75   : > { %9683 = vmatprep.mubr.msk.f32.mxu0 %vm406_vm0, %v377_v50 }
  0x78   : > { %9684 = vmatmul.mubr.msk.f32.gmra.mxu0 %vm406_vm0, %v378_v51 }
  0x79   : > { %9686 = vmatprep.mubr.msk.f32.mxu0 %vm406_vm0, %v379_v52 }
  0x7c   : > { %9687 = vmatmul.mubr.msk.f32.gmra.mxu0 %vm406_vm0, %v380_v53 }
  0x7d   : > { %9689 = vmatprep.mubr.msk.f32.mxu0 %vm406_vm0, %v381_v54 }
  0x80   : > { %9690 = vmatmul.mubr.msk.f32.gmra.mxu0 %vm406_vm0, %v382_v55 }
  0x81   : > { %9692 = vmatprep.mubr.msk.f32.mxu0 %vm406_vm0, %v383_v56 }
  0x84   : > { %9693 = vmatmul.mubr.msk.f32.gmra.mxu0 %vm406_vm0, %v384_v57 }
  0x85   : > { %9695 = vmatprep.mubr.msk.f32.mxu0 %vm406_vm0, %v385_v58 }
  0x88   : > { %9696 = vmatmul.mubr.msk.f32.gmra.mxu0 %vm406_vm0, %v386_v59 }
  0x89   : > { %9698 = vmatprep.mubr.msk.f32.mxu0 %vm406_vm0, %v387_v60 }
  0x8c   : > { %9699 = vmatmul.mubr.msk.f32.gmra.mxu0 %vm406_vm0, %v388_v61 }
  0x8d   : > { %9701 = vmatprep.mubr.msk.f32.mxu0 %vm406_vm0, %v389_v62 }
  0x90   : > { %9702 = vmatmul.mubr.msk.f32.gmra.mxu0 %vm406_vm0, %v390_v63 }
  0x91   : > { %9704 = vmatprep.mubr.msk.f32.mxu0 %vm406_vm0, %v391_v0 }
  0x94   : > { %9705 = vmatmul.mubr.msk.f32.gmra.mxu0 %vm406_vm0, %v392_v1 }
  0x95   : > { %9707 = vmatprep.mubr.msk.f32.mxu0 %vm406_vm0, %v393_v2 }
  0x98   : > { %9708 = vmatmul.mubr.msk.f32.gmra.mxu0 %vm406_vm0, %v394_v3  ;;  %vm7595_vm0 = vcmask 64512  }
  0xdc   : > { %v9616_v10 = vpop.f32.mrf.mxu0 }
  0xdd   : > { %v671_v11 = vadd.f32 %v9616_v10, %v10423_v9 }
  0xde   : > { %v665_v13 = vpop.f32.mrf.mxu0 }
  0xdf   : > { %v985_v14 = vmax.f32 %v671_v11, 0.0  ;;  %v666_v15 = vadd.f32 %v10423_v9, %v665_v13 }
  0xe0   : > { %v9619_v16 = vpop.f32.mrf.mxu0 }
  0xe1   : > { %v1129_v17 = vcombine.high %v985_v14, %v985_v14  ;;  %v1136_v18 = vrot.slane %v985_v14, %v10427_v12  ;;  %v984_v19 = vmax.f32 %v666_v15, 0.0  ;;  %v681_v20 = vadd.f32 %v9619_v16, %v10423_v9 }
  0xe2   : > { %v675_v21 = vpop.f32.mrf.mxu0 }
  0xe3   : > { %v1143_v22 = vrot.slane %v1129_v17, %v10427_v12  ;;  %v1144_v23 = vcombine.high %v1136_v18, %v1136_v18  ;;  %v2485_v24 = vsel %vm2456_vm1, %v1136_v18, -inf  ;;  %v1112_v25 = vcombine.high %v984_v19, %v984_v19 }
  0xe4   : > { %v2486_v26 = vrot.slane %v2485_v24, 4  ;;  %v1119_v27 = vrot.slane %v984_v19, %v10427_v12  ;;  %v10435_v28 = vmax.f32 %v681_v20, 0.0  ;;  %v10438_v29 = vadd.f32 %v10423_v9, %v675_v21 }
  0xe5   : > { %v1145_v30 = vcombine.high %v1143_v22, %v1143_v22  ;;  %v2492_v31 = vsel %vm2456_vm1, %v1144_v23, -inf  ;;  %v2499_v32 = vsel %vm2456_vm1, %v1143_v22, -inf  ;;  %v1126_v33 = vrot.slane %v1112_v25, %v10427_v12 }
  0xe6   : > { %v2487_v34 = vmax.f32 %v2485_v24, %v2486_v26  ;;  %v2493_v35 = vrot.slane %v2492_v31, 4  ;;  %v2500_v36 = vrot.slane %v2499_v32, 4  ;;  %v1127_v37 = vcombine.high %v1119_v27, %v1119_v27 }
  0xe7   : > { %v2506_v38 = vsel %vm2456_vm1, %v1145_v30, -inf  ;;  %v1128_v39 = vcombine.high %v1126_v33, %v1126_v33  ;;  %v2457_v40 = vsel %vm2456_vm1, %v1119_v27, -inf  ;;  %v2471_v41 = vsel %vm2456_vm1, %v1126_v33, -inf }
  0xe8   : > { %v2488_v42 = vrot.slane %v2487_v34, 2  ;;  %v2494_v43 = vmax.f32 %v2492_v31, %v2493_v35  ;;  %v2501_v44 = vmax.f32 %v2499_v32, %v2500_v36  ;;  %v2507_v45 = vrot.slane %v2506_v38, 4 }
  0xe9   : > { %v2458_v46 = vrot.slane %v2457_v40, 4  ;;  %v2464_v47 = vsel %vm2456_vm1, %v1127_v37, -inf  ;;  %v2472_v48 = vrot.slane %v2471_v41, 4  ;;  %v2478_v49 = vsel %vm2456_vm1, %v1128_v39, -inf }
  0xea   : > { %v2489_v50 = vmax.f32 %v2487_v34, %v2488_v42  ;;  %v2495_v51 = vrot.slane %v2494_v43, 2  ;;  %v2502_v52 = vrot.slane %v2501_v44, 2  ;;  %v2508_v53 = vmax.f32 %v2506_v38, %v2507_v45  ;;  %v9622_v45 = vpop.f32.mrf.mxu0 }
  0xeb   : > { %v2459_v54 = vmax.f32 %v2457_v40, %v2458_v46  ;;  %v2465_v55 = vrot.slane %v2464_v47, 4  ;;  %v2473_v56 = vmax.f32 %v2471_v41, %v2472_v48  ;;  %v2479_v57 = vrot.slane %v2478_v49, 4 }
  0xec   : > { %v2490_v58 = vrot.slane %v2489_v50, 1  ;;  %v2496_v59 = vmax.f32 %v2494_v43, %v2495_v51  ;;  %v2503_v60 = vmax.f32 %v2501_v44, %v2502_v52  ;;  %v2509_v61 = vrot.slane %v2508_v53, 2 }
  0xed   : > { %v2460_v62 = vrot.slane %v2459_v54, 2  ;;  %v2466_v63 = vmax.f32 %v2464_v47, %v2465_v55  ;;  %v2474_v0 = vrot.slane %v2473_v56, 2  ;;  %v2480_v1 = vmax.f32 %v2478_v49, %v2479_v57 }
  0xee   : > { %v2491_v2 = vmax.f32 %v2489_v50, %v2490_v58  ;;  %v2497_v3 = vrot.slane %v2496_v59, 1  ;;  %v2504_v4 = vrot.slane %v2503_v60, 1  ;;  %v2510_v5 = vmax.f32 %v2508_v53, %v2509_v61 }
  0xef   : > { %v2461_v6 = vmax.f32 %v2459_v54, %v2460_v62  ;;  %v2467_v7 = vrot.slane %v2466_v63, 2  ;;  %v2475_v10 = vmax.f32 %v2473_v56, %v2474_v0  ;;  %v2481_v11 = vrot.slane %v2480_v1, 2 }
  0xf0   : > { %v2498_v13 = vmax.f32 %v2496_v59, %v2497_v3  ;;  %v2505_v14 = vmax.f32 %v2503_v60, %v2504_v4  ;;  %v2511_v15 = vrot.slane %v2510_v5, 1  ;;  %v10449_v16 = vsel %vm4249_vm2, %v2491_v2, -inf }
  0xf1   : > { %v2462_v17 = vrot.slane %v2461_v6, 1  ;;  %v2468_v18 = vmax.f32 %v2466_v63, %v2467_v7  ;;  %v2476_v19 = vrot.slane %v2475_v10, 1  ;;  %v2482_v20 = vmax.f32 %v2480_v1, %v2481_v11 }
  0xf2   : > { %v2512_v21 = vmax.f32 %v2510_v5, %v2511_v15  ;;  %v10452_v22 = vsel %vm4249_vm2, %v2498_v13, -inf  ;;  %v10455_v23 = vsel %vm4249_vm2, %v2505_v14, -inf  ;;  %v1163_v24 = vcombine.high %v10435_v28, %v10435_v28 }
  0xf3   : > { %v2463_v25 = vmax.f32 %v2461_v6, %v2462_v17  ;;  %v2469_v26 = vrot.slane %v2468_v18, 1  ;;  %v2477_v27 = vmax.f32 %v2475_v10, %v2476_v19  ;;  %v2483_v30 = vrot.slane %v2482_v20, 1  ;;  %v685_v6 = vpop.f32.mrf.mxu0 }
  0xf4   : > { %v10460_v31 = vsel %vm4249_vm2, %v2512_v21, -inf  ;;  %v1170_v32 = vrot.slane %v10435_v28, %v10427_v12  ;;  %v1177_v33 = vrot.slane %v1163_v24, %v10427_v12  ;;  %v986_v34 = vmax.f32 %v10438_v29, 0.0 }
  0xf5   : > { %v2470_v35 = vmax.f32 %v2468_v18, %v2469_v26  ;;  %v2484_v36 = vmax.f32 %v2482_v20, %v2483_v30  ;;  %v10467_v37 = vsel %vm4249_vm2, %v2463_v25, -inf  ;;  %v10470_v38 = vsel %vm4249_vm2, %v2477_v27, -inf }
  0xf6   : > { %v1178_v39 = vcombine.high %v1170_v32, %v1170_v32  ;;  %v1179_v40 = vcombine.high %v1177_v33, %v1177_v33  ;;  %v2541_v41 = vsel %vm2456_vm1, %v1170_v32, -inf  ;;  %v2555_v42 = vsel %vm2456_vm1, %v1177_v33, -inf  ;;  %v9625_v32 = vpop.f32.mrf.mxu0 }
  0xf7   : > { %v10475_v28 = vsel %vm4249_vm2, %v2470_v35, -inf  ;;  %v10478_v43 = vsel %vm4249_vm2, %v2484_v36, -inf  ;;  %v2542_v29 = vrot.slane %v2541_v41, 4  ;;  %v2556_v44 = vrot.slane %v2555_v42, 4 }
  0xf8   : > { %v2548_v46 = vsel %vm2456_vm1, %v1178_v39, -inf  ;;  %v2562_v47 = vsel %vm2456_vm1, %v1179_v40, -inf  ;;  %v1146_v48 = vcombine.high %v986_v34, %v986_v34  ;;  %v1153_v49 = vrot.slane %v986_v34, %v10427_v12 }
  0xf9   : > { %v2543_v50 = vmax.f32 %v2541_v41, %v2542_v29  ;;  %v2549_v51 = vrot.slane %v2548_v46, 4  ;;  %v2557_v52 = vmax.f32 %v2555_v42, %v2556_v44  ;;  %v2563_v53 = vrot.slane %v2562_v47, 4 }
  0xfa   : > { %v1160_v54 = vrot.slane %v1146_v48, %v10427_v12  ;;  %v1161_v55 = vcombine.high %v1153_v49, %v1153_v49  ;;  %v2513_v56 = vsel %vm2456_vm1, %v1153_v49, -inf  ;;  %v691_v57 = vadd.f32 %v9622_v45, %v10423_v9 }
  0xfb   : > { %v2544_v58 = vrot.slane %v2543_v50, 2  ;;  %v2550_v59 = vmax.f32 %v2548_v46, %v2549_v51  ;;  %v2558_v60 = vrot.slane %v2557_v52, 2  ;;  %v2564_v61 = vmax.f32 %v2562_v47, %v2563_v53  ;;  %v695_v51 = vpop.f32.mrf.mxu0 }
  0xfc   : > { %v1162_v62 = vcombine.high %v1160_v54, %v1160_v54  ;;  %v2514_v63 = vrot.slane %v2513_v56, 4  ;;  %v2520_v0 = vsel %vm2456_vm1, %v1161_v55, -inf  ;;  %v2527_v1 = vsel %vm2456_vm1, %v1160_v54, -inf }
  0xfd   : > { %v2545_v2 = vmax.f32 %v2543_v50, %v2544_v58  ;;  %v2551_v3 = vrot.slane %v2550_v59, 2  ;;  %v2559_v4 = vmax.f32 %v2557_v52, %v2558_v60  ;;  %v2565_v5 = vrot.slane %v2564_v61, 2 }
  0xfe   : > { %v2515_v7 = vmax.f32 %v2513_v56, %v2514_v63  ;;  %v2521_v10 = vrot.slane %v2520_v0, 4  ;;  %v2528_v11 = vrot.slane %v2527_v1, 4  ;;  %v2534_v13 = vsel %vm2456_vm1, %v1162_v62, -inf }
  0xff   : > { %v2546_v14 = vrot.slane %v2545_v2, 1  ;;  %v2552_v15 = vmax.f32 %v2550_v59, %v2551_v3  ;;  %v2560_v17 = vrot.slane %v2559_v4, 1  ;;  %v2566_v18 = vmax.f32 %v2564_v61, %v2565_v5 }
 0x100   : > { %v2516_v19 = vrot.slane %v2515_v7, 2  ;;  %v2522_v20 = vmax.f32 %v2520_v0, %v2521_v10  ;;  %v2529_v21 = vmax.f32 %v2527_v1, %v2528_v11  ;;  %v2535_v24 = vrot.slane %v2534_v13, 4 }
 0x101   : > { %v2547_v25 = vmax.f32 %v2545_v2, %v2546_v14  ;;  %v2553_v26 = vrot.slane %v2552_v15, 1  ;;  %v2561_v27 = vmax.f32 %v2559_v4, %v2560_v17  ;;  %v2567_v30 = vrot.slane %v2566_v18, 1 }
 0x102   : > { %v2517_v33 = vmax.f32 %v2515_v7, %v2516_v19  ;;  %v2523_v34 = vrot.slane %v2522_v20, 2  ;;  %v2530_v35 = vrot.slane %v2529_v21, 2  ;;  %v2536_v36 = vmax.f32 %v2534_v13, %v2535_v24 }
 0x103   : > { %v2554_v39 = vmax.f32 %v2552_v15, %v2553_v26  ;;  %v2568_v40 = vmax.f32 %v2566_v18, %v2567_v30  ;;  %v10490_v41 = vsel %vm4249_vm2, %v2547_v25, -inf  ;;  %v10493_v42 = vsel %vm4249_vm2, %v2561_v27, -inf }
 0x104   : > { %v4264_v29 = vmax.f32 %v10449_v16, %v10490_v41  ;;  %v4270_v44 = vmax.f32 %v10455_v23, %v10493_v42  ;;  %v2518_v45 = vrot.slane %v2517_v33, 1  ;;  %v2524_v46 = vmax.f32 %v2522_v20, %v2523_v34 }
 0x105   : > { %v4266_v47 = vsel %vm4249_vm2, %v2554_v39, -inf  ;;  %v10501_v48 = vsel %vm4249_vm2, %v2568_v40, -inf  ;;  %v2531_v49 = vmax.f32 %v2529_v21, %v2530_v35  ;;  %v2537_v50 = vrot.slane %v2536_v36, 2 }
 0x106   : > { %v4267_v52 = vmax.f32 %v10452_v22, %v4266_v47  ;;  %v4273_v53 = vmax.f32 %v10460_v31, %v10501_v48  ;;  %v2519_v16 = vmax.f32 %v2517_v33, %v2518_v45  ;;  %v2525_v54 = vrot.slane %v2524_v46, 1 }
 0x107   : > { %v2532_v55 = vrot.slane %v2531_v49, 1  ;;  %v2538_v56 = vmax.f32 %v2536_v36, %v2537_v50  ;;  %v989_v58 = vmax.f32 %v691_v57, 0.0  ;;  %v686_v59 = vadd.f32 %v10423_v9, %v685_v6 }
 0x108   : > { %v2526_v60 = vmax.f32 %v2524_v46, %v2525_v54  ;;  %v4251_v61 = vsel %vm4249_vm2, %v2519_v16, -inf  ;;  %v701_v62 = vadd.f32 %v9625_v32, %v10423_v9  ;;  %v10510_v22 = vadd.f32 %v10423_v9, %v695_v51 }
 0x109   : > { %v2533_v63 = vmax.f32 %v2531_v49, %v2532_v55  ;;  %v2539_v31 = vrot.slane %v2538_v56, 1  ;;  %v4252_v0 = vmax.f32 %v10467_v37, %v4251_v61  ;;  %v1197_v1 = vcombine.high %v989_v58, %v989_v58 }
 0x10a   : > { %v4254_v2 = vsel %vm4249_vm2, %v2526_v60, -inf  ;;  %v1204_v57 = vrot.slane %v989_v58, %v10427_v12  ;;  %v988_v3 = vmax.f32 %v686_v59, 0.0  ;;  %v10515_v4 = vmax.f32 %v701_v62, 0.0 }
 0x10b   : > { %v2540_v5 = vmax.f32 %v2538_v56, %v2539_v31  ;;  %v4255_v6 = vmax.f32 %v10475_v28, %v4254_v2  ;;  %v4257_v7 = vsel %vm4249_vm2, %v2533_v63, -inf  ;;  %v1211_v10 = vrot.slane %v1197_v1, %v10427_v12 }
 0x10c   : > { %v4258_v11 = vmax.f32 %v10470_v38, %v4257_v7  ;;  %v1212_v13 = vcombine.high %v1204_v57, %v1204_v57  ;;  %v2597_v37 = vsel %vm2456_vm1, %v1204_v57, -inf  ;;  %v1180_v14 = vcombine.high %v988_v3, %v988_v3 }
 0x10d   : > { %v4260_v15 = vsel %vm4249_vm2, %v2540_v5, -inf  ;;  %v4813_v17 = vsel %vm4812_vm3, %v4255_v6, %v4252_v0  ;;  %v1213_v18 = vcombine.high %v1211_v10, %v1211_v10  ;;  %v2598_v19 = vrot.slane %v2597_v37, 4 }
 0x10e   : > { %v4261_v20 = vmax.f32 %v10478_v43, %v4260_v15  ;;  %v4815_v28 = vsel %vm4814_vm4, %v4258_v11, %v4813_v17  ;;  %v2604_v21 = vsel %vm2456_vm1, %v1212_v13, -inf  ;;  %v2611_v24 = vsel %vm2456_vm1, %v1211_v10, -inf  ;;  %v9628_v17 = vpop.f32.mrf.mxu0 }
 0x10f   : > { %v2599_v25 = vmax.f32 %v2597_v37, %v2598_v19  ;;  %v2605_v38 = vrot.slane %v2604_v21, 4  ;;  %v2612_v26 = vrot.slane %v2611_v24, 4  ;;  %v2618_v27 = vsel %vm2456_vm1, %v1213_v18, -inf }
 0x110   : > { %v4817_v30 = vsel %vm4816_vm5, %v4261_v20, %v4815_v28  ;;  %v2619_v32 = vrot.slane %v2618_v27, 4  ;;  %v1187_v33 = vrot.slane %v988_v3, %v10427_v12  ;;  %v1194_v34 = vrot.slane %v1180_v14, %v10427_v12 }
 0x111   : > { %v4819_v43 = vsel %vm4818_vm6, %v4264_v29, %v4817_v30  ;;  %v2600_v35 = vrot.slane %v2599_v25, 2  ;;  %v2606_v36 = vmax.f32 %v2604_v21, %v2605_v38  ;;  %v2613_v39 = vmax.f32 %v2611_v24, %v2612_v26 }
 0x112   : > { %v4821_v40 = vsel %vm4820_vm7, %v4267_v52, %v4819_v43  ;;  %v2620_v41 = vmax.f32 %v2618_v27, %v2619_v32  ;;  %v1195_v45 = vcombine.high %v1187_v33, %v1187_v33  ;;  %v1196_v46 = vcombine.high %v1194_v34, %v1194_v34 }
 0x113   : > { %v4823_v47 = vsel %vm4822_vm8, %v4270_v44, %v4821_v40  ;;  %v2601_v48 = vmax.f32 %v2599_v25, %v2600_v35  ;;  %v2607_v49 = vrot.slane %v2606_v36, 2  ;;  %v2614_v50 = vrot.slane %v2613_v39, 2 }
 0x114   : > { %v4825_v51 = vsel %vm4824_vm9, %v4273_v53, %v4823_v47  ;;  %v2621_v16 = vrot.slane %v2620_v41, 2  ;;  %v2569_v29 = vsel %vm2456_vm1, %v1187_v33, -inf  ;;  %v2576_v54 = vsel %vm2456_vm1, %v1195_v45, -inf }
 0x115   : > { %4948 = vst.msk [vmem:[#allocation2 + $0x11] sm:$0xff] %vm4249_vm2, %v4825_v51  ;;  %v2602_v52 = vrot.slane %v2601_v48, 1  ;;  %v2608_v55 = vmax.f32 %v2606_v36, %v2607_v49  ;;  %v2615_v56 = vmax.f32 %v2613_v39, %v2614_v50  ;;  %v2570_v58 = vrot.slane %v2569_v29, 4 }
 0x116   : > { %v2622_v59 = vmax.f32 %v2620_v41, %v2621_v16  ;;  %v2577_v23 = vrot.slane %v2576_v54, 4  ;;  %v2583_v42 = vsel %vm2456_vm1, %v1194_v34, -inf  ;;  %v2590_v44 = vsel %vm2456_vm1, %v1196_v46, -inf }
 0x117   : > { %v2603_v60 = vmax.f32 %v2601_v48, %v2602_v52  ;;  %v2609_v61 = vrot.slane %v2608_v55, 1  ;;  %v2616_v53 = vrot.slane %v2615_v56, 1  ;;  %v2571_v62 = vmax.f32 %v2569_v29, %v2570_v58 }
 0x118   : > { %v2623_v63 = vrot.slane %v2622_v59, 1  ;;  %v2578_v31 = vmax.f32 %v2576_v54, %v2577_v23  ;;  %v2584_v0 = vrot.slane %v2583_v42, 4  ;;  %v2591_v1 = vrot.slane %v2590_v44, 4 }
 0x119   : > { %v2610_v2 = vmax.f32 %v2608_v55, %v2609_v61  ;;  %v2617_v57 = vmax.f32 %v2615_v56, %v2616_v53  ;;  %v10545_v3 = vsel %vm4249_vm2, %v2603_v60, -inf  ;;  %v2572_v5 = vrot.slane %v2571_v62, 2 }
 0x11a   : > { %v2624_v6 = vmax.f32 %v2622_v59, %v2623_v63  ;;  %v2579_v7 = vrot.slane %v2578_v31, 2  ;;  %v2585_v10 = vmax.f32 %v2583_v42, %v2584_v0  ;;  %v2592_v11 = vmax.f32 %v2590_v44, %v2591_v1 }
 0x11b   : > { %v10548_v13 = vsel %vm4249_vm2, %v2610_v2, -inf  ;;  %v10551_v37 = vsel %vm4249_vm2, %v2617_v57, -inf  ;;  %v2573_v14 = vmax.f32 %v2571_v62, %v2572_v5  ;;  %v1231_v15 = vcombine.high %v10515_v4, %v10515_v4 }
 0x11c   : > { %v10556_v18 = vsel %vm4249_vm2, %v2624_v6, -inf  ;;  %v2580_v19 = vmax.f32 %v2578_v31, %v2579_v7  ;;  %v2586_v20 = vrot.slane %v2585_v10, 2  ;;  %v2593_v28 = vrot.slane %v2592_v11, 2 }
 0x11d   : > { %v2574_v21 = vrot.slane %v2573_v14, 1  ;;  %v1238_v24 = vrot.slane %v10515_v4, %v10427_v12  ;;  %v1245_v25 = vrot.slane %v1231_v15, %v10427_v12  ;;  %v990_v38 = vmax.f32 %v10510_v22, 0.0 }
 0x11e   : > { %v2581_v26 = vrot.slane %v2580_v19, 1  ;;  %v2587_v27 = vmax.f32 %v2585_v10, %v2586_v20  ;;  %v2594_v30 = vmax.f32 %v2592_v11, %v2593_v28  ;;  %v711_v32 = vadd.f32 %v9628_v17, %v10423_v9 }
 0x11f   : > { %v2575_v33 = vmax.f32 %v2573_v14, %v2574_v21  ;;  %v1246_v34 = vcombine.high %v1238_v24, %v1238_v24  ;;  %v1247_v43 = vcombine.high %v1245_v25, %v1245_v25  ;;  %v2653_v35 = vsel %vm2456_vm1, %v1238_v24, -inf }
 0x120   : > { %v2582_v36 = vmax.f32 %v2580_v19, %v2581_v26  ;;  %v2588_v39 = vrot.slane %v2587_v27, 1  ;;  %v2595_v40 = vrot.slane %v2594_v30, 1  ;;  %v2654_v41 = vrot.slane %v2653_v35, 4 }
 0x121   : > { %v10565_v4 = vsel %vm4249_vm2, %v2575_v33, -inf  ;;  %v2660_v45 = vsel %vm2456_vm1, %v1246_v34, -inf  ;;  %v2667_v22 = vsel %vm2456_vm1, %v1245_v25, -inf  ;;  %v2674_v46 = vsel %vm2456_vm1, %v1247_v43, -inf }
 0x122   : > { %v2589_v47 = vmax.f32 %v2587_v27, %v2588_v39  ;;  %v2596_v48 = vmax.f32 %v2594_v30, %v2595_v40  ;;  %v10571_v49 = vsel %vm4249_vm2, %v2582_v36, -inf  ;;  %v2655_v50 = vmax.f32 %v2653_v35, %v2654_v41 }
 0x123   : > { %v2661_v51 = vrot.slane %v2660_v45, 4  ;;  %v2668_v16 = vrot.slane %v2667_v22, 4  ;;  %v2675_v29 = vrot.slane %v2674_v46, 4  ;;  %v1214_v54 = vcombine.high %v990_v38, %v990_v38 }
 0x124   : > { %v10574_v52 = vsel %vm4249_vm2, %v2589_v47, -inf  ;;  %v10577_v55 = vsel %vm4249_vm2, %v2596_v48, -inf  ;;  %v2656_v56 = vrot.slane %v2655_v50, 2  ;;  %v1221_v58 = vrot.slane %v990_v38, %v10427_v12  ;;  %v705_v38 = vpop.f32.mrf.mxu0 }
 0x125   : > { %v2662_v59 = vmax.f32 %v2660_v45, %v2661_v51  ;;  %v2669_v23 = vmax.f32 %v2667_v22, %v2668_v16  ;;  %v2676_v42 = vmax.f32 %v2674_v46, %v2675_v29  ;;  %v1228_v44 = vrot.slane %v1214_v54, %v10427_v12 }
 0x126   : > { %v2657_v60 = vmax.f32 %v2655_v50, %v2656_v56  ;;  %v1229_v61 = vcombine.high %v1221_v58, %v1221_v58  ;;  %v2625_v53 = vsel %vm2456_vm1, %v1221_v58, -inf  ;;  %v993_v62 = vmax.f32 %v711_v32, 0.0  ;;  %v9631_v48 = vpop.f32.mrf.mxu0 }
 0x127   : > { %v2663_v63 = vrot.slane %v2662_v59, 2  ;;  %v2670_v31 = vrot.slane %v2669_v23, 2  ;;  %v2677_v0 = vrot.slane %v2676_v42, 2  ;;  %v1230_v1 = vcombine.high %v1228_v44, %v1228_v44 }
 0x128   : > { %v2658_v2 = vrot.slane %v2657_v60, 1  ;;  %v2626_v57 = vrot.slane %v2625_v53, 4  ;;  %v2632_v5 = vsel %vm2456_vm1, %v1229_v61, -inf  ;;  %v2639_v6 = vsel %vm2456_vm1, %v1228_v44, -inf }
 0x129   : > { %v2664_v7 = vmax.f32 %v2662_v59, %v2663_v63  ;;  %v2671_v10 = vmax.f32 %v2669_v23, %v2670_v31  ;;  %v2678_v11 = vmax.f32 %v2676_v42, %v2677_v0  ;;  %v2633_v14 = vrot.slane %v2632_v5, 4 }
 0x12a   : > { %v2659_v15 = vmax.f32 %v2657_v60, %v2658_v2  ;;  %v2627_v17 = vmax.f32 %v2625_v53, %v2626_v57  ;;  %v2640_v19 = vrot.slane %v2639_v6, 4  ;;  %v2646_v20 = vsel %vm2456_vm1, %v1230_v1, -inf }
 0x12b   : > { %v2665_v28 = vrot.slane %v2664_v7, 1  ;;  %v2672_v21 = vrot.slane %v2671_v10, 1  ;;  %v2679_v24 = vrot.slane %v2678_v11, 1  ;;  %v2634_v25 = vmax.f32 %v2632_v5, %v2633_v14 }
 0x12c   : > { %v10586_v26 = vsel %vm4249_vm2, %v2659_v15, -inf  ;;  %v2628_v27 = vrot.slane %v2627_v17, 2  ;;  %v2641_v30 = vmax.f32 %v2639_v6, %v2640_v19  ;;  %v2647_v32 = vrot.slane %v2646_v20, 4 }
 0x12d   : > { %v2666_v33 = vmax.f32 %v2664_v7, %v2665_v28  ;;  %v2673_v34 = vmax.f32 %v2671_v10, %v2672_v21  ;;  %v2680_v43 = vmax.f32 %v2678_v11, %v2679_v24  ;;  %v4288_v35 = vmax.f32 %v10545_v3, %v10586_v26 }
 0x12e   : > { %v2629_v36 = vmax.f32 %v2627_v17, %v2628_v27  ;;  %v2635_v39 = vrot.slane %v2634_v25, 2  ;;  %v2642_v40 = vrot.slane %v2641_v30, 2  ;;  %v2648_v41 = vmax.f32 %v2646_v20, %v2647_v32 }
 0x12f   : > { %v10591_v45 = vsel %vm4249_vm2, %v2666_v33, -inf  ;;  %v10594_v22 = vsel %vm4249_vm2, %v2673_v34, -inf  ;;  %v10597_v46 = vsel %vm4249_vm2, %v2680_v43, -inf  ;;  %v1265_v47 = vcombine.high %v993_v62, %v993_v62 }
 0x130   : > { %v4291_v50 = vmax.f32 %v10548_v13, %v10591_v45  ;;  %v4294_v51 = vmax.f32 %v10551_v37, %v10594_v22  ;;  %v4297_v16 = vmax.f32 %v10556_v18, %v10597_v46  ;;  %v2630_v29 = vrot.slane %v2629_v36, 1 }
 0x131   : > { %v2636_v54 = vmax.f32 %v2634_v25, %v2635_v39  ;;  %v2643_v56 = vmax.f32 %v2641_v30, %v2642_v40  ;;  %v2649_v58 = vrot.slane %v2648_v41, 2  ;;  %v1272_v59 = vrot.slane %v993_v62, %v10427_v12 }
 0x132   : > { %v2631_v23 = vmax.f32 %v2629_v36, %v2630_v29  ;;  %v1279_v42 = vrot.slane %v1265_v47, %v10427_v12  ;;  %v706_v44 = vadd.f32 %v10423_v9, %v705_v38  ;;  %v10609_v60 = vadd.f32 %v9631_v48, %v10423_v9 }
 0x133   : > { %v2637_v13 = vrot.slane %v2636_v54, 1  ;;  %v2644_v61 = vrot.slane %v2643_v56, 1  ;;  %v2650_v37 = vmax.f32 %v2648_v41, %v2649_v58  ;;  %v1280_v53 = vcombine.high %v1272_v59, %v1272_v59 }
 0x134   : > { %v4275_v63 = vsel %vm4249_vm2, %v2631_v23, -inf  ;;  %v1281_v31 = vcombine.high %v1279_v42, %v1279_v42  ;;  %v2709_v0 = vsel %vm2456_vm1, %v1272_v59, -inf  ;;  %v2723_v1 = vsel %vm2456_vm1, %v1279_v42, -inf }
 0x135   : > { %v2638_v62 = vmax.f32 %v2636_v54, %v2637_v13  ;;  %v2645_v2 = vmax.f32 %v2643_v56, %v2644_v61  ;;  %v2651_v57 = vrot.slane %v2650_v37, 1  ;;  %v4276_v5 = vmax.f32 %v10565_v4, %v4275_v63  ;;  %v715_v61 = vpop.f32.mrf.mxu0 }
 0x136   : > { %v2710_v6 = vrot.slane %v2709_v0, 4  ;;  %v2716_v7 = vsel %vm2456_vm1, %v1280_v53, -inf  ;;  %v2724_v10 = vrot.slane %v2723_v1, 4  ;;  %v2730_v11 = vsel %vm2456_vm1, %v1281_v31, -inf }
 0x137   : > { %v2652_v14 = vmax.f32 %v2650_v37, %v2651_v57  ;;  %v4278_v15 = vsel %vm4249_vm2, %v2638_v62, -inf  ;;  %v4281_v17 = vsel %vm4249_vm2, %v2645_v2, -inf  ;;  %v2717_v19 = vrot.slane %v2716_v7, 4 }
 0x138   : > { %v4279_v20 = vmax.f32 %v10571_v49, %v4278_v15  ;;  %v4282_v28 = vmax.f32 %v10574_v52, %v4281_v17  ;;  %v2711_v21 = vmax.f32 %v2709_v0, %v2710_v6  ;;  %v2725_v24 = vmax.f32 %v2723_v1, %v2724_v10 }
 0x139   : > { %v4284_v4 = vsel %vm4249_vm2, %v2652_v14, -inf  ;;  %v2718_v25 = vmax.f32 %v2716_v7, %v2717_v19  ;;  %v2731_v38 = vrot.slane %v2730_v11, 4  ;;  %v992_v27 = vmax.f32 %v706_v44, 0.0  ;;  %v9634_v7 = vpop.f32.mrf.mxu0 }
 0x13a   : > { %v4285_v30 = vmax.f32 %v10577_v55, %v4284_v4  ;;  %v4826_v32 = vsel %vm4812_vm3, %v4279_v20, %v4276_v5  ;;  %v2712_v33 = vrot.slane %v2711_v21, 2  ;;  %v2726_v34 = vrot.slane %v2725_v24, 2 }
 0x13b   : > { %v4827_v43 = vsel %vm4814_vm4, %v4282_v28, %v4826_v32  ;;  %v2719_v36 = vrot.slane %v2718_v25, 2  ;;  %v2732_v39 = vmax.f32 %v2730_v11, %v2731_v38  ;;  %v1248_v49 = vcombine.high %v992_v27, %v992_v27 }
 0x13c   : > { %v4828_v52 = vsel %vm4816_vm5, %v4285_v30, %v4827_v43  ;;  %v2713_v40 = vmax.f32 %v2711_v21, %v2712_v33  ;;  %v2727_v41 = vmax.f32 %v2725_v24, %v2726_v34  ;;  %v1255_v45 = vrot.slane %v992_v27, %v10427_v12 }
 0x13d   : > { %v4829_v55 = vsel %vm4818_vm6, %v4288_v35, %v4828_v52  ;;  %v2720_v22 = vmax.f32 %v2718_v25, %v2719_v36  ;;  %v2733_v47 = vrot.slane %v2732_v39, 2  ;;  %v1262_v48 = vrot.slane %v1248_v49, %v10427_v12 }
 0x13e   : > { %v4830_v29 = vsel %vm4820_vm7, %v4291_v50, %v4829_v55  ;;  %v2714_v54 = vrot.slane %v2713_v40, 1  ;;  %v2728_v56 = vrot.slane %v2727_v41, 1  ;;  %v1263_v58 = vcombine.high %v1255_v45, %v1255_v45  ;;  %v5790_v55 = vld [vmem:[%s14755_s3 + $0x238] sm:$0xff] }
 0x13f   : > { %v4831_v59 = vsel %vm4822_vm8, %v4294_v51, %v4830_v29  ;;  %v2721_v23 = vrot.slane %v2720_v22, 1  ;;  %v2734_v42 = vmax.f32 %v2732_v39, %v2733_v47  ;;  %v1264_v44 = vcombine.high %v1262_v48, %v1262_v48  ;;  %9710 = vmatprep.subr.mxu0 %v5790_v55 }
 0x140   : > { %v4832_v3 = vsel %vm4824_vm9, %v4297_v16, %v4831_v59  ;;  %v2715_v26 = vmax.f32 %v2713_v40, %v2714_v54  ;;  %v2729_v35 = vmax.f32 %v2727_v41, %v2728_v56  ;;  %v2681_v13 = vsel %vm2456_vm1, %v1255_v45, -inf  ;;  %9711 = vmatpush3.msra.mxu0 %v5790_v55 }
 0x141   : > { %4949 = vst.msk [vmem:[#allocation2 + $0x21] sm:$0xff] %vm4249_vm2, %v4832_v3  ;;  %v2722_v50 = vmax.f32 %v2720_v22, %v2721_v23  ;;  %v2735_v37 = vrot.slane %v2734_v42, 1  ;;  %v2682_v53 = vrot.slane %v2681_v13, 4  ;;  %v2688_v51 = vsel %vm2456_vm1, %v1263_v58, -inf }
 0x142   : > { %v10642_v63 = vsel %vm4249_vm2, %v2715_v26, -inf  ;;  %v10645_v31 = vsel %vm4249_vm2, %v2729_v35, -inf  ;;  %v2689_v18 = vrot.slane %v2688_v51, 4  ;;  %v2695_v46 = vsel %vm2456_vm1, %v1262_v48, -inf }
 0x143   : > { %v2736_v16 = vmax.f32 %v2734_v42, %v2735_v37  ;;  %v10649_v0 = vsel %vm4249_vm2, %v2722_v50, -inf  ;;  %v2683_v1 = vmax.f32 %v2681_v13, %v2682_v53  ;;  %v2696_v62 = vrot.slane %v2695_v46, 4 }
 0x144   : > { %v2690_v2 = vmax.f32 %v2688_v51, %v2689_v18  ;;  %v2702_v57 = vsel %vm2456_vm1, %v1264_v44, -inf  ;;  %v995_v5 = vmax.f32 %v10609_v60, 0.0  ;;  %v716_v6 = vadd.f32 %v10423_v9, %v715_v61 }
 0x145   : > { %v10655_v10 = vsel %vm4249_vm2, %v2736_v16, -inf  ;;  %v2684_v11 = vrot.slane %v2683_v1, 2  ;;  %v2697_v14 = vmax.f32 %v2695_v46, %v2696_v62  ;;  %v2703_v15 = vrot.slane %v2702_v57, 4 }
 0x146   : > { %v2691_v17 = vrot.slane %v2690_v2, 2  ;;  %v1299_v19 = vcombine.high %v995_v5, %v995_v5  ;;  %v1306_v20 = vrot.slane %v995_v5, %v10427_v12  ;;  %v994_v28 = vmax.f32 %v716_v6, 0.0 }
 0x147   : > { %v2685_v21 = vmax.f32 %v2683_v1, %v2684_v11  ;;  %v2698_v24 = vrot.slane %v2697_v14, 2  ;;  %v2704_v4 = vmax.f32 %v2702_v57, %v2703_v15  ;;  %v731_v25 = vadd.f32 %v9634_v7, %v10423_v9 }
 0x148   : > { %v2692_v60 = vmax.f32 %v2690_v2, %v2691_v17  ;;  %v1313_v38 = vrot.slane %v1299_v19, %v10427_v12  ;;  %v1314_v27 = vcombine.high %v1306_v20, %v1306_v20  ;;  %v2765_v30 = vsel %vm2456_vm1, %v1306_v20, -inf }
 0x149   : > { %v2686_v32 = vrot.slane %v2685_v21, 1  ;;  %v2699_v33 = vmax.f32 %v2697_v14, %v2698_v24  ;;  %v2705_v34 = vrot.slane %v2704_v4, 2  ;;  %v2766_v43 = vrot.slane %v2765_v30, 4 }
 0x14a   : > { %v2693_v36 = vrot.slane %v2692_v60, 1  ;;  %v1315_v39 = vcombine.high %v1313_v38, %v1313_v38  ;;  %v2772_v49 = vsel %vm2456_vm1, %v1314_v27, -inf  ;;  %v2779_v52 = vsel %vm2456_vm1, %v1313_v38, -inf }
 0x14b   : > { %v2687_v40 = vmax.f32 %v2685_v21, %v2686_v32  ;;  %v2700_v41 = vrot.slane %v2699_v33, 1  ;;  %v2706_v45 = vmax.f32 %v2704_v4, %v2705_v34  ;;  %v2767_v9 = vmax.f32 %v2765_v30, %v2766_v43 }
 0x14c   : > { %v2694_v22 = vmax.f32 %v2692_v60, %v2693_v36  ;;  %v2773_v47 = vrot.slane %v2772_v49, 4  ;;  %v2780_v48 = vrot.slane %v2779_v52, 4  ;;  %v2786_v29 = vsel %vm2456_vm1, %v1315_v39, -inf }
 0x14d   : > { %v2701_v54 = vmax.f32 %v2699_v33, %v2700_v41  ;;  %v2707_v56 = vrot.slane %v2706_v45, 1  ;;  %v10668_v58 = vsel %vm4249_vm2, %v2687_v40, -inf  ;;  %v2768_v59 = vrot.slane %v2767_v9, 2 }
 0x14e   : > { %v10671_v23 = vsel %vm4249_vm2, %v2694_v22, -inf  ;;  %v2774_v42 = vmax.f32 %v2772_v49, %v2773_v47  ;;  %v2781_v44 = vmax.f32 %v2779_v52, %v2780_v48  ;;  %v2787_v3 = vrot.slane %v2786_v29, 4  ;;  %v5789_v52 = vld [vmem:[%s14755_s3 + $0x230] sm:$0xff] }
 0x14f   : > { %v2708_v26 = vmax.f32 %v2706_v45, %v2707_v56  ;;  %v10674_v35 = vsel %vm4249_vm2, %v2701_v54, -inf  ;;  %v2769_v13 = vmax.f32 %v2767_v9, %v2768_v59  ;;  %v1282_v61 = vcombine.high %v994_v28, %v994_v28  ;;  %9712 = vmatprep.subr.mxu0 %v5789_v52 }
 0x150   : > { %v2775_v50 = vrot.slane %v2774_v42, 2  ;;  %v2782_v37 = vrot.slane %v2781_v44, 2  ;;  %v2788_v53 = vmax.f32 %v2786_v29, %v2787_v3  ;;  %v1289_v51 = vrot.slane %v994_v28, %v10427_v12  ;;  %9713 = vmatpush3.msra.mxu0 %v5789_v52 }
 0x151   : > { %v10678_v18 = vsel %vm4249_vm2, %v2708_v26, -inf  ;;  %v2770_v46 = vrot.slane %v2769_v13, 1  ;;  %v1296_v16 = vrot.slane %v1282_v61, %v10427_v12  ;;  %v997_v1 = vmax.f32 %v731_v25, 0.0 }
 0x152   : > { %v2776_v62 = vmax.f32 %v2774_v42, %v2775_v50  ;;  %v2783_v2 = vmax.f32 %v2781_v44, %v2782_v37  ;;  %v2789_v57 = vrot.slane %v2788_v53, 2  ;;  %v1297_v5 = vcombine.high %v1289_v51, %v1289_v51 }
 0x153   : > { %v2771_v6 = vmax.f32 %v2769_v13, %v2770_v46  ;;  %v1298_v7 = vcombine.high %v1296_v16, %v1296_v16  ;;  %v2737_v11 = vsel %vm2456_vm1, %v1289_v51, -inf  ;;  %v2751_v14 = vsel %vm2456_vm1, %v1296_v16, -inf }
 0x154   : > { %v2777_v15 = vrot.slane %v2776_v62, 1  ;;  %v2784_v17 = vrot.slane %v2783_v2, 1  ;;  %v2790_v19 = vmax.f32 %v2788_v53, %v2789_v57  ;;  %v2738_v20 = vrot.slane %v2737_v11, 4 }
 0x155   : > { %v10684_v28 = vsel %vm4249_vm2, %v2771_v6, -inf  ;;  %v2744_v21 = vsel %vm2456_vm1, %v1297_v5, -inf  ;;  %v2752_v24 = vrot.slane %v2751_v14, 4  ;;  %v2758_v4 = vsel %vm2456_vm1, %v1298_v7, -inf  ;;  %v725_v5 = vpop.f32.mrf.mxu0 }
 0x156   : > { %v2778_v25 = vmax.f32 %v2776_v62, %v2777_v15  ;;  %v2785_v60 = vmax.f32 %v2783_v2, %v2784_v17  ;;  %v2791_v38 = vrot.slane %v2790_v19, 1  ;;  %v4312_v27 = vmax.f32 %v10642_v63, %v10684_v28 }
 0x157   : > { %v2739_v30 = vmax.f32 %v2737_v11, %v2738_v20  ;;  %v2745_v32 = vrot.slane %v2744_v21, 4  ;;  %v2753_v33 = vmax.f32 %v2751_v14, %v2752_v24  ;;  %v2759_v34 = vrot.slane %v2758_v4, 4 }
 0x158   : > { %v2792_v43 = vmax.f32 %v2790_v19, %v2791_v38  ;;  %v10691_v36 = vsel %vm4249_vm2, %v2778_v25, -inf  ;;  %v10694_v39 = vsel %vm4249_vm2, %v2785_v60, -inf  ;;  %v1333_v49 = vcombine.high %v997_v1, %v997_v1 }
 0x159   : > { %v4315_v40 = vmax.f32 %v10649_v0, %v10691_v36  ;;  %v4318_v41 = vmax.f32 %v10645_v31, %v10694_v39  ;;  %v2740_v45 = vrot.slane %v2739_v30, 2  ;;  %v2746_v9 = vmax.f32 %v2744_v21, %v2745_v32  ;;  %v5787_v0 = vld [vmem:[%s14755_s3 + $0x220] sm:$0xff] }
 0x15a   : > { %v10704_v55 = vsel %vm4249_vm2, %v2792_v43, -inf  ;;  %v2754_v22 = vrot.slane %v2753_v33, 2  ;;  %v2760_v47 = vmax.f32 %v2758_v4, %v2759_v34  ;;  %v1340_v48 = vrot.slane %v997_v1, %v10427_v12 }
 0x15b   : > { %v4321_v29 = vmax.f32 %v10655_v10, %v10704_v55  ;;  %v2741_v54 = vmax.f32 %v2739_v30, %v2740_v45  ;;  %v2747_v56 = vrot.slane %v2746_v9, 2  ;;  %v1347_v59 = vrot.slane %v1333_v49, %v10427_v12 }
 0x15c   : > { %v2755_v42 = vmax.f32 %v2753_v33, %v2754_v22  ;;  %v2761_v44 = vrot.slane %v2760_v47, 2  ;;  %v1348_v3 = vcombine.high %v1340_v48, %v1340_v48  ;;  %v2821_v26 = vsel %vm2456_vm1, %v1340_v48, -inf  ;;  %v9637_v33 = vpop.f32.mrf.mxu0 }
 0x15d   : > { %v2742_v13 = vrot.slane %v2741_v54, 1  ;;  %v2748_v61 = vmax.f32 %v2746_v9, %v2747_v56  ;;  %v1349_v50 = vcombine.high %v1347_v59, %v1347_v59  ;;  %v2822_v37 = vrot.slane %v2821_v26, 4 }
 0x15e   : > { %v2756_v53 = vrot.slane %v2755_v42, 1  ;;  %v2762_v51 = vmax.f32 %v2760_v47, %v2761_v44  ;;  %v2828_v46 = vsel %vm2456_vm1, %v1348_v3, -inf  ;;  %v2835_v16 = vsel %vm2456_vm1, %v1347_v59, -inf }
 0x15f   : > { %v2743_v1 = vmax.f32 %v2741_v54, %v2742_v13  ;;  %v2749_v62 = vrot.slane %v2748_v61, 1  ;;  %v2823_v2 = vmax.f32 %v2821_v26, %v2822_v37  ;;  %v2829_v57 = vrot.slane %v2828_v46, 4 }
 0x160   : > { %v2757_v6 = vmax.f32 %v2755_v42, %v2756_v53  ;;  %v2763_v7 = vrot.slane %v2762_v51, 1  ;;  %v2836_v11 = vrot.slane %v2835_v16, 4  ;;  %v2842_v14 = vsel %vm2456_vm1, %v1349_v50, -inf }
 0x161   : > { %v2750_v15 = vmax.f32 %v2748_v61, %v2749_v62  ;;  %v4299_v17 = vsel %vm4249_vm2, %v2743_v1, -inf  ;;  %v2824_v19 = vrot.slane %v2823_v2, 2  ;;  %v2830_v20 = vmax.f32 %v2828_v46, %v2829_v57 }
 0x162   : > { %v2764_v21 = vmax.f32 %v2762_v51, %v2763_v7  ;;  %v4300_v24 = vmax.f32 %v10668_v58, %v4299_v17  ;;  %v4305_v4 = vsel %vm4249_vm2, %v2757_v6, -inf  ;;  %v2837_v25 = vmax.f32 %v2835_v16, %v2836_v11  ;;  %v5788_v58 = vld [vmem:[%s14755_s3 + $0x228] sm:$0xff] }
 0x163   : > { %v4302_v60 = vsel %vm4249_vm2, %v2750_v15, -inf  ;;  %v4306_v38 = vmax.f32 %v10674_v35, %v4305_v4  ;;  %v2825_v30 = vmax.f32 %v2823_v2, %v2824_v19  ;;  %v2831_v32 = vrot.slane %v2830_v20, 2  ;;  %v10728_v35 = vld [vmem:[%s14754_s2] ss:$0 sm:$0xff]  ;;  %9714 = vmatprep.subr.mxu0 %v5788_v58  ;;  %v735_v19 = vpop.f32.mrf.mxu0 }
 0x164   : > { %v4303_v34 = vmax.f32 %v10671_v23, %v4302_v60  ;;  %v4308_v43 = vsel %vm4249_vm2, %v2764_v21, -inf  ;;  %v2838_v49 = vrot.slane %v2837_v25, 2  ;;  %v2843_v52 = vrot.slane %v2842_v14, 4  ;;  %9715 = vmatpush3.msra.mxu0 %v5788_v58 }
 0x165   : > { %v4309_v45 = vmax.f32 %v10678_v18, %v4308_v43  ;;  %v2826_v9 = vrot.slane %v2825_v30, 1  ;;  %v2832_v22 = vmax.f32 %v2830_v20, %v2831_v32  ;;  %v726_v47 = vadd.f32 %v10728_v35, %v725_v5  ;;  %9716 = vmatprep.subr.mxu0 %v5787_v0 }
 0x166   : > { %v4833_v23 = vsel %vm4812_vm3, %v4303_v34, %v4300_v24  ;;  %v2839_v48 = vmax.f32 %v2837_v25, %v2838_v49  ;;  %v2844_v54 = vmax.f32 %v2842_v14, %v2843_v52  ;;  %v741_v56 = vadd.f32 %v10728_v35, %v9637_v33  ;;  %9717 = vmatpush3.msra.mxu0 %v5787_v0 }
 0x167   : > { %v4834_v59 = vsel %vm4814_vm4, %v4306_v38, %v4833_v23  ;;  %v2827_v18 = vmax.f32 %v2825_v30, %v2826_v9  ;;  %v2833_v42 = vrot.slane %v2832_v22, 1  ;;  %v996_v44 = vmax.f32 %v726_v47, 0.0  ;;  %v9640_v9 = vpop.f32.mrf.mxu0 }
 0x168   : > { %v4835_v3 = vsel %vm4816_vm5, %v4309_v45, %v4834_v59  ;;  %v2840_v26 = vrot.slane %v2839_v48, 1  ;;  %v2845_v13 = vrot.slane %v2844_v54, 2  ;;  %v999_v61 = vmax.f32 %v741_v56, 0.0 }
 0x169   : > { %v4836_v50 = vsel %vm4818_vm6, %v4312_v27, %v4835_v3  ;;  %v2834_v37 = vmax.f32 %v2832_v22, %v2833_v42  ;;  %v10740_v53 = vsel %vm4249_vm2, %v2827_v18, -inf  ;;  %v1316_v51 = vcombine.high %v996_v44, %v996_v44 }
 0x16a   : > { %v4837_v46 = vsel %vm4820_vm7, %v4315_v40, %v4836_v50  ;;  %v2841_v16 = vmax.f32 %v2839_v48, %v2840_v26  ;;  %v2846_v1 = vmax.f32 %v2844_v54, %v2845_v13  ;;  %v1323_v62 = vrot.slane %v996_v44, %v10427_v12 }
 0x16b   : > { %v4838_v63 = vsel %vm4822_vm8, %v4318_v41, %v4837_v46  ;;  %v10752_v28 = vsel %vm4249_vm2, %v2834_v37, -inf  ;;  %v1330_v27 = vrot.slane %v1316_v51, %v10427_v12  ;;  %v1367_v2 = vcombine.high %v999_v61, %v999_v61  ;;  %v745_v51 = vpop.f32.mrf.mxu0  ;;  %v5786_v46 = vld [vmem:[%s14755_s3 + $0x218] sm:$0xff] }
 0x16c   : > { %v4839_v36 = vsel %vm4824_vm9, %v4321_v29, %v4838_v63  ;;  %v2847_v40 = vrot.slane %v2846_v1, 1  ;;  %v10763_v31 = vsel %vm4249_vm2, %v2841_v16, -inf  ;;  %v1331_v39 = vcombine.high %v1323_v62, %v1323_v62  ;;  %9718 = vmatprep.subr.mxu0 %v5786_v46 }
 0x16d   : > { %4950 = vst.msk [vmem:[#allocation2 + $0x31] sm:$0xff] %vm4249_vm2, %v4839_v36  ;;  %v1332_v41 = vcombine.high %v1330_v27, %v1330_v27  ;;  %v2793_v57 = vsel %vm2456_vm1, %v1323_v62, -inf  ;;  %v2807_v5 = vsel %vm2456_vm1, %v1330_v27, -inf  ;;  %v1374_v6 = vrot.slane %v999_v61, %v10427_v12  ;;  %9719 = vmatpush3.msra.mxu0 %v5786_v46 }
 0x16e   : > { %v2848_v7 = vmax.f32 %v2846_v1, %v2847_v40  ;;  %v2794_v10 = vrot.slane %v2793_v57, 4  ;;  %v2800_v55 = vsel %vm2456_vm1, %v1331_v39, -inf  ;;  %v2808_v29 = vrot.slane %v2807_v5, 4 }
 0x16f   : > { %v2801_v11 = vrot.slane %v2800_v55, 4  ;;  %v2814_v14 = vsel %vm2456_vm1, %v1332_v41, -inf  ;;  %v1381_v15 = vrot.slane %v1367_v2, %v10427_v12  ;;  %v1382_v17 = vcombine.high %v1374_v6, %v1374_v6 }
 0x170   : > { %v10773_v20 = vsel %vm4249_vm2, %v2848_v7, -inf  ;;  %v2795_v21 = vmax.f32 %v2793_v57, %v2794_v10  ;;  %v2809_v24 = vmax.f32 %v2807_v5, %v2808_v29  ;;  %v2815_v4 = vrot.slane %v2814_v14, 4 }
 0x171   : > { %v2802_v25 = vmax.f32 %v2800_v55, %v2801_v11  ;;  %v1383_v60 = vcombine.high %v1381_v15, %v1381_v15  ;;  %v2877_v38 = vsel %vm2456_vm1, %v1374_v6, -inf  ;;  %v2884_v30 = vsel %vm2456_vm1, %v1382_v17, -inf  ;;  %v9643_v55 = vpop.f32.mrf.mxu0 }
 0x172   : > { %v2796_v32 = vrot.slane %v2795_v21, 2  ;;  %v2810_v33 = vrot.slane %v2809_v24, 2  ;;  %v2816_v34 = vmax.f32 %v2814_v14, %v2815_v4  ;;  %v2878_v43 = vrot.slane %v2877_v38, 4 }
 0x173   : > { %v2803_v49 = vrot.slane %v2802_v25, 2  ;;  %v2885_v52 = vrot.slane %v2884_v30, 4  ;;  %v2891_v58 = vsel %vm2456_vm1, %v1381_v15, -inf  ;;  %v2898_v45 = vsel %vm2456_vm1, %v1383_v60, -inf }
 0x174   : > { %v2797_v22 = vmax.f32 %v2795_v21, %v2796_v32  ;;  %v2811_v47 = vmax.f32 %v2809_v24, %v2810_v33  ;;  %v2817_v23 = vrot.slane %v2816_v34, 2  ;;  %v2879_v48 = vmax.f32 %v2877_v38, %v2878_v43 }
 0x175   : > { %v2804_v54 = vmax.f32 %v2802_v25, %v2803_v49  ;;  %v2886_v56 = vmax.f32 %v2884_v30, %v2885_v52  ;;  %v2892_v59 = vrot.slane %v2891_v58, 4  ;;  %v2899_v18 = vrot.slane %v2898_v45, 4 }
 0x176   : > { %v2798_v42 = vrot.slane %v2797_v22, 1  ;;  %v2812_v44 = vrot.slane %v2811_v47, 1  ;;  %v2818_v3 = vmax.f32 %v2816_v34, %v2817_v23  ;;  %v2880_v26 = vrot.slane %v2879_v48, 2 }
 0x177   : > { %v2805_v13 = vrot.slane %v2804_v54, 1  ;;  %v2887_v61 = vrot.slane %v2886_v56, 2  ;;  %v2893_v50 = vmax.f32 %v2891_v58, %v2892_v59  ;;  %v2900_v37 = vmax.f32 %v2898_v45, %v2899_v18 }
 0x178   : > { %v2799_v16 = vmax.f32 %v2797_v22, %v2798_v42  ;;  %v2813_v1 = vmax.f32 %v2811_v47, %v2812_v44  ;;  %v2819_v62 = vrot.slane %v2818_v3, 1  ;;  %v2881_v63 = vmax.f32 %v2879_v48, %v2880_v26 }
 0x179   : > { %v2806_v27 = vmax.f32 %v2804_v54, %v2805_v13  ;;  %v2888_v2 = vmax.f32 %v2886_v56, %v2887_v61  ;;  %v2894_v0 = vrot.slane %v2893_v50, 2  ;;  %v2901_v36 = vrot.slane %v2900_v37, 2 }
 0x17a   : > { %v2820_v40 = vmax.f32 %v2818_v3, %v2819_v62  ;;  %v10783_v39 = vsel %vm4249_vm2, %v2799_v16, -inf  ;;  %v10786_v41 = vsel %vm4249_vm2, %v2813_v1, -inf  ;;  %v2882_v57 = vrot.slane %v2881_v63, 1 }
 0x17b   : > { %v10789_v5 = vsel %vm4249_vm2, %v2806_v27, -inf  ;;  %v2889_v6 = vrot.slane %v2888_v2, 1  ;;  %v2895_v7 = vmax.f32 %v2893_v50, %v2894_v0  ;;  %v2902_v10 = vmax.f32 %v2900_v37, %v2901_v36 }
 0x17c   : > { %v10792_v29 = vsel %vm4249_vm2, %v2820_v40, -inf  ;;  %v2883_v11 = vmax.f32 %v2881_v63, %v2882_v57  ;;  %v736_v14 = vadd.f32 %v10728_v35, %v735_v19  ;;  %v751_v15 = vadd.f32 %v10728_v35, %v9640_v9 }
 0x17d   : > { %v2890_v17 = vmax.f32 %v2888_v2, %v2889_v6  ;;  %v2896_v21 = vrot.slane %v2895_v7, 1  ;;  %v2903_v24 = vrot.slane %v2902_v10, 1  ;;  %v746_v4 = vadd.f32 %v10728_v35, %v745_v51 }
 0x17e   : > { %v10798_v25 = vsel %vm4249_vm2, %v2883_v11, -inf  ;;  %v998_v60 = vmax.f32 %v736_v14, 0.0  ;;  %v1001_v38 = vmax.f32 %v751_v15, 0.0  ;;  %v10801_v30 = vadd.f32 %v10728_v35, %v9643_v55 }
 0x17f   : > { %v2897_v32 = vmax.f32 %v2895_v7, %v2896_v21  ;;  %v2904_v33 = vmax.f32 %v2902_v10, %v2903_v24  ;;  %v4336_v19 = vmax.f32 %v10740_v53, %v10798_v25  ;;  %v10806_v34 = vsel %vm4249_vm2, %v2890_v17, -inf  ;;  %v5784_v53 = vld [vmem:[%s14755_s3 + $0x208] sm:$0xff] }
 0x180   : > { %v4339_v43 = vmax.f32 %v10752_v28, %v10806_v34  ;;  %v1350_v49 = vcombine.high %v998_v60, %v998_v60  ;;  %v1357_v52 = vrot.slane %v998_v60, %v10427_v12  ;;  %v1401_v58 = vcombine.high %v1001_v38, %v1001_v38 }
 0x181   : > { %v10812_v45 = vsel %vm4249_vm2, %v2897_v32, -inf  ;;  %v10815_v9 = vsel %vm4249_vm2, %v2904_v33, -inf  ;;  %v1408_v22 = vrot.slane %v1001_v38, %v10427_v12  ;;  %v10818_v47 = vmax.f32 %v746_v4, 0.0 }
 0x182   : > { %v4342_v23 = vmax.f32 %v10763_v31, %v10812_v45  ;;  %v4345_v48 = vmax.f32 %v10773_v20, %v10815_v9  ;;  %v1364_v54 = vrot.slane %v1350_v49, %v10427_v12  ;;  %v1365_v56 = vcombine.high %v1357_v52, %v1357_v52  ;;  %v5783_v31 = vld [vmem:[%s14755_s3 + $0x200] sm:$0xff] }
 0x183   : > { %v2849_v59 = vsel %vm2456_vm1, %v1357_v52, -inf  ;;  %v1415_v18 = vrot.slane %v1401_v58, %v10427_v12  ;;  %v1416_v42 = vcombine.high %v1408_v22, %v1408_v22  ;;  %v2933_v44 = vsel %vm2456_vm1, %v1408_v22, -inf }
 0x184   : > { %v1366_v3 = vcombine.high %v1364_v54, %v1364_v54  ;;  %v2850_v26 = vrot.slane %v2849_v59, 4  ;;  %v2856_v13 = vsel %vm2456_vm1, %v1365_v56, -inf  ;;  %v2863_v61 = vsel %vm2456_vm1, %v1364_v54, -inf }
 0x185   : > { %v2857_v50 = vrot.slane %v2856_v13, 4  ;;  %v2864_v37 = vrot.slane %v2863_v61, 4  ;;  %v1417_v51 = vcombine.high %v1415_v18, %v1415_v18  ;;  %v2934_v46 = vrot.slane %v2933_v44, 4 }
 0x186   : > { %v2851_v16 = vmax.f32 %v2849_v59, %v2850_v26  ;;  %v2870_v1 = vsel %vm2456_vm1, %v1366_v3, -inf  ;;  %v2940_v62 = vsel %vm2456_vm1, %v1416_v42, -inf  ;;  %v2947_v63 = vsel %vm2456_vm1, %v1415_v18, -inf }
 0x187   : > { %v2858_v27 = vmax.f32 %v2856_v13, %v2857_v50  ;;  %v2865_v2 = vmax.f32 %v2863_v61, %v2864_v37  ;;  %v2871_v0 = vrot.slane %v2870_v1, 4  ;;  %v2935_v36 = vmax.f32 %v2933_v44, %v2934_v46  ;;  %v755_v37 = vpop.f32.mrf.mxu0 }
 0x188   : > { %v2852_v40 = vrot.slane %v2851_v16, 2  ;;  %v2941_v57 = vrot.slane %v2940_v62, 4  ;;  %v2948_v6 = vrot.slane %v2947_v63, 4  ;;  %v2954_v7 = vsel %vm2456_vm1, %v1417_v51, -inf }
 0x189   : > { %v2859_v10 = vrot.slane %v2858_v27, 2  ;;  %v2866_v55 = vrot.slane %v2865_v2, 2  ;;  %v2872_v11 = vmax.f32 %v2870_v1, %v2871_v0  ;;  %v2936_v14 = vrot.slane %v2935_v36, 2 }
 0x18a   : > { %v2853_v15 = vmax.f32 %v2851_v16, %v2852_v40  ;;  %v2942_v17 = vmax.f32 %v2940_v62, %v2941_v57  ;;  %v2949_v21 = vmax.f32 %v2947_v63, %v2948_v6  ;;  %v2955_v24 = vrot.slane %v2954_v7, 4 }
 0x18b   : > { %v2860_v4 = vmax.f32 %v2858_v27, %v2859_v10  ;;  %v2867_v60 = vmax.f32 %v2865_v2, %v2866_v55  ;;  %v2873_v38 = vrot.slane %v2872_v11, 2  ;;  %v2937_v32 = vmax.f32 %v2935_v36, %v2936_v14 }
 0x18c   : > { %v2854_v33 = vrot.slane %v2853_v15, 1  ;;  %v2943_v49 = vrot.slane %v2942_v17, 2  ;;  %v2950_v52 = vrot.slane %v2949_v21, 2  ;;  %v2956_v58 = vmax.f32 %v2954_v7, %v2955_v24 }
 0x18d   : > { %v2861_v22 = vrot.slane %v2860_v4, 1  ;;  %v2868_v54 = vrot.slane %v2867_v60, 1  ;;  %v2874_v56 = vmax.f32 %v2872_v11, %v2873_v38  ;;  %v2938_v59 = vrot.slane %v2937_v32, 1 }
 0x18e   : > { %v2855_v18 = vmax.f32 %v2853_v15, %v2854_v33  ;;  %v2944_v42 = vmax.f32 %v2942_v17, %v2943_v49  ;;  %v2951_v44 = vmax.f32 %v2949_v21, %v2950_v52  ;;  %v2957_v3 = vrot.slane %v2956_v58, 2 }
 0x18f   : > { %v2862_v26 = vmax.f32 %v2860_v4, %v2861_v22  ;;  %v2869_v13 = vmax.f32 %v2867_v60, %v2868_v54  ;;  %v2875_v61 = vrot.slane %v2874_v56, 1  ;;  %v2939_v50 = vmax.f32 %v2937_v32, %v2938_v59  ;;  %v5785_v32 = vld [vmem:[%s14755_s3 + $0x210] sm:$0xff] }
 0x190   : > { %v4323_v51 = vsel %vm4249_vm2, %v2855_v18, -inf  ;;  %v2945_v46 = vrot.slane %v2944_v42, 1  ;;  %v2952_v16 = vrot.slane %v2951_v44, 1  ;;  %v2958_v1 = vmax.f32 %v2956_v58, %v2957_v3  ;;  %9720 = vmatprep.subr.mxu0 %v5785_v32 }
 0x191   : > { %v2876_v62 = vmax.f32 %v2874_v56, %v2875_v61  ;;  %v4324_v63 = vmax.f32 %v10783_v39, %v4323_v51  ;;  %v4326_v27 = vsel %vm4249_vm2, %v2862_v26, -inf  ;;  %v4329_v2 = vsel %vm4249_vm2, %v2869_v13, -inf  ;;  %v9646_v39 = vpop.f32.mrf.mxu0  ;;  %9721 = vmatpush3.msra.mxu0 %v5785_v32 }
 0x192   : > { %v4327_v0 = vmax.f32 %v10789_v5, %v4326_v27  ;;  %v4330_v36 = vmax.f32 %v10786_v41, %v4329_v2  ;;  %v2946_v40 = vmax.f32 %v2944_v42, %v2945_v46  ;;  %v2953_v57 = vmax.f32 %v2951_v44, %v2952_v16  ;;  %9722 = vmatprep.subr.mxu0 %v5784_v53 }
 0x193   : > { %v4332_v6 = vsel %vm4249_vm2, %v2876_v62, -inf  ;;  %v2959_v7 = vrot.slane %v2958_v1, 1  ;;  %v10842_v10 = vsel %vm4249_vm2, %v2939_v50, -inf  ;;  %v1384_v55 = vcombine.high %v10818_v47, %v10818_v47  ;;  %9723 = vmatpush3.msra.mxu0 %v5784_v53 }
 0x194   : > { %v4333_v11 = vmax.f32 %v10792_v29, %v4332_v6  ;;  %v4840_v14 = vsel %vm4812_vm3, %v4327_v0, %v4324_v63  ;;  %v10849_v5 = vsel %vm4249_vm2, %v2946_v40, -inf  ;;  %v10852_v41 = vsel %vm4249_vm2, %v2953_v57, -inf  ;;  %9724 = vmatprep.subr.mxu0 %v5783_v31 }
 0x195   : > { %v4841_v15 = vsel %vm4814_vm4, %v4330_v36, %v4840_v14  ;;  %v2960_v17 = vmax.f32 %v2958_v1, %v2959_v7  ;;  %v1391_v21 = vrot.slane %v10818_v47, %v10427_v12  ;;  %v1398_v24 = vrot.slane %v1384_v55, %v10427_v12  ;;  %9725 = vmatpush3.msra.mxu0 %v5783_v31 }
 0x196   : > { %v4842_v4 = vsel %vm4816_vm5, %v4333_v11, %v4841_v15  ;;  %v1003_v29 = vmax.f32 %v10801_v30, 0.0  ;;  %v756_v60 = vadd.f32 %v10728_v35, %v755_v37  ;;  %v10862_v38 = vadd.f32 %v10728_v35, %v9646_v39 }
 0x197   : > { %v4843_v47 = vsel %vm4818_vm6, %v4336_v19, %v4842_v4  ;;  %v10872_v33 = vsel %vm4249_vm2, %v2960_v17, -inf  ;;  %v1399_v49 = vcombine.high %v1391_v21, %v1391_v21  ;;  %v1400_v52 = vcombine.high %v1398_v24, %v1398_v24 }
 0x198   : > { %v4844_v30 = vsel %vm4820_vm7, %v4339_v43, %v4843_v47  ;;  %v2905_v58 = vsel %vm2456_vm1, %v1391_v21, -inf  ;;  %v2919_v22 = vsel %vm2456_vm1, %v1398_v24, -inf  ;;  %v1435_v54 = vcombine.high %v1003_v29, %v1003_v29 }
 0x199   : > { %v4845_v25 = vsel %vm4822_vm8, %v4342_v23, %v4844_v30  ;;  %v2906_v19 = vrot.slane %v2905_v58, 4  ;;  %v2912_v28 = vsel %vm2456_vm1, %v1399_v49, -inf  ;;  %v2920_v34 = vrot.slane %v2919_v22, 4 }
 0x19a   : > { %v4846_v43 = vsel %vm4824_vm9, %v4345_v48, %v4845_v25  ;;  %v2913_v56 = vrot.slane %v2912_v28, 4  ;;  %v2926_v59 = vsel %vm2456_vm1, %v1400_v52, -inf  ;;  %v1442_v18 = vrot.slane %v1003_v29, %v10427_v12 }
 0x19b   : > { %4951 = vst.msk [vmem:[#allocation2 + $0x41] sm:$0xff] %vm4249_vm2, %v4846_v43  ;;  %v2907_v45 = vmax.f32 %v2905_v58, %v2906_v19  ;;  %v2921_v23 = vmax.f32 %v2919_v22, %v2920_v34  ;;  %v2927_v42 = vrot.slane %v2926_v59, 4  ;;  %v1449_v44 = vrot.slane %v1435_v54, %v10427_v12 }
 0x19c   : > { %v2914_v20 = vmax.f32 %v2912_v28, %v2913_v56  ;;  %v1450_v9 = vcombine.high %v1442_v18, %v1442_v18  ;;  %v2989_v48 = vsel %vm2456_vm1, %v1442_v18, -inf  ;;  %v1002_v3 = vmax.f32 %v756_v60, 0.0 }
 0x19d   : > { %v2908_v26 = vrot.slane %v2907_v45, 2  ;;  %v2922_v13 = vrot.slane %v2921_v23, 2  ;;  %v2928_v61 = vmax.f32 %v2926_v59, %v2927_v42  ;;  %v1451_v50 = vcombine.high %v1449_v44, %v1449_v44 }
 0x19e   : > { %v2915_v37 = vrot.slane %v2914_v20, 2  ;;  %v2990_v51 = vrot.slane %v2989_v48, 4  ;;  %v2996_v46 = vsel %vm2456_vm1, %v1450_v9, -inf  ;;  %v3003_v16 = vsel %vm2456_vm1, %v1449_v44, -inf }
 0x19f   : > { %v2909_v1 = vmax.f32 %v2907_v45, %v2908_v26  ;;  %v2923_v62 = vmax.f32 %v2921_v23, %v2922_v13  ;;  %v2929_v63 = vrot.slane %v2928_v61, 2  ;;  %v2997_v27 = vrot.slane %v2996_v46, 4 }
 0x1a0   : > { %v2916_v2 = vmax.f32 %v2914_v20, %v2915_v37  ;;  %v2991_v0 = vmax.f32 %v2989_v48, %v2990_v51  ;;  %v3004_v36 = vrot.slane %v3003_v16, 4  ;;  %v3010_v40 = vsel %vm2456_vm1, %v1451_v50, -inf }
 0x1a1   : > { %v2910_v57 = vrot.slane %v2909_v1, 1  ;;  %v2924_v6 = vrot.slane %v2923_v62, 1  ;;  %v2930_v7 = vmax.f32 %v2928_v61, %v2929_v63  ;;  %v2998_v55 = vmax.f32 %v2996_v46, %v2997_v27  ;;  %v765_v27 = vpop.f32.mrf.mxu0 }
 0x1a2   : > { %v2917_v39 = vrot.slane %v2916_v2, 1  ;;  %v2992_v11 = vrot.slane %v2991_v0, 2  ;;  %v3005_v14 = vmax.f32 %v3003_v16, %v3004_v36  ;;  %v3011_v15 = vrot.slane %v3010_v40, 4 }
 0x1a3   : > { %v2911_v17 = vmax.f32 %v2909_v1, %v2910_v57  ;;  %v2925_v21 = vmax.f32 %v2923_v62, %v2924_v6  ;;  %v2931_v24 = vrot.slane %v2930_v7, 1  ;;  %v2999_v4 = vrot.slane %v2998_v55, 2 }
 0x1a4   : > { %v2918_v29 = vmax.f32 %v2916_v2, %v2917_v39  ;;  %v2993_v60 = vmax.f32 %v2991_v0, %v2992_v11  ;;  %v3006_v32 = vrot.slane %v3005_v14, 2  ;;  %v3012_v47 = vmax.f32 %v3010_v40, %v3011_v15 }
 0x1a5   : > { %v2932_v49 = vmax.f32 %v2930_v7, %v2931_v24  ;;  %v10904_v52 = vsel %vm4249_vm2, %v2911_v17, -inf  ;;  %v10907_v30 = vsel %vm4249_vm2, %v2925_v21, -inf  ;;  %v3000_v58 = vmax.f32 %v2998_v55, %v2999_v4 }
 0x1a6   : > { %v10910_v22 = vsel %vm4249_vm2, %v2918_v29, -inf  ;;  %v2994_v54 = vrot.slane %v2993_v60, 1  ;;  %v3007_v53 = vmax.f32 %v3005_v14, %v3006_v32  ;;  %v3013_v25 = vrot.slane %v3012_v47, 2 }
 0x1a7   : > { %v10913_v19 = vsel %vm4249_vm2, %v2932_v49, -inf  ;;  %v3001_v28 = vrot.slane %v3000_v58, 1  ;;  %v1418_v34 = vcombine.high %v1002_v3, %v1002_v3  ;;  %v1425_v43 = vrot.slane %v1002_v3, %v10427_v12 }
 0x1a8   : > { %v2995_v56 = vmax.f32 %v2993_v60, %v2994_v54  ;;  %v3008_v59 = vrot.slane %v3007_v53, 1  ;;  %v3014_v18 = vmax.f32 %v3012_v47, %v3013_v25  ;;  %v1005_v31 = vmax.f32 %v10862_v38, 0.0 }
 0x1a9   : > { %v3002_v45 = vmax.f32 %v3000_v58, %v3001_v28  ;;  %v1432_v23 = vrot.slane %v1418_v34, %v10427_v12  ;;  %v1433_v42 = vcombine.high %v1425_v43, %v1425_v43  ;;  %v2961_v44 = vsel %vm2456_vm1, %v1425_v43, -inf }
 0x1aa   : > { %v3009_v20 = vmax.f32 %v3007_v53, %v3008_v59  ;;  %v3015_v9 = vrot.slane %v3014_v18, 1  ;;  %v10920_v48 = vsel %vm4249_vm2, %v2995_v56, -inf  ;;  %v2962_v26 = vrot.slane %v2961_v44, 4 }
 0x1ab   : > { %v4360_v3 = vmax.f32 %v10842_v10, %v10920_v48  ;;  %v10925_v13 = vsel %vm4249_vm2, %v3002_v45, -inf  ;;  %v1434_v61 = vcombine.high %v1432_v23, %v1432_v23  ;;  %v2968_v38 = vsel %vm2456_vm1, %v1433_v42, -inf }
 0x1ac   : > { %v3016_v50 = vmax.f32 %v3014_v18, %v3015_v9  ;;  %v4363_v37 = vmax.f32 %v10849_v5, %v10925_v13  ;;  %v10931_v51 = vsel %vm4249_vm2, %v3009_v20, -inf  ;;  %v2963_v46 = vmax.f32 %v2961_v44, %v2962_v26 }
 0x1ad   : > { %v4366_v16 = vmax.f32 %v10852_v41, %v10931_v51  ;;  %v2969_v1 = vrot.slane %v2968_v38, 4  ;;  %v2975_v62 = vsel %vm2456_vm1, %v1432_v23, -inf  ;;  %v2982_v63 = vsel %vm2456_vm1, %v1434_v61, -inf }
 0x1ae   : > { %v10938_v2 = vsel %vm4249_vm2, %v3016_v50, -inf  ;;  %v2964_v0 = vrot.slane %v2963_v46, 2  ;;  %v2976_v36 = vrot.slane %v2975_v62, 4  ;;  %v2983_v40 = vrot.slane %v2982_v63, 4 }
 0x1af   : > { %v4369_v57 = vmax.f32 %v10872_v33, %v10938_v2  ;;  %v2970_v6 = vmax.f32 %v2968_v38, %v2969_v1  ;;  %v1469_v7 = vcombine.high %v1005_v31, %v1005_v31  ;;  %v1476_v55 = vrot.slane %v1005_v31, %v10427_v12 }
 0x1b0   : > { %v2965_v39 = vmax.f32 %v2963_v46, %v2964_v0  ;;  %v2977_v11 = vmax.f32 %v2975_v62, %v2976_v36  ;;  %v2984_v14 = vmax.f32 %v2982_v63, %v2983_v40  ;;  %v766_v15 = vadd.f32 %v10728_v35, %v765_v27 }
 0x1b1   : > { %v2971_v17 = vrot.slane %v2970_v6, 2  ;;  %v1483_v21 = vrot.slane %v1469_v7, %v10427_v12  ;;  %v1484_v24 = vcombine.high %v1476_v55, %v1476_v55  ;;  %v3045_v4 = vsel %vm2456_vm1, %v1476_v55, -inf  ;;  %v9649_v55 = vpop.f32.mrf.mxu0 }
 0x1b2   : > { %v2966_v29 = vrot.slane %v2965_v39, 1  ;;  %v2978_v60 = vrot.slane %v2977_v11, 2  ;;  %v2985_v32 = vrot.slane %v2984_v14, 2  ;;  %v3046_v47 = vrot.slane %v3045_v4, 4 }
 0x1b3   : > { %v2972_v49 = vmax.f32 %v2970_v6, %v2971_v17  ;;  %v1485_v58 = vcombine.high %v1483_v21, %v1483_v21  ;;  %v3052_v54 = vsel %vm2456_vm1, %v1484_v24, -inf  ;;  %v3059_v53 = vsel %vm2456_vm1, %v1483_v21, -inf }
 0x1b4   : > { %v2967_v25 = vmax.f32 %v2965_v39, %v2966_v29  ;;  %v2979_v28 = vmax.f32 %v2977_v11, %v2978_v60  ;;  %v2986_v34 = vmax.f32 %v2984_v14, %v2985_v32  ;;  %v3047_v43 = vmax.f32 %v3045_v4, %v3046_v47 }
 0x1b5   : > { %v2973_v56 = vrot.slane %v2972_v49, 1  ;;  %v3053_v59 = vrot.slane %v3052_v54, 4  ;;  %v3060_v18 = vrot.slane %v3059_v53, 4  ;;  %v3066_v31 = vsel %vm2456_vm1, %v1485_v58, -inf }
 0x1b6   : > { %v2980_v45 = vrot.slane %v2979_v28, 1  ;;  %v2987_v23 = vrot.slane %v2986_v34, 1  ;;  %v4347_v42 = vsel %vm4249_vm2, %v2967_v25, -inf  ;;  %v3048_v44 = vrot.slane %v3047_v43, 2 }
 0x1b7   : > { %v2974_v20 = vmax.f32 %v2972_v49, %v2973_v56  ;;  %v4348_v9 = vmax.f32 %v10904_v52, %v4347_v42  ;;  %v3054_v26 = vmax.f32 %v3052_v54, %v3053_v59  ;;  %v3061_v61 = vmax.f32 %v3059_v53, %v3060_v18  ;;  %v775_v49 = vpop.f32.mrf.mxu0 }
 0x1b8   : > { %v2981_v38 = vmax.f32 %v2979_v28, %v2980_v45  ;;  %v2988_v50 = vmax.f32 %v2986_v34, %v2987_v23  ;;  %v3049_v46 = vmax.f32 %v3047_v43, %v3048_v44  ;;  %v3067_v1 = vrot.slane %v3066_v31, 4 }
 0x1b9   : > { %v4350_v62 = vsel %vm4249_vm2, %v2974_v20, -inf  ;;  %v3055_v63 = vrot.slane %v3054_v26, 2  ;;  %v3062_v27 = vrot.slane %v3061_v61, 2  ;;  %v1004_v0 = vmax.f32 %v766_v15, 0.0  ;;  %v9652_v41 = vpop.f32.mrf.mxu0 }
 0x1ba   : > { %v4351_v36 = vmax.f32 %v10910_v22, %v4350_v62  ;;  %v4353_v40 = vsel %vm4249_vm2, %v2981_v38, -inf  ;;  %v4356_v6 = vsel %vm4249_vm2, %v2988_v50, -inf  ;;  %v3050_v7 = vrot.slane %v3049_v46, 1 }
 0x1bb   : > { %v4354_v52 = vmax.f32 %v10907_v30, %v4353_v40  ;;  %v4357_v39 = vmax.f32 %v10913_v19, %v4356_v6  ;;  %v3056_v11 = vmax.f32 %v3054_v26, %v3055_v63  ;;  %v3063_v14 = vmax.f32 %v3061_v61, %v3062_v27 }
 0x1bc   : > { %v4847_v17 = vsel %vm4812_vm3, %v4351_v36, %v4348_v9  ;;  %v3051_v21 = vmax.f32 %v3049_v46, %v3050_v7  ;;  %v3068_v24 = vmax.f32 %v3066_v31, %v3067_v1  ;;  %v1452_v4 = vcombine.high %v1004_v0, %v1004_v0 }
 0x1bd   : > { %v4848_v15 = vsel %vm4814_vm4, %v4354_v52, %v4847_v17  ;;  %v3057_v22 = vrot.slane %v3056_v11, 1  ;;  %v3064_v29 = vrot.slane %v3063_v14, 1  ;;  %v1459_v60 = vrot.slane %v1004_v0, %v10427_v12 }
 0x1be   : > { %v4849_v32 = vsel %vm4816_vm5, %v4357_v39, %v4848_v15  ;;  %v3069_v47 = vrot.slane %v3068_v24, 2  ;;  %v10962_v30 = vsel %vm4249_vm2, %v3051_v21, -inf  ;;  %v1466_v19 = vrot.slane %v1452_v4, %v10427_v12 }
 0x1bf   : > { %v4850_v58 = vsel %vm4818_vm6, %v4360_v3, %v4849_v32  ;;  %v3058_v54 = vmax.f32 %v3056_v11, %v3057_v22  ;;  %v3065_v53 = vmax.f32 %v3063_v14, %v3064_v29  ;;  %v1467_v25 = vcombine.high %v1459_v60, %v1459_v60 }
 0x1c0   : > { %v4851_v28 = vsel %vm4820_vm7, %v4363_v37, %v4850_v58  ;;  %v3070_v34 = vmax.f32 %v3068_v24, %v3069_v47  ;;  %v1468_v43 = vcombine.high %v1466_v19, %v1466_v19  ;;  %v3017_v56 = vsel %vm2456_vm1, %v1459_v60, -inf }
 0x1c1   : > { %v4852_v59 = vsel %vm4822_vm8, %v4366_v16, %v4851_v28  ;;  %v10979_v10 = vsel %vm4249_vm2, %v3058_v54, -inf  ;;  %v10982_v48 = vsel %vm4249_vm2, %v3065_v53, -inf  ;;  %v3018_v3 = vrot.slane %v3017_v56, 4 }
 0x1c2   : > { %v4853_v5 = vsel %vm4824_vm9, %v4369_v57, %v4852_v59  ;;  %v3071_v13 = vrot.slane %v3070_v34, 1  ;;  %v3024_v37 = vsel %vm2456_vm1, %v1467_v25, -inf  ;;  %v3031_v18 = vsel %vm2456_vm1, %v1466_v19, -inf }
 0x1c3   : > { %4952 = vst.msk [vmem:[#allocation2 + $0x51] sm:$0xff] %vm4249_vm2, %v4853_v5  ;;  %v3019_v51 = vmax.f32 %v3017_v56, %v3018_v3  ;;  %v3025_v16 = vrot.slane %v3024_v37, 4  ;;  %v3032_v31 = vrot.slane %v3031_v18, 4  ;;  %v3038_v45 = vsel %vm2456_vm1, %v1468_v43, -inf }
 0x1c4   : > { %v3072_v23 = vmax.f32 %v3070_v34, %v3071_v13  ;;  %v3039_v42 = vrot.slane %v3038_v45, 4  ;;  %v781_v44 = vadd.f32 %v10728_v35, %v9649_v55  ;;  %v776_v33 = vadd.f32 %v10728_v35, %v775_v49 }
 0x1c5   : > { %v3020_v2 = vrot.slane %v3019_v51, 2  ;;  %v3026_v57 = vmax.f32 %v3024_v37, %v3025_v16  ;;  %v3033_v20 = vmax.f32 %v3031_v18, %v3032_v31  ;;  %v791_v9 = vadd.f32 %v10728_v35, %v9652_v41 }
 0x1c6   : > { %v10996_v26 = vsel %vm4249_vm2, %v3072_v23, -inf  ;;  %v3040_v61 = vmax.f32 %v3038_v45, %v3039_v42  ;;  %v1007_v38 = vmax.f32 %v781_v44, 0.0  ;;  %v1006_v50 = vmax.f32 %v776_v33, 0.0 }
 0x1c7   : > { %v3021_v46 = vmax.f32 %v3019_v51, %v3020_v2  ;;  %v3027_v1 = vrot.slane %v3026_v57, 2  ;;  %v3034_v62 = vrot.slane %v3033_v20, 2  ;;  %v10998_v63 = vmax.f32 %v791_v9, 0.0 }
 0x1c8   : > { %v3041_v27 = vrot.slane %v3040_v61, 2  ;;  %v1503_v0 = vcombine.high %v1007_v38, %v1007_v38  ;;  %v1510_v36 = vrot.slane %v1007_v38, %v10427_v12  ;;  %v1486_v40 = vcombine.high %v1006_v50, %v1006_v50 }
 0x1c9   : > { %v3022_v6 = vrot.slane %v3021_v46, 1  ;;  %v3028_v7 = vmax.f32 %v3026_v57, %v3027_v1  ;;  %v3035_v55 = vmax.f32 %v3033_v20, %v3034_v62  ;;  %v1493_v35 = vrot.slane %v1006_v50, %v10427_v12 }
 0x1ca   : > { %v3042_v52 = vmax.f32 %v3040_v61, %v3041_v27  ;;  %v1517_v39 = vrot.slane %v1503_v0, %v10427_v12  ;;  %v1518_v11 = vcombine.high %v1510_v36, %v1510_v36  ;;  %v3101_v14 = vsel %vm2456_vm1, %v1510_v36, -inf }
 0x1cb   : > { %v3023_v17 = vmax.f32 %v3021_v46, %v3022_v6  ;;  %v3029_v21 = vrot.slane %v3028_v7, 1  ;;  %v3036_v24 = vrot.slane %v3035_v55, 1  ;;  %v3102_v4 = vrot.slane %v3101_v14, 4 }
 0x1cc   : > { %v3043_v15 = vrot.slane %v3042_v52, 1  ;;  %v1519_v22 = vcombine.high %v1517_v39, %v1517_v39  ;;  %v3108_v29 = vsel %vm2456_vm1, %v1518_v11, -inf  ;;  %v3115_v60 = vsel %vm2456_vm1, %v1517_v39, -inf }
 0x1cd   : > { %v3030_v32 = vmax.f32 %v3028_v7, %v3029_v21  ;;  %v3037_v47 = vmax.f32 %v3035_v55, %v3036_v24  ;;  %v11007_v19 = vsel %vm4249_vm2, %v3023_v17, -inf  ;;  %v3103_v49 = vmax.f32 %v3101_v14, %v3102_v4 }
 0x1ce   : > { %v3044_v58 = vmax.f32 %v3042_v52, %v3043_v15  ;;  %v3109_v54 = vrot.slane %v3108_v29, 4  ;;  %v3116_v53 = vrot.slane %v3115_v60, 4  ;;  %v3122_v25 = vsel %vm2456_vm1, %v1519_v22, -inf }
 0x1cf   : > { %v11011_v28 = vsel %vm4249_vm2, %v3030_v32, -inf  ;;  %v11014_v34 = vsel %vm4249_vm2, %v3037_v47, -inf  ;;  %v3104_v43 = vrot.slane %v3103_v49, 2  ;;  %v3123_v56 = vrot.slane %v3122_v25, 4 }
 0x1d0   : > { %v11017_v59 = vsel %vm4249_vm2, %v3044_v58, -inf  ;;  %v3110_v3 = vmax.f32 %v3108_v29, %v3109_v54  ;;  %v3117_v5 = vmax.f32 %v3115_v60, %v3116_v53  ;;  %v1500_v13 = vrot.slane %v1486_v40, %v10427_v12 }
 0x1d1   : > { %v3105_v37 = vmax.f32 %v3103_v49, %v3104_v43  ;;  %v3124_v18 = vmax.f32 %v3122_v25, %v3123_v56  ;;  %v1501_v41 = vcombine.high %v1493_v35, %v1493_v35  ;;  %v3073_v51 = vsel %vm2456_vm1, %v1493_v35, -inf  ;;  %v785_v35 = vpop.f32.mrf.mxu0 }
 0x1d2   : > { %v3111_v16 = vrot.slane %v3110_v3, 2  ;;  %v3118_v31 = vrot.slane %v3117_v5, 2  ;;  %v1502_v45 = vcombine.high %v1500_v13, %v1500_v13  ;;  %v3074_v23 = vrot.slane %v3073_v51, 4 }
 0x1d3   : > { %v3106_v42 = vrot.slane %v3105_v37, 1  ;;  %v3125_v44 = vrot.slane %v3124_v18, 2  ;;  %v3080_v33 = vsel %vm2456_vm1, %v1501_v41, -inf  ;;  %v3087_v2 = vsel %vm2456_vm1, %v1500_v13, -inf  ;;  %v9655_v54 = vpop.f32.mrf.mxu0  ;;  %v11052_v13 = vld [vmem:[%s14754_s2] ss:$0 sm:$0xff] }
 0x1d4   : > { %v3112_v57 = vmax.f32 %v3110_v3, %v3111_v16  ;;  %v3119_v20 = vmax.f32 %v3117_v5, %v3118_v31  ;;  %v3075_v9 = vmax.f32 %v3073_v51, %v3074_v23  ;;  %v3081_v61 = vrot.slane %v3080_v33, 4 }
 0x1d5   : > { %v3107_v38 = vmax.f32 %v3105_v37, %v3106_v42  ;;  %v3126_v50 = vmax.f32 %v3124_v18, %v3125_v44  ;;  %v3088_v46 = vrot.slane %v3087_v2, 4  ;;  %v3094_v1 = vsel %vm2456_vm1, %v1502_v45, -inf }
 0x1d6   : > { %v3113_v62 = vrot.slane %v3112_v57, 1  ;;  %v3120_v27 = vrot.slane %v3119_v20, 1  ;;  %v3076_v0 = vrot.slane %v3075_v9, 2  ;;  %v3082_v36 = vmax.f32 %v3080_v33, %v3081_v61 }
 0x1d7   : > { %v3127_v40 = vrot.slane %v3126_v50, 1  ;;  %v11025_v6 = vsel %vm4249_vm2, %v3107_v38, -inf  ;;  %v3089_v7 = vmax.f32 %v3087_v2, %v3088_v46  ;;  %v3095_v55 = vrot.slane %v3094_v1, 4 }
 0x1d8   : > { %v3114_v52 = vmax.f32 %v3112_v57, %v3113_v62  ;;  %v3121_v39 = vmax.f32 %v3119_v20, %v3120_v27  ;;  %v4384_v11 = vmax.f32 %v10962_v30, %v11025_v6  ;;  %v3077_v14 = vmax.f32 %v3075_v9, %v3076_v0 }
 0x1d9   : > { %v3128_v17 = vmax.f32 %v3126_v50, %v3127_v40  ;;  %v3083_v21 = vrot.slane %v3082_v36, 2  ;;  %v3090_v24 = vrot.slane %v3089_v7, 2  ;;  %v3096_v4 = vmax.f32 %v3094_v1, %v3095_v55 }
 0x1da   : > { %v11030_v15 = vsel %vm4249_vm2, %v3114_v52, -inf  ;;  %v11033_v22 = vsel %vm4249_vm2, %v3121_v39, -inf  ;;  %v3078_v29 = vrot.slane %v3077_v14, 1  ;;  %v1537_v60 = vcombine.high %v10998_v63, %v10998_v63 }
 0x1db   : > { %v4387_v32 = vmax.f32 %v10979_v10, %v11030_v15  ;;  %v4390_v47 = vmax.f32 %v10982_v48, %v11033_v22  ;;  %v11042_v49 = vsel %vm4249_vm2, %v3128_v17, -inf  ;;  %v3084_v58 = vmax.f32 %v3082_v36, %v3083_v21 }
 0x1dc   : > { %v4393_v53 = vmax.f32 %v10996_v26, %v11042_v49  ;;  %v3079_v25 = vmax.f32 %v3077_v14, %v3078_v29  ;;  %v3091_v43 = vmax.f32 %v3089_v7, %v3090_v24  ;;  %v3097_v56 = vrot.slane %v3096_v4, 2 }
 0x1dd   : > { %v3085_v3 = vrot.slane %v3084_v58, 1  ;;  %v1544_v5 = vrot.slane %v10998_v63, %v10427_v12  ;;  %v1551_v10 = vrot.slane %v1537_v60, %v10427_v12  ;;  %v786_v37 = vadd.f32 %v11052_v13, %v785_v35  ;;  %v795_v35 = vpop.f32.mrf.mxu0 }
 0x1de   : > { %v3092_v18 = vrot.slane %v3091_v43, 1  ;;  %v3098_v41 = vmax.f32 %v3096_v4, %v3097_v56  ;;  %v4371_v51 = vsel %vm4249_vm2, %v3079_v25, -inf  ;;  %v801_v16 = vadd.f32 %v11052_v13, %v9655_v54 }
 0x1df   : > { %v3086_v31 = vmax.f32 %v3084_v58, %v3085_v3  ;;  %v4372_v45 = vmax.f32 %v11007_v19, %v4371_v51  ;;  %v1552_v23 = vcombine.high %v1544_v5, %v1544_v5  ;;  %v1553_v63 = vcombine.high %v1551_v10, %v1551_v10 }
 0x1e0   : > { %v3093_v42 = vmax.f32 %v3091_v43, %v3092_v18  ;;  %v3099_v44 = vrot.slane %v3098_v41, 1  ;;  %v3157_v33 = vsel %vm2456_vm1, %v1544_v5, -inf  ;;  %v3171_v2 = vsel %vm2456_vm1, %v1551_v10, -inf }
 0x1e1   : > { %v4374_v57 = vsel %vm4249_vm2, %v3086_v31, -inf  ;;  %v3158_v20 = vrot.slane %v3157_v33, 4  ;;  %v3164_v9 = vsel %vm2456_vm1, %v1552_v23, -inf  ;;  %v3172_v61 = vrot.slane %v3171_v2, 4 }
 0x1e2   : > { %v3100_v38 = vmax.f32 %v3098_v41, %v3099_v44  ;;  %v4375_v50 = vmax.f32 %v11011_v28, %v4374_v57  ;;  %v4377_v46 = vsel %vm4249_vm2, %v3093_v42, -inf  ;;  %v3165_v19 = vrot.slane %v3164_v9, 4 }
 0x1e3   : > { %v4378_v1 = vmax.f32 %v11014_v34, %v4377_v46  ;;  %v3159_v62 = vmax.f32 %v3157_v33, %v3158_v20  ;;  %v3173_v27 = vmax.f32 %v3171_v2, %v3172_v61  ;;  %v3178_v0 = vsel %vm2456_vm1, %v1553_v63, -inf }
 0x1e4   : > { %v4380_v36 = vsel %vm4249_vm2, %v3100_v38, -inf  ;;  %v4854_v40 = vsel %vm4812_vm3, %v4375_v50, %v4372_v45  ;;  %v3166_v7 = vmax.f32 %v3164_v9, %v3165_v19  ;;  %v3179_v55 = vrot.slane %v3178_v0, 4 }
 0x1e5   : > { %v4381_v52 = vmax.f32 %v11017_v59, %v4380_v36  ;;  %v4855_v28 = vsel %vm4814_vm4, %v4378_v1, %v4854_v40  ;;  %v3160_v39 = vrot.slane %v3159_v62, 2  ;;  %v3174_v14 = vrot.slane %v3173_v27, 2 }
 0x1e6   : > { %v3167_v17 = vrot.slane %v3166_v7, 2  ;;  %v3180_v21 = vmax.f32 %v3178_v0, %v3179_v55  ;;  %v1008_v34 = vmax.f32 %v786_v37, 0.0  ;;  %v1011_v24 = vmax.f32 %v801_v16, 0.0 }
 0x1e7   : > { %v4856_v4 = vsel %vm4816_vm5, %v4381_v52, %v4855_v28  ;;  %v3161_v15 = vmax.f32 %v3159_v62, %v3160_v39  ;;  %v3175_v29 = vmax.f32 %v3173_v27, %v3174_v14  ;;  %v796_v60 = vadd.f32 %v11052_v13, %v795_v35 }
 0x1e8   : > { %v4857_v58 = vsel %vm4818_vm6, %v4384_v11, %v4856_v4  ;;  %v3168_v59 = vmax.f32 %v3166_v7, %v3167_v17  ;;  %v3181_v54 = vrot.slane %v3180_v21, 2  ;;  %v1520_v25 = vcombine.high %v1008_v34, %v1008_v34 }
 0x1e9   : > { %v4858_v43 = vsel %vm4820_vm7, %v4387_v32, %v4857_v58  ;;  %v3162_v56 = vrot.slane %v3161_v15, 1  ;;  %v3176_v3 = vrot.slane %v3175_v29, 1  ;;  %v1527_v5 = vrot.slane %v1008_v34, %v10427_v12 }
 0x1ea   : > { %v4859_v10 = vsel %vm4822_vm8, %v4390_v47, %v4858_v43  ;;  %v3169_v37 = vrot.slane %v3168_v59, 1  ;;  %v3182_v18 = vmax.f32 %v3180_v21, %v3181_v54  ;;  %v1534_v30 = vrot.slane %v1520_v25, %v10427_v12 }
 0x1eb   : > { %v4860_v6 = vsel %vm4824_vm9, %v4393_v53, %v4859_v10  ;;  %v3163_v11 = vmax.f32 %v3161_v15, %v3162_v56  ;;  %v3177_v32 = vmax.f32 %v3175_v29, %v3176_v3  ;;  %v1535_v41 = vcombine.high %v1527_v5, %v1527_v5 }
 0x1ec   : > { %4953 = vst.msk [vmem:[#allocation2 + $0x61] sm:$0xff] %vm4249_vm2, %v4860_v6  ;;  %v3170_v51 = vmax.f32 %v3168_v59, %v3169_v37  ;;  %v3183_v16 = vrot.slane %v3182_v18, 1  ;;  %v1536_v31 = vcombine.high %v1534_v30, %v1534_v30  ;;  %v3129_v48 = vsel %vm2456_vm1, %v1527_v5, -inf  ;;  %v11110_v5 = vpop.f32.mrf.mxu0 }
 0x1ed   : > { %v11090_v22 = vsel %vm4249_vm2, %v3163_v11, -inf  ;;  %v11093_v47 = vsel %vm4249_vm2, %v3177_v32, -inf  ;;  %v3130_v45 = vrot.slane %v3129_v48, 4  ;;  %v3136_v26 = vsel %vm2456_vm1, %v1535_v41, -inf }
 0x1ee   : > { %v3184_v49 = vmax.f32 %v3182_v18, %v3183_v16  ;;  %v11097_v53 = vsel %vm4249_vm2, %v3170_v51, -inf  ;;  %v3137_v23 = vrot.slane %v3136_v26, 4  ;;  %v3143_v63 = vsel %vm2456_vm1, %v1534_v30, -inf }
 0x1ef   : > { %v3131_v42 = vmax.f32 %v3129_v48, %v3130_v45  ;;  %v3144_v44 = vrot.slane %v3143_v63, 4  ;;  %v3150_v33 = vsel %vm2456_vm1, %v1536_v31, -inf  ;;  %v1571_v2 = vcombine.high %v1011_v24, %v1011_v24 }
 0x1f0   : > { %v11102_v57 = vsel %vm4249_vm2, %v3184_v49, -inf  ;;  %v3138_v20 = vmax.f32 %v3136_v26, %v3137_v23  ;;  %v3151_v9 = vrot.slane %v3150_v33, 4  ;;  %v1578_v61 = vrot.slane %v1011_v24, %v10427_v12 }
 0x1f1   : > { %v3132_v38 = vrot.slane %v3131_v42, 2  ;;  %v3145_v50 = vmax.f32 %v3143_v63, %v3144_v44  ;;  %v1585_v46 = vrot.slane %v1571_v2, %v10427_v12  ;;  %v1010_v19 = vmax.f32 %v796_v60, 0.0  ;;  %v11125_v63 = vpop.f32.mrf.mxu0 }
 0x1f2   : > { %v3139_v1 = vrot.slane %v3138_v20, 2  ;;  %v3152_v62 = vmax.f32 %v3150_v33, %v3151_v9  ;;  %v1586_v27 = vcombine.high %v1578_v61, %v1578_v61  ;;  %v3213_v0 = vsel %vm2456_vm1, %v1578_v61, -inf }
 0x1f3   : > { %v3133_v36 = vmax.f32 %v3131_v42, %v3132_v38  ;;  %v3146_v40 = vrot.slane %v3145_v50, 2  ;;  %v1587_v7 = vcombine.high %v1585_v46, %v1585_v46  ;;  %v3214_v55 = vrot.slane %v3213_v0, 4 }
 0x1f4   : > { %v3140_v35 = vmax.f32 %v3138_v20, %v3139_v1  ;;  %v3153_v52 = vrot.slane %v3152_v62, 2  ;;  %v3220_v28 = vsel %vm2456_vm1, %v1586_v27, -inf  ;;  %v3227_v39 = vsel %vm2456_vm1, %v1585_v46, -inf }
 0x1f5   : > { %v3134_v14 = vrot.slane %v3133_v36, 1  ;;  %v3147_v17 = vmax.f32 %v3145_v50, %v3146_v40  ;;  %v3215_v21 = vmax.f32 %v3213_v0, %v3214_v55  ;;  %v3221_v34 = vrot.slane %v3220_v28, 4  ;;  %v11151_v40 = vpop.f32.mrf.mxu0 }
 0x1f6   : > { %v3141_v24 = vrot.slane %v3140_v35, 1  ;;  %v3154_v4 = vmax.f32 %v3152_v62, %v3153_v52  ;;  %v3228_v15 = vrot.slane %v3227_v39, 4  ;;  %v3234_v29 = vsel %vm2456_vm1, %v1587_v7, -inf }
 0x1f7   : > { %v3135_v60 = vmax.f32 %v3133_v36, %v3134_v14  ;;  %v3148_v58 = vrot.slane %v3147_v17, 1  ;;  %v3216_v59 = vrot.slane %v3215_v21, 2  ;;  %v3222_v54 = vmax.f32 %v3220_v28, %v3221_v34 }
 0x1f8   : > { %v3142_v25 = vmax.f32 %v3140_v35, %v3141_v24  ;;  %v3155_v43 = vrot.slane %v3154_v4, 1  ;;  %v3229_v56 = vmax.f32 %v3227_v39, %v3228_v15  ;;  %v3235_v3 = vrot.slane %v3234_v29, 4 }
 0x1f9   : > { %v3149_v10 = vmax.f32 %v3147_v17, %v3148_v58  ;;  %v11113_v37 = vsel %vm4249_vm2, %v3135_v60, -inf  ;;  %v3217_v18 = vmax.f32 %v3215_v21, %v3216_v59  ;;  %v3223_v30 = vrot.slane %v3222_v54, 2  ;;  %v815_v58 = vpop.f32.mrf.mxu0 }
 0x1fa   : > { %v3156_v6 = vmax.f32 %v3154_v4, %v3155_v43  ;;  %v11116_v11 = vsel %vm4249_vm2, %v3142_v25, -inf  ;;  %v3230_v32 = vrot.slane %v3229_v56, 2  ;;  %v3236_v41 = vmax.f32 %v3234_v29, %v3235_v3 }
 0x1fb   : > { %v11119_v51 = vsel %vm4249_vm2, %v3149_v10, -inf  ;;  %v3218_v16 = vrot.slane %v3217_v18, 1  ;;  %v3224_v31 = vmax.f32 %v3222_v54, %v3223_v30  ;;  %v1554_v48 = vcombine.high %v1010_v19, %v1010_v19 }
 0x1fc   : > { %v11122_v45 = vsel %vm4249_vm2, %v3156_v6, -inf  ;;  %v3231_v26 = vmax.f32 %v3229_v56, %v3230_v32  ;;  %v3237_v49 = vrot.slane %v3236_v41, 2  ;;  %v1561_v23 = vrot.slane %v1010_v19, %v10427_v12 }
 0x1fd   : > { %v3219_v42 = vmax.f32 %v3217_v18, %v3218_v16  ;;  %v3225_v44 = vrot.slane %v3224_v31, 1  ;;  %v1568_v33 = vrot.slane %v1554_v48, %v10427_v12  ;;  %v14762_v38 = vmov 0.0  }
 0x1fe   : > { %v3232_v2 = vrot.slane %v3231_v26, 1  ;;  %v3238_v20 = vmax.f32 %v3236_v41, %v3237_v49  ;;  %v1569_v9 = vcombine.high %v1561_v23, %v1561_v23  ;;  %v3185_v61 = vsel %vm2456_vm1, %v1561_v23, -inf  ;;  %4634 = vst.msk [vmem:[#allocation2] sm:$0xff] %vm4249_vm2, %v14762_v38  ;;  %4636 = vst.msk [vmem:[#allocation2 + $0xa0] sm:$0xff] %vm4249_vm2, %v14762_v38 }
 0x1ff   : > { %4635 = vst.msk [vmem:[#allocation2 + $0x8] sm:$0x3] %vm2456_vm1, %v14762_v38  ;;  %4637 = vst.msk [vmem:[#allocation2 + $0xa8] sm:$0x3] %vm2456_vm1, %v14762_v38  ;;  %v3226_v50 = vmax.f32 %v3224_v31, %v3225_v44  ;;  %v11146_v46 = vsel %vm4249_vm2, %v3219_v42, -inf  ;;  %v1570_v19 = vcombine.high %v1568_v33, %v1568_v33  ;;  %v3186_v1 = vrot.slane %v3185_v61, 4 }
 0x200   : > { %4639 = vst.msk [vmem:[#allocation2 + $0x90] sm:$0xff] %vm4249_vm2, %v14762_v38  ;;  %4641 = vst.msk [vmem:[#allocation2 + $0x130] sm:$0xff] %vm4249_vm2, %v14762_v38  ;;  %v3233_v62 = vmax.f32 %v3231_v26, %v3232_v2  ;;  %v3239_v27 = vrot.slane %v3238_v20, 1  ;;  %v4408_v0 = vmax.f32 %v11090_v22, %v11146_v46  ;;  %v3192_v36 = vsel %vm2456_vm1, %v1569_v9, -inf }
 0x201   : > { %4640 = vst.msk [vmem:[#allocation2 + $0x98] sm:$0x3] %vm2456_vm1, %v14762_v38  ;;  %4642 = vst.msk [vmem:[#allocation2 + $0x138] sm:$0x3] %vm2456_vm1, %v14762_v38  ;;  %v11154_v7 = vsel %vm4249_vm2, %v3226_v50, -inf  ;;  %v3187_v55 = vmax.f32 %v3185_v61, %v3186_v1  ;;  %v3193_v35 = vrot.slane %v3192_v36, 4  ;;  %v811_v43 = vadd.f32 %v11052_v13, %v11110_v5 }
 0x202   : > { %v3199_v52 = vsel %vm2456_vm1, %v1568_v33, -inf  ;;  %v3240_v28 = vmax.f32 %v3238_v20, %v3239_v27  ;;  %v4411_v39 = vmax.f32 %v11097_v53, %v11154_v7  ;;  %v11160_v14 = vsel %vm4249_vm2, %v3233_v62, -inf  ;;  %4666 = vst.msk [vmem:[#allocation2 + $0x29] sm:$0x1] %vm4643_vm10, %v14762_v38  ;;  %4645 = vst.msk [vmem:[#allocation2 + $0x10] sm:$0x1] %vm4643_vm10, %v14762_v38 }
 0x203   : > { %v3200_v17 = vrot.slane %v3199_v52, 4  ;;  %v4414_v21 = vmax.f32 %v11093_v47, %v11160_v14  ;;  %v3188_v34 = vrot.slane %v3187_v55, 2  ;;  %v3194_v24 = vmax.f32 %v3192_v36, %v3193_v35  ;;  %4646 = vst.msk [vmem:[#allocation2 + $0x20] sm:$0x1] %vm4643_vm10, %v14762_v38  ;;  %4647 = vst.msk [vmem:[#allocation2 + $0x30] sm:$0x1] %vm4643_vm10, %v14762_v38 }
 0x204   : > { %v3206_v4 = vsel %vm2456_vm1, %v1570_v19, -inf  ;;  %v11166_v15 = vsel %vm4249_vm2, %v3240_v28, -inf  ;;  %4648 = vst.msk [vmem:[#allocation2 + $0x40] sm:$0x1] %vm4643_vm10, %v14762_v38  ;;  %4649 = vst.msk [vmem:[#allocation2 + $0x50] sm:$0x1] %vm4643_vm10, %v14762_v38  ;;  %v806_v10 = vadd.f32 %v11052_v13, %v11125_v63  ;;  %v821_v18 = vadd.f32 %v11052_v13, %v11151_v40 }
 0x205   : > { %v3201_v29 = vmax.f32 %v3199_v52, %v3200_v17  ;;  %v3207_v60 = vrot.slane %v3206_v4, 4  ;;  %v4417_v59 = vmax.f32 %v11102_v57, %v11166_v15  ;;  %v3189_v54 = vmax.f32 %v3187_v55, %v3188_v34  ;;  %4650 = vst.msk [vmem:[#allocation2 + $0x60] sm:$0x1] %vm4643_vm10, %v14762_v38  ;;  %4651 = vst.msk [vmem:[#allocation2 + $0x70] sm:$0x1] %vm4643_vm10, %v14762_v38 }
 0x206   : > { %v3195_v25 = vrot.slane %v3194_v24, 2  ;;  %4652 = vst.msk [vmem:[#allocation2 + $0x80] sm:$0x1] %vm4643_vm10, %v14762_v38  ;;  %4655 = vst.msk [vmem:[#allocation2 + $0xb0] sm:$0x1] %vm4643_vm10, %v14762_v38  ;;  %v1013_v32 = vmax.f32 %v811_v43, 0.0  ;;  %v11257_v41 = vadd.f32 %v11052_v13, %v815_v58 }
 0x207   : > { %4656 = vst.msk [vmem:[#allocation2 + $0xc0] sm:$0x1] %vm4643_vm10, %v14762_v38  ;;  %4657 = vst.msk [vmem:[#allocation2 + $0xd0] sm:$0x1] %vm4643_vm10, %v14762_v38  ;;  %v3202_v56 = vrot.slane %v3201_v29, 2  ;;  %v3208_v3 = vmax.f32 %v3206_v4, %v3207_v60  ;;  %v3190_v30 = vrot.slane %v3189_v54, 1 }
 0x208   : > { %4658 = vst.msk [vmem:[#allocation2 + $0xe0] sm:$0x1] %vm4643_vm10, %v14762_v38  ;;  %4659 = vst.msk [vmem:[#allocation2 + $0xf0] sm:$0x1] %vm4643_vm10, %v14762_v38  ;;  %v3196_v6 = vmax.f32 %v3194_v24, %v3195_v25  ;;  %v1012_v48 = vmax.f32 %v806_v10, 0.0  ;;  %v11259_v26 = vmax.f32 %v821_v18, 0.0  ;;  %v1605_v23 = vcombine.high %v1013_v32, %v1013_v32 }
 0x209   : > { %4660 = vst.msk [vmem:[#allocation2 + $0x100] sm:$0x1] %vm4643_vm10, %v14762_v38  ;;  %4661 = vst.msk [vmem:[#allocation2 + $0x110] sm:$0x1] %vm4643_vm10, %v14762_v38  ;;  %v3203_v16 = vmax.f32 %v3201_v29, %v3202_v56  ;;  %v3209_v31 = vrot.slane %v3208_v3, 2  ;;  %v3191_v5 = vmax.f32 %v3189_v54, %v3190_v30  ;;  %v1612_v42 = vrot.slane %v1013_v32, %v10427_v12  ;;  %v11268_v27 = vld [vmem:[#allocation2 + $0x22] sm:$0xff] }
 0x20a   : > { %4662 = vst.msk [vmem:[#allocation2 + $0x120] sm:$0x1] %vm4643_vm10, %v14762_v38  ;;  %4665 = vst.msk [vmem:[#allocation2 + $0x19] sm:$0x1] %vm4643_vm10, %v14762_v38  ;;  %v3197_v49 = vrot.slane %v3196_v6, 1  ;;  %v1588_v33 = vcombine.high %v1012_v48, %v1012_v48  ;;  %v11263_v2 = vrot.slane %v1012_v48, %v10427_v12  ;;  %v1619_v61 = vrot.slane %v1605_v23, %v10427_v12  ;;  %v5269_v25 = vld [vmem:[#allocation2 + $0x21] sm:$0xff] }
 0x20b   : > { %4667 = vst.msk [vmem:[#allocation2 + $0x39] sm:$0x1] %vm4643_vm10, %v14762_v38  ;;  %4668 = vst.msk [vmem:[#allocation2 + $0x49] sm:$0x1] %vm4643_vm10, %v14762_v38  ;;  %v3204_v63 = vrot.slane %v3203_v16, 1  ;;  %v3210_v44 = vmax.f32 %v3208_v3, %v3209_v31  ;;  %v4395_v9 = vsel %vm4249_vm2, %v3191_v5, -inf  ;;  %v1620_v50 = vcombine.high %v1612_v42, %v1612_v42  ;;  %9726 = vmatprep.mubr.msk.f32.mxu0 %vm4249_vm2, %v11268_v27 }
 0x20c   : > { %4669 = vst.msk [vmem:[#allocation2 + $0x59] sm:$0x1] %vm4643_vm10, %v14762_v38  ;;  %4670 = vst.msk [vmem:[#allocation2 + $0x69] sm:$0x1] %vm4643_vm10, %v14762_v38  ;;  %v3198_v20 = vmax.f32 %v3196_v6, %v3197_v49  ;;  %v4396_v62 = vmax.f32 %v11113_v37, %v4395_v9  ;;  %v3269_v36 = vsel %vm2456_vm1, %v1612_v42, -inf  ;;  %v1621_v35 = vcombine.high %v1619_v61, %v1619_v61 }
 0x20d   : > { %4671 = vst.msk [vmem:[#allocation2 + $0x79] sm:$0x1] %vm4643_vm10, %v14762_v38  ;;  %4672 = vst.msk [vmem:[#allocation2 + $0x89] sm:$0x1] %vm4643_vm10, %v14762_v38  ;;  %v3205_v19 = vmax.f32 %v3203_v16, %v3204_v63  ;;  %v3211_v1 = vrot.slane %v3210_v44, 1  ;;  %v3270_v52 = vrot.slane %v3269_v36, 4  ;;  %v1602_v5 = vrot.slane %v1588_v33, %v10427_v12 }
 0x20e   : > { %4675 = vst.msk [vmem:[#allocation2 + $0xb9] sm:$0x1] %vm4643_vm10, %v14762_v38  ;;  %4676 = vst.msk [vmem:[#allocation2 + $0xc9] sm:$0x1] %vm4643_vm10, %v14762_v38  ;;  %v4398_v55 = vsel %vm4249_vm2, %v3198_v20, -inf  ;;  %v3276_v28 = vsel %vm2456_vm1, %v1620_v50, -inf  ;;  %v1603_v63 = vcombine.high %v11263_v2, %v11263_v2 }
 0x20f   : > { %4677 = vst.msk [vmem:[#allocation2 + $0xd9] sm:$0x1] %vm4643_vm10, %v14762_v38  ;;  %4678 = vst.msk [vmem:[#allocation2 + $0xe9] sm:$0x1] %vm4643_vm10, %v14762_v38  ;;  %v3212_v34 = vmax.f32 %v3210_v44, %v3211_v1  ;;  %v4399_v24 = vmax.f32 %v11116_v11, %v4398_v55  ;;  %v4401_v37 = vsel %vm4249_vm2, %v3205_v19, -inf  ;;  %v3277_v4 = vrot.slane %v3276_v28, 4 }
 0x210   : > { %4679 = vst.msk [vmem:[#allocation2 + $0xf9] sm:$0x1] %vm4643_vm10, %v14762_v38  ;;  %4680 = vst.msk [vmem:[#allocation2 + $0x109] sm:$0x1] %vm4643_vm10, %v14762_v38  ;;  %v4402_v29 = vmax.f32 %v11119_v51, %v4401_v37  ;;  %v3271_v60 = vmax.f32 %v3269_v36, %v3270_v52  ;;  %v3283_v58 = vsel %vm2456_vm1, %v1619_v61, -inf  ;;  %v3290_v54 = vsel %vm2456_vm1, %v1621_v35, -inf }
 0x211   : > { %4681 = vst.msk [vmem:[#allocation2 + $0x119] sm:$0x1] %vm4643_vm10, %v14762_v38  ;;  %4682 = vst.msk [vmem:[#allocation2 + $0x129] sm:$0x1] %vm4643_vm10, %v14762_v38  ;;  %v4404_v56 = vsel %vm4249_vm2, %v3212_v34, -inf  ;;  %v4861_v11 = vsel %vm4812_vm3, %v4399_v24, %v4396_v62  ;;  %v3278_v3 = vmax.f32 %v3276_v28, %v3277_v4  ;;  %v3284_v10 = vrot.slane %v3283_v58, 4 }
 0x212   : > { %4644 = vst.msk [vmem:[#allocation2] sm:$0x1] %vm4643_vm10, %v14762_v38  ;;  %4653 = vst.msk [vmem:[#allocation2 + $0x90] sm:$0x1] %vm4643_vm10, %v14762_v38  ;;  %v11271_v40 = vld [vmem:[#allocation2 + $0x32] sm:$0xff]  ;;  %v5769_v17 = vld [vmem:[#allocation2 + $0x42] sm:$0xff]  ;;  %v4405_v18 = vmax.f32 %v11122_v45, %v4404_v56  ;;  %v4862_v30 = vsel %vm4814_vm4, %v4402_v29, %v4861_v11  ;;  %v1604_v33 = vcombine.high %v1602_v5, %v1602_v5 }
 0x213   : > { %4654 = vst.msk [vmem:[#allocation2 + $0xa0] sm:$0x1] %vm4643_vm10, %v14762_v38  ;;  %4663 = vst.msk [vmem:[#allocation2 + $0x130] sm:$0x1] %vm4643_vm10, %v14762_v38  ;;  %9727 = vmatmul.mubr.msk.f32.vlgmr.msra.gmra.mxu0 %vm4249_vm2, %v11271_v40  ;;  %v5770_v43 = vld [vmem:[#allocation2 + $0x52] sm:$0xff]  ;;  %v3272_v51 = vrot.slane %v3271_v60, 2  ;;  %v3285_v31 = vmax.f32 %v3283_v58, %v3284_v10  ;;  %v1639_v37 = vcombine.high %v11259_v26, %v11259_v26 }
 0x214   : > { %4664 = vst.msk [vmem:[#allocation2 + $0x9] sm:$0x1] %vm4643_vm10, %v14762_v38  ;;  %4673 = vst.msk [vmem:[#allocation2 + $0x99] sm:$0x1] %vm4643_vm10, %v14762_v38  ;;  %9729 = vmatprep.mubr.msk.f32.mxu0 %vm4249_vm2, %v5769_v17  ;;  %v3291_v6 = vrot.slane %v3290_v54, 4  ;;  %v5236_v32 = vld [vmem:[#allocation2 + $0x12] sm:$0xff]  ;;  %v4863_v49 = vsel %vm4816_vm5, %v4405_v18, %v4862_v30  ;;  %v1646_v58 = vrot.slane %v11259_v26, %v10427_v12 }
 0x215   : > { %4674 = vst.msk [vmem:[#allocation2 + $0xa9] sm:$0x1] %vm4643_vm10, %v14762_v38  ;;  %4683 = vst.msk [vmem:[#allocation2 + $0x139] sm:$0x1] %vm4643_vm10, %v14762_v38  ;;  %v3279_v16 = vrot.slane %v3278_v3, 2  ;;  %v9887_v48 = vpack.i.bf16 %v5236_v32, %v5269_v25  ;;  %v3273_v23 = vmax.f32 %v3271_v60, %v3272_v51  ;;  %v4864_v45 = vsel %vm4818_vm6, %v4408_v0, %v4863_v49 }
 0x216   : > { %v3292_v42 = vmax.f32 %v3290_v54, %v3291_v6  ;;  %v3286_v20 = vrot.slane %v3285_v31, 2  ;;  %v4865_v9 = vsel %vm4820_vm7, %v4411_v39, %v4864_v45  ;;  %v3241_v19 = vsel %vm2456_vm1, %v11263_v2, -inf }
 0x217   : > { %9730 = vmatmul.mubr.msk.f32.gmra.mxu0 %vm4249_vm2, %v5770_v43  ;;  %v3280_v44 = vmax.f32 %v3278_v3, %v3279_v16  ;;  %9888 = vrot.lane.b32.xlu0 %v9887_v48, %s14809_s17  ;;  %v3274_v61 = vrot.slane %v3273_v23, 1  ;;  %v4866_v22 = vsel %vm4822_vm8, %v4414_v21, %v4865_v9  ;;  %v3242_v1 = vrot.slane %v3241_v19, 4 }
 0x218   : > { %v3293_v50 = vrot.slane %v3292_v42, 2  ;;  %v3287_v0 = vmax.f32 %v3285_v31, %v3286_v20  ;;  %v4867_v53 = vsel %vm4824_vm9, %v4417_v59, %v4866_v22  ;;  %v3248_v62 = vsel %vm2456_vm1, %v1603_v63, -inf }
 0x219   : > { %v3281_v46 = vrot.slane %v3280_v44, 1  ;;  %v3275_v7 = vmax.f32 %v3273_v23, %v3274_v61  ;;  %4954 = vst.msk [vmem:[#allocation2 + $0x71] sm:$0xff] %vm4249_vm2, %v4867_v53  ;;  %v3243_v55 = vmax.f32 %v3241_v19, %v3242_v1  ;;  %v3249_v47 = vrot.slane %v3248_v62, 4  ;;  %v5771_v19 = vld [vmem:[#allocation2 + $0x62] sm:$0xff] }
 0x21a   : > { %v3294_v39 = vmax.f32 %v3292_v42, %v3293_v50  ;;  %v3288_v36 = vrot.slane %v3287_v0, 1  ;;  %v3255_v35 = vsel %vm2456_vm1, %v1602_v5, -inf  ;;  %v3262_v57 = vsel %vm2456_vm1, %v1604_v33, -inf  ;;  %9732 = vmatprep.mubr.msk.f32.mxu0 %vm4249_vm2, %v5771_v19 }
 0x21b   : > { %v3282_v2 = vmax.f32 %v3280_v44, %v3281_v46  ;;  %v11316_v21 = vsel %vm4249_vm2, %v3275_v7, -inf  ;;  %v3244_v52 = vrot.slane %v3243_v55, 2  ;;  %v3250_v28 = vmax.f32 %v3248_v62, %v3249_v47 }
 0x21c   : > { %v3295_v14 = vrot.slane %v3294_v39, 1  ;;  %v3289_v15 = vmax.f32 %v3287_v0, %v3288_v36  ;;  %v3256_v34 = vrot.slane %v3255_v35, 4  ;;  %v3263_v24 = vrot.slane %v3262_v57, 4 }
 0x21d   : > { %v11321_v59 = vsel %vm4249_vm2, %v3282_v2, -inf  ;;  %v3245_v29 = vmax.f32 %v3243_v55, %v3244_v52  ;;  %v3251_v60 = vrot.slane %v3250_v28, 2  ;;  %v1653_v56 = vrot.slane %v1639_v37, %v10427_v12 }
 0x21e   : > { %v3296_v17 = vmax.f32 %v3294_v39, %v3295_v14  ;;  %v11326_v4 = vsel %vm4249_vm2, %v3289_v15, -inf  ;;  %v3257_v25 = vmax.f32 %v3255_v35, %v3256_v34  ;;  %v3264_v43 = vmax.f32 %v3262_v57, %v3263_v24  ;;  %v9664_v14 = vpop.f32.mrf.mxu0 }
 0x21f   : > { %v3246_v11 = vrot.slane %v3245_v29, 1  ;;  %v3252_v3 = vmax.f32 %v3250_v28, %v3251_v60  ;;  %v1654_v10 = vcombine.high %v1646_v58, %v1646_v58  ;;  %v3325_v18 = vsel %vm2456_vm1, %v1646_v58, -inf }
 0x220   : > { %v11331_v54 = vsel %vm4249_vm2, %v3296_v17, -inf  ;;  %v3258_v30 = vrot.slane %v3257_v25, 2  ;;  %v3265_v51 = vrot.slane %v3264_v43, 2  ;;  %v1655_v6 = vcombine.high %v1653_v56, %v1653_v56 }
 0x221   : > { %v3326_v32 = vrot.slane %v3325_v18, 4  ;;  %v3247_v16 = vmax.f32 %v3245_v29, %v3246_v11  ;;  %v3253_v31 = vrot.slane %v3252_v3, 1  ;;  %v3332_v26 = vsel %vm2456_vm1, %v1654_v10, -inf }
 0x222   : > { %v3339_v48 = vsel %vm2456_vm1, %v1653_v56, -inf  ;;  %v3259_v5 = vmax.f32 %v3257_v25, %v3258_v30  ;;  %v3266_v49 = vmax.f32 %v3264_v43, %v3265_v51  ;;  %v3333_v42 = vrot.slane %v3332_v26, 4 }
 0x223   : > { %v3327_v23 = vmax.f32 %v3325_v18, %v3326_v32  ;;  %v3254_v63 = vmax.f32 %v3252_v3, %v3253_v31  ;;  %v11338_v45 = vsel %vm4249_vm2, %v3247_v16, -inf  ;;  %v3340_v44 = vrot.slane %v3339_v48, 4  ;;  %v825_v16 = vpop.f32.mrf.mxu0 }
 0x224   : > { %v3346_v20 = vsel %vm2456_vm1, %v1655_v6, -inf  ;;  %v3260_v33 = vrot.slane %v3259_v5, 1  ;;  %v3267_v9 = vrot.slane %v3266_v49, 1  ;;  %v3334_v50 = vmax.f32 %v3332_v26, %v3333_v42 }
 0x225   : > { %v3328_v61 = vrot.slane %v3327_v23, 2  ;;  %v11342_v22 = vsel %vm4249_vm2, %v3254_v63, -inf  ;;  %v3341_v46 = vmax.f32 %v3339_v48, %v3340_v44  ;;  %v3347_v0 = vrot.slane %v3346_v20, 4 }
 0x226   : > { %v1014_v1 = vmax.f32 %v11257_v41, 0.0  ;;  %v3261_v53 = vmax.f32 %v3259_v5, %v3260_v33  ;;  %v3268_v7 = vmax.f32 %v3266_v49, %v3267_v9  ;;  %v3335_v62 = vrot.slane %v3334_v50, 2  ;;  %v5270_v49 = vld [vmem:[#allocation2 + $0x31] sm:$0xff] }
 0x227   : > { %v3329_v39 = vmax.f32 %v3327_v23, %v3328_v61  ;;  %v3342_v2 = vrot.slane %v3341_v46, 2  ;;  %v3348_v36 = vmax.f32 %v3346_v20, %v3347_v0  ;;  %v831_v60 = vadd.f32 %v11052_v13, %v9664_v14 }
 0x228   : > { %v1622_v55 = vcombine.high %v1014_v1, %v1014_v1  ;;  %v1629_v47 = vrot.slane %v1014_v1, %v10427_v12  ;;  %v11348_v35 = vsel %vm4249_vm2, %v3261_v53, -inf  ;;  %v11351_v57 = vsel %vm4249_vm2, %v3268_v7, -inf  ;;  %v9667_v1 = vpop.f32.mrf.mxu0 }
 0x229   : > { %v3330_v15 = vrot.slane %v3329_v39, 1  ;;  %v3336_v41 = vmax.f32 %v3334_v50, %v3335_v62  ;;  %v3343_v52 = vmax.f32 %v3341_v46, %v3342_v2  ;;  %v3349_v28 = vrot.slane %v3348_v36, 2 }
 0x22a   : > { %v1636_v17 = vrot.slane %v1622_v55, %v10427_v12  ;;  %v1637_v34 = vcombine.high %v1629_v47, %v1629_v47  ;;  %v3297_v29 = vsel %vm2456_vm1, %v1629_v47, -inf  ;;  %v1017_v46 = vmax.f32 %v831_v60, 0.0 }
 0x22b   : > { %v3331_v24 = vmax.f32 %v3329_v39, %v3330_v15  ;;  %v3337_v37 = vrot.slane %v3336_v41, 1  ;;  %v3344_v58 = vrot.slane %v3343_v52, 1  ;;  %v3350_v25 = vmax.f32 %v3348_v36, %v3349_v28 }
 0x22c   : > { %v1638_v43 = vcombine.high %v1636_v17, %v1636_v17  ;;  %v3298_v56 = vrot.slane %v3297_v29, 4  ;;  %v3304_v10 = vsel %vm2456_vm1, %v1637_v34, -inf  ;;  %v3311_v18 = vsel %vm2456_vm1, %v1636_v17, -inf }
 0x22d   : > { %v3338_v11 = vmax.f32 %v3336_v41, %v3337_v37  ;;  %v11357_v3 = vsel %vm4249_vm2, %v3331_v24, -inf  ;;  %v3345_v30 = vmax.f32 %v3343_v52, %v3344_v58  ;;  %v3351_v51 = vrot.slane %v3350_v25, 1 }
 0x22e   : > { %v4432_v6 = vmax.f32 %v11316_v21, %v11357_v3  ;;  %v3299_v32 = vmax.f32 %v3297_v29, %v3298_v56  ;;  %v3305_v26 = vrot.slane %v3304_v10, 4  ;;  %v3312_v48 = vrot.slane %v3311_v18, 4 }
 0x22f   : > { %v11364_v31 = vsel %vm4249_vm2, %v3338_v11, -inf  ;;  %v3318_v5 = vsel %vm2456_vm1, %v1638_v43, -inf  ;;  %v3352_v23 = vmax.f32 %v3350_v25, %v3351_v51  ;;  %v11370_v63 = vsel %vm4249_vm2, %v3345_v30, -inf }
 0x230   : > { %v4435_v42 = vmax.f32 %v11321_v59, %v11364_v31  ;;  %v3300_v44 = vrot.slane %v3299_v32, 2  ;;  %v4438_v20 = vmax.f32 %v11326_v4, %v11370_v63  ;;  %v3306_v33 = vmax.f32 %v3304_v10, %v3305_v26 }
 0x231   : > { %v3313_v9 = vmax.f32 %v3311_v18, %v3312_v48  ;;  %v3319_v61 = vrot.slane %v3318_v5, 4  ;;  %v11375_v50 = vsel %vm4249_vm2, %v3352_v23, -inf  ;;  %v9892_v0 = vpack.i.bf16 %v11268_v27, %v5270_v49 }
 0x232   : > { %v3301_v19 = vmax.f32 %v3299_v32, %v3300_v44  ;;  %v4441_v53 = vmax.f32 %v11331_v54, %v11375_v50  ;;  %v3307_v7 = vrot.slane %v3306_v33, 2  ;;  %v1673_v36 = vcombine.high %v1017_v46, %v1017_v46 }
 0x233   : > { %v3314_v39 = vrot.slane %v3313_v9, 2  ;;  %v3320_v62 = vmax.f32 %v3318_v5, %v3319_v61  ;;  %v1680_v55 = vrot.slane %v1017_v46, %v10427_v12  ;;  %9893 = vrot.lane.b32.xlu0 %v9892_v0, %s14809_s17  ;;  %v826_v47 = vadd.f32 %v11052_v13, %v825_v16 }
 0x234   : > { %v3302_v2 = vrot.slane %v3301_v19, 1  ;;  %v3308_v14 = vmax.f32 %v3306_v33, %v3307_v7  ;;  %v11384_v27 = vadd.f32 %v11052_v13, %v9667_v1  ;;  %v1687_v28 = vrot.slane %v1673_v36, %v10427_v12 }
 0x235   : > { %v3315_v15 = vmax.f32 %v3313_v9, %v3314_v39  ;;  %v3321_v41 = vrot.slane %v3320_v62, 2  ;;  %v1688_v17 = vcombine.high %v1680_v55, %v1680_v55  ;;  %v3381_v34 = vsel %vm2456_vm1, %v1680_v55, -inf }
 0x236   : > { %v3303_v52 = vmax.f32 %v3301_v19, %v3302_v2  ;;  %v3309_v24 = vrot.slane %v3308_v14, 1  ;;  %v3382_v60 = vrot.slane %v3381_v34, 4  ;;  %v1689_v25 = vcombine.high %v1687_v28, %v1687_v28 }
 0x237   : > { %v3316_v37 = vrot.slane %v3315_v15, 1  ;;  %v3322_v29 = vmax.f32 %v3320_v62, %v3321_v41  ;;  %v3388_v43 = vsel %vm2456_vm1, %v1688_v17, -inf  ;;  %v3395_v56 = vsel %vm2456_vm1, %v1687_v28, -inf }
 0x238   : > { %v4419_v58 = vsel %vm4249_vm2, %v3303_v52, -inf  ;;  %v3310_v11 = vmax.f32 %v3308_v14, %v3309_v24  ;;  %v3383_v51 = vmax.f32 %v3381_v34, %v3382_v60  ;;  %v3389_v32 = vrot.slane %v3388_v43, 4 }
 0x239   : > { %v3317_v10 = vmax.f32 %v3315_v15, %v3316_v37  ;;  %v3323_v18 = vrot.slane %v3322_v29, 1  ;;  %v4420_v30 = vmax.f32 %v11338_v45, %v4419_v58  ;;  %v3396_v16 = vrot.slane %v3395_v56, 4 }
 0x23a   : > { %v3402_v26 = vsel %vm2456_vm1, %v1689_v25, -inf  ;;  %v4422_v5 = vsel %vm4249_vm2, %v3310_v11, -inf  ;;  %v3384_v9 = vrot.slane %v3383_v51, 2  ;;  %v3390_v61 = vmax.f32 %v3388_v43, %v3389_v32  ;;  %v5271_v11 = vld [vmem:[#allocation2 + $0x41] sm:$0xff] }
 0x23b   : > { %v3324_v48 = vmax.f32 %v3322_v29, %v3323_v18  ;;  %v4425_v49 = vsel %vm4249_vm2, %v3317_v10, -inf  ;;  %v3403_v23 = vrot.slane %v3402_v26, 4  ;;  %v4423_v44 = vmax.f32 %v11342_v22, %v4422_v5  ;;  %v835_v29 = vpop.f32.mrf.mxu0 }
 0x23c   : > { %v4426_v33 = vmax.f32 %v11348_v35, %v4425_v49  ;;  %v3397_v45 = vmax.f32 %v3395_v56, %v3396_v16  ;;  %v1016_v0 = vmax.f32 %v826_v47, 0.0  ;;  %v3385_v39 = vmax.f32 %v3383_v51, %v3384_v9 }
 0x23d   : > { %v4428_v19 = vsel %vm4249_vm2, %v3324_v48, -inf  ;;  %v3404_v46 = vmax.f32 %v3402_v26, %v3403_v23  ;;  %v4868_v7 = vsel %vm4812_vm3, %v4423_v44, %v4420_v30  ;;  %v3391_v62 = vrot.slane %v3390_v61, 2 }
 0x23e   : > { %v4429_v1 = vmax.f32 %v11351_v57, %v4428_v19  ;;  %v4869_v2 = vsel %vm4814_vm4, %v4426_v33, %v4868_v7  ;;  %v3398_v36 = vrot.slane %v3397_v45, 2  ;;  %v1656_v22 = vcombine.high %v1016_v0, %v1016_v0 }
 0x23f   : > { %v3405_v55 = vrot.slane %v3404_v46, 2  ;;  %v3386_v14 = vrot.slane %v3385_v39, 1  ;;  %v3392_v15 = vmax.f32 %v3390_v61, %v3391_v62  ;;  %v1663_v41 = vrot.slane %v1016_v0, %v10427_v12 }
 0x240   : > { %v4870_v35 = vsel %vm4816_vm5, %v4429_v1, %v4869_v2  ;;  %v3399_v47 = vmax.f32 %v3397_v45, %v3398_v36  ;;  %v1670_v28 = vrot.slane %v1656_v22, %v10427_v12  ;;  %v1019_v26 = vmax.f32 %v11384_v27, 0.0 }
 0x241   : > { %v4871_v57 = vsel %vm4818_vm6, %v4432_v6, %v4870_v35  ;;  %v3406_v52 = vmax.f32 %v3404_v46, %v3405_v55  ;;  %v3387_v34 = vmax.f32 %v3385_v39, %v3386_v14  ;;  %v3393_v24 = vrot.slane %v3392_v15, 1 }
 0x242   : > { %v4872_v17 = vsel %vm4820_vm7, %v4435_v42, %v4871_v57  ;;  %v1671_v37 = vcombine.high %v1663_v41, %v1663_v41  ;;  %v3400_v3 = vrot.slane %v3399_v47, 1  ;;  %v1672_v60 = vcombine.high %v1670_v28, %v1670_v28 }
 0x243   : > { %v4873_v21 = vsel %vm4822_vm8, %v4438_v20, %v4872_v17  ;;  %v3407_v6 = vrot.slane %v3406_v52, 1  ;;  %v3394_v59 = vmax.f32 %v3392_v15, %v3393_v24  ;;  %v11421_v31 = vsel %vm4249_vm2, %v3387_v34, -inf  ;;  %v5772_v24 = vld [vmem:[#allocation2 + $0x72] sm:$0xff] }
 0x244   : > { %v4874_v58 = vsel %vm4824_vm9, %v4441_v53, %v4873_v21  ;;  %v3353_v42 = vsel %vm2456_vm1, %v1663_v41, -inf  ;;  %v3401_v25 = vmax.f32 %v3399_v47, %v3400_v3  ;;  %v3360_v20 = vsel %vm2456_vm1, %v1671_v37, -inf  ;;  %v9670_v53 = vpop.f32.mrf.mxu0  ;;  %9733 = vmatmul.mubr.msk.f32.gmra.mxu0 %vm4249_vm2, %v5772_v24 }
 0x245   : > { %4955 = vst.msk [vmem:[#allocation2 + $0x81] sm:$0xff] %vm4249_vm2, %v4874_v58  ;;  %v3408_v4 = vmax.f32 %v3406_v52, %v3407_v6  ;;  %v3354_v63 = vrot.slane %v3353_v42, 4  ;;  %v11427_v43 = vsel %vm4249_vm2, %v3394_v59, -inf  ;;  %v3361_v56 = vrot.slane %v3360_v20, 4 }
 0x246   : > { %v3367_v54 = vsel %vm2456_vm1, %v1670_v28, -inf  ;;  %v3374_v50 = vsel %vm2456_vm1, %v1672_v60, -inf  ;;  %v11432_v10 = vsel %vm4249_vm2, %v3401_v25, -inf  ;;  %v836_v48 = vadd.f32 %v11052_v13, %v835_v29 }
 0x247   : > { %v11435_v18 = vsel %vm4249_vm2, %v3408_v4, -inf  ;;  %v3355_v30 = vmax.f32 %v3353_v42, %v3354_v63  ;;  %v3368_v51 = vrot.slane %v3367_v54, 4  ;;  %v3362_v32 = vmax.f32 %v3360_v20, %v3361_v56 }
 0x248   : > { %v3375_v16 = vrot.slane %v3374_v50, 4  ;;  %v851_v23 = vadd.f32 %v11052_v13, %v9670_v53  ;;  %v9897_v44 = vpack.i.bf16 %v11271_v40, %v5271_v11  ;;  %v1707_v61 = vcombine.high %v1019_v26, %v1019_v26 }
 0x249   : > { %v3356_v5 = vrot.slane %v3355_v30, 2  ;;  %v3369_v49 = vmax.f32 %v3367_v54, %v3368_v51  ;;  %v3363_v33 = vrot.slane %v3362_v32, 2  ;;  %v1714_v19 = vrot.slane %v1019_v26, %v10427_v12 }
 0x24a   : > { %v3376_v9 = vmax.f32 %v3374_v50, %v3375_v16  ;;  %v1018_v0 = vmax.f32 %v836_v48, 0.0  ;;  %v11442_v1 = vmax.f32 %v851_v23, 0.0  ;;  %9898 = vrot.lane.b32.xlu1 %v9897_v44, %s14809_s17  ;;  %v1721_v39 = vrot.slane %v1707_v61, %v10427_v12 }
 0x24b   : > { %v3357_v45 = vmax.f32 %v3355_v30, %v3356_v5  ;;  %v3370_v46 = vrot.slane %v3369_v49, 2  ;;  %v3364_v27 = vmax.f32 %v3362_v32, %v3363_v33  ;;  %v1722_v62 = vcombine.high %v1714_v19, %v1714_v19 }
 0x24c   : > { %v3377_v7 = vrot.slane %v3376_v9, 2  ;;  %v3437_v40 = vsel %vm2456_vm1, %v1714_v19, -inf  ;;  %v1690_v36 = vcombine.high %v1018_v0, %v1018_v0  ;;  %v1723_v35 = vcombine.high %v1721_v39, %v1721_v39 }
 0x24d   : > { %v3358_v13 = vrot.slane %v3357_v45, 1  ;;  %v3371_v2 = vmax.f32 %v3369_v49, %v3370_v46  ;;  %v3365_v55 = vrot.slane %v3364_v27, 1  ;;  %v3438_v14 = vrot.slane %v3437_v40, 4 }
 0x24e   : > { %v3378_v22 = vmax.f32 %v3376_v9, %v3377_v7  ;;  %v3444_v57 = vsel %vm2456_vm1, %v1722_v62, -inf  ;;  %v3451_v47 = vsel %vm2456_vm1, %v1721_v39, -inf  ;;  %v3458_v3 = vsel %vm2456_vm1, %v1723_v35, -inf }
 0x24f   : > { %v3359_v15 = vmax.f32 %v3357_v45, %v3358_v13  ;;  %v3372_v41 = vrot.slane %v3371_v2, 1  ;;  %v3366_v52 = vmax.f32 %v3364_v27, %v3365_v55  ;;  %v3439_v17 = vmax.f32 %v3437_v40, %v3438_v14 }
 0x250   : > { %v3379_v28 = vrot.slane %v3378_v22, 1  ;;  %v3445_v34 = vrot.slane %v3444_v57, 4  ;;  %v3452_v21 = vrot.slane %v3451_v47, 4  ;;  %v3459_v4 = vrot.slane %v3458_v3, 4 }
 0x251   : > { %v3373_v37 = vmax.f32 %v3371_v2, %v3372_v41  ;;  %v11450_v29 = vsel %vm4249_vm2, %v3359_v15, -inf  ;;  %v11455_v60 = vsel %vm4249_vm2, %v3366_v52, -inf  ;;  %v3440_v58 = vrot.slane %v3439_v17, 2 }
 0x252   : > { %v3380_v6 = vmax.f32 %v3378_v22, %v3379_v28  ;;  %v3446_v59 = vmax.f32 %v3444_v57, %v3445_v34  ;;  %v3453_v25 = vmax.f32 %v3451_v47, %v3452_v21  ;;  %v1697_v63 = vrot.slane %v1018_v0, %v10427_v12 }
 0x253   : > { %v11458_v42 = vsel %vm4249_vm2, %v3373_v37, -inf  ;;  %v3441_v56 = vmax.f32 %v3439_v17, %v3440_v58  ;;  %v1704_v50 = vrot.slane %v1690_v36, %v10427_v12  ;;  %v3460_v11 = vmax.f32 %v3458_v3, %v3459_v4  ;;  %v845_v58 = vpop.f32.mrf.mxu0 }
 0x254   : > { %v11462_v20 = vsel %vm4249_vm2, %v3380_v6, -inf  ;;  %v3447_v54 = vrot.slane %v3446_v59, 2  ;;  %v3454_v53 = vrot.slane %v3453_v25, 2  ;;  %v1705_v30 = vcombine.high %v1697_v63, %v1697_v63 }
 0x255   : > { %v3409_v51 = vsel %vm2456_vm1, %v1697_v63, -inf  ;;  %v3442_v32 = vrot.slane %v3441_v56, 1  ;;  %v1706_v26 = vcombine.high %v1704_v50, %v1704_v50  ;;  %v3461_v49 = vrot.slane %v3460_v11, 2 }
 0x256   : > { %v3448_v16 = vmax.f32 %v3446_v59, %v3447_v54  ;;  %v3410_v48 = vrot.slane %v3409_v51, 4  ;;  %v3455_v5 = vmax.f32 %v3453_v25, %v3454_v53  ;;  %v3416_v23 = vsel %vm2456_vm1, %v1705_v30, -inf }
 0x257   : > { %v3423_v44 = vsel %vm2456_vm1, %v1704_v50, -inf  ;;  %v3443_v33 = vmax.f32 %v3441_v56, %v3442_v32  ;;  %v3417_v19 = vrot.slane %v3416_v23, 4  ;;  %v3462_v46 = vmax.f32 %v3460_v11, %v3461_v49 }
 0x258   : > { %v3449_v9 = vrot.slane %v3448_v16, 1  ;;  %v3411_v61 = vmax.f32 %v3409_v51, %v3410_v48  ;;  %v3456_v45 = vrot.slane %v3455_v5, 1  ;;  %v3424_v0 = vrot.slane %v3423_v44, 4 }
 0x259   : > { %v3430_v27 = vsel %vm2456_vm1, %v1706_v26, -inf  ;;  %v11470_v39 = vsel %vm4249_vm2, %v3443_v33, -inf  ;;  %v3418_v13 = vmax.f32 %v3416_v23, %v3417_v19  ;;  %v3463_v40 = vrot.slane %v3462_v46, 1 }
 0x25a   : > { %v3450_v7 = vmax.f32 %v3448_v16, %v3449_v9  ;;  %v3412_v62 = vrot.slane %v3411_v61, 2  ;;  %v3457_v2 = vmax.f32 %v3455_v5, %v3456_v45  ;;  %v4456_v36 = vmax.f32 %v11421_v31, %v11470_v39  ;;  %v9673_v5 = vpop.f32.mrf.mxu0 }
 0x25b   : > { %v3425_v55 = vmax.f32 %v3423_v44, %v3424_v0  ;;  %v3419_v14 = vrot.slane %v3418_v13, 2  ;;  %v3431_v15 = vrot.slane %v3430_v27, 4  ;;  %v3464_v41 = vmax.f32 %v3462_v46, %v3463_v40 }
 0x25c   : > { %v11475_v22 = vsel %vm4249_vm2, %v3450_v7, -inf  ;;  %v3413_v35 = vmax.f32 %v3411_v61, %v3412_v62  ;;  %v11480_v47 = vsel %vm4249_vm2, %v3457_v2, -inf  ;;  %v1741_v3 = vcombine.high %v11442_v1, %v11442_v1  ;;  %v11508_v2 = vld [vmem:[%s14754_s2] ss:$0 sm:$0xff]  ;;  %v855_v40 = vpop.f32.mrf.mxu0 }
 0x25d   : > { %v4459_v57 = vmax.f32 %v11427_v43, %v11475_v22  ;;  %v3426_v52 = vrot.slane %v3425_v55, 2  ;;  %v4462_v28 = vmax.f32 %v11432_v10, %v11480_v47  ;;  %v3420_v34 = vmax.f32 %v3418_v13, %v3419_v14 }
 0x25e   : > { %v3414_v17 = vrot.slane %v3413_v35, 1  ;;  %v3432_v24 = vmax.f32 %v3430_v27, %v3431_v15  ;;  %v11485_v37 = vsel %vm4249_vm2, %v3464_v41, -inf  ;;  %v1748_v6 = vrot.slane %v11442_v1, %v10427_v12 }
 0x25f   : > { %v3427_v21 = vmax.f32 %v3425_v55, %v3426_v52  ;;  %v4465_v59 = vmax.f32 %v11435_v18, %v11485_v37  ;;  %v3421_v4 = vrot.slane %v3420_v34, 1  ;;  %v1755_v54 = vrot.slane %v1741_v3, %v10427_v12 }
 0x260   : > { %v3415_v25 = vmax.f32 %v3413_v35, %v3414_v17  ;;  %v3433_v63 = vrot.slane %v3432_v24, 2  ;;  %v1756_v50 = vcombine.high %v1748_v6, %v1748_v6  ;;  %v3493_v53 = vsel %vm2456_vm1, %v1748_v6, -inf }
 0x261   : > { %v3428_v56 = vrot.slane %v3427_v21, 1  ;;  %v3422_v11 = vmax.f32 %v3420_v34, %v3421_v4  ;;  %v3494_v32 = vrot.slane %v3493_v53, 4  ;;  %v1757_v26 = vcombine.high %v1755_v54, %v1755_v54 }
 0x262   : > { %v3434_v30 = vmax.f32 %v3432_v24, %v3433_v63  ;;  %v4443_v51 = vsel %vm4249_vm2, %v3415_v25, -inf  ;;  %v3500_v48 = vsel %vm2456_vm1, %v1756_v50, -inf  ;;  %v3507_v19 = vsel %vm2456_vm1, %v1755_v54, -inf }
 0x263   : > { %v3429_v16 = vmax.f32 %v3427_v21, %v3428_v56  ;;  %v4444_v1 = vmax.f32 %v11450_v29, %v4443_v51  ;;  %v4446_v23 = vsel %vm4249_vm2, %v3422_v11, -inf  ;;  %v3495_v44 = vmax.f32 %v3493_v53, %v3494_v32 }
 0x264   : > { %v3435_v49 = vrot.slane %v3434_v30, 1  ;;  %v3501_v33 = vrot.slane %v3500_v48, 4  ;;  %v4447_v9 = vmax.f32 %v11455_v60, %v4446_v23  ;;  %v3514_v45 = vsel %vm2456_vm1, %v1757_v26, -inf }
 0x265   : > { %v4449_v61 = vsel %vm4249_vm2, %v3429_v16, -inf  ;;  %v3496_v0 = vrot.slane %v3495_v44, 2  ;;  %v3508_v62 = vrot.slane %v3507_v19, 4  ;;  %v3515_v13 = vrot.slane %v3514_v45, 4 }
 0x266   : > { %v3436_v46 = vmax.f32 %v3434_v30, %v3435_v49  ;;  %v4450_v29 = vmax.f32 %v11458_v42, %v4449_v61  ;;  %v3502_v27 = vmax.f32 %v3500_v48, %v3501_v33  ;;  %v4875_v7 = vsel %vm4812_vm3, %v4447_v9, %v4444_v1 }
 0x267   : > { %v846_v60 = vadd.f32 %v11508_v2, %v845_v58  ;;  %v3497_v14 = vmax.f32 %v3495_v44, %v3496_v0  ;;  %v3509_v41 = vmax.f32 %v3507_v19, %v3508_v62  ;;  %v3516_v52 = vmax.f32 %v3514_v45, %v3515_v13 }
 0x268   : > { %v4452_v55 = vsel %vm4249_vm2, %v3436_v46, -inf  ;;  %v4876_v35 = vsel %vm4814_vm4, %v4450_v29, %v4875_v7  ;;  %v3503_v42 = vrot.slane %v3502_v27, 2  ;;  %v861_v21 = vadd.f32 %v11508_v2, %v9673_v5 }
 0x269   : > { %v4453_v15 = vmax.f32 %v11462_v20, %v4452_v55  ;;  %v1020_v17 = vmax.f32 %v846_v60, 0.0  ;;  %v3498_v34 = vrot.slane %v3497_v14, 1  ;;  %v856_v3 = vadd.f32 %v11508_v2, %v855_v40 }
 0x26a   : > { %v3504_v24 = vmax.f32 %v3502_v27, %v3503_v42  ;;  %v3510_v58 = vrot.slane %v3509_v41, 2  ;;  %v3517_v25 = vrot.slane %v3516_v52, 2  ;;  %v1023_v5 = vmax.f32 %v861_v21, 0.0 }
 0x26b   : > { %v4877_v6 = vsel %vm4816_vm5, %v4453_v15, %v4876_v35  ;;  %v1724_v4 = vcombine.high %v1020_v17, %v1020_v17  ;;  %v3499_v20 = vmax.f32 %v3497_v14, %v3498_v34  ;;  %v1731_v54 = vrot.slane %v1020_v17, %v10427_v12 }
 0x26c   : > { %v4878_v63 = vsel %vm4818_vm6, %v4456_v36, %v4877_v6  ;;  %v3505_v56 = vrot.slane %v3504_v24, 1  ;;  %v3511_v53 = vmax.f32 %v3509_v41, %v3510_v58  ;;  %v3518_v11 = vmax.f32 %v3516_v52, %v3517_v25 }
 0x26d   : > { %v4879_v50 = vsel %vm4820_vm7, %v4459_v57, %v4878_v63  ;;  %v1738_v30 = vrot.slane %v1724_v4, %v10427_v12  ;;  %v11532_v36 = vsel %vm4249_vm2, %v3499_v20, -inf  ;;  %v1739_v51 = vcombine.high %v1731_v54, %v1731_v54 }
 0x26e   : > { %v4880_v31 = vsel %vm4822_vm8, %v4462_v28, %v4879_v50  ;;  %v3506_v39 = vmax.f32 %v3504_v24, %v3505_v56  ;;  %v3512_v22 = vrot.slane %v3511_v53, 1  ;;  %v3519_v57 = vrot.slane %v3518_v11, 1  ;;  %v5773_v50 = vld [vmem:[#allocation2 + $0x82] sm:$0xff] }
 0x26f   : > { %v4881_v43 = vsel %vm4824_vm9, %v4465_v59, %v4880_v31  ;;  %v1740_v32 = vcombine.high %v1738_v30, %v1738_v30  ;;  %v3465_v10 = vsel %vm2456_vm1, %v1731_v54, -inf  ;;  %v3472_v47 = vsel %vm2456_vm1, %v1739_v51, -inf  ;;  %9735 = vmatprep.mubr.msk.f32.mxu0 %vm4249_vm2, %v5773_v50 }
 0x270   : > { %4956 = vst.msk [vmem:[#allocation2 + $0xb1] sm:$0xff] %vm4249_vm2, %v4881_v43  ;;  %v11540_v16 = vsel %vm4249_vm2, %v3506_v39, -inf  ;;  %v3479_v28 = vsel %vm2456_vm1, %v1738_v30, -inf  ;;  %v3513_v1 = vmax.f32 %v3511_v53, %v3512_v22  ;;  %v3520_v26 = vmax.f32 %v3518_v11, %v3519_v57  ;;  %v9676_v57 = vpop.f32.mrf.mxu0 }
 0x271   : > { %v3466_v48 = vrot.slane %v3465_v10, 4  ;;  %v3473_v18 = vrot.slane %v3472_v47, 4  ;;  %v3480_v37 = vrot.slane %v3479_v28, 4  ;;  %v3486_v59 = vsel %vm2456_vm1, %v1740_v32, -inf }
 0x272   : > { %v1022_v49 = vmax.f32 %v856_v3, 0.0  ;;  %v11547_v23 = vsel %vm4249_vm2, %v3513_v1, -inf  ;;  %v11550_v44 = vsel %vm4249_vm2, %v3520_v26, -inf  ;;  %v3487_v19 = vrot.slane %v3486_v59, 4 }
 0x273   : > { %v3467_v33 = vmax.f32 %v3465_v10, %v3466_v48  ;;  %v3474_v9 = vmax.f32 %v3472_v47, %v3473_v18  ;;  %v3481_v61 = vmax.f32 %v3479_v28, %v3480_v37  ;;  %v1775_v45 = vcombine.high %v1023_v5, %v1023_v5 }
 0x274   : > { %v1782_v46 = vrot.slane %v1023_v5, %v10427_v12  ;;  %v1758_v27 = vcombine.high %v1022_v49, %v1022_v49  ;;  %v1765_v7 = vrot.slane %v1022_v49, %v10427_v12  ;;  %v3488_v13 = vmax.f32 %v3486_v59, %v3487_v19 }
 0x275   : > { %v3468_v29 = vrot.slane %v3467_v33, 2  ;;  %v3475_v0 = vrot.slane %v3474_v9, 2  ;;  %v3482_v62 = vrot.slane %v3481_v61, 2  ;;  %v1789_v60 = vrot.slane %v1775_v45, %v10427_v12  ;;  %v865_v45 = vpop.f32.mrf.mxu0 }
 0x276   : > { %v1790_v40 = vcombine.high %v1782_v46, %v1782_v46  ;;  %v3549_v14 = vsel %vm2456_vm1, %v1782_v46, -inf  ;;  %v1772_v42 = vrot.slane %v1758_v27, %v10427_v12  ;;  %v3489_v41 = vrot.slane %v3488_v13, 2 }
 0x277   : > { %v3469_v55 = vmax.f32 %v3467_v33, %v3468_v29  ;;  %v3476_v35 = vmax.f32 %v3474_v9, %v3475_v0  ;;  %v3483_v15 = vmax.f32 %v3481_v61, %v3482_v62  ;;  %v1791_v52 = vcombine.high %v1789_v60, %v1789_v60 }
 0x278   : > { %v3550_v17 = vrot.slane %v3549_v14, 4  ;;  %v3556_v21 = vsel %vm2456_vm1, %v1790_v40, -inf  ;;  %v3563_v3 = vsel %vm2456_vm1, %v1789_v60, -inf  ;;  %v3490_v58 = vmax.f32 %v3488_v13, %v3489_v41 }
 0x279   : > { %v3470_v34 = vrot.slane %v3469_v55, 1  ;;  %v3477_v24 = vrot.slane %v3476_v35, 1  ;;  %v3484_v6 = vrot.slane %v3483_v15, 1  ;;  %v3557_v4 = vrot.slane %v3556_v21, 4 }
 0x27a   : > { %v3551_v25 = vmax.f32 %v3549_v14, %v3550_v17  ;;  %v3564_v56 = vrot.slane %v3563_v3, 4  ;;  %v3570_v54 = vsel %vm2456_vm1, %v1791_v52, -inf  ;;  %v3491_v11 = vrot.slane %v3490_v58, 1 }
 0x27b   : > { %v3471_v63 = vmax.f32 %v3469_v55, %v3470_v34  ;;  %v3478_v20 = vmax.f32 %v3476_v35, %v3477_v24  ;;  %v3485_v53 = vmax.f32 %v3483_v15, %v3484_v6  ;;  %v3558_v31 = vmax.f32 %v3556_v21, %v3557_v4  ;;  %v9679_v34 = vpop.f32.mrf.mxu0  ;;  %v5272_v6 = vld [vmem:[#allocation2 + $0x51] sm:$0xff] }
 0x27c   : > { %v3552_v30 = vrot.slane %v3551_v25, 2  ;;  %v3565_v43 = vmax.f32 %v3563_v3, %v3564_v56  ;;  %v3571_v22 = vrot.slane %v3570_v54, 4  ;;  %v3492_v32 = vmax.f32 %v3490_v58, %v3491_v11 }
 0x27d   : > { %v11562_v39 = vsel %vm4249_vm2, %v3471_v63, -inf  ;;  %v11565_v51 = vsel %vm4249_vm2, %v3478_v20, -inf  ;;  %v11568_v10 = vsel %vm4249_vm2, %v3485_v53, -inf  ;;  %v3559_v28 = vrot.slane %v3558_v31, 2 }
 0x27e   : > { %v3553_v47 = vmax.f32 %v3551_v25, %v3552_v30  ;;  %v3566_v1 = vrot.slane %v3565_v43, 2  ;;  %v3572_v26 = vmax.f32 %v3570_v54, %v3571_v22  ;;  %v1773_v48 = vcombine.high %v1765_v7, %v1765_v7  ;;  %v875_v22 = vpop.f32.mrf.mxu0 }
 0x27f   : > { %v1774_v18 = vcombine.high %v1772_v42, %v1772_v42  ;;  %v11571_v37 = vsel %vm4249_vm2, %v3492_v32, -inf  ;;  %v3560_v5 = vmax.f32 %v3558_v31, %v3559_v28  ;;  %v3521_v49 = vsel %vm2456_vm1, %v1765_v7, -inf  ;;  %v10074_v31 = vld [vmem:[#allocation2 + $0x42] sm:$0xff] }
 0x280   : > { %v3554_v59 = vrot.slane %v3553_v47, 1  ;;  %v3567_v33 = vmax.f32 %v3565_v43, %v3566_v1  ;;  %v3573_v9 = vrot.slane %v3572_v26, 2  ;;  %v3522_v61 = vrot.slane %v3521_v49, 4 }
 0x281   : > { %v3528_v19 = vsel %vm2456_vm1, %v1773_v48, -inf  ;;  %v3561_v29 = vrot.slane %v3560_v5, 1  ;;  %v3535_v27 = vsel %vm2456_vm1, %v1772_v42, -inf  ;;  %v3542_v14 = vsel %vm2456_vm1, %v1774_v18, -inf }
 0x282   : > { %v3555_v46 = vmax.f32 %v3553_v47, %v3554_v59  ;;  %v3529_v0 = vrot.slane %v3528_v19, 4  ;;  %v3568_v62 = vrot.slane %v3567_v33, 1  ;;  %v3574_v13 = vmax.f32 %v3572_v26, %v3573_v9 }
 0x283   : > { %v3523_v60 = vmax.f32 %v3521_v49, %v3522_v61  ;;  %v3536_v40 = vrot.slane %v3535_v27, 4  ;;  %v3562_v55 = vmax.f32 %v3560_v5, %v3561_v29  ;;  %v3543_v3 = vrot.slane %v3542_v14, 4 }
 0x284   : > { %v11577_v35 = vsel %vm4249_vm2, %v3555_v46, -inf  ;;  %v3530_v7 = vmax.f32 %v3528_v19, %v3529_v0  ;;  %v3569_v15 = vmax.f32 %v3567_v33, %v3568_v62  ;;  %v3575_v41 = vrot.slane %v3574_v13, 1 }
 0x285   : > { %v4480_v52 = vmax.f32 %v11532_v36, %v11577_v35  ;;  %v3524_v17 = vrot.slane %v3523_v60, 2  ;;  %v11583_v42 = vsel %vm4249_vm2, %v3562_v55, -inf  ;;  %v3537_v21 = vmax.f32 %v3535_v27, %v3536_v40 }
 0x286   : > { %v3531_v24 = vrot.slane %v3530_v7, 2  ;;  %v3576_v58 = vmax.f32 %v3574_v13, %v3575_v41  ;;  %v4483_v25 = vmax.f32 %v11540_v16, %v11583_v42  ;;  %v11588_v4 = vsel %vm4249_vm2, %v3569_v15, -inf }
 0x287   : > { %v3525_v63 = vmax.f32 %v3523_v60, %v3524_v17  ;;  %v4486_v20 = vmax.f32 %v11547_v23, %v11588_v4  ;;  %v3538_v54 = vrot.slane %v3537_v21, 2  ;;  %v3544_v50 = vmax.f32 %v3542_v14, %v3543_v3 }
 0x288   : > { %v3532_v56 = vmax.f32 %v3530_v7, %v3531_v24  ;;  %v11593_v53 = vsel %vm4249_vm2, %v3576_v58, -inf  ;;  %v871_v30 = vadd.f32 %v11508_v2, %v9676_v57  ;;  %v9902_v43 = vpack.i.bf16 %v10074_v31, %v5272_v6 }
 0x289   : > { %v3526_v11 = vrot.slane %v3525_v63, 1  ;;  %v4489_v32 = vmax.f32 %v11550_v44, %v11593_v53  ;;  %v3539_v28 = vmax.f32 %v3537_v21, %v3538_v54  ;;  %v3545_v1 = vrot.slane %v3544_v50, 2 }
 0x28a   : > { %v3533_v47 = vrot.slane %v3532_v56, 1  ;;  %v1025_v48 = vmax.f32 %v871_v30, 0.0  ;;  %9903 = vrot.lane.b32.xlu1 %v9902_v43, %s14809_s17  ;;  %v866_v18 = vadd.f32 %v11508_v2, %v865_v45  ;;  %v881_v59 = vadd.f32 %v11508_v2, %v9679_v34 }
 0x28b   : > { %v3527_v26 = vmax.f32 %v3525_v63, %v3526_v11  ;;  %v3540_v49 = vrot.slane %v3539_v28, 1  ;;  %v3546_v57 = vmax.f32 %v3544_v50, %v3545_v1  ;;  %v11602_v33 = vadd.f32 %v11508_v2, %v875_v22 }
 0x28c   : > { %v3534_v5 = vmax.f32 %v3532_v56, %v3533_v47  ;;  %v1809_v44 = vcombine.high %v1025_v48, %v1025_v48  ;;  %v1816_v61 = vrot.slane %v1025_v48, %v10427_v12  ;;  %v1024_v19 = vmax.f32 %v866_v18, 0.0 }
 0x28d   : > { %v4467_v9 = vsel %vm4249_vm2, %v3527_v26, -inf  ;;  %v3541_v46 = vmax.f32 %v3539_v28, %v3540_v49  ;;  %v3547_v29 = vrot.slane %v3546_v57, 1  ;;  %v1027_v31 = vmax.f32 %v881_v59, 0.0 }
 0x28e   : > { %v4468_v0 = vmax.f32 %v11562_v39, %v4467_v9  ;;  %v4470_v45 = vsel %vm4249_vm2, %v3534_v5, -inf  ;;  %v1823_v62 = vrot.slane %v1809_v44, %v10427_v12  ;;  %v1824_v13 = vcombine.high %v1816_v61, %v1816_v61 }
 0x28f   : > { %v4471_v27 = vmax.f32 %v11565_v51, %v4470_v45  ;;  %v3605_v60 = vsel %vm2456_vm1, %v1816_v61, -inf  ;;  %v3548_v40 = vmax.f32 %v3546_v57, %v3547_v29  ;;  %v4473_v55 = vsel %vm4249_vm2, %v3541_v46, -inf }
 0x290   : > { %v3606_v7 = vrot.slane %v3605_v60, 4  ;;  %v1792_v14 = vcombine.high %v1024_v19, %v1024_v19  ;;  %v4474_v15 = vmax.f32 %v11568_v10, %v4473_v55  ;;  %v1825_v17 = vcombine.high %v1823_v62, %v1823_v62 }
 0x291   : > { %v4882_v41 = vsel %vm4812_vm3, %v4471_v27, %v4468_v0  ;;  %v3612_v39 = vsel %vm2456_vm1, %v1824_v13, -inf  ;;  %v4476_v34 = vsel %vm4249_vm2, %v3548_v40, -inf  ;;  %v3619_v21 = vsel %vm2456_vm1, %v1823_v62, -inf }
 0x292   : > { %v3607_v51 = vmax.f32 %v3605_v60, %v3606_v7  ;;  %v3613_v24 = vrot.slane %v3612_v39, 4  ;;  %v4477_v3 = vmax.f32 %v11571_v37, %v4476_v34  ;;  %v4883_v6 = vsel %vm4814_vm4, %v4474_v15, %v4882_v41 }
 0x293   : > { %v3620_v58 = vrot.slane %v3619_v21, 4  ;;  %v3626_v63 = vsel %vm2456_vm1, %v1825_v17, -inf  ;;  %v1799_v50 = vrot.slane %v1024_v19, %v10427_v12  ;;  %v1806_v30 = vrot.slane %v1792_v14, %v10427_v12 }
 0x294   : > { %v3608_v56 = vrot.slane %v3607_v51, 2  ;;  %v3614_v10 = vmax.f32 %v3612_v39, %v3613_v24  ;;  %v3627_v54 = vrot.slane %v3626_v63, 4  ;;  %v4884_v53 = vsel %vm4816_vm5, %v4477_v3, %v4883_v6 }
 0x295   : > { %v3621_v11 = vmax.f32 %v3619_v21, %v3620_v58  ;;  %v4885_v37 = vsel %vm4818_vm6, %v4480_v52, %v4884_v53  ;;  %v1807_v26 = vcombine.high %v1799_v50, %v1799_v50  ;;  %v1808_v48 = vcombine.high %v1806_v30, %v1806_v30 }
 0x296   : > { %v3609_v43 = vmax.f32 %v3607_v51, %v3608_v56  ;;  %v3615_v22 = vrot.slane %v3614_v10, 2  ;;  %v3628_v47 = vmax.f32 %v3626_v63, %v3627_v54  ;;  %v4886_v28 = vsel %vm4820_vm7, %v4483_v25, %v4885_v37 }
 0x297   : > { %v3622_v1 = vrot.slane %v3621_v11, 2  ;;  %v4887_v18 = vsel %vm4822_vm8, %v4486_v20, %v4886_v28  ;;  %v3577_v49 = vsel %vm2456_vm1, %v1799_v50, -inf  ;;  %v3584_v16 = vsel %vm2456_vm1, %v1807_v26, -inf }
 0x298   : > { %v3610_v59 = vrot.slane %v3609_v43, 1  ;;  %v3616_v36 = vmax.f32 %v3614_v10, %v3615_v22  ;;  %v3629_v35 = vrot.slane %v3628_v47, 2  ;;  %v4888_v52 = vsel %vm4824_vm9, %v4489_v32, %v4887_v18 }
 0x299   : > { %v3623_v5 = vmax.f32 %v3621_v11, %v3622_v1  ;;  %4957 = vst.msk [vmem:[#allocation2 + $0xc1] sm:$0xff] %vm4249_vm2, %v4888_v52  ;;  %v3578_v9 = vrot.slane %v3577_v49, 4  ;;  %v3585_v23 = vrot.slane %v3584_v16, 4  ;;  %v3591_v4 = vsel %vm2456_vm1, %v1806_v30, -inf }
 0x29a   : > { %v3611_v42 = vmax.f32 %v3609_v43, %v3610_v59  ;;  %v3617_v25 = vrot.slane %v3616_v36, 1  ;;  %v3630_v57 = vmax.f32 %v3628_v47, %v3629_v35  ;;  %v3598_v20 = vsel %vm2456_vm1, %v1808_v48, -inf }
 0x29b   : > { %v3624_v44 = vrot.slane %v3623_v5, 1  ;;  %v3579_v46 = vmax.f32 %v3577_v49, %v3578_v9  ;;  %v3586_v0 = vmax.f32 %v3584_v16, %v3585_v23  ;;  %v3592_v45 = vrot.slane %v3591_v4, 4 }
 0x29c   : > { %v3618_v61 = vmax.f32 %v3616_v36, %v3617_v25  ;;  %v3631_v19 = vrot.slane %v3630_v57, 1  ;;  %v11642_v32 = vsel %vm4249_vm2, %v3611_v42, -inf  ;;  %v3599_v27 = vrot.slane %v3598_v20, 4  ;;  %v9682_v42 = vpop.f32.mrf.mxu0 }
 0x29d   : > { %v3625_v29 = vmax.f32 %v3623_v5, %v3624_v44  ;;  %v3580_v60 = vrot.slane %v3579_v46, 2  ;;  %v1843_v40 = vcombine.high %v1027_v31, %v1027_v31  ;;  %v3587_v7 = vrot.slane %v3586_v0, 2 }
 0x29e   : > { %v3632_v62 = vmax.f32 %v3630_v57, %v3631_v19  ;;  %v11645_v13 = vsel %vm4249_vm2, %v3618_v61, -inf  ;;  %v3593_v14 = vmax.f32 %v3591_v4, %v3592_v45  ;;  %v3600_v15 = vmax.f32 %v3598_v20, %v3599_v27 }
 0x29f   : > { %v11648_v55 = vsel %vm4249_vm2, %v3625_v29, -inf  ;;  %v3581_v17 = vmax.f32 %v3579_v46, %v3580_v60  ;;  %v1850_v39 = vrot.slane %v1027_v31, %v10427_v12  ;;  %v1857_v34 = vrot.slane %v1843_v40, %v10427_v12 }
 0x2a0   : > { %v11651_v41 = vsel %vm4249_vm2, %v3632_v62, -inf  ;;  %v3588_v51 = vmax.f32 %v3586_v0, %v3587_v7  ;;  %v3594_v24 = vrot.slane %v3593_v14, 2  ;;  %v3601_v21 = vrot.slane %v3600_v15, 2 }
 0x2a1   : > { %v1026_v3 = vmax.f32 %v11602_v33, 0.0  ;;  %v3582_v6 = vrot.slane %v3581_v17, 1  ;;  %v1858_v58 = vcombine.high %v1850_v39, %v1850_v39  ;;  %v1859_v63 = vcombine.high %v1857_v34, %v1857_v34 }
 0x2a2   : > { %v3661_v56 = vsel %vm2456_vm1, %v1850_v39, -inf  ;;  %v3589_v10 = vrot.slane %v3588_v51, 1  ;;  %v3595_v54 = vmax.f32 %v3593_v14, %v3594_v24  ;;  %v3602_v50 = vmax.f32 %v3600_v15, %v3601_v21 }
 0x2a3   : > { %v3662_v53 = vrot.slane %v3661_v56, 4  ;;  %v3583_v11 = vmax.f32 %v3581_v17, %v3582_v6  ;;  %v3668_v30 = vsel %vm2456_vm1, %v1858_v58, -inf  ;;  %v3675_v31 = vsel %vm2456_vm1, %v1857_v34, -inf }
 0x2a4   : > { %v3682_v37 = vsel %vm2456_vm1, %v1859_v63, -inf  ;;  %v3590_v43 = vmax.f32 %v3588_v51, %v3589_v10  ;;  %v3596_v22 = vrot.slane %v3595_v54, 1  ;;  %v3603_v47 = vrot.slane %v3602_v50, 1 }
 0x2a5   : > { %v3663_v33 = vmax.f32 %v3661_v56, %v3662_v53  ;;  %v11661_v28 = vsel %vm4249_vm2, %v3583_v11, -inf  ;;  %v3669_v1 = vrot.slane %v3668_v30, 4  ;;  %v3676_v26 = vrot.slane %v3675_v31, 4 }
 0x2a6   : > { %v3683_v48 = vrot.slane %v3682_v37, 4  ;;  %v3597_v18 = vmax.f32 %v3595_v54, %v3596_v22  ;;  %v3604_v59 = vmax.f32 %v3602_v50, %v3603_v47  ;;  %v11664_v36 = vsel %vm4249_vm2, %v3590_v43, -inf  ;;  %v5273_v22 = vld [vmem:[#allocation2 + $0x61] sm:$0xff]  ;;  %v885_v47 = vpop.f32.mrf.mxu0 }
 0x2a7   : > { %v3664_v35 = vrot.slane %v3663_v33, 2  ;;  %v3670_v52 = vmax.f32 %v3668_v30, %v3669_v1  ;;  %v3677_v5 = vmax.f32 %v3675_v31, %v3676_v26  ;;  %v1826_v16 = vcombine.high %v1026_v3, %v1026_v3 }
 0x2a8   : > { %v3684_v49 = vmax.f32 %v3682_v37, %v3683_v48  ;;  %v11667_v25 = vsel %vm4249_vm2, %v3597_v18, -inf  ;;  %v11670_v57 = vsel %vm4249_vm2, %v3604_v59, -inf  ;;  %v1833_v44 = vrot.slane %v1026_v3, %v10427_v12 }
 0x2a9   : > { %v3665_v9 = vmax.f32 %v3663_v33, %v3664_v35  ;;  %v3671_v23 = vrot.slane %v3670_v52, 2  ;;  %v3678_v4 = vrot.slane %v3677_v5, 2  ;;  %v1840_v61 = vrot.slane %v1826_v16, %v10427_v12  ;;  %v10075_v16 = vld [vmem:[#allocation2 + $0x52] sm:$0xff] }
 0x2aa   : > { %v3685_v20 = vrot.slane %v3684_v49, 2  ;;  %v1841_v46 = vcombine.high %v1833_v44, %v1833_v44  ;;  %v3633_v29 = vsel %vm2456_vm1, %v1833_v44, -inf  ;;  %v891_v0 = vadd.f32 %v11508_v2, %v9682_v42 }
 0x2ab   : > { %v3666_v19 = vrot.slane %v3665_v9, 1  ;;  %v3672_v45 = vmax.f32 %v3670_v52, %v3671_v23  ;;  %v3679_v27 = vmax.f32 %v3677_v5, %v3678_v4  ;;  %v1842_v60 = vcombine.high %v1840_v61, %v1840_v61 }
 0x2ac   : > { %v3686_v62 = vmax.f32 %v3684_v49, %v3685_v20  ;;  %v3634_v7 = vrot.slane %v3633_v29, 4  ;;  %v3640_v14 = vsel %vm2456_vm1, %v1841_v46, -inf  ;;  %v3647_v15 = vsel %vm2456_vm1, %v1840_v61, -inf }
 0x2ad   : > { %v3667_v40 = vmax.f32 %v3665_v9, %v3666_v19  ;;  %v3673_v17 = vrot.slane %v3672_v45, 1  ;;  %v3680_v39 = vrot.slane %v3679_v27, 1  ;;  %v3641_v51 = vrot.slane %v3640_v14, 4 }
 0x2ae   : > { %v3687_v34 = vrot.slane %v3686_v62, 1  ;;  %v3635_v21 = vmax.f32 %v3633_v29, %v3634_v7  ;;  %v3648_v3 = vrot.slane %v3647_v15, 4  ;;  %v3654_v6 = vsel %vm2456_vm1, %v1842_v60, -inf }
 0x2af   : > { %v11679_v24 = vsel %vm4249_vm2, %v3667_v40, -inf  ;;  %v3674_v58 = vmax.f32 %v3672_v45, %v3673_v17  ;;  %v3681_v63 = vmax.f32 %v3679_v27, %v3680_v39  ;;  %v3642_v50 = vmax.f32 %v3640_v14, %v3641_v51 }
 0x2b0   : > { %v3688_v56 = vmax.f32 %v3686_v62, %v3687_v34  ;;  %v4504_v10 = vmax.f32 %v11642_v32, %v11679_v24  ;;  %v3636_v54 = vrot.slane %v3635_v21, 2  ;;  %v3649_v53 = vmax.f32 %v3647_v15, %v3648_v3 }
 0x2b1   : > { %v3655_v11 = vrot.slane %v3654_v6, 4  ;;  %v11685_v30 = vsel %vm4249_vm2, %v3674_v58, -inf  ;;  %v11688_v31 = vsel %vm4249_vm2, %v3681_v63, -inf  ;;  %v1029_v43 = vmax.f32 %v891_v0, 0.0 }
 0x2b2   : > { %v11691_v37 = vsel %vm4249_vm2, %v3688_v56, -inf  ;;  %v4507_v33 = vmax.f32 %v11645_v13, %v11685_v30  ;;  %v4510_v1 = vmax.f32 %v11648_v55, %v11688_v31  ;;  %v3637_v48 = vmax.f32 %v3635_v21, %v3636_v54 }
 0x2b3   : > { %v4513_v26 = vmax.f32 %v11651_v41, %v11691_v37  ;;  %v3643_v18 = vrot.slane %v3642_v50, 2  ;;  %v3650_v59 = vrot.slane %v3649_v53, 2  ;;  %v3656_v35 = vmax.f32 %v3654_v6, %v3655_v11 }
 0x2b4   : > { %v1877_v52 = vcombine.high %v1029_v43, %v1029_v43  ;;  %v3638_v5 = vrot.slane %v3637_v48, 1  ;;  %v1884_v49 = vrot.slane %v1029_v43, %v10427_v12  ;;  %v9907_v42 = vpack.i.bf16 %v10075_v16, %v5273_v22 }
 0x2b5   : > { %v886_v9 = vadd.f32 %v11508_v2, %v885_v47  ;;  %v3644_v44 = vmax.f32 %v3642_v50, %v3643_v18  ;;  %v3651_v23 = vmax.f32 %v3649_v53, %v3650_v59  ;;  %v3657_v4 = vrot.slane %v3656_v35, 2 }
 0x2b6   : > { %v1891_v20 = vrot.slane %v1877_v52, %v10427_v12  ;;  %v3639_v61 = vmax.f32 %v3637_v48, %v3638_v5  ;;  %v1892_v19 = vcombine.high %v1884_v49, %v1884_v49  ;;  %v3717_v46 = vsel %vm2456_vm1, %v1884_v49, -inf  ;;  %9908 = vrot.lane.b32.xlu0 %v9907_v42, %s14809_s17  ;;  %v9685_v5 = vpop.f32.mrf.mxu0 }
 0x2b7   : > { %v1028_v29 = vmax.f32 %v886_v9, 0.0  ;;  %v3645_v0 = vrot.slane %v3644_v44, 1  ;;  %v3652_v45 = vrot.slane %v3651_v23, 1  ;;  %v3658_v27 = vmax.f32 %v3656_v35, %v3657_v4 }
 0x2b8   : > { %v1893_v62 = vcombine.high %v1891_v20, %v1891_v20  ;;  %v4491_v60 = vsel %vm4249_vm2, %v3639_v61, -inf  ;;  %v3718_v40 = vrot.slane %v3717_v46, 4  ;;  %v3724_v7 = vsel %vm2456_vm1, %v1892_v19, -inf }
 0x2b9   : > { %v3731_v14 = vsel %vm2456_vm1, %v1891_v20, -inf  ;;  %v3646_v15 = vmax.f32 %v3644_v44, %v3645_v0  ;;  %v3653_v17 = vmax.f32 %v3651_v23, %v3652_v45  ;;  %v3659_v39 = vrot.slane %v3658_v27, 1  ;;  %v895_v45 = vpop.f32.mrf.mxu0 }
 0x2ba   : > { %v4492_v34 = vmax.f32 %v11661_v28, %v4491_v60  ;;  %v3719_v51 = vmax.f32 %v3717_v46, %v3718_v40  ;;  %v3725_v21 = vrot.slane %v3724_v7, 4  ;;  %v3732_v3 = vrot.slane %v3731_v14, 4 }
 0x2bb   : > { %v3738_v6 = vsel %vm2456_vm1, %v1893_v62, -inf  ;;  %v3660_v58 = vmax.f32 %v3658_v27, %v3659_v39  ;;  %v4494_v63 = vsel %vm4249_vm2, %v3646_v15, -inf  ;;  %v4497_v56 = vsel %vm4249_vm2, %v3653_v17, -inf }
 0x2bc   : > { %v3739_v54 = vrot.slane %v3738_v6, 4  ;;  %v4495_v50 = vmax.f32 %v11664_v36, %v4494_v63  ;;  %v4498_v53 = vmax.f32 %v11667_v25, %v4497_v56  ;;  %v3720_v11 = vrot.slane %v3719_v51, 2 }
 0x2bd   : > { %v3726_v43 = vmax.f32 %v3724_v7, %v3725_v21  ;;  %v4500_v22 = vsel %vm4249_vm2, %v3660_v58, -inf  ;;  %v3733_v28 = vmax.f32 %v3731_v14, %v3732_v3  ;;  %v1860_v48 = vcombine.high %v1028_v29, %v1028_v29  ;;  %v5274_v14 = vld [vmem:[#allocation2 + $0x71] sm:$0xff] }
 0x2be   : > { %v3740_v47 = vmax.f32 %v3738_v6, %v3739_v54  ;;  %v4501_v18 = vmax.f32 %v11670_v57, %v4500_v22  ;;  %v4889_v59 = vsel %vm4812_vm3, %v4495_v50, %v4492_v34  ;;  %v3721_v35 = vmax.f32 %v3719_v51, %v3720_v11  ;;  %v10076_v54 = vld [vmem:[#allocation2 + $0x62] sm:$0xff] }
 0x2bf   : > { %v3727_v52 = vrot.slane %v3726_v43, 2  ;;  %v4890_v49 = vsel %vm4814_vm4, %v4498_v53, %v4889_v59  ;;  %v3734_v16 = vrot.slane %v3733_v28, 2  ;;  %v1867_v25 = vrot.slane %v1028_v29, %v10427_v12  ;;  %v5774_v53 = vld [vmem:[#allocation2 + $0x92] sm:$0xff] }
 0x2c0   : > { %v3741_v36 = vrot.slane %v3740_v47, 2  ;;  %v4891_v42 = vsel %vm4816_vm5, %v4501_v18, %v4890_v49  ;;  %v3722_v9 = vrot.slane %v3721_v35, 1  ;;  %v1874_v23 = vrot.slane %v1860_v48, %v10427_v12  ;;  %9736 = vmatmul.mubr.msk.f32.gmra.mxu0 %vm4249_vm2, %v5774_v53 }
 0x2c1   : > { %v3728_v44 = vmax.f32 %v3726_v43, %v3727_v52  ;;  %v4892_v57 = vsel %vm4818_vm6, %v4504_v10, %v4891_v42  ;;  %v3735_v4 = vmax.f32 %v3733_v28, %v3734_v16  ;;  %v1875_v61 = vcombine.high %v1867_v25, %v1867_v25 }
 0x2c2   : > { %v3742_v20 = vmax.f32 %v3740_v47, %v3741_v36  ;;  %v4893_v19 = vsel %vm4820_vm7, %v4507_v33, %v4892_v57  ;;  %v3723_v46 = vmax.f32 %v3721_v35, %v3722_v9  ;;  %v1876_v0 = vcombine.high %v1874_v23, %v1874_v23 }
 0x2c3   : > { %v3729_v29 = vrot.slane %v3728_v44, 1  ;;  %v4894_v27 = vsel %vm4822_vm8, %v4510_v1, %v4893_v19  ;;  %v3736_v32 = vrot.slane %v3735_v4, 1  ;;  %v3689_v10 = vsel %vm2456_vm1, %v1867_v25, -inf  ;;  %v5775_v19 = vld [vmem:[#allocation2 + $0xc2] sm:$0xff] }
 0x2c4   : > { %v3743_v24 = vrot.slane %v3742_v20, 1  ;;  %v4895_v13 = vsel %vm4824_vm9, %v4513_v26, %v4894_v27  ;;  %v11738_v33 = vsel %vm4249_vm2, %v3723_v46, -inf  ;;  %v3690_v62 = vrot.slane %v3689_v10, 4  ;;  %v9688_v26 = vpop.f32.mrf.mxu0  ;;  %9738 = vmatprep.mubr.msk.f32.mxu0 %vm4249_vm2, %v5775_v19 }
 0x2c5   : > { %v3730_v30 = vmax.f32 %v3728_v44, %v3729_v29  ;;  %4958 = vst.msk [vmem:[#allocation2 + $0xd1] sm:$0xff] %vm4249_vm2, %v4895_v13  ;;  %v3737_v60 = vmax.f32 %v3735_v4, %v3736_v32  ;;  %v3696_v31 = vsel %vm2456_vm1, %v1875_v61, -inf  ;;  %v3703_v1 = vsel %vm2456_vm1, %v1874_v23, -inf }
 0x2c6   : > { %v3744_v55 = vmax.f32 %v3742_v20, %v3743_v24  ;;  %v3691_v7 = vmax.f32 %v3689_v10, %v3690_v62  ;;  %v3697_v41 = vrot.slane %v3696_v31, 4  ;;  %v3704_v37 = vrot.slane %v3703_v1, 4 }
 0x2c7   : > { %v11744_v40 = vsel %vm4249_vm2, %v3730_v30, -inf  ;;  %v11747_v15 = vsel %vm4249_vm2, %v3737_v60, -inf  ;;  %v3710_v39 = vsel %vm2456_vm1, %v1876_v0, -inf  ;;  %v901_v34 = vadd.f32 %v11508_v2, %v9685_v5 }
 0x2c8   : > { %v11750_v17 = vsel %vm4249_vm2, %v3744_v55, -inf  ;;  %v3692_v51 = vrot.slane %v3691_v7, 2  ;;  %v3698_v21 = vmax.f32 %v3696_v31, %v3697_v41  ;;  %v3705_v3 = vmax.f32 %v3703_v1, %v3704_v37 }
 0x2c9   : > { %v3711_v6 = vrot.slane %v3710_v39, 4  ;;  %v1031_v58 = vmax.f32 %v901_v34, 0.0  ;;  %v896_v63 = vadd.f32 %v11508_v2, %v895_v45  ;;  %v911_v56 = vadd.f32 %v11508_v2, %v9688_v26 }
 0x2ca   : > { %v9912_v50 = vpack.i.bf16 %v10076_v54, %v5274_v14  ;;  %v3693_v11 = vmax.f32 %v3691_v7, %v3692_v51  ;;  %v3699_v43 = vrot.slane %v3698_v21, 2  ;;  %v3706_v22 = vrot.slane %v3705_v3, 2 }
 0x2cb   : > { %v3712_v28 = vmax.f32 %v3710_v39, %v3711_v6  ;;  %v1911_v47 = vcombine.high %v1031_v58, %v1031_v58  ;;  %v1918_v48 = vrot.slane %v1031_v58, %v10427_v12  ;;  %v1030_v18 = vmax.f32 %v896_v63, 0.0 }
 0x2cc   : > { %v11758_v59 = vmax.f32 %v911_v56, 0.0  ;;  %9913 = vrot.lane.b32.xlu1 %v9912_v50, %s14809_s17  ;;  %v3694_v35 = vrot.slane %v3693_v11, 1  ;;  %v3700_v52 = vmax.f32 %v3698_v21, %v3699_v43  ;;  %v3707_v2 = vmax.f32 %v3705_v3, %v3706_v22 }
 0x2cd   : > { %v3713_v5 = vrot.slane %v3712_v28, 2  ;;  %v1925_v49 = vrot.slane %v1911_v47, %v10427_v12  ;;  %v1926_v16 = vcombine.high %v1918_v48, %v1918_v48  ;;  %v3773_v36 = vsel %vm2456_vm1, %v1918_v48, -inf }
 0x2ce   : > { %v1894_v25 = vcombine.high %v1030_v18, %v1030_v18  ;;  %v3695_v42 = vmax.f32 %v3693_v11, %v3694_v35  ;;  %v3701_v9 = vrot.slane %v3700_v52, 1  ;;  %v3708_v44 = vrot.slane %v3707_v2, 1 }
 0x2cf   : > { %v3714_v23 = vmax.f32 %v3712_v28, %v3713_v5  ;;  %v1927_v57 = vcombine.high %v1925_v49, %v1925_v49  ;;  %v3774_v4 = vrot.slane %v3773_v36, 4  ;;  %v3780_v20 = vsel %vm2456_vm1, %v1926_v16, -inf  ;;  %v905_v16 = vpop.f32.mrf.mxu0 }
 0x2d0   : > { %v3787_v61 = vsel %vm2456_vm1, %v1925_v49, -inf  ;;  %v3702_v46 = vmax.f32 %v3700_v52, %v3701_v9  ;;  %v3709_v29 = vmax.f32 %v3707_v2, %v3708_v44  ;;  %v11766_v45 = vsel %vm4249_vm2, %v3695_v42, -inf }
 0x2d1   : > { %v3715_v0 = vrot.slane %v3714_v23, 1  ;;  %v3775_v27 = vmax.f32 %v3773_v36, %v3774_v4  ;;  %v3781_v32 = vrot.slane %v3780_v20, 4  ;;  %v3788_v24 = vrot.slane %v3787_v61, 4 }
 0x2d2   : > { %v3794_v10 = vsel %vm2456_vm1, %v1927_v57, -inf  ;;  %v11771_v30 = vsel %vm4249_vm2, %v3702_v46, -inf  ;;  %v11774_v62 = vsel %vm4249_vm2, %v3709_v29, -inf  ;;  %v1901_v7 = vrot.slane %v1030_v18, %v10427_v12 }
 0x2d3   : > { %v3716_v13 = vmax.f32 %v3714_v23, %v3715_v0  ;;  %v3795_v60 = vrot.slane %v3794_v10, 4  ;;  %v3776_v55 = vrot.slane %v3775_v27, 2  ;;  %v3782_v31 = vmax.f32 %v3780_v20, %v3781_v32 }
 0x2d4   : > { %v3789_v1 = vmax.f32 %v3787_v61, %v3788_v24  ;;  %v1908_v26 = vrot.slane %v1894_v25, %v10427_v12  ;;  %v1945_v14 = vcombine.high %v11758_v59, %v11758_v59  ;;  %v1909_v21 = vcombine.high %v1901_v7, %v1901_v7  ;;  %v9691_v24 = vpop.f32.mrf.mxu0 }
 0x2d5   : > { %v11778_v41 = vsel %vm4249_vm2, %v3716_v13, -inf  ;;  %v3796_v37 = vmax.f32 %v3794_v10, %v3795_v60  ;;  %v3777_v39 = vmax.f32 %v3775_v27, %v3776_v55  ;;  %v3783_v34 = vrot.slane %v3782_v31, 2 }
 0x2d6   : > { %v3790_v51 = vrot.slane %v3789_v1, 2  ;;  %v1910_v6 = vcombine.high %v1908_v26, %v1908_v26  ;;  %v3745_v58 = vsel %vm2456_vm1, %v1901_v7, -inf  ;;  %v3759_v63 = vsel %vm2456_vm1, %v1908_v26, -inf }
 0x2d7   : > { %v3797_v3 = vrot.slane %v3796_v37, 2  ;;  %v3778_v56 = vrot.slane %v3777_v39, 1  ;;  %v3784_v54 = vmax.f32 %v3782_v31, %v3783_v34  ;;  %v3746_v53 = vrot.slane %v3745_v58, 4 }
 0x2d8   : > { %v3791_v50 = vmax.f32 %v3789_v1, %v3790_v51  ;;  %v3752_v43 = vsel %vm2456_vm1, %v1909_v21, -inf  ;;  %v3760_v22 = vrot.slane %v3759_v63, 4  ;;  %v3766_v28 = vsel %vm2456_vm1, %v1910_v6, -inf }
 0x2d9   : > { %v3798_v11 = vmax.f32 %v3796_v37, %v3797_v3  ;;  %v3779_v47 = vmax.f32 %v3777_v39, %v3778_v56  ;;  %v3785_v48 = vrot.slane %v3784_v54, 1  ;;  %v3747_v35 = vmax.f32 %v3745_v58, %v3746_v53  ;;  %v11813_v37 = vld [vmem:[%s14754_s2] ss:$0 sm:$0xff] }
 0x2da   : > { %v3792_v18 = vrot.slane %v3791_v50, 1  ;;  %v3753_v2 = vrot.slane %v3752_v43, 4  ;;  %v3761_v5 = vmax.f32 %v3759_v63, %v3760_v22  ;;  %v3767_v49 = vrot.slane %v3766_v28, 4 }
 0x2db   : > { %v3799_v52 = vrot.slane %v3798_v11, 1  ;;  %v3786_v36 = vmax.f32 %v3784_v54, %v3785_v48  ;;  %v11788_v42 = vsel %vm4249_vm2, %v3779_v47, -inf  ;;  %v3748_v9 = vrot.slane %v3747_v35, 2 }
 0x2dc   : > { %v3793_v25 = vmax.f32 %v3791_v50, %v3792_v18  ;;  %v4528_v23 = vmax.f32 %v11738_v33, %v11788_v42  ;;  %v3754_v57 = vmax.f32 %v3752_v43, %v3753_v2  ;;  %v3762_v4 = vrot.slane %v3761_v5, 2 }
 0x2dd   : > { %v3800_v44 = vmax.f32 %v3798_v11, %v3799_v52  ;;  %v11793_v20 = vsel %vm4249_vm2, %v3786_v36, -inf  ;;  %v3749_v19 = vmax.f32 %v3747_v35, %v3748_v9  ;;  %v3768_v46 = vmax.f32 %v3766_v28, %v3767_v49 }
 0x2de   : > { %v11796_v61 = vsel %vm4249_vm2, %v3793_v25, -inf  ;;  %v4531_v29 = vmax.f32 %v11744_v40, %v11793_v20  ;;  %v3755_v32 = vrot.slane %v3754_v57, 2  ;;  %v3763_v60 = vmax.f32 %v3761_v5, %v3762_v4 }
 0x2df   : > { %v4534_v0 = vmax.f32 %v11747_v15, %v11796_v61  ;;  %v11803_v27 = vsel %vm4249_vm2, %v3800_v44, -inf  ;;  %v3750_v13 = vrot.slane %v3749_v19, 1  ;;  %v3769_v55 = vrot.slane %v3768_v46, 2 }
 0x2e0   : > { %v4537_v10 = vmax.f32 %v11750_v17, %v11803_v27  ;;  %v3756_v31 = vmax.f32 %v3754_v57, %v3755_v32  ;;  %v1952_v1 = vrot.slane %v11758_v59, %v10427_v12  ;;  %v1959_v7 = vrot.slane %v1945_v14, %v10427_v12 }
 0x2e1   : > { %v906_v26 = vadd.f32 %v11813_v37, %v905_v16  ;;  %v3751_v39 = vmax.f32 %v3749_v19, %v3750_v13  ;;  %v3764_v34 = vrot.slane %v3763_v60, 1  ;;  %v3770_v51 = vmax.f32 %v3768_v46, %v3769_v55 }
 0x2e2   : > { %v921_v21 = vadd.f32 %v11813_v37, %v9691_v24  ;;  %v3757_v3 = vrot.slane %v3756_v31, 1  ;;  %v1960_v6 = vcombine.high %v1952_v1, %v1952_v1  ;;  %v1961_v58 = vcombine.high %v1959_v7, %v1959_v7 }
 0x2e3   : > { %v3829_v63 = vsel %vm2456_vm1, %v1952_v1, -inf  ;;  %v3765_v59 = vmax.f32 %v3763_v60, %v3764_v34  ;;  %v3771_v56 = vrot.slane %v3770_v51, 1  ;;  %v4515_v14 = vsel %vm4249_vm2, %v3751_v39, -inf }
 0x2e4   : > { %v3830_v54 = vrot.slane %v3829_v63, 4  ;;  %v3758_v50 = vmax.f32 %v3756_v31, %v3757_v3  ;;  %v4516_v53 = vmax.f32 %v11766_v45, %v4515_v14  ;;  %v3836_v11 = vsel %vm2456_vm1, %v1960_v6, -inf }
 0x2e5   : > { %v3843_v43 = vsel %vm2456_vm1, %v1959_v7, -inf  ;;  %v3772_v22 = vmax.f32 %v3770_v51, %v3771_v56  ;;  %v4521_v28 = vsel %vm4249_vm2, %v3765_v59, -inf  ;;  %v3837_v48 = vrot.slane %v3836_v11, 4 }
 0x2e6   : > { %v3831_v47 = vmax.f32 %v3829_v63, %v3830_v54  ;;  %v4518_v18 = vsel %vm4249_vm2, %v3758_v50, -inf  ;;  %v4522_v35 = vmax.f32 %v11774_v62, %v4521_v28  ;;  %v3844_v52 = vrot.slane %v3843_v43, 4 }
 0x2e7   : > { %v3850_v2 = vsel %vm2456_vm1, %v1961_v58, -inf  ;;  %v4519_v5 = vmax.f32 %v11771_v30, %v4518_v18  ;;  %v4524_v45 = vsel %vm4249_vm2, %v3772_v22, -inf  ;;  %v3838_v16 = vmax.f32 %v3836_v11, %v3837_v48 }
 0x2e8   : > { %v3832_v49 = vrot.slane %v3831_v47, 2  ;;  %v4525_v36 = vmax.f32 %v11778_v41, %v4524_v45  ;;  %v3845_v25 = vmax.f32 %v3843_v43, %v3844_v52  ;;  %v3851_v9 = vrot.slane %v3850_v2, 4 }
 0x2e9   : > { %v1032_v44 = vmax.f32 %v906_v26, 0.0  ;;  %v4896_v57 = vsel %vm4812_vm3, %v4519_v5, %v4516_v53  ;;  %v3839_v19 = vrot.slane %v3838_v16, 2  ;;  %v1035_v46 = vmax.f32 %v921_v21, 0.0 }
 0x2ea   : > { %v3833_v4 = vmax.f32 %v3831_v47, %v3832_v49  ;;  %v4897_v62 = vsel %vm4814_vm4, %v4522_v35, %v4896_v57  ;;  %v3846_v32 = vrot.slane %v3845_v25, 2  ;;  %v3852_v24 = vmax.f32 %v3850_v2, %v3851_v9 }
 0x2eb   : > { %v1928_v13 = vcombine.high %v1032_v44, %v1032_v44  ;;  %v4898_v30 = vsel %vm4816_vm5, %v4525_v36, %v4897_v62  ;;  %v3840_v55 = vmax.f32 %v3838_v16, %v3839_v19  ;;  %v1935_v31 = vrot.slane %v1032_v44, %v10427_v12 }
 0x2ec   : > { %v3834_v60 = vrot.slane %v3833_v4, 1  ;;  %v4899_v41 = vsel %vm4818_vm6, %v4528_v23, %v4898_v30  ;;  %v3847_v1 = vmax.f32 %v3845_v25, %v3846_v32  ;;  %v3853_v7 = vrot.slane %v3852_v24, 2 }
 0x2ed   : > { %v1942_v26 = vrot.slane %v1928_v13, %v10427_v12  ;;  %v4900_v39 = vsel %vm4820_vm7, %v4531_v29, %v4899_v41  ;;  %v3841_v51 = vrot.slane %v3840_v55, 1  ;;  %v1943_v21 = vcombine.high %v1935_v31, %v1935_v31 }
 0x2ee   : > { %v3835_v34 = vmax.f32 %v3833_v4, %v3834_v60  ;;  %v4901_v3 = vsel %vm4822_vm8, %v4534_v0, %v4900_v39  ;;  %v3848_v33 = vrot.slane %v3847_v1, 1  ;;  %v3854_v42 = vmax.f32 %v3852_v24, %v3853_v7 }
 0x2ef   : > { %v1944_v23 = vcombine.high %v1942_v26, %v1942_v26  ;;  %v4902_v6 = vsel %vm4824_vm9, %v4537_v10, %v4901_v3  ;;  %v3842_v58 = vmax.f32 %v3840_v55, %v3841_v51  ;;  %v3801_v20 = vsel %vm2456_vm1, %v1935_v31, -inf  ;;  %v915_v10 = vpop.f32.mrf.mxu0 }
 0x2f0   : > { %v11851_v40 = vsel %vm4249_vm2, %v3835_v34, -inf  ;;  %4959 = vst.msk [vmem:[#allocation2 + $0xe1] sm:$0xff] %vm4249_vm2, %v4902_v6  ;;  %v3849_v29 = vmax.f32 %v3847_v1, %v3848_v33  ;;  %v3855_v15 = vrot.slane %v3854_v42, 1  ;;  %v3802_v61 = vrot.slane %v3801_v20, 4 }
 0x2f1   : > { %v3808_v0 = vsel %vm2456_vm1, %v1943_v21, -inf  ;;  %v11857_v63 = vsel %vm4249_vm2, %v3842_v58, -inf  ;;  %v3815_v17 = vsel %vm2456_vm1, %v1942_v26, -inf  ;;  %v3822_v27 = vsel %vm2456_vm1, %v1944_v23, -inf  ;;  %v9694_v58 = vpop.f32.mrf.mxu0 }
 0x2f2   : > { %v3809_v59 = vrot.slane %v3808_v0, 4  ;;  %v3856_v56 = vmax.f32 %v3854_v42, %v3855_v15  ;;  %v11862_v14 = vsel %vm4249_vm2, %v3849_v29, -inf  ;;  %v3803_v54 = vmax.f32 %v3801_v20, %v3802_v61  ;;  %v5776_v20 = vld [vmem:[#allocation2 + $0xd2] sm:$0xff] }
 0x2f3   : > { %v3816_v50 = vrot.slane %v3815_v17, 4  ;;  %v3823_v11 = vrot.slane %v3822_v27, 4  ;;  %v1979_v43 = vcombine.high %v1035_v46, %v1035_v46  ;;  %v1986_v22 = vrot.slane %v1035_v46, %v10427_v12  ;;  %9739 = vmatmul.mubr.msk.f32.gmra.mxu0 %vm4249_vm2, %v5776_v20 }
 0x2f4   : > { %v3810_v53 = vmax.f32 %v3808_v0, %v3809_v59  ;;  %v11866_v28 = vsel %vm4249_vm2, %v3856_v56, -inf  ;;  %v3804_v47 = vrot.slane %v3803_v54, 2  ;;  %v916_v18 = vadd.f32 %v11813_v37, %v915_v10 }
 0x2f5   : > { %v3817_v48 = vmax.f32 %v3815_v17, %v3816_v50  ;;  %v3824_v52 = vmax.f32 %v3822_v27, %v3823_v11  ;;  %v1993_v2 = vrot.slane %v1979_v43, %v10427_v12  ;;  %v1994_v5 = vcombine.high %v1986_v22, %v1986_v22 }
 0x2f6   : > { %v3811_v35 = vrot.slane %v3810_v53, 2  ;;  %v3805_v45 = vmax.f32 %v3803_v54, %v3804_v47  ;;  %v3885_v16 = vsel %vm2456_vm1, %v1986_v22, -inf  ;;  %v1034_v36 = vmax.f32 %v916_v18, 0.0 }
 0x2f7   : > { %v3818_v49 = vrot.slane %v3817_v48, 2  ;;  %v3825_v9 = vrot.slane %v3824_v52, 2  ;;  %v1995_v44 = vcombine.high %v1993_v2, %v1993_v2  ;;  %v3886_v57 = vrot.slane %v3885_v16, 4 }
 0x2f8   : > { %v3812_v25 = vmax.f32 %v3810_v53, %v3811_v35  ;;  %v3806_v4 = vrot.slane %v3805_v45, 1  ;;  %v3892_v46 = vsel %vm2456_vm1, %v1994_v5, -inf  ;;  %v3899_v62 = vsel %vm2456_vm1, %v1993_v2, -inf }
 0x2f9   : > { %v3819_v19 = vmax.f32 %v3817_v48, %v3818_v49  ;;  %v3826_v24 = vmax.f32 %v3824_v52, %v3825_v9  ;;  %v3887_v13 = vmax.f32 %v3885_v16, %v3886_v57  ;;  %v3893_v30 = vrot.slane %v3892_v46, 4 }
 0x2fa   : > { %v3813_v32 = vrot.slane %v3812_v25, 1  ;;  %v3807_v60 = vmax.f32 %v3805_v45, %v3806_v4  ;;  %v3900_v31 = vrot.slane %v3899_v62, 4  ;;  %v3906_v41 = vsel %vm2456_vm1, %v1995_v44, -inf }
 0x2fb   : > { %v3820_v55 = vrot.slane %v3819_v19, 1  ;;  %v3827_v7 = vrot.slane %v3826_v24, 1  ;;  %v3888_v26 = vrot.slane %v3887_v13, 2  ;;  %v3894_v39 = vmax.f32 %v3892_v46, %v3893_v30  ;;  %v5276_v46 = vld [vmem:[#allocation2 + $0x91] sm:$0xff] }
 0x2fc   : > { %v3814_v1 = vmax.f32 %v3812_v25, %v3813_v32  ;;  %v11875_v51 = vsel %vm4249_vm2, %v3807_v60, -inf  ;;  %v3901_v21 = vmax.f32 %v3899_v62, %v3900_v31  ;;  %v3907_v3 = vrot.slane %v3906_v41, 4 }
 0x2fd   : > { %v3821_v34 = vmax.f32 %v3819_v19, %v3820_v55  ;;  %v3828_v33 = vmax.f32 %v3826_v24, %v3827_v7  ;;  %v3889_v23 = vmax.f32 %v3887_v13, %v3888_v26  ;;  %v3895_v6 = vrot.slane %v3894_v39, 2 }
 0x2fe   : > { %v11878_v42 = vsel %vm4249_vm2, %v3814_v1, -inf  ;;  %v3902_v15 = vrot.slane %v3901_v21, 2  ;;  %v3908_v61 = vmax.f32 %v3906_v41, %v3907_v3  ;;  %v1962_v0 = vcombine.high %v1034_v36, %v1034_v36  ;;  %v5275_v41 = vld [vmem:[#allocation2 + $0x81] sm:$0xff] }
 0x2ff   : > { %v11881_v29 = vsel %vm4249_vm2, %v3821_v34, -inf  ;;  %v11885_v59 = vsel %vm4249_vm2, %v3828_v33, -inf  ;;  %v3890_v17 = vrot.slane %v3889_v23, 1  ;;  %v3896_v27 = vmax.f32 %v3894_v39, %v3895_v6  ;;  %v10078_v39 = vld [vmem:[#allocation2 + $0x82] sm:$0xff] }
 0x300   : > { %v1969_v10 = vrot.slane %v1034_v36, %v10427_v12  ;;  %v3903_v56 = vmax.f32 %v3901_v21, %v3902_v15  ;;  %v3909_v54 = vrot.slane %v3908_v61, 2  ;;  %v1976_v50 = vrot.slane %v1962_v0, %v10427_v12  ;;  %v925_v21 = vpop.f32.mrf.mxu0  ;;  %v10079_v0 = vld [vmem:[#allocation2 + $0x72] sm:$0xff] }
 0x301   : > { %v931_v53 = vadd.f32 %v11813_v37, %v9694_v58  ;;  %v3891_v11 = vmax.f32 %v3889_v23, %v3890_v17  ;;  %v3897_v43 = vrot.slane %v3896_v27, 1  ;;  %v9922_v34 = vpack.i.bf16 %v10078_v39, %v5276_v46  ;;  %v5777_v58 = vld [vmem:[#allocation2 + $0xe2] sm:$0xff] }
 0x302   : > { %v1977_v22 = vcombine.high %v1969_v10, %v1969_v10  ;;  %v3857_v47 = vsel %vm2456_vm1, %v1969_v10, -inf  ;;  %v3904_v48 = vrot.slane %v3903_v56, 1  ;;  %v3910_v18 = vmax.f32 %v3908_v61, %v3909_v54  ;;  %9741 = vmatprep.mubr.msk.f32.mxu0 %vm4249_vm2, %v5777_v58 }
 0x303   : > { %v1978_v35 = vcombine.high %v1976_v50, %v1976_v50  ;;  %v3858_v52 = vrot.slane %v3857_v47, 4  ;;  %v3898_v2 = vmax.f32 %v3896_v27, %v3897_v43  ;;  %v11892_v5 = vsel %vm4249_vm2, %v3891_v11, -inf  ;;  %9923 = vrot.lane.b32.xlu1 %v9922_v34, %s14809_s17 }
 0x304   : > { %v3864_v45 = vsel %vm2456_vm1, %v1977_v22, -inf  ;;  %v3871_v49 = vsel %vm2456_vm1, %v1976_v50, -inf  ;;  %v3905_v16 = vmax.f32 %v3903_v56, %v3904_v48  ;;  %v3911_v36 = vrot.slane %v3910_v18, 1 }
 0x305   : > { %v4552_v25 = vmax.f32 %v11851_v40, %v11892_v5  ;;  %v3859_v9 = vmax.f32 %v3857_v47, %v3858_v52  ;;  %v11899_v44 = vsel %vm4249_vm2, %v3898_v2, -inf  ;;  %v3865_v57 = vrot.slane %v3864_v45, 4  ;;  %v5473_v5 = vld [vmem:[%s14755_s3 + $0x1e0] sm:$0xff] }
 0x306   : > { %v3872_v4 = vrot.slane %v3871_v49, 4  ;;  %v3878_v19 = vsel %vm2456_vm1, %v1978_v35, -inf  ;;  %v3912_v62 = vmax.f32 %v3910_v18, %v3911_v36  ;;  %v4555_v32 = vmax.f32 %v11857_v63, %v11899_v44  ;;  %v5457_v63 = vld [vmem:[%s14755_s3 + $0x160] sm:$0xff] }
 0x307   : > { %v11905_v24 = vsel %vm4249_vm2, %v3905_v16, -inf  ;;  %v3860_v13 = vrot.slane %v3859_v9, 2  ;;  %v3866_v60 = vmax.f32 %v3864_v45, %v3865_v57  ;;  %v3879_v31 = vrot.slane %v3878_v19, 4 }
 0x308   : > { %v4558_v30 = vmax.f32 %v11862_v14, %v11905_v24  ;;  %v3873_v55 = vmax.f32 %v3871_v49, %v3872_v4  ;;  %v11910_v1 = vsel %vm4249_vm2, %v3912_v62, -inf  ;;  %v1037_v26 = vmax.f32 %v931_v53, 0.0  ;;  %v11926_v62 = vpop.f32.mrf.mxu0  ;;  %v5472_v24 = vld [vmem:[%s14755_s3 + $0x1d8] sm:$0xff] }
 0x309   : > { %v3861_v7 = vmax.f32 %v3859_v9, %v3860_v13  ;;  %v4561_v3 = vmax.f32 %v11866_v28, %v11910_v1  ;;  %v3867_v33 = vrot.slane %v3866_v60, 2  ;;  %v3880_v6 = vmax.f32 %v3878_v19, %v3879_v31  ;;  %v5456_v1 = vld [vmem:[%s14755_s3 + $0x158] sm:$0xff] }
 0x30a   : > { %v3874_v23 = vrot.slane %v3873_v55, 2  ;;  %v2013_v15 = vcombine.high %v1037_v26, %v1037_v26  ;;  %v2020_v61 = vrot.slane %v1037_v26, %v10427_v12  ;;  %v9917_v17 = vpack.i.bf16 %v10079_v0, %v5275_v41 }
 0x30b   : > { %v3862_v20 = vrot.slane %v3861_v7, 1  ;;  %v3868_v27 = vmax.f32 %v3866_v60, %v3867_v33  ;;  %v3881_v56 = vrot.slane %v3880_v6, 2  ;;  %v926_v54 = vadd.f32 %v11813_v37, %v925_v21 }
 0x30c   : > { %v3875_v10 = vmax.f32 %v3873_v55, %v3874_v23  ;;  %v2027_v53 = vrot.slane %v2013_v15, %v10427_v12  ;;  %v2028_v11 = vcombine.high %v2020_v61, %v2020_v61  ;;  %v3941_v43 = vsel %vm2456_vm1, %v2020_v61, -inf  ;;  %9918 = vrot.lane.b32.xlu0 %v9917_v17, %s14809_s17  ;;  %v11941_v15 = vpop.f32.mrf.mxu0  ;;  %v5475_v61 = vld [vmem:[%s14755_s3 + $0x1f0] sm:$0xff] }
 0x30d   : > { %v3863_v50 = vmax.f32 %v3861_v7, %v3862_v20  ;;  %v3869_v22 = vrot.slane %v3868_v27, 1  ;;  %v3882_v48 = vmax.f32 %v3880_v6, %v3881_v56  ;;  %v3942_v18 = vrot.slane %v3941_v43, 4  ;;  %v5460_v6 = vld [vmem:[%s14755_s3 + $0x178] sm:$0xff] }
 0x30e   : > { %v3876_v47 = vrot.slane %v3875_v10, 1  ;;  %v2029_v52 = vcombine.high %v2027_v53, %v2027_v53  ;;  %v3948_v2 = vsel %vm2456_vm1, %v2028_v11, -inf  ;;  %v3955_v45 = vsel %vm2456_vm1, %v2027_v53, -inf  ;;  %v5474_v11 = vld [vmem:[%s14755_s3 + $0x1e8] sm:$0xff]  ;;  %v9700_v40 = vpop.f32.mrf.mxu0 }
 0x30f   : > { %v4539_v35 = vsel %vm4249_vm2, %v3863_v50, -inf  ;;  %v3870_v49 = vmax.f32 %v3868_v27, %v3869_v22  ;;  %v3883_v36 = vrot.slane %v3882_v48, 1  ;;  %v3943_v57 = vmax.f32 %v3941_v43, %v3942_v18  ;;  %v5458_v18 = vld [vmem:[%s14755_s3 + $0x168] sm:$0xff] }
 0x310   : > { %v3877_v16 = vmax.f32 %v3875_v10, %v3876_v47  ;;  %v4540_v9 = vmax.f32 %v11875_v51, %v4539_v35  ;;  %v3949_v4 = vrot.slane %v3948_v2, 4  ;;  %v3956_v19 = vrot.slane %v3955_v45, 4  ;;  %v5476_v51 = vld [vmem:[%s14755_s3 + $0x1f8] sm:$0xff] }
 0x311   : > { %v3962_v46 = vsel %vm2456_vm1, %v2029_v52, -inf  ;;  %v3884_v13 = vmax.f32 %v3882_v48, %v3883_v36  ;;  %v4542_v60 = vsel %vm4249_vm2, %v3870_v49, -inf  ;;  %v3944_v26 = vrot.slane %v3943_v57, 2  ;;  %9382 = vmatprep.subr.mxu1 %v5476_v51 }
 0x312   : > { %v4545_v55 = vsel %vm4249_vm2, %v3877_v16, -inf  ;;  %v3963_v31 = vrot.slane %v3962_v46, 4  ;;  %v4543_v41 = vmax.f32 %v11878_v42, %v4542_v60  ;;  %v3950_v39 = vmax.f32 %v3948_v2, %v3949_v4  ;;  %9383 = vmatpush3.msra.mxu1 %v5460_v6  ;;  %v945_v60 = vpop.f32.mrf.mxu0  ;;  %v5454_v6 = vld [vmem:[%s14755_s3 + $0x148] sm:$0xff] }
 0x313   : > { %v4546_v7 = vmax.f32 %v11881_v29, %v4545_v55  ;;  %v4548_v34 = vsel %vm4249_vm2, %v3884_v13, -inf  ;;  %v3957_v21 = vmax.f32 %v3955_v45, %v3956_v19  ;;  %v1036_v23 = vmax.f32 %v926_v54, 0.0  ;;  %9384 = vmatprep.subr.mxu1 %v5475_v61  ;;  %v5471_v55 = vld [vmem:[%s14755_s3 + $0x1d0] sm:$0xff] }
 0x314   : > { %v3964_v33 = vmax.f32 %v3962_v46, %v3963_v31  ;;  %v4549_v42 = vmax.f32 %v11885_v59, %v4548_v34  ;;  %v4903_v29 = vsel %vm4812_vm3, %v4543_v41, %v4540_v9  ;;  %v3945_v58 = vmax.f32 %v3943_v57, %v3944_v26  ;;  %v5459_v59 = vld [vmem:[%s14755_s3 + $0x170] sm:$0xff] }
 0x315   : > { %v3951_v20 = vrot.slane %v3950_v39, 2  ;;  %v4904_v0 = vsel %vm4814_vm4, %v4546_v7, %v4903_v29  ;;  %v3958_v17 = vrot.slane %v3957_v21, 2  ;;  %v1996_v10 = vcombine.high %v1036_v23, %v1036_v23  ;;  %9385 = vmatpush3.msra.mxu1 %v5459_v59 }
 0x316   : > { %v3965_v27 = vrot.slane %v3964_v33, 2  ;;  %v4905_v56 = vsel %vm4816_vm5, %v4549_v42, %v4904_v0  ;;  %v3946_v54 = vrot.slane %v3945_v58, 1  ;;  %v2003_v53 = vrot.slane %v1036_v23, %v10427_v12  ;;  %9386 = vmatprep.subr.mxu1 %v5474_v11  ;;  %v5470_v23 = vld [vmem:[%s14755_s3 + $0x1c8] sm:$0xff]  ;;  %v5469_v42 = vld [vmem:[%s14755_s3 + $0x1c0] sm:$0xff] }
 0x317   : > { %v3952_v50 = vmax.f32 %v3950_v39, %v3951_v20  ;;  %v4906_v43 = vsel %vm4818_vm6, %v4552_v25, %v4905_v56  ;;  %v3959_v22 = vmax.f32 %v3957_v21, %v3958_v17  ;;  %v2010_v48 = vrot.slane %v1996_v10, %v10427_v12  ;;  %9387 = vmatpush3.msra.mxu1 %v5458_v18  ;;  %v5455_v39 = vld [vmem:[%s14755_s3 + $0x150] sm:$0xff]  ;;  %v5468_v10 = vld [vmem:[%s14755_s3 + $0x1b8] sm:$0xff] }
 0x318   : > { %v3966_v47 = vmax.f32 %v3964_v33, %v3965_v27  ;;  %v4907_v35 = vsel %vm4820_vm7, %v4555_v32, %v4906_v43  ;;  %v3947_v52 = vmax.f32 %v3945_v58, %v3946_v54  ;;  %v2011_v45 = vcombine.high %v2003_v53, %v2003_v53  ;;  %9388 = vmatprep.subr.mxu1 %v5473_v5  ;;  %v5467_v18 = vld [vmem:[%s14755_s3 + $0x1b0] sm:$0xff] }
 0x319   : > { %v3953_v2 = vrot.slane %v3952_v50, 1  ;;  %v4908_v25 = vsel %vm4822_vm8, %v4558_v30, %v4907_v35  ;;  %v3960_v49 = vrot.slane %v3959_v22, 1  ;;  %v2012_v36 = vcombine.high %v2010_v48, %v2010_v48  ;;  %9389 = vmatpush3.msra.mxu1 %v5457_v63 }
 0x31a   : > { %v3967_v16 = vrot.slane %v3966_v47, 1  ;;  %v4909_v44 = vsel %vm4824_vm9, %v4561_v3, %v4908_v25  ;;  %v11982_v9 = vsel %vm4249_vm2, %v3947_v52, -inf  ;;  %v3913_v14 = vsel %vm2456_vm1, %v2003_v53, -inf  ;;  %9390 = vmatprep.subr.mxu1 %v5472_v24  ;;  %v5452_v53 = vld [vmem:[%s14755_s3 + $0x138] sm:$0xff]  ;;  %v5450_v24 = vld [vmem:[%s14755_s3 + $0x128] sm:$0xff] }
 0x31b   : > { %v3954_v32 = vmax.f32 %v3952_v50, %v3953_v2  ;;  %4960 = vst.msk [vmem:[#allocation2 + $0xf1] sm:$0xff] %vm4249_vm2, %v4909_v44  ;;  %v3961_v30 = vmax.f32 %v3959_v22, %v3960_v49  ;;  %v3914_v4 = vrot.slane %v3913_v14, 4  ;;  %v3920_v28 = vsel %vm2456_vm1, %v2011_v45, -inf  ;;  %9391 = vmatpush3.msra.mxu1 %v5456_v1  ;;  %v5465_v1 = vld [vmem:[%s14755_s3 + $0x1a0] sm:$0xff] }
 0x31c   : > { %v3968_v57 = vmax.f32 %v3966_v47, %v3967_v16  ;;  %v3921_v19 = vrot.slane %v3920_v28, 4  ;;  %v3927_v46 = vsel %vm2456_vm1, %v2010_v48, -inf  ;;  %v3934_v13 = vsel %vm2456_vm1, %v2012_v36, -inf  ;;  %9392 = vmatprep.subr.mxu1 %v5471_v55  ;;  %v5466_v36 = vld [vmem:[%s14755_s3 + $0x1a8] sm:$0xff]  ;;  %v5449_v55 = vld [vmem:[%s14755_s3 + $0x120] sm:$0xff] }
 0x31d   : > { %v11994_v3 = vsel %vm4249_vm2, %v3954_v32, -inf  ;;  %v12002_v31 = vsel %vm4249_vm2, %v3961_v30, -inf  ;;  %v3915_v7 = vmax.f32 %v3913_v14, %v3914_v4  ;;  %v3928_v26 = vrot.slane %v3927_v46, 4  ;;  %9393 = vmatpush3.msra.mxu1 %v5455_v39 }
 0x31e   : > { %v12005_v41 = vsel %vm4249_vm2, %v3968_v57, -inf  ;;  %v3922_v51 = vmax.f32 %v3920_v28, %v3921_v19  ;;  %v3935_v34 = vrot.slane %v3934_v13, 4  ;;  %v941_v21 = vadd.f32 %v11813_v37, %v11926_v62  ;;  %9394 = vmatprep.subr.mxu1 %v5470_v23 }
 0x31f   : > { %v936_v33 = vadd.f32 %v11813_v37, %v11941_v15  ;;  %v3916_v29 = vrot.slane %v3915_v7, 2  ;;  %v3929_v58 = vmax.f32 %v3927_v46, %v3928_v26  ;;  %v951_v62 = vadd.f32 %v11813_v37, %v9700_v40  ;;  %v5453_v15 = vld [vmem:[%s14755_s3 + $0x140] sm:$0xff]  ;;  %9395 = vmatpush3.msra.mxu1 %v5454_v6  ;;  %v5451_v40 = vld [vmem:[%s14755_s3 + $0x130] sm:$0xff] }
 0x320   : > { %v946_v20 = vadd.f32 %v11813_v37, %v945_v60  ;;  %v3923_v61 = vrot.slane %v3922_v51, 2  ;;  %v3936_v0 = vmax.f32 %v3934_v13, %v3935_v34  ;;  %v1039_v17 = vmax.f32 %v941_v21, 0.0  ;;  %9396 = vmatprep.subr.mxu1 %v5469_v42  ;;  %v5464_v34 = vld [vmem:[%s14755_s3 + $0x198] sm:$0xff] }
 0x321   : > { %v1038_v27 = vmax.f32 %v936_v33, 0.0  ;;  %v3917_v59 = vmax.f32 %v3915_v7, %v3916_v29  ;;  %v3930_v56 = vrot.slane %v3929_v58, 2  ;;  %v12031_v54 = vmax.f32 %v951_v62, 0.0  ;;  %9397 = vmatpush3.msra.mxu1 %v5453_v15  ;;  %v5448_v42 = vld [vmem:[%s14755_s3 + $0x118] sm:$0xff]  ;;  %v5463_v15 = vld [vmem:[%s14755_s3 + $0x190] sm:$0xff] }
 0x322   : > { %v12033_v50 = vmax.f32 %v946_v20, 0.0  ;;  %v3924_v11 = vmax.f32 %v3922_v51, %v3923_v61  ;;  %v3937_v43 = vrot.slane %v3936_v0, 2  ;;  %v2047_v22 = vcombine.high %v1039_v17, %v1039_v17  ;;  %v12039_v48 = vld [vmem:[#allocation2 + $0xf2] sm:$0xff]  ;;  %9398 = vmatprep.subr.mxu1 %v5468_v10 }
 0x323   : > { %v2054_v47 = vrot.slane %v1039_v17, %v10427_v12  ;;  %v3918_v35 = vrot.slane %v3917_v59, 1  ;;  %v3931_v52 = vmax.f32 %v3929_v58, %v3930_v56  ;;  %v2030_v2 = vcombine.high %v1038_v27, %v1038_v27  ;;  %9742 = vmatmul.mubr.msk.f32.gmra.mxu0 %vm4249_vm2, %v12039_v48  ;;  %9399 = vmatpush3.msra.mxu1 %v5452_v53  ;;  %v5447_v10 = vld [vmem:[%s14755_s3 + $0x110] sm:$0xff] }
 0x324   : > { %v2037_v45 = vrot.slane %v1038_v27, %v10427_v12  ;;  %v3925_v5 = vrot.slane %v3924_v11, 1  ;;  %v3938_v25 = vmax.f32 %v3936_v0, %v3937_v43  ;;  %v2061_v49 = vrot.slane %v2047_v22, %v10427_v12  ;;  %9400 = vmatprep.subr.mxu1 %v5467_v18  ;;  %v5462_v43 = vld [vmem:[%s14755_s3 + $0x188] sm:$0xff] }
 0x325   : > { %v2062_v16 = vcombine.high %v2054_v47, %v2054_v47  ;;  %v3919_v63 = vmax.f32 %v3917_v59, %v3918_v35  ;;  %v3932_v44 = vrot.slane %v3931_v52, 1  ;;  %v3997_v32 = vsel %vm2456_vm1, %v2054_v47, -inf  ;;  %9401 = vmatpush3.msra.mxu1 %v5451_v40 }
 0x326   : > { %v2044_v14 = vrot.slane %v2030_v2, %v10427_v12  ;;  %v3926_v30 = vmax.f32 %v3924_v11, %v3925_v5  ;;  %v3939_v57 = vrot.slane %v3938_v25, 1  ;;  %v2063_v4 = vcombine.high %v2061_v49, %v2061_v49  ;;  %9402 = vmatprep.subr.mxu1 %v5466_v36 }
 0x327   : > { %v3998_v28 = vrot.slane %v3997_v32, 4  ;;  %v3933_v19 = vmax.f32 %v3931_v52, %v3932_v44  ;;  %v12063_v46 = vsel %vm4249_vm2, %v3919_v63, -inf  ;;  %v4004_v13 = vsel %vm2456_vm1, %v2062_v16, -inf  ;;  %9403 = vmatpush3.msra.mxu1 %v5450_v24  ;;  %v5446_v52 = vld [vmem:[%s14755_s3 + $0x108] sm:$0xff]  ;;  %v5445_v44 = vld [vmem:[%s14755_s3 + $0x100] sm:$0xff] }
 0x328   : > { %v4011_v60 = vsel %vm2456_vm1, %v2061_v49, -inf  ;;  %v3940_v7 = vmax.f32 %v3938_v25, %v3939_v57  ;;  %v12071_v26 = vsel %vm4249_vm2, %v3926_v30, -inf  ;;  %v4005_v51 = vrot.slane %v4004_v13, 4  ;;  %9404 = vmatprep.subr.mxu1 %v5465_v1  ;;  %v5461_v25 = vld [vmem:[%s14755_s3 + $0x180] sm:$0xff] }
 0x329   : > { %v3999_v39 = vmax.f32 %v3997_v32, %v3998_v28  ;;  %v12077_v21 = vsel %vm4249_vm2, %v3933_v19, -inf  ;;  %v4012_v33 = vrot.slane %v4011_v60, 4  ;;  %v4018_v23 = vsel %vm2456_vm1, %v2063_v4, -inf  ;;  %9405 = vmatpush3.msra.mxu1 %v5449_v55 }
 0x32a   : > { %v2045_v6 = vcombine.high %v2037_v45, %v2037_v45  ;;  %v12084_v29 = vsel %vm4249_vm2, %v3940_v7, -inf  ;;  %v4006_v62 = vmax.f32 %v4004_v13, %v4005_v51  ;;  %v4019_v20 = vrot.slane %v4018_v23, 4  ;;  %9406 = vmatprep.subr.mxu1 %v5464_v34 }
 0x32b   : > { %v4000_v58 = vrot.slane %v3999_v39, 2  ;;  %v4013_v61 = vmax.f32 %v4011_v60, %v4012_v33  ;;  %v2046_v0 = vcombine.high %v2044_v14, %v2044_v14  ;;  %v3969_v17 = vsel %vm2456_vm1, %v2037_v45, -inf  ;;  %9407 = vmatpush3.msra.mxu1 %v5448_v42 }
 0x32c   : > { %v3976_v27 = vsel %vm2456_vm1, %v2045_v6, -inf  ;;  %v4007_v56 = vrot.slane %v4006_v62, 2  ;;  %v4020_v53 = vmax.f32 %v4018_v23, %v4019_v20  ;;  %v3970_v11 = vrot.slane %v3969_v17, 4  ;;  %9408 = vmatprep.subr.mxu1 %v5463_v15 }
 0x32d   : > { %v4001_v59 = vmax.f32 %v3999_v39, %v4000_v58  ;;  %v4014_v22 = vrot.slane %v4013_v61, 2  ;;  %v3977_v47 = vrot.slane %v3976_v27, 4  ;;  %v3983_v18 = vsel %vm2456_vm1, %v2044_v14, -inf  ;;  %9409 = vmatpush3.msra.mxu1 %v5447_v10 }
 0x32e   : > { %v3990_v35 = vsel %vm2456_vm1, %v2046_v0, -inf  ;;  %v4008_v45 = vmax.f32 %v4006_v62, %v4007_v56  ;;  %v4021_v40 = vrot.slane %v4020_v53, 2  ;;  %v3971_v5 = vmax.f32 %v3969_v17, %v3970_v11  ;;  %9410 = vmatprep.subr.mxu1 %v5462_v43 }
 0x32f   : > { %v4002_v2 = vrot.slane %v4001_v59, 1  ;;  %v4015_v49 = vmax.f32 %v4013_v61, %v4014_v22  ;;  %v3978_v16 = vmax.f32 %v3976_v27, %v3977_v47  ;;  %v3984_v36 = vrot.slane %v3983_v18, 4  ;;  %9411 = vmatpush3.msra.mxu1 %v5446_v52 }
 0x330   : > { %v3991_v63 = vrot.slane %v3990_v35, 4  ;;  %v4009_v14 = vrot.slane %v4008_v45, 1  ;;  %v4022_v24 = vmax.f32 %v4020_v53, %v4021_v40  ;;  %v3972_v30 = vrot.slane %v3971_v5, 2  ;;  %9412 = vmatprep.subr.mxu1 %v5461_v25 }
 0x331   : > { %v4003_v32 = vmax.f32 %v4001_v59, %v4002_v2  ;;  %v4016_v57 = vrot.slane %v4015_v49, 1  ;;  %v3979_v4 = vrot.slane %v3978_v16, 2  ;;  %v3985_v28 = vmax.f32 %v3983_v18, %v3984_v36  ;;  %9413 = vmatpush3.msra.mxu1 %v5445_v44 }
 0x332   : > { %v3992_v1 = vmax.f32 %v3990_v35, %v3991_v63  ;;  %v4010_v19 = vmax.f32 %v4008_v45, %v4009_v14  ;;  %v4023_v13 = vrot.slane %v4022_v24, 1  ;;  %v3973_v55 = vmax.f32 %v3971_v5, %v3972_v30 }
 0x333   : > { %v4575_v60 = vsel %vm4249_vm2, %v4003_v32, -inf  ;;  %v4017_v7 = vmax.f32 %v4015_v49, %v4016_v57  ;;  %v3980_v51 = vmax.f32 %v3978_v16, %v3979_v4  ;;  %v3986_v34 = vrot.slane %v3985_v28, 2 }
 0x334   : > { %v4576_v39 = vmax.f32 %v11982_v9, %v4575_v60  ;;  %v4024_v33 = vmax.f32 %v4022_v24, %v4023_v13  ;;  %v4578_v23 = vsel %vm4249_vm2, %v4010_v19, -inf  ;;  %v3974_v6 = vrot.slane %v3973_v55, 1 }
 0x335   : > { %v3993_v42 = vrot.slane %v3992_v1, 2  ;;  %v4579_v58 = vmax.f32 %v11994_v3, %v4578_v23  ;;  %v4581_v62 = vsel %vm4249_vm2, %v4017_v7, -inf  ;;  %v3981_v20 = vrot.slane %v3980_v51, 1 }
 0x336   : > { %v3987_v15 = vmax.f32 %v3985_v28, %v3986_v34  ;;  %v4582_v61 = vmax.f32 %v12002_v31, %v4581_v62  ;;  %v4584_v0 = vsel %vm4249_vm2, %v4024_v33, -inf  ;;  %v3975_v17 = vmax.f32 %v3973_v55, %v3974_v6 }
 0x337   : > { %v3994_v27 = vmax.f32 %v3992_v1, %v3993_v42  ;;  %v4585_v9 = vmax.f32 %v12005_v41, %v4584_v0  ;;  %v3982_v10 = vmax.f32 %v3980_v51, %v3981_v20  ;;  %v2081_v56 = vcombine.high %v12031_v54, %v12031_v54  ;;  %v9703_v42 = vpop.f32.mrf.mxu0 }
 0x338   : > { %v3988_v59 = vrot.slane %v3987_v15, 1  ;;  %v4563_v3 = vsel %vm4249_vm2, %v3975_v17, -inf  ;;  %v2088_v11 = vrot.slane %v12031_v54, %v10427_v12  ;;  %v2064_v31 = vcombine.high %v12033_v50, %v12033_v50 }
 0x339   : > { %v3995_v53 = vrot.slane %v3994_v27, 1  ;;  %v4564_v22 = vmax.f32 %v12063_v46, %v4563_v3  ;;  %v4566_v47 = vsel %vm4249_vm2, %v3982_v10, -inf  ;;  %v2095_v41 = vrot.slane %v2081_v56, %v10427_v12 }
 0x33a   : > { %v3989_v43 = vmax.f32 %v3987_v15, %v3988_v59  ;;  %v4567_v35 = vmax.f32 %v12071_v26, %v4566_v47  ;;  %v2096_v52 = vcombine.high %v2088_v11, %v2088_v11  ;;  %v4053_v2 = vsel %vm2456_vm1, %v2088_v11, -inf }
 0x33b   : > { %v3996_v18 = vmax.f32 %v3994_v27, %v3995_v53  ;;  %v2097_v40 = vcombine.high %v2095_v41, %v2095_v41  ;;  %v4054_v54 = vrot.slane %v4053_v2, 4  ;;  %v4067_v5 = vsel %vm2456_vm1, %v2095_v41, -inf  ;;  %v955_v53 = vpop.f32.mrf.mxu0 }
 0x33c   : > { %v4569_v45 = vsel %vm4249_vm2, %v3989_v43, -inf  ;;  %v4910_v49 = vsel %vm4812_vm3, %v4567_v35, %v4564_v22  ;;  %v4060_v16 = vsel %vm2456_vm1, %v2096_v52, -inf  ;;  %v4068_v44 = vrot.slane %v4067_v5, 4  ;;  %v5219_v43 = vld [vmem:[%s14755_s3 + $0xf8] sm:$0xff] }
 0x33d   : > { %v4570_v25 = vmax.f32 %v12077_v21, %v4569_v45  ;;  %v4572_v46 = vsel %vm4249_vm2, %v3996_v18, -inf  ;;  %v4055_v26 = vmax.f32 %v4053_v2, %v4054_v54  ;;  %v4061_v63 = vrot.slane %v4060_v16, 4  ;;  %9462 = vmatprep.subr.mxu1 %v5219_v43 }
 0x33e   : > { %v4573_v36 = vmax.f32 %v12084_v29, %v4572_v46  ;;  %v4074_v14 = vsel %vm2456_vm1, %v2097_v40, -inf  ;;  %v2071_v24 = vrot.slane %v12033_v50, %v10427_v12  ;;  %v2078_v21 = vrot.slane %v2064_v31, %v10427_v12 }
 0x33f   : > { %v4911_v32 = vsel %vm4814_vm4, %v4570_v25, %v4910_v49  ;;  %v4056_v57 = vrot.slane %v4055_v26, 2  ;;  %v4062_v4 = vmax.f32 %v4060_v16, %v4061_v63  ;;  %v4069_v28 = vmax.f32 %v4067_v5, %v4068_v44  ;;  %v9706_v25 = vpop.f32.mrf.mxu0 }
 0x340   : > { %v4912_v30 = vsel %vm4816_vm5, %v4573_v36, %v4911_v32  ;;  %v4075_v29 = vrot.slane %v4074_v14, 4  ;;  %v2079_v19 = vcombine.high %v2071_v24, %v2071_v24  ;;  %v2080_v13 = vcombine.high %v2078_v21, %v2078_v21 }
 0x341   : > { %v4913_v1 = vsel %vm4818_vm6, %v4576_v39, %v4912_v30  ;;  %v4057_v55 = vmax.f32 %v4055_v26, %v4056_v57  ;;  %v4063_v7 = vrot.slane %v4062_v4, 2  ;;  %v4070_v51 = vrot.slane %v4069_v28, 2 }
 0x342   : > { %v4914_v60 = vsel %vm4820_vm7, %v4579_v58, %v4913_v1  ;;  %v4076_v50 = vmax.f32 %v4074_v14, %v4075_v29  ;;  %v4025_v33 = vsel %vm2456_vm1, %v2071_v24, -inf  ;;  %v4032_v23 = vsel %vm2456_vm1, %v2079_v19, -inf }
 0x343   : > { %v4915_v34 = vsel %vm4822_vm8, %v4582_v61, %v4914_v60  ;;  %v4064_v39 = vmax.f32 %v4062_v4, %v4063_v7  ;;  %v4026_v62 = vrot.slane %v4025_v33, 4  ;;  %v4033_v20 = vrot.slane %v4032_v23, 4 }
 0x344   : > { %v4916_v6 = vsel %vm4824_vm9, %v4585_v9, %v4915_v34  ;;  %v4039_v58 = vsel %vm2456_vm1, %v2078_v21, -inf  ;;  %v4058_v15 = vrot.slane %v4057_v55, 1  ;;  %v4071_v0 = vmax.f32 %v4069_v28, %v4070_v51  ;;  %v12171_v21 = vld [vmem:[%s14754_s2] ss:$0 sm:$0xff] }
 0x345   : > { %4961 = vst.msk [vmem:[#allocation2 + $0x101] sm:$0xff] %vm4249_vm2, %v4916_v6  ;;  %v4040_v17 = vrot.slane %v4039_v58, 4  ;;  %v4077_v27 = vrot.slane %v4076_v50, 2  ;;  %v4027_v61 = vmax.f32 %v4025_v33, %v4026_v62  ;;  %v4034_v10 = vmax.f32 %v4032_v23, %v4033_v20 }
 0x346   : > { %v4046_v59 = vsel %vm2456_vm1, %v2080_v13, -inf  ;;  %v4065_v3 = vrot.slane %v4064_v39, 1  ;;  %v4059_v22 = vmax.f32 %v4057_v55, %v4058_v15  ;;  %v4072_v47 = vrot.slane %v4071_v0, 1 }
 0x347   : > { %v4041_v56 = vmax.f32 %v4039_v58, %v4040_v17  ;;  %v4028_v9 = vrot.slane %v4027_v61, 2  ;;  %v4035_v11 = vrot.slane %v4034_v10, 2  ;;  %v4047_v31 = vrot.slane %v4046_v59, 4 }
 0x348   : > { %v961_v18 = vadd.f32 %v11813_v37, %v9703_v42  ;;  %v12154_v35 = vmax.f32 %v4076_v50, %v4077_v27  ;;  %v956_v5 = vadd.f32 %v11813_v37, %v955_v53  ;;  %v4066_v49 = vmax.f32 %v4064_v39, %v4065_v3 }
 0x349   : > { %v4042_v41 = vrot.slane %v4041_v56, 2  ;;  %v4029_v52 = vmax.f32 %v4027_v61, %v4028_v9  ;;  %v4036_v2 = vmax.f32 %v4034_v10, %v4035_v11  ;;  %v4048_v45 = vmax.f32 %v4046_v59, %v4047_v31 }
 0x34a   : > { %v1043_v54 = vmax.f32 %v961_v18, 0.0  ;;  %v12161_v26 = vmax.f32 %v4071_v0, %v4072_v47  ;;  %v4079_v14 = vrot.slane %v12154_v35, 1  ;;  %v12166_v24 = vsel %vm4249_vm2, %v4059_v22, -inf }
 0x34b   : > { %v4043_v40 = vmax.f32 %v4041_v56, %v4042_v41  ;;  %v4030_v16 = vrot.slane %v4029_v52, 1  ;;  %v4049_v36 = vrot.slane %v4048_v45, 2  ;;  %v4037_v63 = vrot.slane %v4036_v2, 1 }
 0x34c   : > { %v12157_v46 = vld [vmem:[#allocation2 + $0x102] sm:$0xff]  ;;  %v2115_v44 = vcombine.high %v1043_v54, %v1043_v54  ;;  %v2122_v32 = vrot.slane %v1043_v54, %v10427_v12  ;;  %v971_v30 = vadd.f32 %v12171_v21, %v9706_v25  ;;  %v1042_v1 = vmax.f32 %v956_v5, 0.0 }
 0x34d   : > { %9744 = vmatprep.mubr.msk.f32.mxu0 %vm4249_vm2, %v12157_v46  ;;  %v4044_v37 = vrot.slane %v4043_v40, 1  ;;  %v12177_v29 = vsel %vm4249_vm2, %v4066_v49, -inf  ;;  %v4031_v19 = vmax.f32 %v4029_v52, %v4030_v16  ;;  %v4050_v13 = vmax.f32 %v4048_v45, %v4049_v36 }
 0x34e   : > { %v2129_v57 = vrot.slane %v2115_v44, %v10427_v12  ;;  %v2130_v4 = vcombine.high %v2122_v32, %v2122_v32  ;;  %v4109_v28 = vsel %vm2456_vm1, %v2122_v32, -inf  ;;  %v4038_v55 = vmax.f32 %v4036_v2, %v4037_v63 }
 0x34f   : > { %v4110_v60 = vrot.slane %v4109_v28, 4  ;;  %v1045_v6 = vmax.f32 %v971_v30, 0.0  ;;  %v4045_v42 = vmax.f32 %v4043_v40, %v4044_v37  ;;  %v2098_v62 = vcombine.high %v1042_v1, %v1042_v1 }
 0x350   : > { %v2131_v7 = vcombine.high %v2129_v57, %v2129_v57  ;;  %v4116_v51 = vsel %vm2456_vm1, %v2130_v4, -inf  ;;  %v4123_v34 = vsel %vm2456_vm1, %v2129_v57, -inf  ;;  %v2105_v20 = vrot.slane %v1042_v1, %v10427_v12 }
 0x351   : > { %v4111_v50 = vmax.f32 %v4109_v28, %v4110_v60  ;;  %v4117_v33 = vrot.slane %v4116_v51, 4  ;;  %v4124_v23 = vrot.slane %v4123_v34, 4  ;;  %v4051_v58 = vrot.slane %v4050_v13, 1 }
 0x352   : > { %v4130_v39 = vsel %vm2456_vm1, %v2131_v7, -inf  ;;  %v2112_v61 = vrot.slane %v2098_v62, %v10427_v12  ;;  %v2113_v10 = vcombine.high %v2105_v20, %v2105_v20  ;;  %v4081_v59 = vsel %vm2456_vm1, %v2105_v20, -inf }
 0x353   : > { %v4112_v15 = vrot.slane %v4111_v50, 2  ;;  %v4118_v0 = vmax.f32 %v4116_v51, %v4117_v33  ;;  %v4125_v17 = vmax.f32 %v4123_v34, %v4124_v23  ;;  %v4131_v27 = vrot.slane %v4130_v39, 4  ;;  %v12194_v33 = vld [vmem:[#allocation2 + $0xc1] sm:$0xff] }
 0x354   : > { %v4082_v9 = vrot.slane %v4081_v59, 4  ;;  %v2114_v31 = vcombine.high %v2112_v61, %v2112_v61  ;;  %v4088_v43 = vsel %vm2456_vm1, %v2113_v10, -inf  ;;  %v4095_v22 = vsel %vm2456_vm1, %v2112_v61, -inf }
 0x355   : > { %v4113_v56 = vmax.f32 %v4111_v50, %v4112_v15  ;;  %v4119_v53 = vrot.slane %v4118_v0, 2  ;;  %v4126_v3 = vrot.slane %v4125_v17, 2  ;;  %v4132_v11 = vmax.f32 %v4130_v39, %v4131_v27 }
 0x356   : > { %v4083_v52 = vmax.f32 %v4081_v59, %v4082_v9  ;;  %v4089_v45 = vrot.slane %v4088_v43, 4  ;;  %v4096_v40 = vrot.slane %v4095_v22, 4  ;;  %v4102_v54 = vsel %vm2456_vm1, %v2114_v31, -inf }
 0x357   : > { %v4114_v47 = vrot.slane %v4113_v56, 1  ;;  %v4120_v41 = vmax.f32 %v4118_v0, %v4119_v53  ;;  %v4127_v18 = vmax.f32 %v4125_v17, %v4126_v3  ;;  %v4133_v2 = vrot.slane %v4132_v11, 2 }
 0x358   : > { %v4052_v5 = vmax.f32 %v4050_v13, %v4051_v58  ;;  %v4084_v16 = vrot.slane %v4083_v52, 2  ;;  %v4090_v63 = vmax.f32 %v4088_v43, %v4089_v45  ;;  %v4097_v44 = vmax.f32 %v4095_v22, %v4096_v40  ;;  %v5244_v58 = vld [vmem:[#allocation2 + $0xb2] sm:$0xff] }
 0x359   : > { %v4121_v25 = vrot.slane %v4120_v41, 1  ;;  %v4128_v49 = vrot.slane %v4127_v18, 1  ;;  %v4134_v36 = vmax.f32 %v4132_v11, %v4133_v2  ;;  %v4103_v32 = vrot.slane %v4102_v54, 4 }
 0x35a   : > { %v12189_v37 = vmax.f32 %v12154_v35, %v4079_v14  ;;  %v4586_v30 = vsel %vm4249_vm2, %v4031_v19, -inf  ;;  %v4589_v57 = vsel %vm4249_vm2, %v4038_v55, -inf  ;;  %v4085_v4 = vmax.f32 %v4083_v52, %v4084_v16 }
 0x35b   : > { %v4115_v28 = vmax.f32 %v4113_v56, %v4114_v47  ;;  %v4091_v1 = vrot.slane %v4090_v63, 2  ;;  %v4098_v60 = vrot.slane %v4097_v44, 2  ;;  %v2149_v7 = vcombine.high %v1045_v6, %v1045_v6 }
 0x35c   : > { %v4592_v13 = vsel %vm4249_vm2, %v4045_v42, -inf  ;;  %v4135_v51 = vrot.slane %v4134_v36, 1  ;;  %v4086_v34 = vrot.slane %v4085_v4, 1  ;;  %v4104_v50 = vmax.f32 %v4102_v54, %v4103_v32 }
 0x35d   : > { %v4595_v23 = vsel %vm4249_vm2, %v4052_v5, -inf  ;;  %v4122_v35 = vmax.f32 %v4120_v41, %v4121_v25  ;;  %v4129_v14 = vmax.f32 %v4127_v18, %v4128_v49  ;;  %v4092_v39 = vmax.f32 %v4090_v63, %v4091_v1 }
 0x35e   : > { %v4087_v19 = vmax.f32 %v4085_v4, %v4086_v34  ;;  %v4099_v62 = vmax.f32 %v4097_v44, %v4098_v60  ;;  %v4105_v55 = vrot.slane %v4104_v50, 2  ;;  %v2156_v20 = vrot.slane %v1045_v6, %v10427_v12  ;;  %v965_v6 = vpop.f32.mrf.mxu0 }
 0x35f   : > { %v4599_v15 = vsel %vm4249_vm2, %v4115_v28, -inf  ;;  %v4093_v0 = vrot.slane %v4092_v39, 1  ;;  %v2163_v42 = vrot.slane %v2149_v7, %v10427_v12  ;;  %v9927_v17 = vpack.i.bf16 %v5244_v58, %v12194_v33 }
 0x360   : > { %v4136_v27 = vmax.f32 %v4134_v36, %v4135_v51  ;;  %v4100_v61 = vrot.slane %v4099_v62, 1  ;;  %v4106_v10 = vmax.f32 %v4104_v50, %v4105_v55  ;;  %v4587_v59 = vsel %vm4249_vm2, %v4087_v19, -inf  ;;  %v9709_v36 = vpop.f32.mrf.mxu0 }
 0x361   : > { %v4094_v56 = vmax.f32 %v4092_v39, %v4093_v0  ;;  %v4588_v53 = vmax.f32 %v4586_v30, %v4587_v59  ;;  %v2164_v3 = vcombine.high %v2156_v20, %v2156_v20  ;;  %v2165_v9 = vcombine.high %v2163_v42, %v2163_v42  ;;  %9928 = vrot.lane.b32.xlu0 %v9927_v17, %s14809_s17 }
 0x362   : > { %v4101_v11 = vmax.f32 %v4099_v62, %v4100_v61  ;;  %v4107_v31 = vrot.slane %v4106_v10, 1  ;;  %v4165_v43 = vsel %vm2456_vm1, %v2156_v20, -inf  ;;  %v4179_v22 = vsel %vm2456_vm1, %v2163_v42, -inf }
 0x363   : > { %v4590_v47 = vsel %vm4249_vm2, %v4094_v56, -inf  ;;  %v4166_v41 = vrot.slane %v4165_v43, 4  ;;  %v4172_v18 = vsel %vm2456_vm1, %v2164_v3, -inf  ;;  %v4180_v52 = vrot.slane %v4179_v22, 4 }
 0x364   : > { %v4108_v2 = vmax.f32 %v4106_v10, %v4107_v31  ;;  %v4591_v45 = vmax.f32 %v4589_v57, %v4590_v47  ;;  %v4593_v40 = vsel %vm4249_vm2, %v4101_v11, -inf  ;;  %v4173_v54 = vrot.slane %v4172_v18, 4 }
 0x365   : > { %v4600_v5 = vmax.f32 %v12166_v24, %v4599_v15  ;;  %v4602_v25 = vsel %vm4249_vm2, %v4122_v35, -inf  ;;  %v4594_v49 = vmax.f32 %v4592_v13, %v4593_v40  ;;  %v4186_v16 = vsel %vm2456_vm1, %v2165_v9, -inf }
 0x366   : > { %v4605_v63 = vsel %vm4249_vm2, %v4129_v14, -inf  ;;  %v4596_v44 = vsel %vm4249_vm2, %v4108_v2, -inf  ;;  %v4917_v32 = vsel %vm4812_vm3, %v4591_v45, %v4588_v53  ;;  %v4167_v30 = vmax.f32 %v4165_v43, %v4166_v41 }
 0x367   : > { %v4608_v57 = vsel %vm4249_vm2, %v4136_v27, -inf  ;;  %v4597_v4 = vmax.f32 %v4595_v23, %v4596_v44  ;;  %v4918_v28 = vsel %vm4814_vm4, %v4594_v49, %v4917_v32  ;;  %v4181_v1 = vmax.f32 %v4179_v22, %v4180_v52 }
 0x368   : > { %v4174_v24 = vmax.f32 %v4172_v18, %v4173_v54  ;;  %v4187_v60 = vrot.slane %v4186_v16, 4  ;;  %v966_v7 = vadd.f32 %v12171_v21, %v965_v6  ;;  %v981_v13 = vadd.f32 %v12171_v21, %v9709_v36 }
 0x369   : > { %v4604_v51 = vsel %vm4249_vm2, %v12161_v26, -inf  ;;  %v4607_v34 = vsel %vm4249_vm2, %v12189_v37, -inf  ;;  %v4603_v50 = vmax.f32 %v12177_v29, %v4602_v25  ;;  %v4919_v35 = vsel %vm4816_vm5, %v4597_v4, %v4918_v28 }
 0x36a   : > { %v4606_v23 = vmax.f32 %v4604_v51, %v4605_v63  ;;  %v4920_v14 = vsel %vm4818_vm6, %v4600_v5, %v4919_v35  ;;  %v4168_v39 = vrot.slane %v4167_v30, 2  ;;  %v1044_v19 = vmax.f32 %v966_v7, 0.0  ;;  %v975_v51 = vpop.f32.mrf.mxu0 }
 0x36b   : > { %v4609_v62 = vmax.f32 %v4607_v34, %v4608_v57  ;;  %v4921_v55 = vsel %vm4820_vm7, %v4603_v50, %v4920_v14  ;;  %v4182_v20 = vrot.slane %v4181_v1, 2  ;;  %v1047_v58 = vmax.f32 %v981_v13, 0.0 }
 0x36c   : > { %v4922_v15 = vsel %vm4822_vm8, %v4606_v23, %v4921_v55  ;;  %v4175_v26 = vrot.slane %v4174_v24, 2  ;;  %v4188_v0 = vmax.f32 %v4186_v16, %v4187_v60  ;;  %v2132_v42 = vcombine.high %v1044_v19, %v1044_v19 }
 0x36d   : > { %v4923_v37 = vsel %vm4824_vm9, %v4609_v62, %v4922_v15  ;;  %v2139_v29 = vrot.slane %v1044_v19, %v10427_v12  ;;  %v4169_v17 = vmax.f32 %v4167_v30, %v4168_v39  ;;  %v2183_v61 = vcombine.high %v1047_v58, %v1047_v58 }
 0x36e   : > { %4962 = vst.msk [vmem:[#allocation2 + $0x111] sm:$0xff] %vm4249_vm2, %v4923_v37  ;;  %v2146_v27 = vrot.slane %v2132_v42, %v10427_v12  ;;  %v4183_v10 = vmax.f32 %v4181_v1, %v4182_v20  ;;  %v4176_v53 = vmax.f32 %v4174_v24, %v4175_v26  ;;  %v4189_v3 = vrot.slane %v4188_v0, 2 }
 0x36f   : > { %v2147_v59 = vcombine.high %v2139_v29, %v2139_v29  ;;  %v4137_v56 = vsel %vm2456_vm1, %v2139_v29, -inf  ;;  %v2190_v43 = vrot.slane %v1047_v58, %v10427_v12  ;;  %v2197_v22 = vrot.slane %v2183_v61, %v10427_v12 }
 0x370   : > { %v2148_v9 = vcombine.high %v2146_v27, %v2146_v27  ;;  %v4138_v6 = vrot.slane %v4137_v56, 4  ;;  %v4151_v31 = vsel %vm2456_vm1, %v2146_v27, -inf  ;;  %v4170_v47 = vrot.slane %v4169_v17, 1 }
 0x371   : > { %v4144_v11 = vsel %vm2456_vm1, %v2147_v59, -inf  ;;  %v4152_v52 = vrot.slane %v4151_v31, 4  ;;  %v2198_v45 = vcombine.high %v2190_v43, %v2190_v43  ;;  %v2199_v40 = vcombine.high %v2197_v22, %v2197_v22  ;;  %v12246_v59 = vld [vmem:[#allocation2 + $0xd1] sm:$0xff] }
 0x372   : > { %v4139_v41 = vmax.f32 %v4137_v56, %v4138_v6  ;;  %v4145_v18 = vrot.slane %v4144_v11, 4  ;;  %v4158_v2 = vsel %vm2456_vm1, %v2148_v9, -inf  ;;  %v4221_v54 = vsel %vm2456_vm1, %v2190_v43, -inf }
 0x373   : > { %v4153_v49 = vmax.f32 %v4151_v31, %v4152_v52  ;;  %v4159_v16 = vrot.slane %v4158_v2, 4  ;;  %v4222_v36 = vrot.slane %v4221_v54, 4  ;;  %v4228_v63 = vsel %vm2456_vm1, %v2198_v45, -inf }
 0x374   : > { %v4140_v5 = vrot.slane %v4139_v41, 2  ;;  %v4146_v25 = vmax.f32 %v4144_v11, %v4145_v18  ;;  %v4235_v44 = vsel %vm2456_vm1, %v2197_v22, -inf  ;;  %v4242_v32 = vsel %vm2456_vm1, %v2199_v40, -inf }
 0x375   : > { %v12241_v30 = vld [vmem:[#allocation2 + $0x112] sm:$0xff]  ;;  %v4154_v28 = vrot.slane %v4153_v49, 2  ;;  %v4160_v1 = vmax.f32 %v4158_v2, %v4159_v16  ;;  %v4223_v24 = vmax.f32 %v4221_v54, %v4222_v36  ;;  %v4229_v60 = vrot.slane %v4228_v63, 4 }
 0x376   : > { %v4141_v57 = vmax.f32 %v4139_v41, %v4140_v5  ;;  %v4147_v4 = vrot.slane %v4146_v25, 2  ;;  %9745 = vmatmul.mubr.msk.f32.gmra.mxu0 %vm4249_vm2, %v12241_v30  ;;  %v4236_v7 = vrot.slane %v4235_v44, 4  ;;  %v4243_v13 = vrot.slane %v4242_v32, 4  ;;  %v12266_v5 = vld [vmem:[#allocation2 + $0xe1] sm:$0xff] }
 0x377   : > { %v4161_v34 = vrot.slane %v4160_v1, 2  ;;  %v4177_v50 = vrot.slane %v4176_v53, 1  ;;  %v4184_v35 = vrot.slane %v4183_v10, 1  ;;  %v4190_v23 = vmax.f32 %v4188_v0, %v4189_v3 }
 0x378   : > { %v4148_v14 = vmax.f32 %v4146_v25, %v4147_v4  ;;  %v4171_v39 = vmax.f32 %v4169_v17, %v4170_v47  ;;  %v4142_v19 = vrot.slane %v4141_v57, 1  ;;  %v4155_v62 = vmax.f32 %v4153_v49, %v4154_v28  ;;  %v12282_v28 = vld [vmem:[#allocation2 + $0x101] sm:$0xff] }
 0x379   : > { %v976_v55 = vadd.f32 %v12171_v21, %v975_v51  ;;  %v4224_v20 = vrot.slane %v4223_v24, 2  ;;  %v4230_v58 = vmax.f32 %v4228_v63, %v4229_v60  ;;  %v4237_v15 = vmax.f32 %v4235_v44, %v4236_v7  ;;  %v12274_v63 = vld [vmem:[#allocation2 + $0xf1] sm:$0xff] }
 0x37a   : > { %v4244_v26 = vmax.f32 %v4242_v32, %v4243_v13  ;;  %v4162_v42 = vmax.f32 %v4160_v1, %v4161_v34  ;;  %v4178_v37 = vmax.f32 %v4176_v53, %v4177_v50  ;;  %v4185_v29 = vmax.f32 %v4183_v10, %v4184_v35  ;;  %v10081_v10 = vld [vmem:[#allocation2 + $0xc2] sm:$0xff]  ;;  %v12284_v1 = vld [vmem:[#allocation2 + $0x111] sm:$0xff]  ;;  %v9889_v34 = vpop.permute.xlu0 %9888 }
 0x37b   : > { %v4191_v27 = vrot.slane %v4190_v23, 1  ;;  %v4149_v61 = vrot.slane %v4148_v14, 1  ;;  %v12249_v56 = vsel %vm4249_vm2, %v4171_v39, -inf  ;;  %v4143_v0 = vmax.f32 %v4141_v57, %v4142_v19  ;;  %v12288_v13 = vld [vmem:[#allocation2 + $0xd2] sm:$0xff] }
 0x37c   : > { %v4156_v17 = vrot.slane %v4155_v62, 1  ;;  %v1046_v3 = vmax.f32 %v976_v55, 0.0  ;;  %v12251_v9 = vmax.f32 %v4223_v24, %v4224_v20  ;;  %v4231_v21 = vrot.slane %v4230_v58, 2 }
 0x37d   : > { %v4238_v6 = vrot.slane %v4237_v15, 2  ;;  %v4245_v11 = vrot.slane %v4244_v26, 2  ;;  %v4163_v31 = vrot.slane %v4162_v42, 1  ;;  %v9932_v22 = vpack.i.bf16 %v10081_v10, %v12246_v59 }
 0x37e   : > { %v2166_v43 = vcombine.high %v1046_v3, %v1046_v3  ;;  %v2173_v53 = vrot.slane %v1046_v3, %v10427_v12  ;;  %v12255_v47 = vmax.f32 %v4190_v23, %v4191_v27  ;;  %v12258_v41 = vsel %vm4249_vm2, %v4178_v37, -inf }
 0x37f   : > { %v12261_v18 = vsel %vm4249_vm2, %v4185_v29, -inf  ;;  %v4150_v52 = vmax.f32 %v4148_v14, %v4149_v61  ;;  %v4157_v2 = vmax.f32 %v4155_v62, %v4156_v17  ;;  %9933 = vrot.lane.b32.xlu1 %v9932_v22, %s14809_s17  ;;  %v12269_v25 = vsel %vm4249_vm2, %v4143_v0, -inf  ;;  %v12293_v14 = vld [vmem:[#allocation2 + $0xe2] sm:$0xff]  ;;  %v12309_v0 = vld [vmem:[#allocation2 + $0x11] sm:$0xff]  ;;  %v9894_v17 = vpop.permute.xlu0 %9893 }
 0x380   : > { %v2180_v45 = vrot.slane %v2166_v43, %v10427_v12  ;;  %v2181_v40 = vcombine.high %v2173_v53, %v2173_v53  ;;  %v4193_v54 = vsel %vm2456_vm1, %v2173_v53, -inf  ;;  %v4226_v49 = vrot.slane %v12251_v9, 1  ;;  %v5218_v22 = vld [vmem:[%s14755_s3 + $0xf0] sm:$0xff] }
 0x381   : > { %v12272_v16 = vmax.f32 %v4230_v58, %v4231_v21  ;;  %v4194_v36 = vrot.slane %v4193_v54, 4  ;;  %v12276_v44 = vmax.f32 %v4162_v42, %v4163_v31  ;;  %v12278_v32 = vmax.f32 %v4237_v15, %v4238_v6 }
 0x382   : > { %v12280_v57 = vmax.f32 %v4244_v26, %v4245_v11  ;;  %v2182_v4 = vcombine.high %v2180_v45, %v2180_v45  ;;  %v4200_v60 = vsel %vm2456_vm1, %v2181_v40, -inf  ;;  %v4207_v7 = vsel %vm2456_vm1, %v2180_v45, -inf  ;;  %v5203_v11 = vld [vmem:[%s14755_s3 + $0x78] sm:$0xff] }
 0x383   : > { %v4195_v24 = vmax.f32 %v4193_v54, %v4194_v36  ;;  %v9937_v51 = vpack.i.bf16 %v12288_v13, %v12266_v5  ;;  %v4201_v50 = vrot.slane %v4200_v60, 4  ;;  %v4208_v35 = vrot.slane %v4207_v7, 4  ;;  %v9899_v54 = vpop.permute.xlu1 %9898  ;;  %v5202_v36 = vld [vmem:[%s14755_s3 + $0x70] sm:$0xff] }
 0x384   : > { %v4214_v23 = vsel %vm2456_vm1, %v2182_v4, -inf  ;;  %v9942_v39 = vpack.i.bf16 %v12293_v14, %v12274_v63  ;;  %v9947_v55 = vpack.i.bf16 %v12039_v48, %v12282_v28  ;;  %v9952_v20 = vpack.i.bf16 %v12157_v46, %v12284_v1  ;;  %v12311_v48 = vld [vmem:[#allocation2 + $0x20] sm:$0xff] }
 0x385   : > { %v4196_v19 = vrot.slane %v4195_v24, 2  ;;  %v4215_v62 = vrot.slane %v4214_v23, 4  ;;  %9938 = vrot.lane.b32.xlu0 %v9937_v51, %s14809_s17  ;;  %v4202_v58 = vmax.f32 %v4200_v60, %v4201_v50  ;;  %v4209_v15 = vmax.f32 %v4207_v7, %v4208_v35  ;;  %v12332_v51 = vld [vmem:[#allocation2 + $0x21] sm:$0xff] }
 0x386   : > { %9943 = vrot.lane.b32.xlu1 %v9942_v39, %s14809_s17  ;;  %v9891_v26 = vunpack.i.h.bf16 %v9889_v34  ;;  %v9890_v42 = vunpack.i.l.bf16 %v9889_v34  ;;  %v12304_v37 = vsel %vm4249_vm2, %v4150_v52, -inf  ;;  %v12307_v29 = vsel %vm4249_vm2, %v4157_v2, -inf  ;;  %v12334_v34 = vld [vmem:[#allocation2 + $0x30] sm:$0xff]  ;;  %v5217_v50 = vld [vmem:[%s14755_s3 + $0xe8] sm:$0xff] }
 0x387   : > { %v4197_v27 = vmax.f32 %v4195_v24, %v4196_v19  ;;  %v4216_v61 = vmax.f32 %v4214_v23, %v4215_v62  ;;  %v4203_v46 = vrot.slane %v4202_v58, 2  ;;  %v4210_v3 = vrot.slane %v4209_v15, 2 }
 0x388   : > { %v5429_v21 = vsel %vm4249_vm2, %v12311_v48, %v9890_v42  ;;  %v5413_v6 = vsel %vm4249_vm2, %v12309_v0, %v9891_v26  ;;  %v4233_v31 = vrot.slane %v12272_v16, 1  ;;  %v4240_v43 = vrot.slane %v12278_v32, 1 }
 0x389   : > { %v4198_v53 = vrot.slane %v4197_v27, 1  ;;  %v4217_v10 = vrot.slane %v4216_v61, 2  ;;  %9948 = vrot.lane.b32.xlu0 %v9947_v55, %s14809_s17  ;;  %5541 = vmatprep.mubr.f32.mxu1 %v5429_v21  ;;  %v4204_v52 = vmax.f32 %v4202_v58, %v4203_v46  ;;  %v4211_v2 = vmax.f32 %v4209_v15, %v4210_v3  ;;  %v5216_v58 = vld [vmem:[%s14755_s3 + $0xe0] sm:$0xff]  ;;  %v12359_v3 = vld [vmem:[#allocation2 + $0x31] sm:$0xff] }
 0x38a   : > { %9953 = vrot.lane.b32.xlu1 %v9952_v20, %s14809_s17  ;;  %5542 = vmatmul.mubr.f32.vlgmr.msra.gmra.mxu1 %v5413_v6  ;;  %v9896_v45 = vunpack.i.h.bf16 %v9894_v17  ;;  %v9895_v40 = vunpack.i.l.bf16 %v9894_v17  ;;  %v4227_v4 = vmax.f32 %v12251_v9, %v4226_v49  ;;  %v4247_v24 = vrot.slane %v12280_v57, 1  ;;  %v5201_v49 = vld [vmem:[%s14755_s3 + $0x68] sm:$0xff] }
 0x38b   : > { %v4199_v60 = vmax.f32 %v4197_v27, %v4198_v53  ;;  %v4218_v7 = vmax.f32 %v4216_v61, %v4217_v10  ;;  %9463 = vmatpush3.msra.mxu1 %v5203_v11  ;;  %v4205_v35 = vrot.slane %v4204_v52, 1  ;;  %v4212_v23 = vrot.slane %v4211_v2, 1  ;;  %v9904_v61 = vpop.permute.xlu1 %9903 }
 0x38c   : > { %v5430_v39 = vsel %vm4249_vm2, %v12334_v34, %v9895_v40  ;;  %v5414_v9 = vsel %vm4249_vm2, %v12332_v51, %v9896_v45  ;;  %9464 = vmatprep.subr.mxu1 %v5218_v22  ;;  %v4619_v19 = vsel %vm4249_vm2, %v12276_v44, -inf  ;;  %v4234_v62 = vmax.f32 %v12272_v16, %v4233_v31  ;;  %v5200_v16 = vld [vmem:[%s14755_s3 + $0x60] sm:$0xff] }
 0x38d   : > { %v4219_v55 = vrot.slane %v4218_v7, 1  ;;  %v4611_v20 = vsel %vm4249_vm2, %v4199_v60, -inf  ;;  %5546 = vmatprep.mubr.f32.mxu1 %v5430_v39  ;;  %9465 = vmatpush3.msra.mxu1 %v5202_v36  ;;  %v4241_v15 = vmax.f32 %v12278_v32, %v4240_v43  ;;  %v4206_v26 = vmax.f32 %v4204_v52, %v4205_v35  ;;  %v5215_v32 = vld [vmem:[%s14755_s3 + $0xd8] sm:$0xff]  ;;  %v12367_v43 = vld [vmem:[#allocation2 + $0x40] sm:$0xff]  ;;  %v12389_v35 = vld [vmem:[#allocation2 + $0x50] sm:$0xff] }
 0x38e   : > { %v4213_v42 = vmax.f32 %v4211_v2, %v4212_v23  ;;  %5547 = vmatmul.mubr.f32.gmra.mxu1 %v5414_v9  ;;  %v9901_v27 = vunpack.i.h.bf16 %v9899_v54  ;;  %9466 = vmatprep.subr.mxu1 %v5217_v50  ;;  %v4248_v44 = vmax.f32 %v12280_v57, %v4247_v24  ;;  %v4623_v17 = vsel %vm4249_vm2, %v4227_v4, -inf  ;;  %v5199_v2 = vld [vmem:[%s14755_s3 + $0x58] sm:$0xff]  ;;  %v12387_v50 = vld [vmem:[#allocation2 + $0x41] sm:$0xff]  ;;  %v5198_v23 = vld [vmem:[%s14755_s3 + $0x50] sm:$0xff] }
 0x38f   : > { %v4220_v46 = vmax.f32 %v4218_v7, %v4219_v55  ;;  %v9900_v21 = vunpack.i.l.bf16 %v9899_v54  ;;  %9467 = vmatpush3.msra.mxu1 %v5201_v49  ;;  %v4612_v6 = vmax.f32 %v12269_v25, %v4611_v20  ;;  %v4614_v11 = vsel %vm4249_vm2, %v4206_v26, -inf  ;;  %v9909_v25 = vpop.permute.xlu0 %9908 }
 0x390   : > { %v4617_v31 = vsel %vm4249_vm2, %v4213_v42, -inf  ;;  %v5415_v57 = vsel %vm4249_vm2, %v12359_v3, %v9901_v27  ;;  %9468 = vmatprep.subr.mxu1 %v5216_v58  ;;  %v4615_v53 = vmax.f32 %v12304_v37, %v4614_v11  ;;  %v4626_v45 = vsel %vm4249_vm2, %v4234_v62, -inf  ;;  %v9914_v37 = vpop.permute.xlu1 %9913  ;;  %v5213_v58 = vld [vmem:[%s14755_s3 + $0xc8] sm:$0xff]  ;;  %v12408_v27 = vld [vmem:[#allocation2 + $0x60] sm:$0xff] }
 0x391   : > { %v4618_v10 = vmax.f32 %v12307_v29, %v4617_v31  ;;  %v4620_v22 = vsel %vm4249_vm2, %v4220_v46, -inf  ;;  %v5431_v52 = vsel %vm4249_vm2, %v12367_v43, %v9900_v21  ;;  %9469 = vmatpush3.msra.mxu1 %v5200_v16  ;;  %v9906_v54 = vunpack.i.h.bf16 %v9904_v61  ;;  %v5214_v29 = vld [vmem:[%s14755_s3 + $0xd0] sm:$0xff] }
 0x392   : > { %v4621_v40 = vmax.f32 %v4619_v19, %v4620_v22  ;;  %5551 = vmatprep.mubr.f32.mxu1 %v5431_v52  ;;  %v9905_v36 = vunpack.i.l.bf16 %v9904_v61  ;;  %9470 = vmatprep.subr.mxu1 %v5215_v32  ;;  %v4624_v4 = vmax.f32 %v12249_v56, %v4623_v17  ;;  %v4629_v24 = vsel %vm4249_vm2, %v4241_v15, -inf  ;;  %v5197_v61 = vld [vmem:[%s14755_s3 + $0x48] sm:$0xff]  ;;  %v12414_v17 = vld [vmem:[#allocation2 + $0x51] sm:$0xff] }
 0x393   : > { %v4632_v60 = vsel %vm4249_vm2, %v4248_v44, -inf  ;;  %v4924_v7 = vsel %vm4812_vm3, %v4615_v53, %v4612_v6  ;;  %5552 = vmatmul.mubr.f32.gmra.mxu1 %v5415_v57  ;;  %v5416_v9 = vsel %vm4249_vm2, %v12387_v50, %v9906_v54  ;;  %v9911_v49 = vunpack.i.h.bf16 %v9909_v25  ;;  %v12422_v21 = vld [vmem:[#allocation2 + $0x70] sm:$0xff]  ;;  %v5196_v53 = vld [vmem:[%s14755_s3 + $0x40] sm:$0xff]  ;;  %v5195_v52 = vld [vmem:[%s14755_s3 + $0x38] sm:$0xff] }
 0x394   : > { %v4925_v39 = vsel %vm4814_vm4, %v4618_v10, %v4924_v7  ;;  %v5432_v56 = vsel %vm4249_vm2, %v12389_v35, %v9905_v36  ;;  %9471 = vmatpush3.msra.mxu1 %v5199_v2  ;;  %v4627_v19 = vmax.f32 %v12258_v41, %v4626_v45  ;;  %v9910_v55 = vunpack.i.l.bf16 %v9909_v25  ;;  %v9919_v41 = vpop.permute.xlu0 %9918  ;;  %v5211_v10 = vld [vmem:[%s14755_s3 + $0xb8] sm:$0xff]  ;;  %v12436_v22 = vld [vmem:[#allocation2 + $0x61] sm:$0xff]  ;;  %v9924_v54 = vpop.permute.xlu1 %9923 }
 0x395   : > { %v4926_v62 = vsel %vm4816_vm5, %v4621_v40, %v4925_v39  ;;  %5556 = vmatprep.mubr.f32.mxu1 %v5432_v56  ;;  %v9915_v20 = vunpack.i.l.bf16 %v9914_v37  ;;  %9472 = vmatprep.subr.mxu1 %v5214_v29  ;;  %v4631_v15 = vsel %vm4249_vm2, %v12255_v47, -inf  ;;  %v4630_v26 = vmax.f32 %v12261_v18, %v4629_v24  ;;  %v5212_v18 = vld [vmem:[%s14755_s3 + $0xc0] sm:$0xff]  ;;  %v5210_v40 = vld [vmem:[%s14755_s3 + $0xb0] sm:$0xff]  ;;  %v5209_v29 = vld [vmem:[%s14755_s3 + $0xa8] sm:$0xff] }
 0x396   : > { %v4927_v42 = vsel %vm4818_vm6, %v4624_v4, %v4926_v62  ;;  %9473 = vmatpush3.msra.mxu1 %v5198_v23  ;;  %v4633_v16 = vmax.f32 %v4631_v15, %v4632_v60  ;;  %v5433_v47 = vsel %vm4249_vm2, %v12408_v27, %v9910_v55  ;;  %v5417_v32 = vsel %vm4249_vm2, %v12414_v17, %v9911_v49  ;;  %v12441_v25 = vld [vmem:[#allocation2 + $0x80] sm:$0xff]  ;;  %v5284_v4 = vld [vmem:[#allocation2 + $0x131] sm:$0xff]  ;;  %v5193_v60 = vld [vmem:[%s14755_s3 + $0x28] sm:$0xff] }
 0x397   : > { %v4928_v44 = vsel %vm4820_vm7, %v4627_v19, %v4927_v42  ;;  %5557 = vmatmul.mubr.f32.gmra.mxu1 %v5416_v9  ;;  %v9916_v6 = vunpack.i.h.bf16 %v9914_v37  ;;  %9474 = vmatprep.subr.mxu1 %v5213_v58  ;;  %v5434_v31 = vsel %vm4249_vm2, %v12422_v21, %v9915_v20  ;;  %v9920_v57 = vunpack.i.l.bf16 %v9919_v41  ;;  %v5194_v37 = vld [vmem:[%s14755_s3 + $0x30] sm:$0xff]  ;;  %v5208_v39 = vld [vmem:[%s14755_s3 + $0xa0] sm:$0xff] }
 0x398   : > { %v4929_v46 = vsel %vm4822_vm8, %v4630_v26, %v4928_v44  ;;  %5561 = vmatprep.mubr.f32.mxu1 %v5433_v47  ;;  %9475 = vmatpush3.msra.mxu1 %v5197_v61  ;;  %v9921_v45 = vunpack.i.h.bf16 %v9919_v41  ;;  %v12456_v24 = vld [vmem:[#allocation2 + $0x71] sm:$0xff]  ;;  %v9925_v7 = vunpack.i.l.bf16 %v9924_v54  ;;  %v9926_v55 = vunpack.i.h.bf16 %v9924_v54  ;;  %v5192_v20 = vld [vmem:[%s14755_s3 + $0x20] sm:$0xff] }
 0x399   : > { %v4930_v11 = vsel %vm4824_vm9, %v4633_v16, %v4929_v46  ;;  %9476 = vmatprep.subr.mxu1 %v5212_v18  ;;  %v5418_v2 = vsel %vm4249_vm2, %v12436_v22, %v9916_v6  ;;  %v5435_v36 = vsel %vm4249_vm2, %v12441_v25, %v9920_v57  ;;  %v5260_v49 = vld [vmem:[#allocation2 + $0x90] sm:$0xff]  ;;  %v4980_v58 = vld [vmem:[#allocation2 + $0x1] sm:$0xff]  ;;  %v5207_v26 = vld [vmem:[%s14755_s3 + $0x98] sm:$0xff]  ;;  %v9972_v16 = vpack.i.bf16 %v12309_v0, %v12311_v48 }
 0x39a   : > { %4963 = vst.msk [vmem:[#allocation2 + $0x121] sm:$0xff] %vm4249_vm2, %v4930_v11  ;;  %9477 = vmatpush3.msra.mxu1 %v5196_v53  ;;  %v5419_v23 = vsel %vm4249_vm2, %v12456_v24, %v9921_v45  ;;  %v12474_v15 = vld [vmem:[#allocation2 + $0x10] sm:$0xff]  ;;  %v5436_v42 = vsel %vm4249_vm2, %v5260_v49, %v9925_v7  ;;  %v5227_v41 = vld [vmem:[#allocation2 + $0x81] sm:$0xff]  ;;  %v5191_v47 = vld [vmem:[%s14755_s3 + $0x18] sm:$0xff]  ;;  %v9977_v46 = vpack.i.bf16 %v12332_v51, %v12334_v34  ;;  %vm7597_vm1 = vcmask 97280  }
 0x39b   : > { %5562 = vmatmul.mubr.f32.gmra.mxu1 %v5417_v32  ;;  %9478 = vmatprep.subr.mxu1 %v5211_v10  ;;  %v9967_v61 = vpack.i.bf16 %v4980_v58, %v12474_v15  ;;  %v5420_v44 = vsel %vm4249_vm2, %v5227_v41, %v9926_v55  ;;  %v5206_v18 = vld [vmem:[%s14755_s3 + $0x90] sm:$0xff]  ;;  %v9982_v32 = vpack.i.bf16 %v12359_v3, %v12367_v43  ;;  %v5205_v6 = vld [vmem:[%s14755_s3 + $0x88] sm:$0xff]  ;;  %v5204_v51 = vld [vmem:[%s14755_s3 + $0x80] sm:$0xff] }
 0x39c   : > { %5566 = vmatprep.mubr.f32.mxu1 %v5434_v31  ;;  %9479 = vmatpush3.msra.mxu1 %v5195_v52  ;;  %v5190_v0 = vld [vmem:[%s14755_s3 + $0x10] sm:$0xff]  ;;  %v5189_v11 = vld [vmem:[%s14755_s3 + $0x8] sm:$0xff]  ;;  %v9987_v3 = vpack.i.bf16 %v12387_v50, %v12389_v35  ;;  %v9992_v31 = vpack.i.bf16 %v12414_v17, %v12408_v27  ;;  %v5188_v57 = vld [vmem:[%s14755_s3] sm:$0xff]  ;;  %v9997_v53 = vpack.i.bf16 %v12436_v22, %v12422_v21 }
 0x39d   : > { %9480 = vmatprep.subr.mxu1 %v5210_v40  ;;  %v10002_v50 = vpack.i.bf16 %v12456_v24, %v12441_v25  ;;  %v4988_v10 = vld [vmem:[#allocation2 + $0xa1] sm:$0xff]  ;;  %v12525_v52 = vld [vmem:[#allocation2 + $0xb0] sm:$0xff] }
 0x39e   : > { %9481 = vmatpush3.msra.mxu1 %v5194_v37  ;;  %v12527_v17 = vld [vmem:[#allocation2 + $0xc0] sm:$0xff]  ;;  %v10007_v45 = vpack.i.bf16 %v4988_v10, %v12525_v52  ;;  %v12533_v54 = vld [vmem:[#allocation2 + $0xd0] sm:$0xff] }
 0x39f   : > { %5567 = vmatmul.mubr.f32.gmra.mxu1 %v5418_v2  ;;  %9482 = vmatprep.subr.mxu1 %v5209_v29  ;;  %v4989_v2 = vld [vmem:[#allocation2 + $0xb1] sm:$0xff]  ;;  %v12535_v22 = vld [vmem:[#allocation2 + $0xe0] sm:$0xff]  ;;  %v10017_v25 = vpack.i.bf16 %v12194_v33, %v12533_v54 }
 0x3a0   : > { %5571 = vmatprep.mubr.f32.mxu1 %v5435_v36  ;;  %9483 = vmatpush3.msra.mxu1 %v5193_v60  ;;  %v10012_v40 = vpack.i.bf16 %v4989_v2, %v12527_v17  ;;  %v10022_v36 = vpack.i.bf16 %v12246_v59, %v12535_v22  ;;  %v12543_v37 = vld [vmem:[#allocation2 + $0xf0] sm:$0xff]  ;;  %v12545_v29 = vld [vmem:[#allocation2 + $0x100] sm:$0xff] }
 0x3a1   : > { %v5781_v56 = vld [vmem:[#allocation2 + $0x122] sm:$0xff]  ;;  %9484 = vmatprep.subr.mxu1 %v5208_v39  ;;  %v10032_v24 = vpack.i.bf16 %v12274_v63, %v12545_v29  ;;  %v12553_v60 = vld [vmem:[#allocation2 + $0x110] sm:$0xff] }
 0x3a2   : > { %v12466_v9 = vld [vmem:[#allocation2 + $0x121] sm:$0xff]  ;;  %9747 = vmatprep.mubr.msk.f32.mxu0 %vm4249_vm2, %v5781_v56  ;;  %v9962_v19 = vpack.i.bf16 %v5781_v56, %v5284_v4  ;;  %9485 = vmatpush3.msra.mxu1 %v5192_v20  ;;  %v10027_v4 = vpack.i.bf16 %v12266_v5, %v12543_v37  ;;  %v5782_v20 = vld [vmem:[#allocation2 + $0x132] sm:$0xff] }
 0x3a3   : > { %v9957_v62 = vpack.i.bf16 %v12241_v30, %v12466_v9  ;;  %5572 = vmatmul.mubr.f32.gmra.mxu1 %v5419_v23  ;;  %9486 = vmatprep.subr.mxu1 %v5207_v26  ;;  %v5027_v7 = vld [vmem:[#allocation2 + $0x120] sm:$0xff]  ;;  %v10037_v23 = vpack.i.bf16 %v12282_v28, %v12553_v60 }
 0x3a4   : > { %9963 = vrot.lane.b32.xlu1 %v9962_v19, %s14809_s17  ;;  %5576 = vmatprep.mubr.f32.mxu1 %v5436_v42  ;;  %v10042_v39 = vpack.i.bf16 %v12284_v1, %v5027_v7 }
 0x3a5   : > { %9958 = vrot.lane.b32.xlu0 %v9957_v62, %s14809_s17  ;;  %9487 = vmatpush3.msra.mxu1 %v5191_v47 }
 0x3a6   : > { %9488 = vmatprep.subr.mxu1 %v5206_v18  ;;  %9748 = vmatmul.mubr.msk.f32.gmra.mxu0 %vm4249_vm2, %v5782_v20 }
 0x3a7   : > { %5577 = vmatmul.mubr.f32.gmra.mxu1 %v5420_v44 }
 0x3a8   : > { %9973 = vrot.lane.b32.xlu1 %v9972_v16, %s14809_s17  ;;  %9489 = vmatpush3.msra.mxu1 %v5190_v0 }
 0x3a9   : > { %9968 = vrot.lane.b32.xlu0 %v9967_v61, %s14809_s17  ;;  %9490 = vmatprep.subr.mxu1 %v5205_v6 }
 0x3aa   : > { %9491 = vmatpush3.msra.mxu1 %v5189_v11 }
 0x3ab   : > { %9492 = vmatprep.subr.mxu1 %v5204_v51 }
 0x3ac   : > { %9983 = vrot.lane.b32.xlu1 %v9982_v32, %s14809_s17  ;;  %9493 = vmatpush3.msra.mxu1 %v5188_v57 }
 0x3ad   : > { %9978 = vrot.lane.b32.xlu0 %v9977_v46, %s14809_s17 }
 0x3b0   : > { %9993 = vrot.lane.b32.xlu1 %v9992_v31, %s14809_s17 }
 0x3b1   : > { %9988 = vrot.lane.b32.xlu0 %v9987_v3, %s14809_s17 }
 0x3b4   : > { %10003 = vrot.lane.b32.xlu1 %v10002_v50, %s14809_s17 }
 0x3b5   : > { %9998 = vrot.lane.b32.xlu0 %v9997_v53, %s14809_s17 }
 0x3b8   : > { %10013 = vrot.lane.b32.xlu1 %v10012_v40, %s14809_s17 }
 0x3b9   : > { %10008 = vrot.lane.b32.xlu0 %v10007_v45, %s14809_s17 }
 0x3bc   : > { %10023 = vrot.lane.b32.xlu1 %v10022_v36, %s14809_s17 }
 0x3bd   : > { %10018 = vrot.lane.b32.xlu0 %v10017_v25, %s14809_s17 }
 0x3c0   : > { %10033 = vrot.lane.b32.xlu1 %v10032_v24, %s14809_s17  ;;  %v5268_v24 = vld [vmem:[#allocation2 + $0x130] sm:$0xff] }
 0x3c1   : > { %10028 = vrot.lane.b32.xlu0 %v10027_v4, %s14809_s17 }
 0x3c4   : > { %10043 = vrot.lane.b32.xlu1 %v10042_v39, %s14809_s17 }
 0x3c5   : > { %10038 = vrot.lane.b32.xlu0 %v10037_v23, %s14809_s17 }
 0x3d3   : > { %v9929_v56 = vpop.permute.xlu0 %9928 }
 0x3d4   : > { %v9931_v49 = vunpack.i.h.bf16 %v9929_v56  ;;  %v9930_v19 = vunpack.i.l.bf16 %v9929_v56 }
 0x3d6   : > { %v5437_v62 = vsel %vm4249_vm2, %v12527_v17, %v9930_v19  ;;  %v5421_v55 = vsel %vm4249_vm2, %v4989_v2, %v9931_v49 }
 0x3d7   : > { %5581 = vmatprep.mubr.f32.mxu1 %v5437_v62  ;;  %v4996_v62 = vld [vmem:[#allocation2 + $0x2] sm:$0xff] }
 0x3d8   : > { %5582 = vmatmul.mubr.f32.gmra.mxu1 %v5421_v55 }
 0x3f1   : > { %v9934_v58 = vpop.permute.xlu1 %9933 }
 0x3f2   : > { %v9936_v26 = vunpack.i.h.bf16 %v9934_v58  ;;  %v9935_v42 = vunpack.i.l.bf16 %v9934_v58 }
 0x3f4   : > { %v5438_v41 = vsel %vm4249_vm2, %v12533_v54, %v9935_v42  ;;  %v5422_v61 = vsel %vm4249_vm2, %v12194_v33, %v9936_v26  ;;  %v4964_v26 = vld [vmem:[#allocation2] sm:$0xff] }
 0x3f5   : > { %5586 = vmatprep.mubr.f32.mxu1 %v5438_v41 }
 0x3f6   : > { %5587 = vmatmul.mubr.f32.gmra.mxu1 %v5422_v61  ;;  %v4997_v61 = vld [vmem:[#allocation2 + $0x12] sm:$0xff] }
 0x3f7   : > { %v9939_v16 = vpop.permute.xlu0 %9938 }
 0x3f8   : > { %v9941_v44 = vunpack.i.h.bf16 %v9939_v16  ;;  %v9940_v47 = vunpack.i.l.bf16 %v9939_v16  ;;  %v9944_v18 = vpop.permute.xlu1 %9943 }
 0x3f9   : > { %v9946_v0 = vunpack.i.h.bf16 %v9944_v18  ;;  %v9945_v46 = vunpack.i.l.bf16 %v9944_v18 }
 0x3fa   : > { %v5439_v32 = vsel %vm4249_vm2, %v12535_v22, %v9940_v47  ;;  %v5423_v6 = vsel %vm4249_vm2, %v12246_v59, %v9941_v44 }
 0x3fb   : > { %5591 = vmatprep.mubr.f32.mxu1 %v5439_v32  ;;  %v5440_v11 = vsel %vm4249_vm2, %v12543_v37, %v9945_v46  ;;  %v9949_v51 = vpop.permute.xlu0 %9948  ;;  %v5424_v31 = vsel %vm4249_vm2, %v12266_v5, %v9946_v0  ;;  %v4998_v0 = vld [vmem:[#allocation2 + $0x22] sm:$0xff] }
 0x3fc   : > { %5592 = vmatmul.mubr.f32.gmra.mxu1 %v5423_v6  ;;  %v9950_v33 = vunpack.i.l.bf16 %v9949_v51  ;;  %v9954_v3 = vpop.permute.xlu1 %9953  ;;  %v9951_v57 = vunpack.i.h.bf16 %v9949_v51 }
 0x3fd   : > { %5596 = vmatprep.mubr.f32.mxu1 %v5440_v11  ;;  %v9955_v50 = vunpack.i.l.bf16 %v9954_v3  ;;  %v9956_v10 = vunpack.i.h.bf16 %v9954_v3 }
 0x3fe   : > { %v5441_v53 = vsel %vm4249_vm2, %v12545_v29, %v9950_v33  ;;  %v5425_v59 = vsel %vm4249_vm2, %v12274_v63, %v9951_v57  ;;  %v4999_v33 = vld [vmem:[#allocation2 + $0x32] sm:$0xff] }
 0x3ff   : > { %v5442_v2 = vsel %vm4249_vm2, %v12553_v60, %v9955_v50  ;;  %v5426_v45 = vsel %vm4249_vm2, %v12282_v28, %v9956_v10  ;;  %v5000_v50 = vld [vmem:[#allocation2 + $0x42] sm:$0xff] }
 0x400   : > { %5597 = vmatmul.mubr.f32.gmra.mxu1 %v5424_v31 }
 0x401   : > { %5601 = vmatprep.mubr.f32.mxu1 %v5441_v53 }
 0x404   : > { %5602 = vmatmul.mubr.f32.gmra.mxu1 %v5425_v59 }
 0x405   : > { %5606 = vmatprep.mubr.f32.mxu1 %v5442_v2 }
 0x408   : > { %5607 = vmatmul.mubr.f32.gmra.mxu1 %v5426_v45 }
 0x416   : > { %v9964_v5 = vpop.permute.xlu1 %9963 }
 0x417   : > { %v9959_v40 = vpop.permute.xlu0 %9958  ;;  %v9965_v25 = vunpack.i.l.bf16 %v9964_v5  ;;  %v9966_v39 = vunpack.i.h.bf16 %v9964_v5  ;;  %v5001_v5 = vld [vmem:[#allocation2 + $0x52] sm:$0xff] }
 0x418   : > { %v9961_v36 = vunpack.i.h.bf16 %v9959_v40  ;;  %v9960_v4 = vunpack.i.l.bf16 %v9959_v40 }
 0x419   : > { %v5444_v19 = vsel %vm4249_vm2, %v5268_v24, %v9965_v25  ;;  %v5428_v20 = vsel %vm4249_vm2, %v12466_v9, %v9966_v39  ;;  %v5002_v24 = vld [vmem:[#allocation2 + $0x62] sm:$0xff] }
 0x41a   : > { %v5443_v23 = vsel %vm4249_vm2, %v5027_v7, %v9960_v4  ;;  %v5427_v63 = vsel %vm4249_vm2, %v12284_v1, %v9961_v36  ;;  %v9974_v28 = vpop.permute.xlu1 %9973 }
 0x41b   : > { %5611 = vmatprep.mubr.f32.mxu1 %v5443_v23  ;;  %v9969_v56 = vpop.permute.xlu0 %9968  ;;  %v9975_v58 = vunpack.i.l.bf16 %v9974_v28  ;;  %v9976_v42 = vunpack.i.h.bf16 %v9974_v28 }
 0x41c   : > { %v9970_v49 = vunpack.i.l.bf16 %v9969_v56  ;;  %5612 = vmatmul.mubr.f32.gmra.mxu1 %v5427_v63  ;;  %v9971_v55 = vunpack.i.h.bf16 %v9969_v56 }
 0x41d   : > { %5616 = vmatprep.mubr.f32.mxu1 %v5444_v19  ;;  %v5173_v44 = vsel %vm4249_vm2, %v4997_v61, %v9975_v58  ;;  %v5157_v9 = vsel %vm4249_vm2, %v12474_v15, %v9976_v42 }
 0x41e   : > { %v5172_v7 = vsel %vm4249_vm2, %v4996_v62, %v9970_v49  ;;  %v5156_v41 = vsel %vm4249_vm2, %v4964_v26, %v9971_v55  ;;  %v9984_v47 = vpop.permute.xlu1 %9983  ;;  %v5003_v49 = vld [vmem:[#allocation2 + $0x72] sm:$0xff]  ;;  %v5004_v55 = vld [vmem:[#allocation2 + $0xa2] sm:$0xff] }
 0x41f   : > { %v9979_v1 = vpop.permute.xlu0 %9978  ;;  %v9985_v46 = vunpack.i.l.bf16 %v9984_v47  ;;  %v9986_v11 = vunpack.i.h.bf16 %v9984_v47  ;;  %v4972_v26 = vld [vmem:[#allocation2 + $0xa0] sm:$0xff] }
 0x420   : > { %5617 = vmatmul.mubr.f32.gmra.mxu1 %v5428_v20  ;;  %v9980_v16 = vunpack.i.l.bf16 %v9979_v1  ;;  %v9981_v18 = vunpack.i.h.bf16 %v9979_v1 }
 0x421   : > { %5686 = vmatprep.mubr.f32.mxu1 %v5172_v7  ;;  %v5175_v31 = vsel %vm4249_vm2, %v4999_v33, %v9985_v46  ;;  %v5159_v15 = vsel %vm4249_vm2, %v12334_v34, %v9986_v11 }
 0x422   : > { %v5174_v32 = vsel %vm4249_vm2, %v4998_v0, %v9980_v16  ;;  %v5158_v51 = vsel %vm4249_vm2, %v12311_v48, %v9981_v18  ;;  %v9994_v57 = vpop.permute.xlu1 %9993  ;;  %v5006_v18 = vld [vmem:[#allocation2 + $0xc2] sm:$0xff] }
 0x423   : > { %v9989_v6 = vpop.permute.xlu0 %9988  ;;  %v9995_v59 = vunpack.i.l.bf16 %v9994_v57  ;;  %v9996_v45 = vunpack.i.h.bf16 %v9994_v57 }
 0x424   : > { %5687 = vmatmul.mubr.f32.vlgmr.msra.gmra.mxu1 %v5156_v41  ;;  %v9990_v3 = vunpack.i.l.bf16 %v9989_v6  ;;  %v9991_v53 = vunpack.i.h.bf16 %v9989_v6  ;;  %v5005_v41 = vld [vmem:[#allocation2 + $0xb2] sm:$0xff] }
 0x425   : > { %5691 = vmatprep.mubr.f32.mxu1 %v5173_v44  ;;  %v5177_v25 = vsel %vm4249_vm2, %v5001_v5, %v9995_v59  ;;  %v5161_v34 = vsel %vm4249_vm2, %v12389_v35, %v9996_v45  ;;  %v10084_v5 = vld [vmem:[#allocation2 + $0xf2] sm:$0xff] }
 0x426   : > { %v5176_v10 = vsel %vm4249_vm2, %v5000_v50, %v9990_v3  ;;  %v5160_v48 = vsel %vm4249_vm2, %v12367_v43, %v9991_v53  ;;  %v10004_v36 = vpop.permute.xlu1 %10003 }
 0x427   : > { %v9999_v2 = vpop.permute.xlu0 %9998  ;;  %v10005_v23 = vunpack.i.l.bf16 %v10004_v36  ;;  %v10006_v56 = vunpack.i.h.bf16 %v10004_v36 }
 0x428   : > { %5692 = vmatmul.mubr.f32.gmra.mxu1 %v5157_v9  ;;  %v10000_v40 = vunpack.i.l.bf16 %v9999_v2  ;;  %v10001_v4 = vunpack.i.h.bf16 %v9999_v2 }
 0x429   : > { %5696 = vmatprep.mubr.f32.mxu1 %v5174_v32  ;;  %v5179_v28 = vsel %vm4249_vm2, %v5003_v49, %v10005_v23  ;;  %v5163_v20 = vsel %vm4249_vm2, %v12422_v21, %v10006_v56  ;;  %v10085_v23 = vld [vmem:[#allocation2 + $0x102] sm:$0xff] }
 0x42a   : > { %v5178_v63 = vsel %vm4249_vm2, %v5002_v24, %v10000_v40  ;;  %v5162_v43 = vsel %vm4249_vm2, %v12408_v27, %v10001_v4  ;;  %v10014_v62 = vpop.permute.xlu1 %10013 }
 0x42b   : > { %v10009_v39 = vpop.permute.xlu0 %10008  ;;  %v10015_v58 = vunpack.i.l.bf16 %v10014_v62  ;;  %v10016_v27 = vunpack.i.h.bf16 %v10014_v62 }
 0x42c   : > { %5697 = vmatmul.mubr.f32.gmra.mxu1 %v5158_v51  ;;  %v10010_v19 = vunpack.i.l.bf16 %v10009_v39  ;;  %v10011_v35 = vunpack.i.h.bf16 %v10009_v39 }
 0x42d   : > { %5701 = vmatprep.mubr.f32.mxu1 %v5175_v31  ;;  %v5181_v16 = vsel %vm4249_vm2, %v5005_v41, %v10015_v58  ;;  %v5165_v21 = vsel %vm4249_vm2, %v12525_v52, %v10016_v27 }
 0x42e   : > { %v5180_v7 = vsel %vm4249_vm2, %v5004_v55, %v10010_v19  ;;  %v5164_v42 = vsel %vm4249_vm2, %v4972_v26, %v10011_v35  ;;  %v10024_v44 = vpop.permute.xlu1 %10023 }
 0x42f   : > { %v10019_v1 = vpop.permute.xlu0 %10018  ;;  %v10025_v9 = vunpack.i.l.bf16 %v10024_v44  ;;  %v10026_v32 = vunpack.i.h.bf16 %v10024_v44  ;;  %v6918_v44 = vld [vmem:[%s14757_s5 + $0xf0] sm:$0xff] }
 0x430   : > { %5702 = vmatmul.mubr.f32.gmra.mxu1 %v5159_v15  ;;  %v10020_v61 = vunpack.i.l.bf16 %v10019_v1  ;;  %v10021_v47 = vunpack.i.h.bf16 %v10019_v1 }
 0x431   : > { %5706 = vmatprep.mubr.f32.mxu1 %v5176_v10  ;;  %v5183_v33 = vsel %vm4249_vm2, %v12288_v13, %v10025_v9  ;;  %v5167_v53 = vsel %vm4249_vm2, %v12533_v54, %v10026_v32  ;;  %v6917_v9 = vld [vmem:[%s14757_s5 + $0xe8] sm:$0xff] }
 0x432   : > { %v5182_v0 = vsel %vm4249_vm2, %v5006_v18, %v10020_v61  ;;  %v5166_v6 = vsel %vm4249_vm2, %v12527_v17, %v10021_v47  ;;  %v10034_v3 = vpop.permute.xlu1 %10033 }
 0x433   : > { %v10029_v46 = vpop.permute.xlu0 %10028  ;;  %v10035_v50 = vunpack.i.l.bf16 %v10034_v3  ;;  %v10036_v13 = vunpack.i.h.bf16 %v10034_v3 }
 0x434   : > { %5707 = vmatmul.mubr.f32.gmra.mxu1 %v5160_v48  ;;  %v10030_v51 = vunpack.i.l.bf16 %v10029_v46  ;;  %v10031_v57 = vunpack.i.h.bf16 %v10029_v46 }
 0x435   : > { %5711 = vmatprep.mubr.f32.mxu1 %v5177_v25  ;;  %v5185_v54 = vsel %vm4249_vm2, %v10084_v5, %v10035_v50 }
 0x436   : > { %v5184_v17 = vsel %vm4249_vm2, %v12293_v14, %v10030_v51  ;;  %v5168_v45 = vsel %vm4249_vm2, %v12535_v22, %v10031_v57  ;;  %v10044_v25 = vpop.permute.xlu1 %10043  ;;  %v5169_v14 = vsel %vm4249_vm2, %v12543_v37, %v10036_v13  ;;  %v6914_v57 = vld [vmem:[%s14757_s5 + $0xd0] sm:$0xff]  ;;  %v6911_v13 = vld [vmem:[%s14757_s5 + $0xb8] sm:$0xff] }
 0x437   : > { %v10039_v59 = vpop.permute.xlu0 %10038  ;;  %v10045_v24 = vunpack.i.l.bf16 %v10044_v25  ;;  %v10046_v56 = vunpack.i.h.bf16 %v10044_v25  ;;  %v6909_v25 = vld [vmem:[%s14757_s5 + $0xa8] sm:$0xff] }
 0x438   : > { %5712 = vmatmul.mubr.f32.gmra.mxu1 %v5161_v34  ;;  %v10040_v48 = vunpack.i.l.bf16 %v10039_v59  ;;  %v10041_v4 = vunpack.i.h.bf16 %v10039_v59  ;;  %v6913_v59 = vld [vmem:[%s14757_s5 + $0xc8] sm:$0xff] }
 0x439   : > { %5716 = vmatprep.mubr.f32.mxu1 %v5178_v63  ;;  %v5187_v37 = vsel %vm4249_vm2, %v12241_v30, %v10045_v24  ;;  %v5171_v62 = vsel %vm4249_vm2, %v12553_v60, %v10046_v56 }
 0x43a   : > { %v5186_v22 = vsel %vm4249_vm2, %v10085_v23, %v10040_v48  ;;  %v9728_v23 = vpop.f32.mrf.mxu0 }
 0x43c   : > { %5717 = vmatmul.mubr.f32.gmra.mxu1 %v5162_v43  ;;  %v5170_v43 = vsel %vm4249_vm2, %v12545_v29, %v10041_v4 }
 0x43d   : > { %5721 = vmatprep.mubr.f32.mxu1 %v5179_v28 }
 0x440   : > { %5722 = vmatmul.mubr.f32.gmra.mxu1 %v5163_v20 }
 0x441   : > { %5726 = vmatprep.mubr.f32.mxu1 %v5180_v7 }
 0x444   : > { %5727 = vmatmul.mubr.f32.gmra.mxu1 %v5164_v42 }
 0x445   : > { %5731 = vmatprep.mubr.f32.mxu1 %v5181_v16  ;;  %v6919_v16 = vld [vmem:[%s14757_s5 + $0xf8] sm:$0xff] }
 0x446   : > { %6964 = vmatprep.subr.mxu1 %v6919_v16 }
 0x447   : > { %6965 = vmatpush1.msra.mxu1 %v6918_v44 }
 0x448   : > { %5732 = vmatmul.mubr.f32.gmra.mxu1 %v5165_v21  ;;  %6966 = vmatprep.subr.mxu1 %v6917_v9 }
 0x449   : > { %5736 = vmatprep.mubr.f32.mxu1 %v5182_v0  ;;  %v6916_v0 = vld [vmem:[%s14757_s5 + $0xe0] sm:$0xff] }
 0x44a   : > { %v9414_v11 = vpop.f32.mrf.mxu1  ;;  %6967 = vmatpush1.msra.mxu1 %v6916_v0 }
 0x44c   : > { %5737 = vmatmul.mubr.f32.gmra.mxu1 %v5166_v6  ;;  %v9415_v52 = vpop.f32.mrf.mxu1 }
 0x44d   : > { %5741 = vmatprep.mubr.f32.mxu1 %v5183_v33  ;;  %v12625_v31 = vadd.f32 %v9415_v52, %v9414_v11  ;;  %v6915_v52 = vld [vmem:[%s14757_s5 + $0xd8] sm:$0xff] }
 0x44e   : > { %v9417_v15 = vpop.f32.mrf.mxu1  ;;  %6968 = vmatprep.subr.mxu1 %v6915_v52 }
 0x44f   : > { %6969 = vmatpush1.msra.mxu1 %v6914_v57 }
 0x450   : > { %5742 = vmatmul.mubr.f32.gmra.mxu1 %v5167_v53  ;;  %v9418_v10 = vpop.f32.mrf.mxu1  ;;  %6970 = vmatprep.subr.mxu1 %v6913_v59 }
 0x451   : > { %5746 = vmatprep.mubr.f32.mxu1 %v5184_v17  ;;  %v12631_v2 = vadd.f32 %v9418_v10, %v9417_v15  ;;  %v6912_v10 = vld [vmem:[%s14757_s5 + $0xc0] sm:$0xff] }
 0x452   : > { %6971 = vmatpush1.msra.mxu1 %v6912_v10 }
 0x453   : > { %v9420_v40 = vpop.f32.mrf.mxu1  ;;  %6972 = vmatprep.subr.mxu1 %v6911_v13 }
 0x454   : > { %5747 = vmatmul.mubr.f32.gmra.mxu1 %v5168_v45  ;;  %v6910_v45 = vld [vmem:[%s14757_s5 + $0xb0] sm:$0xff] }
 0x455   : > { %5751 = vmatprep.mubr.f32.mxu1 %v5185_v54  ;;  %v9421_v36 = vpop.f32.mrf.mxu1  ;;  %6973 = vmatpush1.msra.mxu1 %v6910_v45 }
 0x456   : > { %v12638_v34 = vadd.f32 %v9421_v36, %v9420_v40  ;;  %v6908_v36 = vld [vmem:[%s14757_s5 + $0xa0] sm:$0xff]  ;;  %6974 = vmatprep.subr.mxu1 %v6909_v25 }
 0x457   : > { %v9423_v63 = vpop.f32.mrf.mxu1  ;;  %6975 = vmatpush1.msra.mxu1 %v6908_v36 }
 0x458   : > { %5752 = vmatmul.mubr.f32.gmra.mxu1 %v5169_v14 }
 0x459   : > { %5756 = vmatprep.mubr.f32.mxu1 %v5186_v22  ;;  %v9424_v39 = vpop.f32.mrf.mxu1 }
 0x45a   : > { %v12643_v49 = vadd.f32 %v9424_v39, %v9423_v63 }
 0x45b   : > { %v9426_v19 = vpop.f32.mrf.mxu1 }
 0x45c   : > { %5757 = vmatmul.mubr.f32.gmra.mxu1 %v5170_v43  ;;  %v5905_v43 = vpop.f32.mrf.mxu0 }
 0x45d   : > { %5761 = vmatprep.mubr.f32.mxu1 %v5187_v37  ;;  %v9427_v28 = vpop.f32.mrf.mxu1  ;;  %v12714_v37 = vld [vmem:[%s14756_s4] ss:$0 sm:$0xff] }
 0x45e   : > { %v12649_v55 = vadd.f32 %v9427_v28, %v9426_v19 }
 0x45f   : > { %v9429_v35 = vpop.f32.mrf.mxu1 }
 0x460   : > { %5762 = vmatmul.mubr.f32.gmra.mxu1 %v5171_v62 }
 0x461   : > { %7028 = vmatprep.mubr.f32.mxu1 %v14762_v38  ;;  %v9430_v20 = vpop.f32.mrf.mxu1 }
 0x462   : > { %v12652_v29 = vadd.f32 %v9430_v20, %v9429_v35  ;;  %v6907_v35 = vld [vmem:[%s14757_s5 + $0x98] sm:$0xff]  ;;  %v6906_v20 = vld [vmem:[%s14757_s5 + $0x90] sm:$0xff] }
 0x463   : > { %v9432_v58 = vpop.f32.mrf.mxu1  ;;  %6976 = vmatprep.subr.mxu1 %v6907_v35 }
 0x464   : > { %6977 = vmatpush1.msra.mxu1 %v6906_v20 }
 0x465   : > { %v9433_v7 = vpop.f32.mrf.mxu1 }
 0x466   : > { %v12654_v26 = vadd.f32 %v9433_v7, %v9432_v58 }
 0x467   : > { %v9435_v30 = vpop.f32.mrf.mxu1 }
 0x469   : > { %v9436_v1 = vpop.f32.mrf.mxu1 }
 0x46a   : > { %v12656_v27 = vadd.f32 %v9436_v1, %v9435_v30  ;;  %v12724_v1 = vpop.f32.mrf.mxu0 }
 0x498   : > { %v9438_v42 = vpop.f32.mrf.mxu1 }
 0x49a   : > { %v9439_v41 = vpop.f32.mrf.mxu1 }
 0x49b   : > { %v12658_v60 = vadd.f32 %v9439_v41, %v9438_v42 }
 0x4b6   : > { %v9441_v61 = vpop.f32.mrf.mxu1 }
 0x4b8   : > { %v9442_v47 = vpop.f32.mrf.mxu1 }
 0x4b9   : > { %v12666_v21 = vadd.f32 %v9442_v47, %v9441_v61 }
 0x4bc   : > { %v9444_v18 = vpop.f32.mrf.mxu1 }
 0x4be   : > { %v9445_v46 = vpop.f32.mrf.mxu1 }
 0x4bf   : > { %v12674_v32 = vadd.f32 %v9445_v46, %v9444_v18  ;;  %v5915_v46 = vpop.f32.mrf.mxu0 }
 0x4c0   : > { %v9447_v6 = vpop.f32.mrf.mxu1 }
 0x4c2   : > { %v9448_v11 = vpop.f32.mrf.mxu1 }
 0x4c3   : > { %v12676_v51 = vadd.f32 %v9448_v11, %v9447_v6 }
 0x4c4   : > { %v9450_v33 = vpop.f32.mrf.mxu1 }
 0x4c6   : > { %v9451_v3 = vpop.f32.mrf.mxu1 }
 0x4c7   : > { %v12684_v53 = vadd.f32 %v9451_v3, %v9450_v33 }
 0x4c8   : > { %v9453_v15 = vpop.f32.mrf.mxu1 }
 0x4ca   : > { %v9454_v50 = vpop.f32.mrf.mxu1 }
 0x4cb   : > { %v12686_v17 = vadd.f32 %v9454_v50, %v9453_v15  ;;  %v6905_v15 = vld [vmem:[%s14757_s5 + $0x88] sm:$0xff]  ;;  %v6903_v50 = vld [vmem:[%s14757_s5 + $0x78] sm:$0xff] }
 0x4cc   : > { %6978 = vmatprep.subr.mxu1 %v6905_v15 }
 0x4dc   : > { %v9456_v48 = vpop.f32.mrf.mxu1 }
 0x4de   : > { %v9457_v5 = vpop.f32.mrf.mxu1 }
 0x4df   : > { %v12700_v54 = vadd.f32 %v9457_v5, %v9456_v48  ;;  %v6902_v48 = vld [vmem:[%s14757_s5 + $0x70] sm:$0xff] }
 0x4e0   : > { %v9459_v40 = vpop.f32.mrf.mxu1 }
 0x4e2   : > { %v9460_v4 = vpop.f32.mrf.mxu1 }
 0x4e3   : > { %v12708_v14 = vadd.f32 %v9460_v4, %v9459_v40 }
 0x4e4   : > { %v9494_v24 = vpop.f32.mrf.mxu1 }
 0x4e6   : > { %v9495_v22 = vpop.f32.mrf.mxu1 }
 0x4e7   : > { %v9496_v63 = vadd.f32 %v9495_v22, %v9494_v24 }
 0x4e8   : > { %v9497_v39 = vpop.f32.mrf.mxu1 }
 0x4e9   : > { %v5689_v56 = vadd.f32 %v9496_v63, %v12625_v31 }
 0x4ea   : > { %v9498_v19 = vpop.f32.mrf.mxu1 }
 0x4eb   : > { %v5984_v28 = vadd.f32 %v5905_v43, %v5689_v56  ;;  %v9499_v62 = vadd.f32 %v9498_v19, %v9497_v39 }
 0x4ec   : > { %v9500_v58 = vpop.f32.mrf.mxu1 }
 0x4ed   : > { %v6007_v31 = vadd.f32 %v12714_v37, %v5984_v28  ;;  %v5694_v7 = vadd.f32 %v9499_v62, %v12631_v2 }
 0x4ee   : > { %v9501_v30 = vpop.f32.mrf.mxu1 }
 0x4ef   : > { %v6023_v42 = vmax.f32 %v6007_v31, 0.0  ;;  %v5985_v41 = vadd.f32 %v9728_v23, %v5694_v7  ;;  %v9502_v61 = vadd.f32 %v9501_v30, %v9500_v58 }
 0x4f0   : > { %v9503_v16 = vpop.f32.mrf.mxu1 }
 0x4f1   : > { %v6055_v44 = vcombine.high %v6023_v42, %v6023_v42  ;;  %v6062_v47 = vrot.slane %v6023_v42, %v10427_v12  ;;  %v6008_v18 = vadd.f32 %v12714_v37, %v5985_v41  ;;  %v5699_v9 = vadd.f32 %v9502_v61, %v12638_v34  ;;  %v6904_v34 = vld [vmem:[%s14757_s5 + $0x80] sm:$0xff] }
 0x4f2   : > { %v9504_v0 = vpop.f32.mrf.mxu1  ;;  %6979 = vmatpush1.msra.mxu1 %v6904_v34 }
 0x4f3   : > { %v6069_v2 = vrot.slane %v6055_v44, %v10427_v12  ;;  %v6070_v6 = vcombine.high %v6062_v47, %v6062_v47  ;;  %v6392_v11 = vsel %vm6391_vm11, %v6062_v47, -inf  ;;  %v6024_v33 = vmax.f32 %v6008_v18, 0.0  ;;  %6980 = vmatprep.subr.mxu1 %v6903_v50 }
 0x4f4   : > { %v6393_v3 = vrot.slane %v6392_v11, 4  ;;  %v5986_v52 = vadd.f32 %v5915_v46, %v5699_v9  ;;  %v12731_v57 = vpop.f32.mrf.mxu1  ;;  %v9505_v63 = vadd.f32 %v9504_v0, %v9503_v16  ;;  %6981 = vmatpush1.msra.mxu1 %v6902_v48 }
 0x4f5   : > { %v6071_v59 = vcombine.high %v6069_v2, %v6069_v2  ;;  %v6399_v10 = vsel %vm6391_vm11, %v6070_v6, -inf  ;;  %v6406_v13 = vsel %vm6391_vm11, %v6069_v2, -inf  ;;  %v6072_v45 = vcombine.high %v6024_v33, %v6024_v33 }
 0x4f6   : > { %v6394_v5 = vmax.f32 %v6392_v11, %v6393_v3  ;;  %v6400_v40 = vrot.slane %v6399_v10, 4  ;;  %v6407_v25 = vrot.slane %v6406_v13, 4  ;;  %v6079_v36 = vrot.slane %v6024_v33, %v10427_v12  ;;  %v12748_v4 = vpop.f32.mrf.mxu1 }
 0x4f7   : > { %v6413_v24 = vsel %vm6391_vm11, %v6071_v59, -inf  ;;  %v6086_v23 = vrot.slane %v6072_v45, %v10427_v12  ;;  %v6009_v22 = vadd.f32 %v12714_v37, %v5986_v52  ;;  %v5704_v34 = vadd.f32 %v9505_v63, %v12643_v49 }
 0x4f8   : > { %v6395_v39 = vrot.slane %v6394_v5, 2  ;;  %v6401_v56 = vmax.f32 %v6399_v10, %v6400_v40  ;;  %v6408_v43 = vmax.f32 %v6406_v13, %v6407_v25  ;;  %v6414_v19 = vrot.slane %v6413_v24, 4  ;;  %v12753_v28 = vpop.f32.mrf.mxu1 }
 0x4f9   : > { %v6087_v62 = vcombine.high %v6079_v36, %v6079_v36  ;;  %v6088_v35 = vcombine.high %v6086_v23, %v6086_v23  ;;  %v6420_v20 = vsel %vm6391_vm11, %v6079_v36, -inf  ;;  %v6434_v58 = vsel %vm6391_vm11, %v6086_v23, -inf }
 0x4fa   : > { %v6396_v31 = vmax.f32 %v6394_v5, %v6395_v39  ;;  %v6402_v7 = vrot.slane %v6401_v56, 2  ;;  %v6409_v30 = vrot.slane %v6408_v43, 2  ;;  %v6415_v42 = vmax.f32 %v6413_v24, %v6414_v19  ;;  %v12759_v47 = vpop.f32.mrf.mxu1 }
 0x4fb   : > { %v6421_v41 = vrot.slane %v6420_v20, 4  ;;  %v6427_v61 = vsel %vm6391_vm11, %v6087_v62, -inf  ;;  %v6435_v16 = vrot.slane %v6434_v58, 4  ;;  %v6441_v44 = vsel %vm6391_vm11, %v6088_v35, -inf }
 0x4fc   : > { %v6397_v18 = vrot.slane %v6396_v31, 1  ;;  %v6403_v9 = vmax.f32 %v6401_v56, %v6402_v7  ;;  %v6410_v0 = vmax.f32 %v6408_v43, %v6409_v30  ;;  %v6416_v46 = vrot.slane %v6415_v42, 2  ;;  %v12762_v45 = vpop.f32.mrf.mxu1 }
 0x4fd   : > { %v6422_v2 = vmax.f32 %v6420_v20, %v6421_v41  ;;  %v6428_v6 = vrot.slane %v6427_v61, 4  ;;  %v6436_v11 = vmax.f32 %v6434_v58, %v6435_v16  ;;  %v6442_v33 = vrot.slane %v6441_v44, 4 }
 0x4fe   : > { %v6404_v3 = vrot.slane %v6403_v9, 1  ;;  %v6411_v52 = vrot.slane %v6410_v0, 1  ;;  %v6417_v15 = vmax.f32 %v6415_v42, %v6416_v46  ;;  %v12764_v48 = vmax.f32 %v6396_v31, %v6397_v18  ;;  %v12772_v58 = vpop.f32.mrf.mxu1  ;;  %v6899_v18 = vld [vmem:[%s14757_s5 + $0x58] sm:$0xff] }
 0x4ff   : > { %v6423_v50 = vrot.slane %v6422_v2, 2  ;;  %v6429_v59 = vmax.f32 %v6427_v61, %v6428_v6  ;;  %v6437_v10 = vrot.slane %v6436_v11, 2  ;;  %v6443_v13 = vmax.f32 %v6441_v44, %v6442_v33  ;;  %v6896_v33 = vld [vmem:[%s14757_s5 + $0x40] sm:$0xff] }
 0x500   : > { %v12766_v5 = vmax.f32 %v6403_v9, %v6404_v3  ;;  %v6418_v40 = vrot.slane %v6417_v15, 1  ;;  %v6025_v25 = vmax.f32 %v6009_v22, 0.0  ;;  %v12768_v56 = vmax.f32 %v6410_v0, %v6411_v52  ;;  %v6901_v22 = vld [vmem:[%s14757_s5 + $0x68] sm:$0xff]  ;;  %v6898_v9 = vld [vmem:[%s14757_s5 + $0x50] sm:$0xff] }
 0x501   : > { %v6424_v36 = vmax.f32 %v6422_v2, %v6423_v50  ;;  %v6430_v24 = vrot.slane %v6429_v59, 2  ;;  %v6438_v23 = vmax.f32 %v6436_v11, %v6437_v10  ;;  %v6444_v39 = vrot.slane %v6443_v13, 2  ;;  %6982 = vmatprep.subr.mxu1 %v6901_v22  ;;  %v6897_v0 = vld [vmem:[%s14757_s5 + $0x48] sm:$0xff]  ;;  %v12809_v50 = vpop.f32.mrf.mxu1 }
 0x502   : > { %v6089_v43 = vcombine.high %v6025_v25, %v6025_v25  ;;  %v6096_v49 = vrot.slane %v6025_v25, %v10427_v12  ;;  %v5987_v63 = vadd.f32 %v12724_v1, %v5704_v34  ;;  %v12777_v31 = vmax.f32 %v6417_v15, %v6418_v40  ;;  %v6900_v1 = vld [vmem:[%s14757_s5 + $0x60] sm:$0xff] }
 0x503   : > { %v6425_v19 = vrot.slane %v6424_v36, 1  ;;  %v6431_v62 = vmax.f32 %v6429_v59, %v6430_v24  ;;  %v6439_v35 = vrot.slane %v6438_v23, 1  ;;  %v6445_v20 = vmax.f32 %v6443_v13, %v6444_v39  ;;  %6983 = vmatpush1.msra.mxu1 %v6900_v1  ;;  %v6895_v59 = vld [vmem:[%s14757_s5 + $0x38] sm:$0xff]  ;;  %v9516_v1 = vpop.f32.mrf.mxu1 }
 0x504   : > { %v6103_v7 = vrot.slane %v6089_v43, %v10427_v12  ;;  %v6104_v30 = vcombine.high %v6096_v49, %v6096_v49  ;;  %v6448_v42 = vsel %vm6391_vm11, %v6096_v49, -inf  ;;  %v6010_v44 = vadd.f32 %v12714_v37, %v5987_v63  ;;  %6984 = vmatprep.subr.mxu1 %v6899_v18  ;;  %v6893_v49 = vld [vmem:[%s14757_s5 + $0x28] sm:$0xff]  ;;  %v9734_v63 = vpop.f32.mrf.mxu0 }
 0x505   : > { %v12784_v41 = vmax.f32 %v6424_v36, %v6425_v19  ;;  %v6432_v61 = vrot.slane %v6431_v62, 1  ;;  %v12786_v16 = vmax.f32 %v6438_v23, %v6439_v35  ;;  %v6449_v2 = vrot.slane %v6448_v42, 4  ;;  %6985 = vmatpush1.msra.mxu1 %v6898_v9  ;;  %v6894_v36 = vld [vmem:[%s14757_s5 + $0x30] sm:$0xff] }
 0x506   : > { %v6105_v46 = vcombine.high %v6103_v7, %v6103_v7  ;;  %v6455_v6 = vsel %vm6391_vm11, %v6104_v30, -inf  ;;  %v6462_v11 = vsel %vm6391_vm11, %v6103_v7, -inf  ;;  %v6446_v52 = vrot.slane %v6445_v20, 1  ;;  %6986 = vmatprep.subr.mxu1 %v6897_v0  ;;  %v6892_v7 = vld [vmem:[%s14757_s5 + $0x20] sm:$0xff] }
 0x507   : > { %v12803_v3 = vmax.f32 %v6431_v62, %v6432_v61  ;;  %v6450_v10 = vmax.f32 %v6448_v42, %v6449_v2  ;;  %v6456_v13 = vrot.slane %v6455_v6, 4  ;;  %v6463_v40 = vrot.slane %v6462_v11, 4  ;;  %6987 = vmatpush1.msra.mxu1 %v6896_v33  ;;  %v6891_v61 = vld [vmem:[%s14757_s5 + $0x18] sm:$0xff]  ;;  %v6889_v2 = vld [vmem:[%s14757_s5 + $0x8] sm:$0xff] }
 0x508   : > { %v6469_v25 = vsel %vm6391_vm11, %v6105_v46, -inf  ;;  %v6026_v39 = vmax.f32 %v6010_v44, 0.0  ;;  %v9508_v43 = vadd.f32 %v12748_v4, %v12731_v57  ;;  %v9511_v22 = vadd.f32 %v12759_v47, %v12753_v28  ;;  %6988 = vmatprep.subr.mxu1 %v6895_v59 }
 0x509   : > { %v6470_v23 = vrot.slane %v6469_v25, 4  ;;  %v6451_v19 = vrot.slane %v6450_v10, 2  ;;  %v6457_v62 = vmax.f32 %v6455_v6, %v6456_v13  ;;  %v6464_v35 = vmax.f32 %v6462_v11, %v6463_v40  ;;  %6989 = vmatpush1.msra.mxu1 %v6894_v36  ;;  %v5925_v6 = vpop.f32.mrf.mxu0  ;;  %v12855_v36 = vpop.f32.mrf.mxu1 }
 0x50a   : > { %v12830_v30 = vmax.f32 %v6445_v20, %v6446_v52  ;;  %v6106_v57 = vcombine.high %v6026_v39, %v6026_v39  ;;  %v6113_v4 = vrot.slane %v6026_v39, %v10427_v12  ;;  %v5709_v42 = vadd.f32 %v9508_v43, %v12649_v55  ;;  %6990 = vmatprep.subr.mxu1 %v6893_v49  ;;  %v6890_v20 = vld [vmem:[%s14757_s5 + $0x10] sm:$0xff] }
 0x50b   : > { %v6452_v44 = vmax.f32 %v6450_v10, %v6451_v19  ;;  %v6458_v28 = vrot.slane %v6457_v62, 2  ;;  %v6465_v47 = vrot.slane %v6464_v35, 2  ;;  %v12837_v18 = vmax.f32 %v6469_v25, %v6470_v23  ;;  %6991 = vmatpush1.msra.mxu1 %v6892_v7  ;;  %v6888_v10 = vld [vmem:[%s14757_s5] sm:$0xff] }
 0x50c   : > { %v6120_v9 = vrot.slane %v6106_v57, %v10427_v12  ;;  %v6121_v0 = vcombine.high %v6113_v4, %v6113_v4  ;;  %v6476_v55 = vsel %vm6391_vm11, %v6113_v4, -inf  ;;  %v5714_v46 = vadd.f32 %v9511_v22, %v12652_v29  ;;  %6992 = vmatprep.subr.mxu1 %v6891_v61 }
 0x50d   : > { %v6453_v11 = vrot.slane %v6452_v44, 1  ;;  %v6459_v33 = vmax.f32 %v6457_v62, %v6458_v28  ;;  %v12848_v52 = vmax.f32 %v6464_v35, %v6465_v47  ;;  %v6477_v59 = vrot.slane %v6476_v55, 4  ;;  %6993 = vmatpush1.msra.mxu1 %v6890_v20  ;;  %v12865_v20 = vpop.f32.mrf.mxu1 }
 0x50e   : > { %v6122_v13 = vcombine.high %v6120_v9, %v6120_v9  ;;  %v6483_v40 = vsel %vm6391_vm11, %v6121_v0, -inf  ;;  %v6490_v29 = vsel %vm6391_vm11, %v6120_v9, -inf  ;;  %v5988_v25 = vadd.f32 %v5925_v6, %v5709_v42  ;;  %6994 = vmatprep.subr.mxu1 %v6889_v2 }
 0x50f   : > { %v12857_v23 = vmax.f32 %v6452_v44, %v6453_v11  ;;  %v6460_v39 = vrot.slane %v6459_v33, 1  ;;  %v6478_v49 = vmax.f32 %v6476_v55, %v6477_v59  ;;  %v6484_v19 = vrot.slane %v6483_v40, 4  ;;  %6995 = vmatpush1.msra.mxu1 %v6888_v10 }
 0x510   : > { %v6491_v62 = vrot.slane %v6490_v29, 4  ;;  %v6497_v35 = vsel %vm6391_vm11, %v6122_v13, -inf  ;;  %v6011_v22 = vadd.f32 %v12714_v37, %v5988_v25  ;;  %v5989_v42 = vadd.f32 %v9734_v63, %v5714_v46 }
 0x511   : > { %14814 = vst [vmem:[#allocation8_spill] sm:$0xff] %v12857_v23  ;;  %v6479_v57 = vrot.slane %v6478_v49, 2  ;;  %v6498_v4 = vrot.slane %v6497_v35, 4  ;;  %v12863_v61 = vmax.f32 %v6459_v33, %v6460_v39  ;;  %v6485_v44 = vmax.f32 %v6483_v40, %v6484_v19 }
 0x512   : > { %v6492_v28 = vmax.f32 %v6490_v29, %v6491_v62  ;;  %v6027_v47 = vmax.f32 %v6011_v22, 0.0  ;;  %v6012_v55 = vadd.f32 %v12714_v37, %v5989_v42  ;;  %v9514_v2 = vadd.f32 %v12772_v58, %v12762_v45  ;;  %v12882_v45 = vpop.f32.mrf.mxu1 }
 0x513   : > { %v6480_v9 = vmax.f32 %v6478_v49, %v6479_v57  ;;  %v12867_v0 = vmax.f32 %v6497_v35, %v6498_v4  ;;  %v6486_v6 = vrot.slane %v6485_v44, 2  ;;  %v12875_v13 = vadd.f32 %v9516_v1, %v12809_v50 }
 0x514   : > { %v6493_v11 = vrot.slane %v6492_v28, 2  ;;  %v6123_v59 = vcombine.high %v6027_v47, %v6027_v47  ;;  %v6130_v63 = vrot.slane %v6027_v47, %v10427_v12  ;;  %v6028_v10 = vmax.f32 %v6012_v55, 0.0 }
 0x515   : > { %v6481_v46 = vrot.slane %v6480_v9, 1  ;;  %v12877_v40 = vmax.f32 %v6485_v44, %v6486_v6  ;;  %v12890_v22 = vadd.f32 %v9514_v2, %v12654_v26  ;;  %v12898_v6 = vpop.f32.mrf.mxu1 }
 0x516   : > { %v12879_v29 = vmax.f32 %v6492_v28, %v6493_v11  ;;  %v6137_v25 = vrot.slane %v6123_v59, %v10427_v12  ;;  %v6138_v39 = vcombine.high %v6130_v63, %v6130_v63  ;;  %v6504_v49 = vsel %vm6391_vm11, %v6130_v63, -inf  ;;  %v12905_v63 = vld [vmem:[%s14759_s7 + $0x38] sm:$0xff] }
 0x517   : > { %v12884_v58 = vmax.f32 %v6480_v9, %v6481_v46  ;;  %v6140_v19 = vcombine.high %v6028_v10, %v6028_v10  ;;  %v6147_v62 = vrot.slane %v6028_v10, %v10427_v12  ;;  %v6488_v35 = vrot.slane %v12877_v40, 1  ;;  %14816 = vst [vmem:[#allocation10_spill] sm:$0xff] %v12905_v63  ;;  %v12910_v46 = vld [vmem:[%s14759_s7 + $0x30] sm:$0xff]  ;;  %9750 = vmatprep.subr.mxu0 %v12905_v63  ;;  %v9524_v34 = vpop.f32.mrf.mxu1 }
 0x518   : > { %v6139_v50 = vcombine.high %v6137_v25, %v6137_v25  ;;  %v6505_v1 = vrot.slane %v6504_v49, 4  ;;  %v6511_v4 = vsel %vm6391_vm11, %v6138_v39, -inf  ;;  %v6518_v42 = vsel %vm6391_vm11, %v6137_v25, -inf  ;;  %14817 = vst [vmem:[#allocation11_spill] sm:$0xff] %v12910_v46  ;;  %9769 = vmatprep.subr.mxu1 %v12905_v63  ;;  %9751 = vmatpush3.msra.mxu0 %v12905_v63 }
 0x519   : > { %14815 = vst [vmem:[#allocation9_spill] sm:$0xff] %v12884_v58  ;;  %v6154_v44 = vrot.slane %v6140_v19, %v10427_v12  ;;  %v6512_v9 = vrot.slane %v6511_v4, 4  ;;  %v6519_v55 = vrot.slane %v6518_v42, 4  ;;  %v6155_v26 = vcombine.high %v6147_v62, %v6147_v62  ;;  %v9737_v19 = vpop.f32.mrf.mxu0  ;;  %9752 = vmatprep.subr.mxu0 %v12910_v46 }
 0x51a   : > { %v6506_v47 = vmax.f32 %v6504_v49, %v6505_v1  ;;  %v6525_v11 = vsel %vm6391_vm11, %v6139_v50, -inf  ;;  %v6532_v59 = vsel %vm6391_vm11, %v6147_v62, -inf  ;;  %9753 = vmatpush3.msra.mxu0 %v12910_v46  ;;  %v9525_v46 = vpop.f32.mrf.mxu1 }
 0x51b   : > { %v6156_v2 = vcombine.high %v6154_v44, %v6154_v44  ;;  %v6513_v25 = vmax.f32 %v6511_v4, %v6512_v9  ;;  %v6520_v39 = vmax.f32 %v6518_v42, %v6519_v55  ;;  %v6526_v49 = vrot.slane %v6525_v11, 4  ;;  %v12921_v4 = vld [vmem:[%s14759_s7 + $0x28] sm:$0xff]  ;;  %v5935_v15 = vpop.f32.mrf.mxu0 }
 0x51c   : > { %v6507_v10 = vrot.slane %v6506_v47, 2  ;;  %v6533_v62 = vrot.slane %v6532_v59, 4  ;;  %v6539_v50 = vsel %vm6391_vm11, %v6155_v26, -inf  ;;  %v6546_v1 = vsel %vm6391_vm11, %v6154_v44, -inf  ;;  %14818 = vst [vmem:[#allocation12_spill] sm:$0xff] %v12921_v4  ;;  %9754 = vmatprep.subr.mxu0 %v12921_v4 }
 0x51d   : > { %v6553_v38 = vsel %vm6391_vm11, %v6156_v2, -inf  ;;  %v6514_v9 = vrot.slane %v6513_v25, 2  ;;  %v6521_v55 = vrot.slane %v6520_v39, 2  ;;  %v6527_v57 = vmax.f32 %v6525_v11, %v6526_v49  ;;  %9755 = vmatpush3.msra.mxu0 %v12921_v4 }
 0x51e   : > { %v6508_v42 = vmax.f32 %v6506_v47, %v6507_v10  ;;  %v6534_v33 = vmax.f32 %v6532_v59, %v6533_v62  ;;  %v6540_v26 = vrot.slane %v6539_v50, 4  ;;  %v6547_v28 = vrot.slane %v6546_v1, 4 }
 0x51f   : > { %v6554_v44 = vrot.slane %v6553_v38, 4  ;;  %v6515_v7 = vmax.f32 %v6513_v25, %v6514_v9  ;;  %v6522_v43 = vmax.f32 %v6520_v39, %v6521_v55  ;;  %v6528_v24 = vrot.slane %v6527_v57, 2 }
 0x520   : > { %v6509_v2 = vrot.slane %v6508_v42, 1  ;;  %v6535_v47 = vrot.slane %v6534_v33, 2  ;;  %v6541_v10 = vmax.f32 %v6539_v50, %v6540_v26  ;;  %v6548_v8 = vmax.f32 %v6546_v1, %v6547_v28  ;;  %v9740_v50 = vpop.f32.mrf.mxu0 }
 0x521   : > { %v6555_v11 = vmax.f32 %v6553_v38, %v6554_v44  ;;  %v12928_v59 = vmax.f32 %v12877_v40, %v6488_v35  ;;  %v6516_v49 = vrot.slane %v6515_v7, 1  ;;  %v6523_v62 = vrot.slane %v6522_v43, 1 }
 0x522   : > { %v12930_v63 = vmax.f32 %v6527_v57, %v6528_v24  ;;  %v6536_v25 = vmax.f32 %v6534_v33, %v6535_v47  ;;  %v6542_v39 = vrot.slane %v6541_v10, 2  ;;  %v6549_v9 = vrot.slane %v6548_v8, 2 }
 0x523   : > { %v6556_v55 = vrot.slane %v6555_v11, 2  ;;  %v12932_v58 = vmax.f32 %v6508_v42, %v6509_v2  ;;  %v12934_v23 = vmax.f32 %v6515_v7, %v6516_v49  ;;  %v12936_v28 = vmax.f32 %v6522_v43, %v6523_v62  ;;  %v9527_v7 = vpop.f32.mrf.mxu1 }
 0x524   : > { %v5990_v38 = vadd.f32 %v5935_v15, %v12890_v22  ;;  %v6537_v40 = vrot.slane %v6536_v25, 1  ;;  %v6543_v35 = vmax.f32 %v6541_v10, %v6542_v39  ;;  %v6550_v1 = vmax.f32 %v6548_v8, %v6549_v9 }
 0x525   : > { %14819 = vst [vmem:[#allocation13_spill] sm:$0xff] %v12932_v58  ;;  %14820 = vst [vmem:[#allocation14_spill] sm:$0xff] %v12934_v23  ;;  %v12939_v26 = vmax.f32 %v6555_v11, %v6556_v55  ;;  %v5724_v33 = vadd.f32 %v12875_v13, %v12656_v27  ;;  %v9520_v57 = vadd.f32 %v12865_v20, %v12855_v36  ;;  %v5945_v27 = vpop.f32.mrf.mxu0 }
 0x526   : > { %14821 = vst [vmem:[#allocation15_spill] sm:$0xff] %v12936_v28  ;;  %v6013_v24 = vadd.f32 %v12714_v37, %v5990_v38  ;;  %v9523_v43 = vadd.f32 %v12898_v6, %v12882_v45  ;;  %v12949_v22 = vmax.f32 %v6536_v25, %v6537_v40  ;;  %v6544_v42 = vrot.slane %v6543_v35, 1 }
 0x527   : > { %14822 = vst [vmem:[#allocation16_spill] sm:$0xff] %v12939_v26  ;;  %v6551_v8 = vrot.slane %v6550_v1, 1  ;;  %v5991_v2 = vadd.f32 %v9737_v19, %v5724_v33  ;;  %v5729_v47 = vadd.f32 %v9520_v57, %v12658_v60  ;;  %v9526_v45 = vadd.f32 %v9525_v46, %v9524_v34  ;;  %v9528_v19 = vpop.f32.mrf.mxu1  ;;  %v12960_v25 = vpop.f32.mrf.mxu0 }
 0x528   : > { %14823 = vst [vmem:[#allocation17_spill] sm:$0xff] %v12949_v22  ;;  %v6029_v44 = vmax.f32 %v6013_v24, 0.0  ;;  %v5734_v10 = vadd.f32 %v9523_v43, %v12666_v21  ;;  %v12953_v13 = vmax.f32 %v6543_v35, %v6544_v42  ;;  %v12971_v33 = vadd.f32 %v9528_v19, %v9527_v7 }
 0x529   : > { %v6014_v49 = vadd.f32 %v12714_v37, %v5991_v2  ;;  %v5992_v62 = vadd.f32 %v5945_v27, %v5729_v47  ;;  %v12962_v60 = vmax.f32 %v6550_v1, %v6551_v8  ;;  %v5739_v9 = vadd.f32 %v9526_v45, %v12674_v32  ;;  %v5955_v32 = vpop.f32.mrf.mxu0 }
 0x52a   : > { %14824 = vst [vmem:[#allocation18_spill] sm:$0xff] %v12953_v13  ;;  %v6157_v6 = vcombine.high %v6029_v44, %v6029_v44  ;;  %v6164_v11 = vrot.slane %v6029_v44, %v10427_v12  ;;  %v5993_v39 = vadd.f32 %v9740_v50, %v5734_v10 }
 0x52b   : > { %14825 = vst [vmem:[#allocation19_spill] sm:$0xff] %v12962_v60  ;;  %v6030_v38 = vmax.f32 %v6014_v49, 0.0  ;;  %v6015_v35 = vadd.f32 %v12714_v37, %v5992_v62  ;;  %v12980_v7 = vadd.f32 %v5955_v32, %v5739_v9 }
 0x52c   : > { %v6171_v55 = vrot.slane %v6157_v6, %v10427_v12  ;;  %v6172_v34 = vcombine.high %v6164_v11, %v6164_v11  ;;  %v6560_v46 = vsel %vm6391_vm11, %v6164_v11, -inf  ;;  %v6016_v24 = vadd.f32 %v12714_v37, %v5993_v39 }
 0x52d   : > { %v6561_v40 = vrot.slane %v6560_v46, 4  ;;  %v6174_v43 = vcombine.high %v6030_v38, %v6030_v38  ;;  %v6181_v2 = vrot.slane %v6030_v38, %v10427_v12  ;;  %v6031_v27 = vmax.f32 %v6015_v35, 0.0  ;;  %v9530_v38 = vpop.f32.mrf.mxu1 }
 0x52e   : > { %v6173_v1 = vcombine.high %v6171_v55, %v6171_v55  ;;  %v6567_v57 = vsel %vm6391_vm11, %v6172_v34, -inf  ;;  %v6574_v50 = vsel %vm6391_vm11, %v6171_v55, -inf  ;;  %v6032_v49 = vmax.f32 %v6016_v24, 0.0 }
 0x52f   : > { %v6562_v42 = vmax.f32 %v6560_v46, %v6561_v40  ;;  %v6568_v8 = vrot.slane %v6567_v57, 4  ;;  %v6575_v44 = vrot.slane %v6574_v50, 4  ;;  %v6188_v10 = vrot.slane %v6174_v43, %v10427_v12 }
 0x530   : > { %v12977_v47 = vsel %vm6391_vm11, %v6173_v1, -inf  ;;  %v6189_v62 = vcombine.high %v6181_v2, %v6181_v2  ;;  %v6588_v39 = vsel %vm6391_vm11, %v6181_v2, -inf }
 0x531   : > { %v6563_v45 = vrot.slane %v6562_v42, 2  ;;  %v6569_v6 = vmax.f32 %v6567_v57, %v6568_v8  ;;  %v12982_v11 = vmax.f32 %v6574_v50, %v6575_v44  ;;  %v6190_v19 = vcombine.high %v6188_v10, %v6188_v10 }
 0x532   : > { %v6602_v55 = vsel %vm6391_vm11, %v6188_v10, -inf  ;;  %v6589_v40 = vrot.slane %v6588_v39, 4  ;;  %v6595_v35 = vsel %vm6391_vm11, %v6189_v62, -inf  ;;  %v6191_v57 = vcombine.high %v6031_v27, %v6031_v27 }
 0x533   : > { %v6564_v34 = vmax.f32 %v6562_v42, %v6563_v45  ;;  %v6570_v46 = vrot.slane %v6569_v6, 2  ;;  %v6603_v9 = vrot.slane %v6602_v55, 4  ;;  %v12989_v1 = vsel %vm6391_vm11, %v6190_v19, -inf }
 0x534   : > { %14826 = vst [vmem:[#allocation20_spill] sm:$0xff] %v12989_v1  ;;  %v6590_v43 = vmax.f32 %v6588_v39, %v6589_v40  ;;  %v6596_v32 = vrot.slane %v6595_v35, 4  ;;  %v6198_v42 = vrot.slane %v6031_v27, %v10427_v12  ;;  %v6205_v2 = vrot.slane %v6191_v57, %v10427_v12 }
 0x535   : > { %v6565_v50 = vrot.slane %v6564_v34, 1  ;;  %v12992_v8 = vmax.f32 %v6569_v6, %v6570_v46  ;;  %v12994_v44 = vmax.f32 %v6602_v55, %v6603_v9  ;;  %v6208_v39 = vcombine.high %v6032_v49, %v6032_v49 }
 0x536   : > { %v6591_v45 = vrot.slane %v6590_v43, 2  ;;  %v6597_v62 = vmax.f32 %v6595_v35, %v6596_v32  ;;  %v6206_v21 = vcombine.high %v6198_v42, %v6198_v42  ;;  %v6207_v20 = vcombine.high %v6205_v2, %v6205_v2 }
 0x537   : > { %14827 = vst [vmem:[#allocation21_spill] sm:$0xff] %v12994_v44  ;;  %v12998_v10 = vmax.f32 %v6564_v34, %v6565_v50  ;;  %v6616_v36 = vsel %vm6391_vm11, %v6198_v42, -inf  ;;  %v6630_v55 = vsel %vm6391_vm11, %v6205_v2, -inf  ;;  %v6215_v57 = vrot.slane %v6032_v49, %v10427_v12 }
 0x538   : > { %v6592_v40 = vmax.f32 %v6590_v43, %v6591_v45  ;;  %v6598_v6 = vrot.slane %v6597_v62, 2  ;;  %v6617_v46 = vrot.slane %v6616_v36, 4  ;;  %v6623_v27 = vsel %vm6391_vm11, %v6206_v21, -inf }
 0x539   : > { %14828 = vst [vmem:[#allocation22_spill] sm:$0xff] %v12998_v10  ;;  %v6631_v9 = vrot.slane %v6630_v55, 4  ;;  %v6637_v34 = vsel %vm6391_vm11, %v6207_v20, -inf  ;;  %v6624_v19 = vrot.slane %v6623_v27, 4  ;;  %v6222_v43 = vrot.slane %v6208_v39, %v10427_v12 }
 0x53a   : > { %v6593_v35 = vrot.slane %v6592_v40, 1  ;;  %v6618_v32 = vmax.f32 %v6616_v36, %v6617_v46  ;;  %v6638_v24 = vrot.slane %v6637_v34, 4  ;;  %v6223_v45 = vcombine.high %v6215_v57, %v6215_v57 }
 0x53b   : > { %v6632_v42 = vmax.f32 %v6630_v55, %v6631_v9  ;;  %v13008_v15 = vmax.f32 %v6597_v62, %v6598_v6  ;;  %v6625_v21 = vmax.f32 %v6623_v27, %v6624_v19  ;;  %v6644_v13 = vsel %vm6391_vm11, %v6215_v57, -inf  ;;  %v9531_v55 = vpop.f32.mrf.mxu1 }
 0x53c   : > { %v6619_v2 = vrot.slane %v6618_v32, 2  ;;  %v6639_v23 = vmax.f32 %v6637_v34, %v6638_v24  ;;  %v6224_v49 = vcombine.high %v6222_v43, %v6222_v43  ;;  %v6645_v22 = vrot.slane %v6644_v13, 4 }
 0x53d   : > { %14829 = vst [vmem:[#allocation23_spill] sm:$0xff] %v13008_v15  ;;  %v6633_v20 = vrot.slane %v6632_v42, 2  ;;  %v6626_v50 = vrot.slane %v6625_v21, 2  ;;  %v6651_v36 = vsel %vm6391_vm11, %v6223_v45, -inf  ;;  %v6658_v46 = vsel %vm6391_vm11, %v6222_v43, -inf  ;;  %v9533_v43 = vpop.f32.mrf.mxu1 }
 0x53e   : > { %v6620_v58 = vmax.f32 %v6618_v32, %v6619_v2  ;;  %v6640_v39 = vrot.slane %v6639_v23, 2  ;;  %v6646_v4 = vmax.f32 %v6644_v13, %v6645_v22  ;;  %v6652_v62 = vrot.slane %v6651_v36, 4 }
 0x53f   : > { %v6634_v9 = vmax.f32 %v6632_v42, %v6633_v20  ;;  %v6627_v10 = vmax.f32 %v6625_v21, %v6626_v50  ;;  %v6659_v19 = vrot.slane %v6658_v46, 4  ;;  %v6665_v27 = vsel %vm6391_vm11, %v6224_v49, -inf }
 0x540   : > { %v6621_v6 = vrot.slane %v6620_v58, 1  ;;  %v6641_v24 = vmax.f32 %v6639_v23, %v6640_v39  ;;  %v6647_v34 = vrot.slane %v6646_v4, 2  ;;  %v6653_v28 = vmax.f32 %v6651_v36, %v6652_v62 }
 0x541   : > { %v6635_v57 = vrot.slane %v6634_v9, 1  ;;  %v13014_v32 = vmax.f32 %v6592_v40, %v6593_v35  ;;  %v6628_v2 = vrot.slane %v6627_v10, 1  ;;  %v6660_v45 = vmax.f32 %v6658_v46, %v6659_v19 }
 0x542   : > { %v6666_v60 = vrot.slane %v6665_v27, 4  ;;  %v6622_v1 = vmax.f32 %v6620_v58, %v6621_v6  ;;  %v6642_v42 = vrot.slane %v6641_v24, 1  ;;  %v6648_v20 = vmax.f32 %v6646_v4, %v6647_v34  ;;  %v9534_v4 = vpop.f32.mrf.mxu1 }
 0x543   : > { %14830 = vst [vmem:[#allocation24_spill] sm:$0xff] %v13014_v32  ;;  %v6654_v22 = vrot.slane %v6653_v28, 2  ;;  %v13016_v13 = vmax.f32 %v6634_v9, %v6635_v57  ;;  %v6661_v50 = vrot.slane %v6660_v45, 2  ;;  %v6017_v49 = vadd.f32 %v12714_v37, %v12980_v7 }
 0x544   : > { %v6667_v21 = vmax.f32 %v6665_v27, %v6666_v60  ;;  %v6629_v23 = vmax.f32 %v6627_v10, %v6628_v2  ;;  %v6649_v39 = vrot.slane %v6648_v20, 1  ;;  %v5744_v40 = vadd.f32 %v12971_v33, %v12676_v51 }
 0x545   : > { %v6655_v36 = vmax.f32 %v6653_v28, %v6654_v22  ;;  %v13022_v35 = vmax.f32 %v6641_v24, %v6642_v42  ;;  %v6662_v46 = vmax.f32 %v6660_v45, %v6661_v50  ;;  %v6033_v62 = vmax.f32 %v6017_v49, 0.0 }
 0x546   : > { %v6668_v58 = vrot.slane %v6667_v21, 2  ;;  %v6650_v6 = vmax.f32 %v6648_v20, %v6649_v39  ;;  %v5995_v19 = vadd.f32 %v12960_v25, %v5744_v40  ;;  %v9532_v60 = vadd.f32 %v9531_v55, %v9530_v38  ;;  %v9746_v20 = vpop.f32.mrf.mxu0  ;;  %v9536_v39 = vpop.f32.mrf.mxu1 }
 0x547   : > { %v6656_v9 = vrot.slane %v6655_v36, 1  ;;  %v6663_v27 = vrot.slane %v6662_v46, 1  ;;  %v6225_v7 = vcombine.high %v6033_v62, %v6033_v62  ;;  %v6232_v10 = vrot.slane %v6033_v62, %v10427_v12 }
 0x548   : > { %v6669_v57 = vmax.f32 %v6667_v21, %v6668_v58  ;;  %v6856_v34 = vmax.f32 %v6622_v1, %v6650_v6  ;;  %v6018_v51 = vadd.f32 %v12714_v37, %v5995_v19  ;;  %v9535_v33 = vadd.f32 %v9534_v4, %v9533_v43  ;;  %v5965_v6 = vpop.f32.mrf.mxu0 }
 0x549   : > { %v6657_v28 = vmax.f32 %v6655_v36, %v6656_v9  ;;  %v13027_v24 = vmax.f32 %v6662_v46, %v6663_v27  ;;  %v6239_v45 = vrot.slane %v6225_v7, %v10427_v12  ;;  %v6240_v42 = vcombine.high %v6232_v10, %v6232_v10 }
 0x54a   : > { %v6670_v2 = vrot.slane %v6669_v57, 1  ;;  %v14831_v25 = vmax.f32 %v12764_v48, %v12784_v41  ;;  %v6672_v55 = vsel %vm6391_vm11, %v6232_v10, -inf  ;;  %v6034_v50 = vmax.f32 %v6018_v51, 0.0  ;;  %v9537_v10 = vpop.f32.mrf.mxu1 }
 0x54b   : > { %v6857_v22 = vmax.f32 %v6629_v23, %v6657_v28  ;;  %v6241_v43 = vcombine.high %v6239_v45, %v6239_v45  ;;  %v6673_v21 = vrot.slane %v6672_v55, 4  ;;  %v5749_v49 = vadd.f32 %v9532_v60, %v12684_v53 }
 0x54c   : > { %v13033_v38 = vadd.f32 %v6856_v34, %v14831_v25  ;;  %v14832_v36 = vmax.f32 %v12766_v5, %v12803_v3  ;;  %v6679_v48 = vsel %vm6391_vm11, %v6240_v42, -inf  ;;  %v6686_v41 = vsel %vm6391_vm11, %v6239_v45, -inf }
 0x54d   : > { %v6242_v40 = vcombine.high %v6034_v50, %v6034_v50  ;;  %v6674_v46 = vmax.f32 %v6672_v55, %v6673_v21  ;;  %v6680_v58 = vrot.slane %v6679_v48, 4  ;;  %v6687_v62 = vrot.slane %v6686_v41, 4 }
 0x54e   : > { %v13042_v23 = vadd.f32 %v6857_v22, %v14832_v36  ;;  %v6693_v4 = vsel %vm6391_vm11, %v6241_v43, -inf  ;;  %v13047_v9 = vmax.f32 %v6669_v57, %v6670_v2  ;;  %v6249_v19 = vrot.slane %v6034_v50, %v10427_v12 }
 0x54f   : > { %v6694_v53 = vrot.slane %v6693_v4, 4  ;;  %v6256_v5 = vrot.slane %v6242_v40, %v10427_v12  ;;  %v6675_v3 = vrot.slane %v6674_v46, 2  ;;  %v6681_v60 = vmax.f32 %v6679_v48, %v6680_v58 }
 0x550   : > { %v6688_v27 = vmax.f32 %v6686_v41, %v6687_v62  ;;  %v5996_v7 = vadd.f32 %v5965_v6, %v5749_v49  ;;  %v6257_v34 = vcombine.high %v6249_v19, %v6249_v19  ;;  %v6700_v45 = vsel %vm6391_vm11, %v6249_v19, -inf  ;;  %v9539_v41 = vpop.f32.mrf.mxu1 }
 0x551   : > { %v13051_v28 = vmax.f32 %v6693_v4, %v6694_v53  ;;  %v6258_v51 = vcombine.high %v6256_v5, %v6256_v5  ;;  %v6676_v42 = vmax.f32 %v6674_v46, %v6675_v3  ;;  %v6682_v22 = vrot.slane %v6681_v60, 2 }
 0x552   : > { %v6689_v57 = vrot.slane %v6688_v27, 2  ;;  %v6701_v2 = vrot.slane %v6700_v45, 4  ;;  %v6707_v25 = vsel %vm6391_vm11, %v6257_v34, -inf  ;;  %v6714_v55 = vsel %vm6391_vm11, %v6256_v5, -inf }
 0x553   : > { %v6721_v50 = vsel %vm6391_vm11, %v6258_v51, -inf  ;;  %v5754_v43 = vadd.f32 %v9535_v33, %v12686_v17  ;;  %v6677_v21 = vrot.slane %v6676_v42, 1  ;;  %v6683_v49 = vmax.f32 %v6681_v60, %v6682_v22 }
 0x554   : > { %v13058_v36 = vmax.f32 %v6688_v27, %v6689_v57  ;;  %v6702_v48 = vmax.f32 %v6700_v45, %v6701_v2  ;;  %v6708_v40 = vrot.slane %v6707_v25, 4  ;;  %v6715_v58 = vrot.slane %v6714_v55, 4  ;;  %v9540_v45 = vpop.f32.mrf.mxu1 }
 0x555   : > { %v6722_v46 = vrot.slane %v6721_v50, 4  ;;  %v6019_v62 = vadd.f32 %v12714_v37, %v5996_v7  ;;  %v13061_v4 = vmax.f32 %v6676_v42, %v6677_v21  ;;  %v6684_v6 = vrot.slane %v6683_v49, 1 }
 0x556   : > { %v6703_v19 = vrot.slane %v6702_v48, 2  ;;  %v6709_v5 = vmax.f32 %v6707_v25, %v6708_v40  ;;  %v6716_v3 = vmax.f32 %v6714_v55, %v6715_v58  ;;  %v5997_v51 = vadd.f32 %v9746_v20, %v5754_v43  ;;  %v13074_v55 = vld [vmem:[%s14756_s4] ss:$0 sm:$0xff] }
 0x557   : > { %v13064_v17 = vmax.f32 %v6721_v50, %v6722_v46  ;;  %v6035_v33 = vmax.f32 %v6019_v62, 0.0  ;;  %v13066_v60 = vmax.f32 %v6683_v49, %v6684_v6  ;;  %v9538_v42 = vadd.f32 %v9537_v10, %v9536_v39 }
 0x558   : > { %v6704_v34 = vmax.f32 %v6702_v48, %v6703_v19  ;;  %v6710_v22 = vrot.slane %v6709_v5, 2  ;;  %v6717_v37 = vrot.slane %v6716_v3, 2  ;;  %v6020_v50 = vadd.f32 %v13074_v55, %v5997_v51 }
 0x559   : > { %v6259_v7 = vcombine.high %v6035_v33, %v6035_v33  ;;  %v6266_v25 = vrot.slane %v6035_v33, %v10427_v12  ;;  %v9541_v43 = vadd.f32 %v9540_v45, %v9539_v41  ;;  %v5759_v6 = vadd.f32 %v9538_v42, %v12700_v54 }
 0x55a   : > { %v6705_v57 = vrot.slane %v6704_v34, 1  ;;  %v6711_v21 = vmax.f32 %v6709_v5, %v6710_v22  ;;  %v13077_v49 = vmax.f32 %v6716_v3, %v6717_v37  ;;  %v6036_v40 = vmax.f32 %v6020_v50, 0.0 }
 0x55b   : > { %v6273_v20 = vrot.slane %v6259_v7, %v10427_v12  ;;  %v6274_v39 = vcombine.high %v6266_v25, %v6266_v25  ;;  %v6728_v10 = vsel %vm6391_vm11, %v6266_v25, -inf  ;;  %v5764_v54 = vadd.f32 %v9541_v43, %v12708_v14  ;;  %v9749_v43 = vpop.f32.mrf.mxu0 }
 0x55c   : > { %v13080_v48 = vmax.f32 %v6704_v34, %v6705_v57  ;;  %v6712_v58 = vrot.slane %v6711_v21, 1  ;;  %v6729_v62 = vrot.slane %v6728_v10, 4  ;;  %v6276_v33 = vcombine.high %v6036_v40, %v6036_v40 }
 0x55d   : > { %v6275_v46 = vcombine.high %v6273_v20, %v6273_v20  ;;  %v6735_v5 = vsel %vm6391_vm11, %v6274_v39, -inf  ;;  %v6742_v3 = vsel %vm6391_vm11, %v6273_v20, -inf  ;;  %v6283_v37 = vrot.slane %v6036_v40, %v10427_v12 }
 0x55e   : > { %v6730_v34 = vmax.f32 %v6728_v10, %v6729_v62  ;;  %v6736_v51 = vrot.slane %v6735_v5, 4  ;;  %v6743_v45 = vrot.slane %v6742_v3, 4  ;;  %v6290_v7 = vrot.slane %v6276_v33, %v10427_v12 }
 0x55f   : > { %v6749_v22 = vsel %vm6391_vm11, %v6275_v46, -inf  ;;  %v6291_v39 = vcombine.high %v6283_v37, %v6283_v37  ;;  %v6756_v19 = vsel %vm6391_vm11, %v6283_v37, -inf }
 0x560   : > { %v6731_v42 = vrot.slane %v6730_v34, 2  ;;  %v6737_v57 = vmax.f32 %v6735_v5, %v6736_v51  ;;  %v6744_v25 = vmax.f32 %v6742_v3, %v6743_v45  ;;  %v6750_v50 = vrot.slane %v6749_v22, 4 }
 0x561   : > { %v6292_v20 = vcombine.high %v6290_v7, %v6290_v7  ;;  %v6770_v10 = vsel %vm6391_vm11, %v6290_v7, -inf  ;;  %v6757_v41 = vrot.slane %v6756_v19, 4  ;;  %v6763_v40 = vsel %vm6391_vm11, %v6291_v39, -inf }
 0x562   : > { %v6732_v62 = vmax.f32 %v6730_v34, %v6731_v42  ;;  %v6738_v1 = vrot.slane %v6737_v57, 2  ;;  %v6745_v2 = vrot.slane %v6744_v25, 2  ;;  %v6751_v46 = vmax.f32 %v6749_v22, %v6750_v50 }
 0x563   : > { %v6771_v33 = vrot.slane %v6770_v10, 4  ;;  %v6777_v14 = vsel %vm6391_vm11, %v6292_v20, -inf  ;;  %v6758_v53 = vmax.f32 %v6756_v19, %v6757_v41  ;;  %v6764_v27 = vrot.slane %v6763_v40, 4  ;;  %v5975_v20 = vpop.f32.mrf.mxu0 }
 0x564   : > { %v6733_v5 = vrot.slane %v6732_v62, 1  ;;  %v6739_v3 = vmax.f32 %v6737_v57, %v6738_v1  ;;  %v6746_v51 = vmax.f32 %v6744_v25, %v6745_v2  ;;  %v6752_v45 = vrot.slane %v6751_v46, 2 }
 0x565   : > { %v6772_v37 = vmax.f32 %v6770_v10, %v6771_v33  ;;  %v6778_v32 = vrot.slane %v6777_v14, 4  ;;  %v13097_v7 = vmax.f32 %v6711_v21, %v6712_v58  ;;  %v6759_v50 = vrot.slane %v6758_v53, 2 }
 0x566   : > { %v6740_v34 = vrot.slane %v6739_v3, 1  ;;  %v6747_v42 = vrot.slane %v6746_v51, 1  ;;  %v13099_v22 = vmax.f32 %v6751_v46, %v6752_v45  ;;  %v6765_v39 = vmax.f32 %v6763_v40, %v6764_v27 }
 0x567   : > { %v6773_v44 = vrot.slane %v6772_v37, 2  ;;  %v6779_v26 = vmax.f32 %v6777_v14, %v6778_v32  ;;  %v13101_v15 = vmax.f32 %v6732_v62, %v6733_v5  ;;  %v5999_v19 = vadd.f32 %v9749_v43, %v5764_v54 }
 0x568   : > { %v13103_v1 = vmax.f32 %v6739_v3, %v6740_v34  ;;  %v13105_v2 = vmax.f32 %v6746_v51, %v6747_v42  ;;  %v6760_v41 = vmax.f32 %v6758_v53, %v6759_v50  ;;  %v6766_v57 = vrot.slane %v6765_v39, 2 }
 0x569   : > { %v6774_v21 = vmax.f32 %v6772_v37, %v6773_v44  ;;  %v6780_v58 = vrot.slane %v6779_v26, 2  ;;  %v6022_v10 = vadd.f32 %v13074_v55, %v5999_v19  ;;  %v5998_v46 = vadd.f32 %v5975_v20, %v5759_v6 }
 0x56a   : > { %v14833_v27 = vrot.slane %v12837_v18, 2  ;;  %v6761_v62 = vrot.slane %v6760_v41, 1  ;;  %v6767_v40 = vmax.f32 %v6765_v39, %v6766_v57  ;;  %v14834_v44 = vrot.slane %v12848_v52, 1 }
 0x56b   : > { %v6775_v33 = vrot.slane %v6774_v21, 1  ;;  %v13112_v14 = vmax.f32 %v6779_v26, %v6780_v58  ;;  %v6038_v5 = vmax.f32 %v6022_v10, 0.0  ;;  %v6021_v53 = vadd.f32 %v13074_v55, %v5998_v46 }
 0x56c   : > { %v6473_v32 = vmax.f32 %v12837_v18, %v14833_v27  ;;  %v13118_v54 = vmax.f32 %v12848_v52, %v14834_v44  ;;  %v13120_v3 = vmax.f32 %v6760_v41, %v6761_v62  ;;  %v6768_v6 = vrot.slane %v6767_v40, 1 }
 0x56d   : > { %v13122_v51 = vmax.f32 %v6774_v21, %v6775_v33  ;;  %v14835_v18 = vrot.slane %v12879_v29, 1  ;;  %v6310_v37 = vcombine.high %v6038_v5, %v6038_v5  ;;  %v6317_v55 = vrot.slane %v6038_v5, %v10427_v12 }
 0x56e   : > { %v6474_v43 = vrot.slane %v6473_v32, 1  ;;  %v6037_v34 = vmax.f32 %v6021_v53, 0.0  ;;  %v13131_v42 = vmax.f32 %v6767_v40, %v6768_v6  ;;  %v14837_v39 = vrot.slane %v12867_v0, 2 }
 0x56f   : > { %v13127_v45 = vmax.f32 %v12879_v29, %v14835_v18  ;;  %v6324_v29 = vrot.slane %v6310_v37, %v10427_v12  ;;  %v6325_v19 = vcombine.high %v6317_v55, %v6317_v55  ;;  %v6812_v41 = vsel %vm6391_vm11, %v6317_v55, -inf }
 0x570   : > { %14836 = vst [vmem:[#allocation25_spill] sm:$0xff] %v13131_v42  ;;  %v13135_v50 = vmax.f32 %v6473_v32, %v6474_v43  ;;  %v6501_v20 = vmax.f32 %v12867_v0, %v14837_v39  ;;  %v6293_v57 = vcombine.high %v6037_v34, %v6037_v34  ;;  %v6813_v58 = vrot.slane %v6812_v41, 4 }
 0x571   : > { %v6300_v10 = vrot.slane %v6037_v34, %v10427_v12  ;;  %v14838_v46 = vrot.slane %v13058_v36, 1  ;;  %v6326_v32 = vcombine.high %v6324_v29, %v6324_v29  ;;  %v6819_v0 = vsel %vm6391_vm11, %v6325_v19, -inf }
 0x572   : > { %v6826_v62 = vsel %vm6391_vm11, %v6324_v29, -inf  ;;  %v6307_v40 = vrot.slane %v6293_v57, %v10427_v12  ;;  %v6814_v33 = vmax.f32 %v6812_v41, %v6813_v58  ;;  %v6820_v5 = vrot.slane %v6819_v0, 4 }
 0x573   : > { %v13148_v27 = vmax.f32 %v13058_v36, %v14838_v46  ;;  %v6827_v53 = vrot.slane %v6826_v62, 4  ;;  %v6308_v44 = vcombine.high %v6300_v10, %v6300_v10  ;;  %v13154_v43 = vsel %vm6391_vm11, %v6326_v32, -inf }
 0x574   : > { %v6309_v6 = vcombine.high %v6307_v40, %v6307_v40  ;;  %v6784_v18 = vsel %vm6391_vm11, %v6300_v10, -inf  ;;  %v6798_v36 = vsel %vm6391_vm11, %v6307_v40, -inf  ;;  %v6815_v37 = vrot.slane %v6814_v33, 2 }
 0x575   : > { %v6821_v55 = vmax.f32 %v6819_v0, %v6820_v5  ;;  %v13158_v34 = vmax.f32 %v6826_v62, %v6827_v53  ;;  %v6502_v39 = vrot.slane %v6501_v20, 1  ;;  %v6785_v29 = vrot.slane %v6784_v18, 4 }
 0x576   : > { %v6791_v19 = vsel %vm6391_vm11, %v6308_v44, -inf  ;;  %v6799_v41 = vrot.slane %v6798_v36, 4  ;;  %v6805_v57 = vsel %vm6391_vm11, %v6309_v6, -inf  ;;  %v6816_v58 = vmax.f32 %v6814_v33, %v6815_v37 }
 0x577   : > { %v6822_v46 = vrot.slane %v6821_v55, 2  ;;  %v6792_v21 = vrot.slane %v6791_v19, 4  ;;  %v6829_v10 = vrot.slane %v13158_v34, 2  ;;  %v6786_v52 = vmax.f32 %v6784_v18, %v6785_v29 }
 0x578   : > { %v6800_v40 = vmax.f32 %v6798_v36, %v6799_v41  ;;  %v6806_v26 = vrot.slane %v6805_v57, 4  ;;  %v6817_v0 = vrot.slane %v6816_v58, 1  ;;  %v6503_v5 = vmax.f32 %v6501_v20, %v6502_v39 }
 0x579   : > { %v6793_v62 = vmax.f32 %v6791_v19, %v6792_v21  ;;  %v14839_v53 = vrot.slane %v13051_v28, 2  ;;  %v13167_v25 = vmax.f32 %v6821_v55, %v6822_v46  ;;  %v6787_v6 = vrot.slane %v6786_v52, 2 }
 0x57a   : > { %v6801_v33 = vrot.slane %v6800_v40, 2  ;;  %v6807_v37 = vmax.f32 %v6805_v57, %v6806_v26  ;;  %v14840_v42 = vrot.slane %v13077_v49, 1  ;;  %v14841_v36 = vrot.slane %v13064_v17, 2 }
 0x57b   : > { %v6697_v44 = vmax.f32 %v13051_v28, %v14839_v53  ;;  %v6794_v12 = vrot.slane %v6793_v62, 2  ;;  %v6788_v20 = vmax.f32 %v6786_v52, %v6787_v6  ;;  %v13177_v29 = vmax.f32 %v6816_v58, %v6817_v0 }
 0x57c   : > { %v6720_v18 = vmax.f32 %v13077_v49, %v14840_v42  ;;  %v6725_v21 = vmax.f32 %v13064_v17, %v14841_v36  ;;  %v13175_v39 = vmax.f32 %v6800_v40, %v6801_v33  ;;  %v6843_v28 = vmax.f32 %v12777_v31, %v12830_v30 }
 0x57d   : > { %v6698_v32 = vrot.slane %v6697_v44, 1  ;;  %v6795_v55 = vmax.f32 %v6793_v62, %v6794_v12  ;;  %v6808_v26 = vrot.slane %v6807_v37, 2  ;;  %v6845_v41 = vmax.f32 %v12863_v61, %v12928_v59 }
 0x57e   : > { %v6726_v19 = vrot.slane %v6725_v21, 1  ;;  %v6789_v57 = vrot.slane %v6788_v20, 1  ;;  %v6846_v42 = vmax.f32 %v13118_v54, %v13127_v45  ;;  %v6847_v17 = vmax.f32 %v13135_v50, %v6503_v5  ;;  %v14844_v45 = vld [vmem:[#allocation8_spill] sm:$0xff]  ;;  %v14845_v50 = vld [vmem:[#allocation9_spill] sm:$0xff] }
 0x57f   : > { %v6699_v49 = vmax.f32 %v6697_v44, %v6698_v32  ;;  %v6796_v52 = vrot.slane %v6795_v55, 1  ;;  %v6859_v58 = vmax.f32 %v13022_v35, %v13047_v9  ;;  %v6861_v12 = vmax.f32 %v13066_v60, %v13097_v7 }
 0x580   : > { %v6727_v46 = vmax.f32 %v6725_v21, %v6726_v19  ;;  %v13190_v31 = vmax.f32 %v6788_v20, %v6789_v57  ;;  %v6862_v30 = vmax.f32 %v13148_v27, %v6720_v18  ;;  %v14842_v61 = vmax.f32 %v12768_v56, %v12786_v16  ;;  %v14852_v21 = vld [vmem:[#allocation16_spill] sm:$0xff] }
 0x581   : > { %v14843_v59 = vmax.f32 %v13016_v13, %v13027_v24  ;;  %v14846_v32 = vmax.f32 %v14844_v45, %v14845_v50  ;;  %v14847_v35 = vmax.f32 %v13061_v4, %v13080_v48  ;;  %v6803_v60 = vrot.slane %v13175_v39, 1 }
 0x582   : > { %v6863_v7 = vmax.f32 %v6699_v49, %v6727_v46  ;;  %v6875_v40 = vadd.f32 %v6859_v58, %v6843_v28  ;;  %v6877_v0 = vadd.f32 %v6861_v12, %v6845_v41  ;;  %v13206_v27 = vmax.f32 %v6795_v55, %v6796_v52  ;;  %v14854_v28 = vld [vmem:[#allocation21_spill] sm:$0xff]  ;;  %v14856_v41 = vld [vmem:[#allocation20_spill] sm:$0xff] }
 0x583   : > { %v6874_v54 = vadd.f32 %v14843_v59, %v14842_v61  ;;  %v6876_v9 = vadd.f32 %v14847_v35, %v14846_v32  ;;  %v6868_v56 = vmax.f32 %v13190_v31, %v13177_v29  ;;  %v6878_v16 = vadd.f32 %v6862_v30, %v6846_v42  ;;  %v13294_v31 = vld [vmem:[%s14759_s7 + $0x20] sm:$0xff] }
 0x584   : > { %v6948_v13 = vsel %vm4812_vm3, %v13042_v23, %v13033_v38  ;;  %v6879_v24 = vadd.f32 %v6863_v7, %v6847_v17  ;;  %v14848_v4 = vrot.slane %v12930_v63, 1  ;;  %v6572_v5 = vrot.slane %v12992_v8, 1  ;;  %v14851_v38 = vld [vmem:[#allocation23_spill] sm:$0xff]  ;;  %9756 = vmatprep.subr.mxu0 %v13294_v31 }
 0x585   : > { %v6949_v62 = vsel %vm4814_vm4, %v6874_v54, %v6948_v13  ;;  %v14849_v44 = vrot.slane %v12982_v11, 2  ;;  %v14850_v33 = vrot.slane %v12977_v47, 4  ;;  %v6600_v23 = vrot.slane %v14851_v38, 1  ;;  %9757 = vmatpush3.msra.mxu0 %v13294_v31 }
 0x586   : > { %v6531_v48 = vmax.f32 %v12930_v63, %v14848_v4  ;;  %v6950_v53 = vsel %vm4816_vm5, %v6875_v40, %v6949_v62  ;;  %v14853_v20 = vrot.slane %v14852_v21, 1  ;;  %v14855_v55 = vrot.slane %v14854_v28, 2 }
 0x587   : > { %v6578_v6 = vmax.f32 %v12982_v11, %v14849_v44  ;;  %v6583_v18 = vmax.f32 %v12977_v47, %v14850_v33  ;;  %v6951_v36 = vsel %vm4818_vm6, %v6876_v9, %v6950_v53  ;;  %v14857_v57 = vrot.slane %v14856_v41, 4  ;;  %v14865_v53 = vld [vmem:[#allocation11_spill] sm:$0xff] }
 0x588   : > { %v6559_v63 = vmax.f32 %v14852_v21, %v14853_v20  ;;  %v6606_v19 = vmax.f32 %v14854_v28, %v14855_v55  ;;  %v6952_v49 = vsel %vm4820_vm7, %v6877_v0, %v6951_v36  ;;  %v6573_v47 = vmax.f32 %v12992_v8, %v6572_v5  ;;  %v14869_v55 = vld [vmem:[#allocation13_spill] sm:$0xff] }
 0x589   : > { %v6611_v11 = vmax.f32 %v14856_v41, %v14857_v57  ;;  %v6579_v42 = vrot.slane %v6578_v6, 1  ;;  %v6584_v17 = vrot.slane %v6583_v18, 2  ;;  %v6953_v52 = vsel %vm4822_vm8, %v6878_v16, %v6952_v49 }
 0x58a   : > { %v6601_v46 = vmax.f32 %v14851_v38, %v6600_v23  ;;  %v6607_v58 = vrot.slane %v6606_v19, 1  ;;  %v6954_v30 = vsel %vm4824_vm9, %v6879_v24, %v6953_v52  ;;  %v14858_v54 = vrot.slane %v13099_v22, 1  ;;  %v14862_v24 = vld [vmem:[#allocation10_spill] sm:$0xff] }
 0x58b   : > { %v6612_v12 = vrot.slane %v6611_v11, 2  ;;  %v6580_v61 = vmax.f32 %v6578_v6, %v6579_v42  ;;  %v6585_v59 = vmax.f32 %v6583_v18, %v6584_v17  ;;  %7029 = vmatmul.mubr.f32.vlgmr.msra.gmra.mxu1 %v6954_v30  ;;  %v14859_v8 = vrot.slane %v13112_v14, 1  ;;  %v14866_v18 = vld [vmem:[#allocation24_spill] sm:$0xff]  ;;  %v14867_v38 = vld [vmem:[#allocation22_spill] sm:$0xff] }
 0x58c   : > { %v6755_v45 = vmax.f32 %v13099_v22, %v14858_v54  ;;  %v6608_v50 = vmax.f32 %v6606_v19, %v6607_v58  ;;  %v6809_v9 = vmax.f32 %v6807_v37, %v6808_v26  ;;  %v14860_v7 = vmov 0.0   ;;  %9770 = vmatpush3.msra.mxu1 %v14862_v24  ;;  %v14864_v37 = vld [vmem:[#allocation15_spill] sm:$0xff]  ;;  %v14870_v19 = vld [vmem:[#allocation17_spill] sm:$0xff]  ;;  %v14873_v42 = vld [vmem:[#allocation14_spill] sm:$0xff] }
 0x58d   : > { %v6613_v32 = vmax.f32 %v6611_v11, %v6612_v12  ;;  %v6783_v35 = vmax.f32 %v13112_v14, %v14859_v8  ;;  %7034 = vmatprep.mubr.f32.mxu1 %v14860_v7  ;;  %v6586_v40 = vrot.slane %v6585_v59, 1  ;;  %v6824_v0 = vrot.slane %v13167_v25, 1  ;;  %v14863_v14 = vld [vmem:[#allocation19_spill] sm:$0xff]  ;;  %9771 = vmatprep.subr.mxu1 %v14865_v53  ;;  %v14874_v17 = vld [vmem:[#allocation18_spill] sm:$0xff] }
 0x58e   : > { %v6830_v16 = vmax.f32 %v13158_v34, %v6829_v10  ;;  %v14861_v13 = vrot.slane %v13154_v43, 4  ;;  %v6804_v4 = vmax.f32 %v13175_v39, %v6803_v60  ;;  %v6850_v26 = vmax.f32 %v14864_v37, %v14863_v14  ;;  %9772 = vmatpush3.msra.mxu1 %v14865_v53  ;;  %v14868_v39 = vld [vmem:[#allocation12_spill] sm:$0xff]  ;;  %v6920_v24 = vld [vmem:[%s14758_s6] sm:$0x3] }
 0x58f   : > { %v6614_v62 = vrot.slane %v6613_v32, 1  ;;  %v6851_v5 = vmax.f32 %v6531_v48, %v6559_v63  ;;  %v6810_v44 = vrot.slane %v6809_v9, 1  ;;  %v6825_v6 = vmax.f32 %v13167_v25, %v6824_v0  ;;  %9773 = vmatprep.subr.mxu1 %v14868_v39  ;;  %v13330_v0 = vld [vmem:[%s14759_s7] sm:$0xff] }
 0x590   : > { %v6835_v22 = vmax.f32 %v13154_v43, %v14861_v13  ;;  %v6831_v33 = vrot.slane %v6830_v16, 1  ;;  %v6587_v10 = vmax.f32 %v6585_v59, %v6586_v40  ;;  %v6852_v23 = vmax.f32 %v14867_v38, %v14866_v18  ;;  %9774 = vmatpush3.msra.mxu1 %v14868_v39  ;;  %v13320_v40 = vld [vmem:[%s14759_s7 + $0x8] sm:$0xff]  ;;  %v14878_v13 = vld [vmem:[#allocation6_spill] sm:$0xff] }
 0x591   : > { %v6615_v43 = vmax.f32 %v6613_v32, %v6614_v62  ;;  %v6853_v36 = vmax.f32 %v6573_v47, %v6601_v46  ;;  %v6854_v48 = vmax.f32 %v6580_v61, %v6608_v50  ;;  %v6866_v20 = vmax.f32 %v13105_v2, %v13122_v51  ;;  %v14876_v2 = vld [vmem:[#allocation25_spill] sm:$0xff]  ;;  %9775 = vmatprep.subr.mxu1 %v13294_v31 }
 0x592   : > { %v6836_v34 = vrot.slane %v6835_v22, 2  ;;  %v6832_v60 = vmax.f32 %v6830_v16, %v6831_v33  ;;  %v6867_v63 = vmax.f32 %v6755_v45, %v6783_v35  ;;  %v6869_v28 = vmax.f32 %v13206_v27, %v6825_v6  ;;  %9776 = vmatpush3.msra.mxu1 %v13294_v31  ;;  %v10087_v16 = vld [vmem:[%s14759_s7 + $0x38] sm:$0xff] }
 0x593   : > { %v6855_v25 = vmax.f32 %v6587_v10, %v6615_v43  ;;  %v14871_v41 = vmax.f32 %v14869_v55, %v14870_v19  ;;  %v14872_v57 = vmax.f32 %v13101_v15, %v13120_v3  ;;  %v14875_v52 = vmax.f32 %v14873_v42, %v14874_v17 }
 0x594   : > { %v6837_v21 = vmax.f32 %v6835_v22, %v6836_v34  ;;  %v6870_v47 = vmax.f32 %v6804_v4, %v6832_v60  ;;  %v14877_v51 = vmax.f32 %v13103_v1, %v14876_v2  ;;  %v6882_v58 = vadd.f32 %v6866_v20, %v6850_v26  ;;  %v13388_v20 = vld [vmem:[%s14760_s8] ss:$0 sm:$0xff] }
 0x595   : > { %v6880_v11 = vadd.f32 %v14872_v57, %v14871_v41  ;;  %v6883_v12 = vadd.f32 %v6867_v63, %v6851_v5  ;;  %v6884_v27 = vadd.f32 %v6868_v56, %v6852_v23  ;;  %v6885_v30 = vadd.f32 %v6869_v28, %v6853_v36  ;;  %v13302_v56 = vld [vmem:[%s14759_s7 + $0x18] sm:$0xff]  ;;  %v10088_v23 = vld [vmem:[%s14759_s7 + $0x30] sm:$0xff]  ;;  %v10089_v36 = vld [vmem:[%s14759_s7 + $0x28] sm:$0xff] }
 0x596   : > { %v6838_v49 = vrot.slane %v6837_v21, 1  ;;  %v6881_v46 = vadd.f32 %v14877_v51, %v14875_v52  ;;  %v6811_v61 = vmax.f32 %v6809_v9, %v6810_v44  ;;  %v6886_v15 = vadd.f32 %v6870_v47, %v6854_v48  ;;  %v13307_v9 = vld [vmem:[%s14759_s7 + $0x10] sm:$0xff]  ;;  %9758 = vmatprep.subr.mxu0 %v13302_v56  ;;  %9777 = vmatprep.subr.mxu1 %v13302_v56 }
 0x597   : > { %9759 = vmatpush3.msra.mxu0 %v13302_v56  ;;  %9778 = vmatpush3.msra.mxu1 %v13302_v56  ;;  %v13340_v22 = vsub.s32 0, %v14878_v13  ;;  %v6928_v62 = vsub.s32 1, %v14878_v13 }
 0x598   : > { %v6839_v59 = vmax.f32 %v6837_v21, %v6838_v49  ;;  %v6955_v3 = vsel %vm4812_vm3, %v6881_v46, %v6880_v11  ;;  %9760 = vmatprep.subr.mxu0 %v13307_v9  ;;  %9779 = vmatprep.subr.mxu1 %v13307_v9  ;;  %vm9099_vm3 = vcmask 1042432  }
 0x599   : > { %v6956_v54 = vsel %vm4814_vm4, %v6882_v58, %v6955_v3  ;;  %9761 = vmatpush3.msra.mxu0 %v13307_v9  ;;  %9780 = vmatpush3.msra.mxu1 %v13307_v9  ;;  %14879 = vst [vmem:[#allocation8_spill] sm:$0xff] %v13340_v22  ;;  %v6925_v4 = vrot.slane %v6920_v24, %v13340_v22  ;;  %vm9124_vm4 = vcmask 125952  }
 0x59a   : > { %v6871_v45 = vmax.f32 %v6811_v61, %v6839_v59  ;;  %v6957_v50 = vsel %vm4816_vm5, %v6883_v12, %v6956_v54  ;;  %9762 = vmatprep.subr.mxu0 %v13320_v40  ;;  %9781 = vmatprep.subr.mxu1 %v13320_v40  ;;  %v6929_v14 = vrot.slane %v6920_v24, %v6928_v62 }
 0x59b   : > { %v6958_v1 = vsel %vm4818_vm6, %v6884_v27, %v6957_v50  ;;  %9763 = vmatpush3.msra.mxu0 %v13320_v40  ;;  %9782 = vmatpush3.msra.mxu1 %v13320_v40 }
 0x59c   : > { %v6887_v32 = vadd.f32 %v6871_v45, %v6855_v25  ;;  %v6959_v8 = vsel %vm4820_vm7, %v6885_v30, %v6958_v1  ;;  %9764 = vmatprep.subr.mxu0 %v13330_v0  ;;  %9783 = vmatprep.subr.mxu1 %v13330_v0 }
 0x59d   : > { %v6960_v35 = vsel %vm4822_vm8, %v6886_v15, %v6959_v8  ;;  %9765 = vmatpush3.msra.mxu0 %v13330_v0  ;;  %9784 = vmatpush3.msra.mxu1 %v13330_v0 }
 0x59e   : > { %v6961_v29 = vsel %vm4824_vm9, %v6887_v32, %v6960_v35  ;;  %9788 = vmatprep.subr.mxu0 %v10087_v16  ;;  %9807 = vmatprep.subr.mxu1 %v10087_v16 }
 0x59f   : > { %7035 = vmatmul.mubr.f32.gmra.mxu1 %v6961_v29 }
 0x64b   : > { %v7030_v37 = vpop.f32.mrf.mxu1 }
 0x64c   : > { %v7031_v26 = vadd.f32 %v7030_v37, %v6925_v4 }
 0x64d   : > { %v7032_v5 = vpop.f32.mrf.mxu1 }
 0x64e   : > { %v7041_v53 = vmax.f32 %v7031_v26, 0.0  ;;  %v7033_v44 = vadd.f32 %v7032_v5, %v6929_v14 }
 0x650   : > { %7147 = vrot.lane.b32.xlu0 %v7041_v53, %s14809_s17  ;;  %9766 = vmatprep.mubr.msk.f32.mxu0 %vm4249_vm2, %v7041_v53  ;;  %v7042_v6 = vmax.f32 %v7033_v44, 0.0 }
 0x654   : > { %7323 = vrot.lane.b32.xlu0 %v7042_v6, %s14809_s17 }
 0x65f   : > { %v7036_v33 = vpop.f32.mrf.mxu1 }
 0x660   : > { %v7037_v34 = vadd.f32 %v7036_v33, %v6925_v4 }
 0x661   : > { %v7038_v10 = vpop.f32.mrf.mxu1 }
 0x662   : > { %v7043_v43 = vmax.f32 %v7037_v34, 0.0  ;;  %v7039_v18 = vadd.f32 %v7038_v10, %v6929_v14 }
 0x664   : > { %7149 = vrot.lane.b32.xlu1 %v7043_v43, %s14809_s17  ;;  %9767 = vmatmul.mubr.msk.f32.vlgmr.msra.gmra.mxu0 %vm4249_vm2, %v7043_v43  ;;  %v7044_v38 = vmax.f32 %v7039_v18, 0.0 }
 0x665   : > { %9789 = vmatpush3.msra.mxu0 %v10087_v16  ;;  %9804 = vmatprep.mubr.msk.f32.mxu0 %vm4249_vm2, %v7042_v6 }
 0x666   : > { %9790 = vmatprep.subr.mxu0 %v10088_v23 }
 0x667   : > { %9791 = vmatpush3.msra.mxu0 %v10088_v23 }
 0x668   : > { %9792 = vmatprep.subr.mxu0 %v10089_v36  ;;  %7325 = vrot.lane.b32.xlu1 %v7044_v38, %s14809_s17 }
 0x669   : > { %9793 = vmatpush3.msra.mxu0 %v10089_v36 }
 0x66a   : > { %9794 = vmatprep.subr.mxu0 %v13294_v31 }
 0x66b   : > { %9795 = vmatpush3.msra.mxu0 %v13294_v31 }
 0x66c   : > { %9796 = vmatprep.subr.mxu0 %v13302_v56 }
 0x66d   : > { %9797 = vmatpush3.msra.mxu0 %v13302_v56 }
 0x66e   : > { %9798 = vmatprep.subr.mxu0 %v13307_v9 }
 0x66f   : > { %9799 = vmatpush3.msra.mxu0 %v13307_v9 }
 0x670   : > { %9800 = vmatprep.subr.mxu0 %v13320_v40 }
 0x671   : > { %9801 = vmatpush3.msra.mxu0 %v13320_v40 }
 0x672   : > { %9802 = vmatprep.subr.mxu0 %v13330_v0 }
 0x673   : > { %9803 = vmatpush3.msra.mxu0 %v13330_v0 }
 0x674   : > { %9805 = vmatmul.mubr.msk.f32.vlgmr.msra.gmra.mxu0 %vm4249_vm2, %v7044_v38 }
 0x6c2   : > { %v7148_v39 = vpop.permute.xlu0 %7147 }
 0x6c3   : > { %9785 = vmatprep.mubr.msk.f32.mxu1 %vm4249_vm2, %v7148_v39 }
 0x6c6   : > { %v7324_v21 = vpop.permute.xlu0 %7323 }
 0x6d6   : > { %v7150_v60 = vpop.permute.xlu1 %7149 }
 0x6d7   : > { %9786 = vmatmul.mubr.msk.f32.vlgmr.msra.gmra.mxu1 %vm4249_vm2, %v7150_v60 }
 0x6d8   : > { %9808 = vmatpush3.msra.mxu1 %v10087_v16  ;;  %9823 = vmatprep.mubr.msk.f32.mxu1 %vm4249_vm2, %v7324_v21 }
 0x6d9   : > { %9809 = vmatprep.subr.mxu1 %v10088_v23 }
 0x6da   : > { %9810 = vmatpush3.msra.mxu1 %v10088_v23  ;;  %v7326_v48 = vpop.permute.xlu1 %7325 }
 0x6db   : > { %9811 = vmatprep.subr.mxu1 %v10089_v36 }
 0x6dc   : > { %9812 = vmatpush3.msra.mxu1 %v10089_v36 }
 0x6dd   : > { %9813 = vmatprep.subr.mxu1 %v13294_v31 }
 0x6de   : > { %9814 = vmatpush3.msra.mxu1 %v13294_v31 }
 0x6df   : > { %9815 = vmatprep.subr.mxu1 %v13302_v56 }
 0x6e0   : > { %9816 = vmatpush3.msra.mxu1 %v13302_v56 }
 0x6e1   : > { %9817 = vmatprep.subr.mxu1 %v13307_v9 }
 0x6e2   : > { %9818 = vmatpush3.msra.mxu1 %v13307_v9 }
 0x6e3   : > { %9819 = vmatprep.subr.mxu1 %v13320_v40 }
 0x6e4   : > { %9820 = vmatpush3.msra.mxu1 %v13320_v40 }
 0x6e5   : > { %9821 = vmatprep.subr.mxu1 %v13330_v0 }
 0x6e6   : > { %9822 = vmatpush3.msra.mxu1 %v13330_v0 }
 0x6e7   : > { %9824 = vmatmul.mubr.msk.f32.vlgmr.msra.gmra.mxu1 %vm4249_vm2, %v7326_v48  ;;  %vm9074_vm2 = vcmask 1040384  }
 0x724   : > { %v9768_v25 = vpop.f32.mrf.mxu0 }
 0x725   : > { %v13391_v63 = vadd.f32 %v9768_v25, %v13388_v20 }
 0x726   : > { %v7132_v28 = vpop.f32.mrf.mxu0 }
 0x727   : > { %7701 = vrot.lane.b32.xlu1 %v13391_v63, %s10155_s29  ;;  %7416 = vrot.lane.b32.xlu0 %v13391_v63, %s10156_s14  ;;  %v13410_v55 = vadd.f32 %v13388_v20, %v7132_v28  ;;  %v13418_v19 = vcombine.high %v13391_v63, %v13391_v63 }
 0x729   : > { %v13454_v41 = vcombine.high %v13410_v55, %v13410_v55 }
 0x72b   : > { %7713 = vrot.lane.b32.xlu1 %v13391_v63, %s10157_s16  ;;  %7455 = vrot.lane.b32.xlu0 %v13391_v63, %s10158_s21 }
 0x72f   : > { %7761 = vrot.lane.b32.xlu1 %v13391_v63, %s10159_s22  ;;  %7467 = vrot.lane.b32.xlu0 %v13391_v63, %s10160_s23 }
 0x733   : > { %7773 = vrot.lane.b32.xlu1 %v13391_v63, %s10161_s24  ;;  %7515 = vrot.lane.b32.xlu0 %v13391_v63, %s10162_s25 }
 0x734   : > { %v9806_v57 = vpop.f32.mrf.mxu0 }
 0x735   : > { %v13473_v11 = vadd.f32 %v9806_v57, %v13388_v20 }
 0x736   : > { %v7308_v47 = vpop.f32.mrf.mxu0 }
 0x737   : > { %7821 = vrot.lane.b32.xlu1 %v13391_v63, %s10163_s26  ;;  %7412 = vrot.lane.b32.xlu0 %v13410_v55, %s10156_s14  ;;  %14880 = vst [vmem:[#allocation9_spill] sm:$0xff] %v13473_v11  ;;  %v13481_v49 = vcombine.high %v13473_v11, %v13473_v11  ;;  %v13516_v42 = vadd.f32 %v13388_v20, %v7308_v47 }
 0x739   : > { %14881 = vst [vmem:[#allocation23_spill] sm:$0xff] %v13481_v49  ;;  %14882 = vst [vmem:[#allocation16_spill] sm:$0xff] %v13516_v42  ;;  %v13524_v17 = vcombine.high %v13516_v42, %v13516_v42 }
 0x73b   : > { %7418 = vrot.lane.b32.xlu1 %v13418_v19, %s10156_s14  ;;  %7451 = vrot.lane.b32.xlu0 %v13410_v55, %s10158_s21  ;;  %14883 = vst [vmem:[#allocation21_spill] sm:$0xff] %v13524_v17 }
 0x73f   : > { %7457 = vrot.lane.b32.xlu1 %v13418_v19, %s10158_s21  ;;  %7463 = vrot.lane.b32.xlu0 %v13410_v55, %s10160_s23 }
 0x743   : > { %7469 = vrot.lane.b32.xlu1 %v13418_v19, %s10160_s23  ;;  %7511 = vrot.lane.b32.xlu0 %v13410_v55, %s10162_s25 }
 0x747   : > { %7517 = vrot.lane.b32.xlu1 %v13418_v19, %s10162_s25  ;;  %7703 = vrot.lane.b32.xlu0 %v13418_v19, %s10155_s29 }
 0x74b   : > { %7697 = vrot.lane.b32.xlu1 %v13410_v55, %s10155_s29  ;;  %7715 = vrot.lane.b32.xlu0 %v13418_v19, %s10157_s16 }
 0x74f   : > { %7709 = vrot.lane.b32.xlu1 %v13410_v55, %s10157_s16  ;;  %7763 = vrot.lane.b32.xlu0 %v13418_v19, %s10159_s22 }
 0x753   : > { %7757 = vrot.lane.b32.xlu1 %v13410_v55, %s10159_s22  ;;  %7775 = vrot.lane.b32.xlu0 %v13418_v19, %s10161_s24 }
 0x757   : > { %7769 = vrot.lane.b32.xlu1 %v13410_v55, %s10161_s24  ;;  %7823 = vrot.lane.b32.xlu0 %v13418_v19, %s10163_s26 }
 0x75b   : > { %7817 = vrot.lane.b32.xlu1 %v13410_v55, %s10163_s26  ;;  %7699 = vrot.lane.b32.xlu0 %v13454_v41, %s10155_s29 }
 0x75f   : > { %7711 = vrot.lane.b32.xlu0 %v13454_v41, %s10157_s16  ;;  %7414 = vrot.lane.b32.xlu1 %v13454_v41, %s10156_s14 }
 0x763   : > { %7759 = vrot.lane.b32.xlu0 %v13454_v41, %s10159_s22  ;;  %7453 = vrot.lane.b32.xlu1 %v13454_v41, %s10158_s21 }
 0x767   : > { %7771 = vrot.lane.b32.xlu0 %v13454_v41, %s10161_s24  ;;  %7465 = vrot.lane.b32.xlu1 %v13454_v41, %s10160_s23 }
 0x76b   : > { %7819 = vrot.lane.b32.xlu0 %v13454_v41, %s10163_s26  ;;  %7513 = vrot.lane.b32.xlu1 %v13454_v41, %s10162_s25 }
 0x76f   : > { %8004 = vrot.lane.b32.xlu0 %v13473_v11, %s10156_s14  ;;  %8006 = vrot.lane.b32.xlu1 %v13481_v49, %s10156_s14 }
 0x773   : > { %8040 = vrot.lane.b32.xlu0 %v13473_v11, %s10158_s21  ;;  %8042 = vrot.lane.b32.xlu1 %v13481_v49, %s10158_s21 }
 0x777   : > { %8052 = vrot.lane.b32.xlu0 %v13473_v11, %s10160_s23  ;;  %8054 = vrot.lane.b32.xlu1 %v13481_v49, %s10160_s23 }
 0x77b   : > { %8100 = vrot.lane.b32.xlu0 %v13473_v11, %s10162_s25  ;;  %8102 = vrot.lane.b32.xlu1 %v13481_v49, %s10162_s25 }
 0x77f   : > { %8283 = vrot.lane.b32.xlu0 %v13473_v11, %s10155_s29  ;;  %8285 = vrot.lane.b32.xlu1 %v13481_v49, %s10155_s29 }
 0x783   : > { %8295 = vrot.lane.b32.xlu0 %v13473_v11, %s10157_s16  ;;  %8297 = vrot.lane.b32.xlu1 %v13481_v49, %s10157_s16 }
 0x787   : > { %8343 = vrot.lane.b32.xlu0 %v13473_v11, %s10159_s22  ;;  %8345 = vrot.lane.b32.xlu1 %v13481_v49, %s10159_s22 }
 0x78b   : > { %8355 = vrot.lane.b32.xlu0 %v13473_v11, %s10161_s24  ;;  %8357 = vrot.lane.b32.xlu1 %v13481_v49, %s10161_s24 }
 0x78f   : > { %8403 = vrot.lane.b32.xlu0 %v13473_v11, %s10163_s26  ;;  %8405 = vrot.lane.b32.xlu1 %v13481_v49, %s10163_s26 }
 0x793   : > { %8000 = vrot.lane.b32.xlu0 %v13516_v42, %s10156_s14  ;;  %8002 = vrot.lane.b32.xlu1 %v13524_v17, %s10156_s14 }
 0x797   : > { %8036 = vrot.lane.b32.xlu0 %v13516_v42, %s10158_s21  ;;  %8038 = vrot.lane.b32.xlu1 %v13524_v17, %s10158_s21  ;;  %v9787_v45 = vpop.f32.mrf.mxu1 }
 0x798   : > { %v13591_v1 = vadd.f32 %v9787_v45, %v13388_v20 }
 0x799   : > { %v13534_v52 = vpop.permute.xlu1 %7701  ;;  %v13536_v2 = vpop.permute.xlu0 %7416 }
 0x79a   : > { %v7221_v40 = vpop.f32.mrf.mxu1  ;;  %v13640_v14 = vcombine.high %v13591_v1, %v13591_v1 }
 0x79b   : > { %8048 = vrot.lane.b32.xlu0 %v13516_v42, %s10160_s23  ;;  %8050 = vrot.lane.b32.xlu1 %v13524_v17, %s10160_s23  ;;  %s10166_s23 = smov 123   ;;  %v13626_v16 = vadd.f32 %v13388_v20, %v7221_v40 }
 0x79d   : > { %v13542_v51 = vpop.permute.xlu1 %7713  ;;  %v13544_v46 = vpop.permute.xlu0 %7455  ;;  %v13708_v21 = vcombine.high %v13626_v16, %v13626_v16 }
 0x79f   : > { %8096 = vrot.lane.b32.xlu0 %v13516_v42, %s10162_s25  ;;  %8098 = vrot.lane.b32.xlu1 %v13524_v17, %s10162_s25 }
 0x7a1   : > { %v13550_v58 = vpop.permute.xlu1 %7761  ;;  %v13552_v12 = vpop.permute.xlu0 %7467 }
 0x7a3   : > { %8279 = vrot.lane.b32.xlu0 %v13516_v42, %s10155_s29  ;;  %8281 = vrot.lane.b32.xlu1 %v13524_v17, %s10155_s29 }
 0x7a5   : > { %v13558_v27 = vpop.permute.xlu1 %7773  ;;  %v13560_v30 = vpop.permute.xlu0 %7515 }
 0x7a7   : > { %8291 = vrot.lane.b32.xlu0 %v13516_v42, %s10157_s16  ;;  %8293 = vrot.lane.b32.xlu1 %v13524_v17, %s10157_s16  ;;  %v9825_v40 = vpop.f32.mrf.mxu1 }
 0x7a9   : > { %v13566_v61 = vpop.permute.xlu1 %7821  ;;  %v13568_v59 = vpop.permute.xlu0 %7412 }
 0x7ab   : > { %8339 = vrot.lane.b32.xlu0 %v13516_v42, %s10159_s22  ;;  %8341 = vrot.lane.b32.xlu1 %v13524_v17, %s10159_s22 }
 0x7ad   : > { %v13574_v15 = vpop.permute.xlu1 %7418  ;;  %v13576_v3 = vpop.permute.xlu0 %7451 }
 0x7af   : > { %8351 = vrot.lane.b32.xlu0 %v13516_v42, %s10161_s24  ;;  %8353 = vrot.lane.b32.xlu1 %v13524_v17, %s10161_s24 }
 0x7b1   : > { %v13582_v54 = vpop.permute.xlu1 %7457  ;;  %v13584_v50 = vpop.permute.xlu0 %7463 }
 0x7b3   : > { %8399 = vrot.lane.b32.xlu0 %v13516_v42, %s10163_s26  ;;  %8401 = vrot.lane.b32.xlu1 %v13524_v17, %s10163_s26 }
 0x7b5   : > { %v13593_v32 = vpop.permute.xlu1 %7469  ;;  %v13595_v8 = vpop.permute.xlu0 %7511 }
 0x7b7   : > { %7428 = vrot.lane.b32.xlu0 %v13591_v1, %s10164_s27  ;;  %7725 = vrot.lane.b32.xlu1 %v13591_v1, %s10162_s25 }
 0x7b9   : > { %v13601_v35 = vpop.permute.xlu1 %7517  ;;  %v13603_v29 = vpop.permute.xlu0 %7703 }
 0x7bb   : > { %7479 = vrot.lane.b32.xlu0 %v13591_v1, %s10165_s28  ;;  %7737 = vrot.lane.b32.xlu1 %v13591_v1, %s10155_s29 }
 0x7bd   : > { %v13609_v31 = vpop.permute.xlu1 %7697  ;;  %v13611_v56 = vpop.permute.xlu0 %7715 }
 0x7bf   : > { %7491 = vrot.lane.b32.xlu0 %v13591_v1, %s10158_s21  ;;  %7785 = vrot.lane.b32.xlu1 %v13591_v1, %s10166_s23 }
 0x7c1   : > { %v13617_v9 = vpop.permute.xlu1 %7709  ;;  %v13619_v0 = vpop.permute.xlu0 %7763 }
 0x7c3   : > { %7527 = vrot.lane.b32.xlu0 %v13591_v1, %s10156_s14  ;;  %7797 = vrot.lane.b32.xlu1 %v13591_v1, %s10159_s22 }
 0x7c5   : > { %v13628_v24 = vpop.permute.xlu1 %7757  ;;  %v13630_v62 = vpop.permute.xlu0 %7775 }
 0x7c7   : > { %7424 = vrot.lane.b32.xlu0 %v13626_v16, %s10164_s27  ;;  %7833 = vrot.lane.b32.xlu1 %v13591_v1, %s10157_s16 }
 0x7c9   : > { %v13636_v4 = vpop.permute.xlu1 %7769  ;;  %v13642_v37 = vpop.permute.xlu0 %7823 }
 0x7cb   : > { %7475 = vrot.lane.b32.xlu0 %v13626_v16, %s10165_s28  ;;  %7430 = vrot.lane.b32.xlu1 %v13640_v14, %s10164_s27 }
 0x7cd   : > { %v13648_v26 = vpop.permute.xlu1 %7817  ;;  %v13650_v5 = vpop.permute.xlu0 %7699 }
 0x7cf   : > { %7487 = vrot.lane.b32.xlu0 %v13626_v16, %s10158_s21  ;;  %7481 = vrot.lane.b32.xlu1 %v13640_v14, %s10165_s28 }
 0x7d1   : > { %v13656_v53 = vpop.permute.xlu1 %7414  ;;  %v13658_v44 = vpop.permute.xlu0 %7711 }
 0x7d3   : > { %7523 = vrot.lane.b32.xlu0 %v13626_v16, %s10156_s14  ;;  %7493 = vrot.lane.b32.xlu1 %v13640_v14, %s10158_s21 }
 0x7d5   : > { %v13664_v6 = vpop.permute.xlu1 %7453  ;;  %v13666_v33 = vpop.permute.xlu0 %7759 }
 0x7d7   : > { %7727 = vrot.lane.b32.xlu0 %v13640_v14, %s10162_s25  ;;  %7529 = vrot.lane.b32.xlu1 %v13640_v14, %s10156_s14 }
 0x7d9   : > { %v13672_v34 = vpop.permute.xlu1 %7465  ;;  %v13674_v10 = vpop.permute.xlu0 %7771 }
 0x7db   : > { %7739 = vrot.lane.b32.xlu0 %v13640_v14, %s10155_s29  ;;  %7721 = vrot.lane.b32.xlu1 %v13626_v16, %s10162_s25 }
 0x7dd   : > { %v13680_v43 = vpop.permute.xlu1 %7513  ;;  %v13682_v18 = vpop.permute.xlu0 %7819 }
 0x7df   : > { %7787 = vrot.lane.b32.xlu0 %v13640_v14, %s10166_s23  ;;  %7733 = vrot.lane.b32.xlu1 %v13626_v16, %s10155_s29 }
 0x7e1   : > { %v13688_v38 = vpop.permute.xlu1 %8006  ;;  %v13690_v23 = vpop.permute.xlu0 %8004 }
 0x7e2   : > { %14884 = vst [vmem:[#allocation20_spill] sm:$0xff] %v13688_v38  ;;  %14885 = vst [vmem:[#allocation10_spill] sm:$0xff] %v13690_v23 }
 0x7e3   : > { %7799 = vrot.lane.b32.xlu0 %v13640_v14, %s10159_s22  ;;  %7781 = vrot.lane.b32.xlu1 %v13626_v16, %s10166_s23 }
 0x7e5   : > { %v13696_v36 = vpop.permute.xlu1 %8042  ;;  %v13698_v39 = vpop.permute.xlu0 %8040 }
 0x7e6   : > { %14886 = vst [vmem:[#allocation19_spill] sm:$0xff] %v13696_v36  ;;  %14887 = vst [vmem:[#allocation15_spill] sm:$0xff] %v13698_v39 }
 0x7e7   : > { %7835 = vrot.lane.b32.xlu0 %v13640_v14, %s10157_s16  ;;  %7793 = vrot.lane.b32.xlu1 %v13626_v16, %s10159_s22 }
 0x7e9   : > { %v13704_v60 = vpop.permute.xlu1 %8054  ;;  %v13710_v48 = vpop.permute.xlu0 %8052 }
 0x7ea   : > { %14888 = vst [vmem:[#allocation11_spill] sm:$0xff] %v13704_v60  ;;  %14889 = vst [vmem:[#allocation24_spill] sm:$0xff] %v13710_v48 }
 0x7eb   : > { %7723 = vrot.lane.b32.xlu0 %v13708_v21, %s10162_s25  ;;  %7829 = vrot.lane.b32.xlu1 %v13626_v16, %s10157_s16 }
 0x7ed   : > { %v13716_v25 = vpop.permute.xlu1 %8102  ;;  %v13718_v28 = vpop.permute.xlu0 %8100 }
 0x7ee   : > { %14890 = vst [vmem:[#allocation22_spill] sm:$0xff] %v13716_v25  ;;  %14891 = vst [vmem:[#allocation12_spill] sm:$0xff] %v13718_v28 }
 0x7ef   : > { %7735 = vrot.lane.b32.xlu0 %v13708_v21, %s10155_s29  ;;  %7426 = vrot.lane.b32.xlu1 %v13708_v21, %s10164_s27 }
 0x7f1   : > { %v13724_v57 = vpop.permute.xlu1 %8285  ;;  %v13726_v47 = vpop.permute.xlu0 %8283 }
 0x7f2   : > { %14892 = vst [vmem:[#allocation13_spill] sm:$0xff] %v13724_v57  ;;  %14893 = vst [vmem:[#allocation17_spill] sm:$0xff] %v13726_v47  ;;  %v13741_v57 = vadd.f32 %v9825_v40, %v13388_v20 }
 0x7f3   : > { %7783 = vrot.lane.b32.xlu0 %v13708_v21, %s10166_s23  ;;  %7477 = vrot.lane.b32.xlu1 %v13708_v21, %s10165_s28 }
 0x7f4   : > { %14896 = vst [vmem:[#allocation25_spill] sm:$0xff] %v13741_v57 }
 0x7f5   : > { %v13732_v45 = vpop.permute.xlu1 %8297  ;;  %v13734_v22 = vpop.permute.xlu0 %8295 }
 0x7f6   : > { %14894 = vst [vmem:[#allocation14_spill] sm:$0xff] %v13732_v45  ;;  %14895 = vst [vmem:[#allocation18_spill] sm:$0xff] %v13734_v22  ;;  %v13755_v45 = vcombine.high %v13741_v57, %v13741_v57 }
 0x7f7   : > { %7795 = vrot.lane.b32.xlu0 %v13708_v21, %s10159_s22  ;;  %7489 = vrot.lane.b32.xlu1 %v13708_v21, %s10158_s21 }
 0x7f8   : > { %14900 = vst [vmem:[#allocation28_spill] sm:$0xff] %v13755_v45 }
 0x7f9   : > { %v13743_v47 = vpop.permute.xlu1 %8345  ;;  %v13745_v42 = vpop.permute.xlu0 %8343 }
 0x7fa   : > { %14897 = vst [vmem:[#allocation6_spill] sm:$0xff] %v13743_v47  ;;  %14898 = vst [vmem:[#allocation26_spill] sm:$0xff] %v13745_v42 }
 0x7fb   : > { %7831 = vrot.lane.b32.xlu0 %v13708_v21, %s10157_s16  ;;  %7525 = vrot.lane.b32.xlu1 %v13708_v21, %s10156_s14 }
 0x7fd   : > { %v13751_v22 = vpop.permute.xlu1 %8357  ;;  %v13757_v17 = vpop.permute.xlu0 %8355 }
 0x7fe   : > { %14899 = vst [vmem:[#allocation27_spill] sm:$0xff] %v13751_v22  ;;  %14901 = vst [vmem:[#allocation29_spill] sm:$0xff] %v13757_v17 }
 0x7ff   : > { %8016 = vrot.lane.b32.xlu0 %v13741_v57, %s10164_s27  ;;  %8018 = vrot.lane.b32.xlu1 %v13755_v45, %s10164_s27 }
 0x801   : > { %v13763_v40 = vpop.permute.xlu1 %8405  ;;  %v13765_v47 = vpop.permute.xlu0 %8403 }
 0x802   : > { %14902 = vst [vmem:[#allocation30_spill] sm:$0xff] %v13763_v40  ;;  %14903 = vst [vmem:[#allocation31_spill] sm:$0xff] %v13765_v47 }
 0x803   : > { %8064 = vrot.lane.b32.xlu0 %v13741_v57, %s10165_s28  ;;  %8066 = vrot.lane.b32.xlu1 %v13755_v45, %s10165_s28 }
 0x805   : > { %v13771_v22 = vpop.permute.xlu1 %8002  ;;  %v13773_v42 = vpop.permute.xlu0 %8000 }
 0x806   : > { %14904 = vst [vmem:[#allocation32_spill] sm:$0xff] %v13771_v22  ;;  %14905 = vst [vmem:[#allocation33_spill] sm:$0xff] %v13773_v42 }
 0x807   : > { %8076 = vrot.lane.b32.xlu0 %v13741_v57, %s10158_s21  ;;  %8078 = vrot.lane.b32.xlu1 %v13755_v45, %s10158_s21 }
 0x809   : > { %v13779_v17 = vpop.permute.xlu1 %8038  ;;  %v13781_v40 = vpop.permute.xlu0 %8036 }
 0x80a   : > { %14906 = vst [vmem:[#allocation34_spill] sm:$0xff] %v13779_v17  ;;  %14907 = vst [vmem:[#allocation35_spill] sm:$0xff] %v13781_v40 }
 0x80b   : > { %8112 = vrot.lane.b32.xlu0 %v13741_v57, %s10156_s14  ;;  %8114 = vrot.lane.b32.xlu1 %v13755_v45, %s10156_s14 }
 0x80d   : > { %v13787_v47 = vpop.permute.xlu1 %8050  ;;  %v13789_v22 = vpop.permute.xlu0 %8048 }
 0x80e   : > { %14908 = vst [vmem:[#allocation36_spill] sm:$0xff] %v13787_v47  ;;  %14909 = vst [vmem:[#allocation37_spill] sm:$0xff] %v13789_v22 }
 0x80f   : > { %8307 = vrot.lane.b32.xlu0 %v13741_v57, %s10162_s25  ;;  %8309 = vrot.lane.b32.xlu1 %v13755_v45, %s10162_s25 }
 0x811   : > { %v13795_v42 = vpop.permute.xlu1 %8098  ;;  %v13797_v17 = vpop.permute.xlu0 %8096 }
 0x812   : > { %14910 = vst [vmem:[#allocation38_spill] sm:$0xff] %v13795_v42  ;;  %14911 = vst [vmem:[#allocation39_spill] sm:$0xff] %v13797_v17  ;;  %v7397_v42 = vpop.f32.mrf.mxu1 }
 0x813   : > { %8319 = vrot.lane.b32.xlu0 %v13741_v57, %s10155_s29  ;;  %8321 = vrot.lane.b32.xlu1 %v13755_v45, %s10155_s29 }
 0x815   : > { %v13803_v40 = vpop.permute.xlu1 %8281  ;;  %v13805_v47 = vpop.permute.xlu0 %8279 }
 0x816   : > { %14912 = vst [vmem:[#allocation40_spill] sm:$0xff] %v13803_v40  ;;  %14913 = vst [vmem:[#allocation41_spill] sm:$0xff] %v13805_v47  ;;  %v13820_v40 = vadd.f32 %v13388_v20, %v7397_v42 }
 0x817   : > { %8367 = vrot.lane.b32.xlu0 %v13741_v57, %s10166_s23  ;;  %8369 = vrot.lane.b32.xlu1 %v13755_v45, %s10166_s23 }
 0x818   : > { %14916 = vst [vmem:[#allocation44_spill] sm:$0xff] %v13820_v40 }
 0x819   : > { %v13811_v22 = vpop.permute.xlu1 %8293  ;;  %v13813_v17 = vpop.permute.xlu0 %8291 }
 0x81a   : > { %14914 = vst [vmem:[#allocation42_spill] sm:$0xff] %v13811_v22  ;;  %14915 = vst [vmem:[#allocation43_spill] sm:$0xff] %v13813_v17  ;;  %v13834_v22 = vcombine.high %v13820_v40, %v13820_v40 }
 0x81b   : > { %8379 = vrot.lane.b32.xlu0 %v13741_v57, %s10159_s22  ;;  %8381 = vrot.lane.b32.xlu1 %v13755_v45, %s10159_s22 }
 0x81c   : > { %14920 = vst [vmem:[#allocation48_spill] sm:$0xff] %v13834_v22 }
 0x81d   : > { %v13822_v47 = vpop.permute.xlu1 %8341  ;;  %v13824_v28 = vpop.permute.xlu0 %8339 }
 0x81e   : > { %14917 = vst [vmem:[#allocation45_spill] sm:$0xff] %v13822_v47  ;;  %14918 = vst [vmem:[#allocation46_spill] sm:$0xff] %v13824_v28 }
 0x81f   : > { %8415 = vrot.lane.b32.xlu0 %v13741_v57, %s10157_s16  ;;  %8417 = vrot.lane.b32.xlu1 %v13755_v45, %s10157_s16 }
 0x821   : > { %v13830_v17 = vpop.permute.xlu1 %8353  ;;  %v13836_v39 = vpop.permute.xlu0 %8351 }
 0x822   : > { %14919 = vst [vmem:[#allocation47_spill] sm:$0xff] %v13830_v17  ;;  %14921 = vst [vmem:[#allocation49_spill] sm:$0xff] %v13836_v39 }
 0x823   : > { %8012 = vrot.lane.b32.xlu0 %v13820_v40, %s10164_s27  ;;  %8014 = vrot.lane.b32.xlu1 %v13834_v22, %s10164_s27 }
 0x825   : > { %v13842_v20 = vpop.permute.xlu1 %8401  ;;  %v13844_v42 = vpop.permute.xlu0 %8399 }
 0x826   : > { %14922 = vst [vmem:[#allocation50_spill] sm:$0xff] %v13842_v20  ;;  %14923 = vst [vmem:[#allocation51_spill] sm:$0xff] %v13844_v42 }
 0x827   : > { %8060 = vrot.lane.b32.xlu0 %v13820_v40, %s10165_s28  ;;  %8062 = vrot.lane.b32.xlu1 %v13834_v22, %s10165_s28 }
 0x829   : > { %v13850_v28 = vpop.permute.xlu1 %7725  ;;  %v13852_v47 = vpop.permute.xlu0 %7428 }
 0x82b   : > { %8072 = vrot.lane.b32.xlu0 %v13820_v40, %s10158_s21  ;;  %8074 = vrot.lane.b32.xlu1 %v13834_v22, %s10158_s21  ;;  %s323_s21 = sand.u32 1, %s10142_s10  }
 0x82d   : > { %v13858_v39 = vpop.permute.xlu1 %7737  ;;  %v13860_v20 = vpop.permute.xlu0 %7479 }
 0x82f   : > { %8108 = vrot.lane.b32.xlu0 %v13820_v40, %s10156_s14  ;;  %8110 = vrot.lane.b32.xlu1 %v13834_v22, %s10156_s14  ;;  %s10169_s14 = smov 4  }
 0x831   : > { %v13866_v42 = vpop.permute.xlu1 %7785  ;;  %v13868_v17 = vpop.permute.xlu0 %7491 }
 0x832   : > { %14924 = vst [vmem:[#allocation52_spill] sm:$0xff] %v13866_v42 }
 0x833   : > { %8303 = vrot.lane.b32.xlu0 %v13820_v40, %s10162_s25  ;;  %8305 = vrot.lane.b32.xlu1 %v13834_v22, %s10162_s25  ;;  %s9827_s25 = smul.u32 768, %s10244_s13  ;;  %s9138_s13 = scalar_lea.sflag [#allocation4], %s323_s21 }
 0x835   : > { %v13874_v57 = vpop.permute.xlu1 %7797  ;;  %v13876_v45 = vpop.permute.xlu0 %7527 }
 0x836   : > { %14925 = vst [vmem:[#allocation53_spill] sm:$0xff] %v13874_v57  ;;  %14926 = vst [vmem:[#allocation54_spill] sm:$0xff] %v13876_v45 }
 0x837   : > { %8315 = vrot.lane.b32.xlu0 %v13820_v40, %s10155_s29  ;;  %8317 = vrot.lane.b32.xlu1 %v13834_v22, %s10155_s29  ;;  %s10168_s29 = smov 8  }
 0x839   : > { %v13882_v48 = vpop.permute.xlu1 %7833  ;;  %v7425_v36 = vpop.permute.xlu0 %7424 }
 0x83a   : > { %14927 = vst [vmem:[#allocation55_spill] sm:$0xff] %v13882_v48 }
 0x83b   : > { %8363 = vrot.lane.b32.xlu0 %v13820_v40, %s10166_s23  ;;  %8365 = vrot.lane.b32.xlu1 %v13834_v22, %s10166_s23  ;;  %s14702_s23 = scalar_lea.hbm %s14761_s9, %s9827_s25 }
 0x83d   : > { %v13888_v60 = vpop.permute.xlu1 %7430  ;;  %v7476_v49 = vpop.permute.xlu0 %7475 }
 0x83e   : > { %14928 = vst [vmem:[#allocation56_spill] sm:$0xff] %v13888_v60 }
 0x83f   : > { %8375 = vrot.lane.b32.xlu0 %v13820_v40, %s10159_s22  ;;  %8377 = vrot.lane.b32.xlu1 %v13834_v22, %s10159_s22  ;;  %s9826_s22 = smul.u32 48, %s323_s21 }
 0x841   : > { %v13894_v11 = vpop.permute.xlu1 %7481  ;;  %v7488_v23 = vpop.permute.xlu0 %7487  ;;  %s14669_s24 = scalar_lea.vmem [#allocation3], %s9826_s22 }
 0x842   : > { %14929 = vst [vmem:[#allocation57_spill] sm:$0xff] %v13894_v11  ;;  %s9151_s26 = sshll.u32 %s14669_s24, 4  ;;  %s14704_s26 = int_to_ptr.vmem [resolvable:$true] %s9151_s26 }
 0x843   : > { %8411 = vrot.lane.b32.xlu0 %v13820_v40, %s10157_s16  ;;  %8413 = vrot.lane.b32.xlu1 %v13834_v22, %s10157_s16  ;;  %v7537_v22 = vsel %vm7436_vm12, %v13536_v2, %v13560_v30  ;;  %v7501_v30 = vsel %vm7436_vm12, %v13544_v46, %v13552_v12  ;;  %v7499_v12 = vsel %vm7436_vm12, %v13576_v3, %v13584_v50  ;;  %s10170_s16 = smov 12  }
 0x844   : > { %v7541_v46 = vsel %vm7441_vm13, %v7537_v22, %v13591_v1  ;;  %v7748_v22 = vsel %vm7436_vm12, %v13603_v29, %v13611_v56  ;;  %v13978_v3 = vsel %vm7436_vm12, %v13628_v24, %v13636_v4  ;;  %v7536_v50 = vsel %vm7436_vm12, %v13656_v53, %v13680_v43 }
 0x845   : > { %v13900_v38 = vpop.permute.xlu1 %7493  ;;  %v13902_v25 = vpop.permute.xlu0 %7523  ;;  %v7746_v29 = vsel %vm7436_vm12, %v13650_v5, %v13658_v44  ;;  %v7500_v24 = vsel %vm7436_vm12, %v13664_v6, %v13672_v34  ;;  %v14937_v43 = vld [vmem:[#allocation56_spill] sm:$0xff] }
 0x846   : > { %14930 = vst [vmem:[#allocation58_spill] sm:$0xff] %v13900_v38  ;;  %v7439_v38 = vsel %vm7436_vm12, %v13391_v63, %v13536_v2  ;;  %v7538_v63 = vsel %vm7436_vm12, %v13574_v15, %v13601_v35  ;;  %v10167_v2 = vmov 1934713408   ;;  %v7841_v35 = vsel %vm7436_vm12, %v13617_v9, %v13648_v26 }
 0x849   : > { %v13904_v7 = vpop.permute.xlu1 %7529  ;;  %v13906_v57 = vpop.permute.xlu0 %7727 }
 0x84a   : > { %14931 = vst [vmem:[#allocation59_spill] sm:$0xff] %v13904_v7 }
 0x84d   : > { %v7722_v48 = vpop.permute.xlu1 %7721  ;;  %v13908_v45 = vpop.permute.xlu0 %7739 }
 0x851   : > { %v13910_v42 = vpop.permute.xlu1 %7733  ;;  %v13912_v11 = vpop.permute.xlu0 %7787 }
 0x852   : > { %14932 = vst [vmem:[#allocation60_spill] sm:$0xff] %v13912_v11  ;;  %v7747_v11 = vsel %vm7436_vm12, %v13534_v52, %v13542_v51  ;;  %v7566_v52 = vunpack.c.l.s4 %v10167_v2 }
 0x855   : > { %v13914_v60 = vpop.permute.xlu1 %7781  ;;  %v13916_v40 = vpop.permute.xlu0 %7799 }
 0x856   : > { %14933 = vst [vmem:[#allocation61_spill] sm:$0xff] %v13914_v60  ;;  %14934 = vst [vmem:[#allocation62_spill] sm:$0xff] %v13916_v40  ;;  %v7535_v60 = vsel %vm7436_vm12, %v13568_v59, %v13595_v8  ;;  %v7843_v8 = vsel %vm7436_vm12, %v13542_v51, %v13566_v61  ;;  %v7502_v51 = vsel %vm7436_vm12, %v13582_v54, %v13593_v32  ;;  %v7567_v32 = vunpack.c.0.s8 %v7566_v52 }
 0x857   : > { %v7808_v61 = vsel %vm7436_vm12, %v13619_v0, %v13630_v62  ;;  %v7844_v54 = vsel %vm7436_vm12, %v13611_v56, %v13642_v37  ;;  %v7444_v56 = vsel %vm7441_vm13, %v7439_v38, %v13852_v47  ;;  %v7806_v0 = vsel %vm7436_vm12, %v13666_v33, %v13674_v10 }
 0x858   : > { %v7503_v62 = vsel %vm7441_vm13, %v7499_v12, %v7476_v49  ;;  %v7751_v37 = vsel %vm7441_vm13, %v7747_v11, %v13850_v28  ;;  %v14015_v6 = vsel %vm7446_vm14, %v7444_v56, %v13591_v1  ;;  %v7505_v49 = vsel %vm7441_vm13, %v7501_v30, %v13860_v20  ;;  %v14938_v28 = vld [vmem:[#allocation52_spill] sm:$0xff]  ;;  %v14939_v20 = vld [vmem:[#allocation54_spill] sm:$0xff]  ;;  %v14941_v12 = vld [vmem:[#allocation7_spill] sm:$0xff] }
 0x859   : > { %v13921_v7 = vpop.permute.xlu1 %7793  ;;  %v13932_v40 = vpop.permute.xlu0 %7835  ;;  %v7507_v26 = vsel %vm7446_vm14, %v7503_v62, %v7488_v23  ;;  %v7755_v33 = vsel %vm7446_vm14, %v7751_v37, %v13858_v39  ;;  %v7509_v11 = vsel %vm7446_vm14, %v7505_v49, %v13868_v17  ;;  %v7847_v17 = vsel %vm7441_vm13, %v7843_v8, %v13858_v39 }
 0x85a   : > { %14935 = vst [vmem:[#allocation63_spill] sm:$0xff] %v13921_v7  ;;  %14936 = vst [vmem:[#allocation64_spill] sm:$0xff] %v13932_v40  ;;  %v7807_v7 = vsel %vm7436_vm12, %v13550_v58, %v13558_v27  ;;  %v7437_v40 = vsel %vm7436_vm12, %v13410_v55, %v13568_v59  ;;  %v7440_v58 = vsel %vm7436_vm12, %v13418_v19, %v13574_v15 }
 0x85b   : > { %v7539_v27 = vsel %vm7441_vm13, %v7535_v60, %v13626_v16  ;;  %v7745_v19 = vsel %vm7436_vm12, %v13609_v31, %v13617_v9  ;;  %v7542_v59 = vsel %vm7441_vm13, %v7538_v63, %v13640_v14  ;;  %v7438_v31 = vsel %vm7436_vm12, %v13454_v41, %v13656_v53  ;;  %v14940_v63 = vld [vmem:[#allocation55_spill] sm:$0xff] }
 0x85c   : > { %v7442_v9 = vsel %vm7441_vm13, %v7437_v40, %v7425_v36  ;;  %v7842_v41 = vsel %vm7436_vm12, %v13658_v44, %v13682_v18  ;;  %v7540_v53 = vsel %vm7441_vm13, %v7536_v50, %v13708_v21  ;;  %v14022_v44 = vsub.s32 %v7567_v32, %v14878_v13  ;;  %v14943_v32 = vld [vmem:[#allocation58_spill] sm:$0xff] }
 0x85d   : > { %v13962_v55 = vpop.permute.xlu1 %7829  ;;  %v7724_v15 = vpop.permute.xlu0 %7723  ;;  %v14028_v34 = vsel %vm7446_vm14, %v7442_v9, %v13626_v16  ;;  %v7749_v10 = vsel %vm7441_vm13, %v7745_v19, %v7722_v48  ;;  %v7445_v18 = vsel %vm7441_vm13, %v7440_v58, %v14937_v43  ;;  %v7599_v38 = vcombine.low %v7507_v26, %v7509_v11  ;;  %v14946_v49 = vld [vmem:[#allocation62_spill] sm:$0xff] }
 0x85e   : > { %v7750_v1 = vsel %vm7441_vm13, %v7746_v29, %v7724_v15  ;;  %v7753_v23 = vsel %vm7446_vm14, %v7749_v10, %v13910_v42  ;;  %v7811_v16 = vsel %vm7441_vm13, %v7807_v7, %v14938_v28  ;;  %v7752_v48 = vsel %vm7441_vm13, %v7748_v22, %v13906_v57 }
 0x85f   : > { %v7545_v30 = vsel %vm7446_vm14, %v7541_v46, %v14939_v20  ;;  %v7851_v2 = vsel %vm7446_vm14, %v7847_v17, %v14940_v63  ;;  %v7543_v52 = vsel %vm7446_vm14, %v7539_v27, %v13902_v25  ;;  %v7756_v39 = vsel %vm7446_vm14, %v7752_v48, %v13908_v45  ;;  %v14942_v46 = vld [vmem:[#allocation57_spill] sm:$0xff] }
 0x860   : > { %v7547_v7 = vcombine.low %v14028_v34, %v14015_v6  ;;  %v7450_v57 = vsel %vm7446_vm14, %v7445_v18, %v13640_v14  ;;  %v7853_v8 = vcombine.low %v7753_v23, %v7755_v33  ;;  %v14057_v22 = vrot.slane %v7599_v38, %v14941_v12 }
 0x861   : > { %v7427_v4 = vpop.permute.xlu1 %7426  ;;  %v7736_v5 = vpop.permute.xlu0 %7735  ;;  %v7506_v19 = vsel %vm7441_vm13, %v7502_v51, %v14942_v46  ;;  %v7648_v50 = vcombine.low %v7543_v52, %v7545_v30  ;;  %v7848_v62 = vsel %vm7441_vm13, %v7844_v54, %v13908_v45  ;;  %v14945_v51 = vld [vmem:[#allocation60_spill] sm:$0xff]  ;;  %v14947_v54 = vld [vmem:[#allocation61_spill] sm:$0xff] }
 0x862   : > { %v7754_v36 = vsel %vm7446_vm14, %v7750_v1, %v7736_v5  ;;  %v7443_v47 = vsel %vm7441_vm13, %v7438_v31, %v7427_v4  ;;  %v7510_v29 = vsel %vm7446_vm14, %v7506_v19, %v14943_v32  ;;  %v14944_v31 = vld [vmem:[#allocation59_spill] sm:$0xff]  ;;  %v7812_v4 = vsel %vm7441_vm13, %v7808_v61, %v14945_v51  ;;  %v14948_v11 = vld [vmem:[#allocation64_spill] sm:$0xff] }
 0x863   : > { %v7861_v58 = vcombine.low %v7754_v36, %v7756_v39  ;;  %v7448_v25 = vsel %vm7446_vm14, %v7443_v47, %v13708_v21  ;;  %v7546_v14 = vsel %vm7446_vm14, %v7542_v59, %v14944_v31  ;;  %v7845_v21 = vsel %vm7441_vm13, %v7841_v35, %v13910_v42 }
 0x864   : > { %v14076_v37 = vrot.slane %v7853_v8, %v14941_v12  ;;  %v7849_v26 = vsel %vm7446_vm14, %v7845_v21, %v13962_v55  ;;  %v7555_v6 = vcombine.low %v7448_v25, %v7450_v57  ;;  %v7816_v45 = vsel %vm7446_vm14, %v7812_v4, %v14946_v49 }
 0x865   : > { %v7478_v60 = vpop.permute.xlu1 %7477  ;;  %v7784_v40 = vpop.permute.xlu0 %7783  ;;  %v14081_v59 = vrot.slane %v7861_v58, %v14941_v12  ;;  %v7809_v61 = vsel %vm7441_vm13, %v13978_v3, %v14947_v54  ;;  %v7852_v34 = vsel %vm7446_vm14, %v7848_v62, %v14948_v11  ;;  %v7846_v55 = vsel %vm7441_vm13, %v7842_v41, %v7736_v5 }
 0x866   : > { %v7504_v27 = vsel %vm7441_vm13, %v7500_v24, %v7478_v60  ;;  %v7810_v42 = vsel %vm7441_vm13, %v7806_v0, %v7784_v40  ;;  %v7951_v18 = vcombine.low %v7849_v26, %v7851_v2  ;;  %v14949_v0 = vld [vmem:[#allocation63_spill] sm:$0xff]  ;;  %v7562_v17 = vrot.slane %v7555_v6, %v14941_v12  ;;  %v14950_v40 = vld [vmem:[#allocation53_spill] sm:$0xff] }
 0x867   : > { %v7813_v36 = vsel %vm7446_vm14, %v7809_v61, %v14949_v0  ;;  %v7870_v60 = vcombine.high %v14076_v37, %v14081_v59  ;;  %v7655_v5 = vrot.slane %v7648_v50, %v14941_v12  ;;  %v7815_v20 = vsel %vm7446_vm14, %v7811_v16, %v14950_v40 }
 0x868   : > { %v7554_v30 = vrot.slane %v7547_v7, %v14941_v12  ;;  %v7902_v52 = vcombine.low %v7813_v36, %v7815_v20  ;;  %v7958_v39 = vrot.slane %v7951_v18, %v14941_v12  ;;  %v14951_v21 = vmov 0.0   ;;  %v14952_v20 = vld [vmem:[#allocation22_spill] sm:$0xff] }
 0x869   : > { %v7490_v15 = vpop.permute.xlu1 %7489  ;;  %v7796_v56 = vpop.permute.xlu0 %7795  ;;  %v7884_v58 = vrot.slane %v7870_v60, %v14022_v44  ;;  %v7869_v6 = vcombine.low %v14076_v37, %v14081_v59 }
 0x86a   : > { %v7508_v9 = vsel %vm7446_vm14, %v7504_v27, %v7490_v15  ;;  %v7814_v10 = vsel %vm7446_vm14, %v7810_v42, %v7796_v56  ;;  %v7564_v8 = vcombine.high %v7554_v30, %v7562_v17  ;;  %v7909_v15 = vrot.slane %v7902_v52, %v14941_v12  ;;  %v14954_v52 = vld [vmem:[#allocation10_spill] sm:$0xff] }
 0x86b   : > { %v7607_v24 = vcombine.low %v7508_v9, %v7510_v29  ;;  %v7910_v28 = vcombine.low %v7814_v10, %v7816_v45  ;;  %v7563_v62 = vcombine.low %v7554_v30, %v7562_v17  ;;  %v7886_v0 = vcombine.high %v7884_v58, %v14951_v21  ;;  %v14953_v30 = vld [vmem:[#allocation20_spill] sm:$0xff] }
 0x86c   : > { %v7578_v50 = vrot.slane %v7564_v8, %v14022_v44  ;;  %v14956_v8 = vld [vmem:[#allocation23_spill] sm:$0xff] }
 0x86d   : > { %v7614_v35 = vrot.slane %v7607_v24, %v14941_v12  ;;  %v7526_v33 = vpop.permute.xlu1 %7525  ;;  %v7832_v1 = vpop.permute.xlu0 %7831  ;;  %v7917_v46 = vrot.slane %v7910_v28, %v14941_v12  ;;  %v14157_v61 = vrot.slane %v7563_v62, %v14022_v44  ;;  %v14962_v62 = vld [vmem:[#allocation32_spill] sm:$0xff] }
 0x86e   : > { %v7544_v43 = vsel %vm7446_vm14, %v7540_v53, %v7526_v33  ;;  %v7850_v3 = vsel %vm7446_vm14, %v7846_v55, %v7832_v1  ;;  %v7580_v18 = vcombine.high %v7578_v50, %v14951_v21 }
 0x86f   : > { %v7616_v38 = vcombine.high %v14057_v22, %v7614_v35  ;;  %v7656_v23 = vcombine.low %v7544_v43, %v7546_v14  ;;  %v7959_v41 = vcombine.low %v7850_v3, %v7852_v34  ;;  %v7919_v32 = vcombine.high %v7909_v15, %v7917_v46 }
 0x870   : > { %v7615_v29 = vcombine.low %v14057_v22, %v7614_v35  ;;  %v14164_v35 = vrot.slane %v7869_v6, %v14022_v44  ;;  %v7918_v37 = vcombine.low %v7909_v15, %v7917_v46  ;;  %v7579_v11 = vcombine.high %v14157_v61, %v14951_v21  ;;  %v14957_v46 = vld [vmem:[#allocation11_spill] sm:$0xff]  ;;  %v14959_v15 = vld [vmem:[#allocation24_spill] sm:$0xff] }
 0x871   : > { %v7663_v53 = vrot.slane %v7656_v23, %v14941_v12  ;;  %v14104_v48 = vpop.permute.xlu1 %8018  ;;  %v7630_v47 = vrot.slane %v7616_v38, %v14022_v44  ;;  %v7966_v63 = vrot.slane %v7959_v41, %v14941_v12  ;;  %v14111_v2 = vpop.permute.xlu0 %8016  ;;  %v7933_v22 = vrot.slane %v7919_v32, %v14022_v44  ;;  %v14964_v6 = vld [vmem:[#allocation28_spill] sm:$0xff] }
 0x872   : > { %v14138_v51 = vrot.slane %v7615_v29, %v14022_v44  ;;  %v14176_v55 = vrot.slane %v7918_v37, %v14022_v44  ;;  %v7885_v43 = vcombine.high %v14164_v35, %v14951_v21  ;;  %v14961_v29 = vld [vmem:[#allocation12_spill] sm:$0xff]  ;;  %v14965_v37 = vld [vmem:[#allocation33_spill] sm:$0xff] }
 0x873   : > { %v7665_v57 = vcombine.high %v7655_v5, %v7663_v53  ;;  %7638 = vrot.lane.b32.xlu0 %v7630_v47, %s10168_s29  ;;  %v7968_v19 = vcombine.high %v7958_v39, %v7966_v63  ;;  %v7664_v16 = vcombine.low %v7655_v5, %v7663_v53  ;;  %v7632_v33 = vcombine.high %v7630_v47, %v14951_v21 }
 0x874   : > { %v7631_v45 = vcombine.high %v14138_v51, %v14951_v21  ;;  %v7967_v10 = vcombine.low %v7958_v39, %v7966_v63  ;;  %v7934_v36 = vcombine.high %v14176_v55, %v14951_v21  ;;  %v7935_v5 = vcombine.high %v7933_v22, %v14951_v21  ;;  %v14955_v39 = vld [vmem:[#allocation9_spill] sm:$0xff] }
 0x875   : > { %v14117_v25 = vpop.permute.xlu1 %8066  ;;  %v7679_v7 = vrot.slane %v7665_v57, %v14022_v44  ;;  %v14120_v27 = vpop.permute.xlu0 %8064  ;;  %v14128_v31 = vrot.slane %v7664_v16, %v14022_v44  ;;  %v7982_v56 = vrot.slane %v7968_v19, %v14022_v44  ;;  %v8123_v63 = vsel %vm7436_vm12, %v14953_v30, %v14952_v20  ;;  %v14958_v19 = vld [vmem:[#allocation19_spill] sm:$0xff] }
 0x876   : > { %v14188_v3 = vrot.slane %v7967_v10, %v14022_v44  ;;  %v8026_v57 = vsel %vm7436_vm12, %v14955_v39, %v14954_v52  ;;  %v8087_v16 = vsel %vm7436_vm12, %v14958_v19, %v14957_v46  ;;  %v14967_v10 = vld [vmem:[#allocation37_spill] sm:$0xff]  ;;  %v14972_v20 = vld [vmem:[#allocation39_spill] sm:$0xff] }
 0x877   : > { %7892 = vrot.lane.b32.xlu0 %v7884_v58, %s10168_s29  ;;  %7687 = vrot.lane.b32.xlu1 %v7679_v7, %s10168_s29  ;;  %v7680_v24 = vcombine.high %v14128_v31, %v14951_v21  ;;  %v7681_v54 = vcombine.high %v7679_v7, %v14951_v21  ;;  %v7984_v47 = vcombine.high %v7982_v56, %v14951_v21 }
 0x878   : > { %v7983_v41 = vcombine.high %v14188_v3, %v14951_v21  ;;  %v8027_v58 = vsel %vm7436_vm12, %v14956_v8, %v14953_v30  ;;  %v8120_v30 = vsel %vm7436_vm12, %v14965_v37, %v14972_v20  ;;  %v8030_v8 = vsel %vm7441_vm13, %v8026_v57, %v14111_v2  ;;  %v14973_v57 = vld [vmem:[#allocation44_spill] sm:$0xff] }
 0x879   : > { %v14130_v14 = vpop.permute.xlu1 %8078  ;;  %v14133_v9 = vpop.permute.xlu0 %8076  ;;  %v8091_v19 = vsel %vm7441_vm13, %v8087_v16, %v14117_v25 }
 0x87b   : > { %7990 = vrot.lane.b32.xlu0 %v7982_v56, %s10168_s29  ;;  %7586 = vrot.lane.b32.xlu1 %v7578_v50, %s10168_s29  ;;  %v14960_v50 = vld [vmem:[#allocation15_spill] sm:$0xff]  ;;  %v8122_v56 = vsel %vm7436_vm12, %v14954_v52, %v14961_v29 }
 0x87c   : > { %v8086_v32 = vsel %vm7436_vm12, %v14960_v50, %v14959_v15 }
 0x87d   : > { %v14140_v4 = vpop.permute.xlu1 %8114  ;;  %v14145_v26 = vpop.permute.xlu0 %8112  ;;  %v8090_v46 = vsel %vm7441_vm13, %v8086_v32, %v14120_v27  ;;  %v14975_v32 = vld [vmem:[#allocation25_spill] sm:$0xff] }
 0x87e   : > { %v8094_v29 = vsel %vm7446_vm14, %v8090_v46, %v14133_v9  ;;  %v8126_v9 = vsel %vm7441_vm13, %v8122_v56, %v14975_v32 }
 0x87f   : > { %7941 = vrot.lane.b32.xlu1 %v7933_v22, %s10168_s29  ;;  %7683 = vrot.lane.b32.xlu0 %v7680_v24, %s10169_s14  ;;  %v14963_v22 = vld [vmem:[#allocation21_spill] sm:$0xff] }
 0x880   : > { %v8025_v24 = vsel %vm7436_vm12, %v14963_v22, %v14962_v62 }
 0x881   : > { %v14151_v49 = vpop.permute.xlu1 %8309  ;;  %v14159_v42 = vpop.permute.xlu0 %8307 }
 0x883   : > { %7634 = vrot.lane.b32.xlu1 %v7631_v45, %s10169_s14  ;;  %7691 = vrot.lane.b32.xlu0 %v7681_v54, %s10170_s16  ;;  %v8127_v45 = vsel %vm7441_vm13, %v8123_v63, %v14964_v6  ;;  %v8031_v63 = vsel %vm7441_vm13, %v8027_v58, %v14104_v48  ;;  %v8095_v48 = vsel %vm7446_vm14, %v8091_v19, %v14130_v14  ;;  %v14974_v58 = vld [vmem:[#allocation48_spill] sm:$0xff]  ;;  %v14978_v19 = vld [vmem:[#allocation18_spill] sm:$0xff] }
 0x884   : > { %v8124_v14 = vsel %vm7441_vm13, %v8120_v30, %v14973_v57 }
 0x885   : > { %v14166_v59 = vpop.permute.xlu1 %8321  ;;  %v14171_v34 = vpop.permute.xlu0 %8319 }
 0x887   : > { %7642 = vrot.lane.b32.xlu1 %v7632_v33, %s10170_s16  ;;  %7582 = vrot.lane.b32.xlu0 %v7579_v11, %s10169_s14  ;;  %v14966_v33 = vld [vmem:[#allocation16_spill] sm:$0xff] }
 0x888   : > { %v8024_v11 = vsel %vm7436_vm12, %v14966_v33, %v14965_v37  ;;  %v8131_v37 = vsel %vm7446_vm14, %v8127_v45, %v14140_v4 }
 0x889   : > { %v14178_v1 = vpop.permute.xlu1 %8369  ;;  %v14183_v38 = vpop.permute.xlu0 %8367 }
 0x88b   : > { %7888 = vrot.lane.b32.xlu1 %v7885_v43, %s10169_s14  ;;  %7590 = vrot.lane.b32.xlu0 %v7580_v18, %s10170_s16  ;;  %v14968_v43 = vld [vmem:[#allocation35_spill] sm:$0xff] }
 0x88c   : > { %v8084_v18 = vsel %vm7436_vm12, %v14968_v43, %v14967_v10 }
 0x88d   : > { %v14190_v23 = vpop.permute.xlu1 %8381  ;;  %v14195_v60 = vpop.permute.xlu0 %8379 }
 0x88f   : > { %7896 = vrot.lane.b32.xlu1 %v7886_v0, %s10170_s16  ;;  %7937 = vrot.lane.b32.xlu0 %v7934_v36, %s10169_s14  ;;  %v14969_v0 = vld [vmem:[#allocation36_spill] sm:$0xff]  ;;  %v14970_v36 = vld [vmem:[#allocation34_spill] sm:$0xff] }
 0x891   : > { %v14199_v17 = vpop.permute.xlu1 %8417  ;;  %v14204_v28 = vpop.permute.xlu0 %8415 }
 0x893   : > { %7986 = vrot.lane.b32.xlu1 %v7983_v41, %s10169_s14  ;;  %7945 = vrot.lane.b32.xlu0 %v7935_v5, %s10170_s16  ;;  %v8085_v41 = vsel %vm7436_vm12, %v14970_v36, %v14969_v0  ;;  %v14971_v5 = vld [vmem:[#allocation38_spill] sm:$0xff]  ;;  %v8130_v36 = vsel %vm7446_vm14, %v8126_v9, %v14145_v26 }
 0x895   : > { %v8015_v53 = vpop.permute.xlu1 %8014  ;;  %v8013_v40 = vpop.permute.xlu0 %8012 }
 0x896   : > { %v8028_v52 = vsel %vm7441_vm13, %v8024_v11, %v8013_v40  ;;  %v8029_v39 = vsel %vm7441_vm13, %v8025_v24, %v8015_v53  ;;  %v8034_v24 = vsel %vm7446_vm14, %v8030_v8, %v14975_v32  ;;  %v14977_v8 = vld [vmem:[#allocation13_spill] sm:$0xff] }
 0x897   : > { %7994 = vrot.lane.b32.xlu1 %v7984_v47, %s10170_s16  ;;  %v8121_v47 = vsel %vm7436_vm12, %v14962_v62, %v14971_v5  ;;  %v8032_v27 = vsel %vm7446_vm14, %v8028_v52, %v14973_v57  ;;  %v8033_v25 = vsel %vm7446_vm14, %v8029_v39, %v14974_v58  ;;  %v14976_v39 = vld [vmem:[#allocation14_spill] sm:$0xff]  ;;  %v14982_v57 = vld [vmem:[#allocation43_spill] sm:$0xff] }
 0x898   : > { %v8125_v22 = vsel %vm7441_vm13, %v8121_v47, %v14974_v58  ;;  %v8132_v11 = vcombine.low %v8032_v27, %v8034_v24  ;;  %v8330_v46 = vsel %vm7436_vm12, %v14977_v8, %v14976_v39  ;;  %v14983_v27 = vld [vmem:[#allocation41_spill] sm:$0xff] }
 0x899   : > { %v8063_v7 = vpop.permute.xlu1 %8062  ;;  %v8061_v54 = vpop.permute.xlu0 %8060  ;;  %v8327_v58 = vsel %vm7436_vm12, %v14983_v27, %v14982_v57  ;;  %v14989_v8 = vld [vmem:[#allocation45_spill] sm:$0xff] }
 0x89a   : > { %v8089_v15 = vsel %vm7441_vm13, %v8085_v41, %v8063_v7  ;;  %v8088_v53 = vsel %vm7441_vm13, %v8084_v18, %v8061_v54  ;;  %v8035_v54 = vsel %vm7446_vm14, %v8031_v63, %v14964_v6  ;;  %v14298_v20 = vrot.slane %v8132_v11, %v14941_v12 }
 0x89b   : > { %v8140_v10 = vcombine.low %v8033_v25, %v8035_v54 }
 0x89d   : > { %v8075_v50 = vpop.permute.xlu1 %8074  ;;  %v8073_v40 = vpop.permute.xlu0 %8072  ;;  %v14301_v30 = vrot.slane %v8140_v10, %v14941_v12 }
 0x89e   : > { %v8093_v2 = vsel %vm7446_vm14, %v8089_v15, %v8075_v50  ;;  %v8092_v16 = vsel %vm7446_vm14, %v8088_v53, %v8073_v40  ;;  %v14979_v15 = vld [vmem:[#allocation17_spill] sm:$0xff]  ;;  %v8334_v40 = vsel %vm7441_vm13, %v8330_v46, %v14151_v49 }
 0x89f   : > { %v8189_v7 = vcombine.low %v8093_v2, %v8095_v48  ;;  %v8181_v62 = vcombine.low %v8092_v16, %v8094_v29  ;;  %v8329_v50 = vsel %vm7436_vm12, %v14979_v15, %v14978_v19  ;;  %v14980_v29 = vld [vmem:[#allocation42_spill] sm:$0xff]  ;;  %v14981_v48 = vld [vmem:[#allocation40_spill] sm:$0xff]  ;;  %v8338_v16 = vsel %vm7446_vm14, %v8334_v40, %v14166_v59 }
 0x8a0   : > { %v8328_v53 = vsel %vm7436_vm12, %v14981_v48, %v14980_v29  ;;  %v8333_v25 = vsel %vm7441_vm13, %v8329_v50, %v14159_v42  ;;  %v8149_v49 = vcombine.high %v14298_v20, %v14301_v30  ;;  %v14990_v50 = vld [vmem:[#allocation49_spill] sm:$0xff]  ;;  %v14991_v48 = vld [vmem:[#allocation46_spill] sm:$0xff] }
 0x8a1   : > { %v14283_v33 = vrot.slane %v8189_v7, %v14941_v12  ;;  %v8111_v56 = vpop.permute.xlu1 %8110  ;;  %v14286_v43 = vrot.slane %v8181_v62, %v14941_v12  ;;  %v8109_v18 = vpop.permute.xlu0 %8108  ;;  %v8337_v24 = vsel %vm7446_vm14, %v8333_v25, %v14171_v34 }
 0x8a2   : > { %v8129_v0 = vsel %vm7446_vm14, %v8125_v22, %v8111_v56  ;;  %v8128_v6 = vsel %vm7446_vm14, %v8124_v14, %v8109_v18 }
 0x8a3   : > { %v8238_v41 = vcombine.low %v8129_v0, %v8131_v37  ;;  %v8198_v4 = vcombine.high %v14286_v43, %v14283_v33  ;;  %v8230_v45 = vcombine.low %v8128_v6, %v8130_v36  ;;  %v14348_v0 = vrot.slane %v8149_v49, %v14022_v44  ;;  %v14984_v36 = vld [vmem:[#allocation29_spill] sm:$0xff]  ;;  %v14985_v6 = vld [vmem:[#allocation26_spill] sm:$0xff] }
 0x8a5   : > { %v14295_v5 = vrot.slane %v8238_v41, %v14941_v12  ;;  %v8306_v47 = vpop.permute.xlu1 %8305  ;;  %v14304_v63 = vrot.slane %v8230_v45, %v14941_v12  ;;  %v8304_v26 = vpop.permute.xlu0 %8303  ;;  %v14307_v52 = vrot.slane %v8198_v4, %v14022_v44  ;;  %v8389_v41 = vsel %vm7436_vm12, %v14985_v6, %v14984_v36  ;;  %v14986_v4 = vld [vmem:[#allocation27_spill] sm:$0xff]  ;;  %v14987_v45 = vld [vmem:[#allocation6_spill] sm:$0xff] }
 0x8a6   : > { %v8332_v7 = vsel %vm7441_vm13, %v8328_v53, %v8306_v47  ;;  %v8331_v9 = vsel %vm7441_vm13, %v8327_v58, %v8304_v26  ;;  %v8390_v47 = vsel %vm7436_vm12, %v14987_v45, %v14986_v4  ;;  %v14988_v26 = vld [vmem:[#allocation47_spill] sm:$0xff]  ;;  %v8387_v53 = vsel %vm7436_vm12, %v14991_v48, %v14990_v50 }
 0x8a7   : > { %v8247_v2 = vcombine.high %v14304_v63, %v14295_v5  ;;  %8220 = vrot.lane.b32.xlu0 %v14307_v52, %s10168_s29  ;;  %v8388_v46 = vsel %vm7436_vm12, %v14989_v8, %v14988_v26  ;;  %v8393_v40 = vsel %vm7441_vm13, %v8389_v41, %v14183_v38 }
 0x8a9   : > { %v8318_v32 = vpop.permute.xlu1 %8317  ;;  %v8316_v62 = vpop.permute.xlu0 %8315  ;;  %v8261_v22 = vrot.slane %v8247_v2, %v14022_v44  ;;  %v8394_v2 = vsel %vm7441_vm13, %v8390_v47, %v14178_v1  ;;  %v8397_v1 = vsel %vm7446_vm14, %v8393_v40, %v14195_v60 }
 0x8aa   : > { %v8336_v14 = vsel %vm7446_vm14, %v8332_v7, %v8318_v32  ;;  %v8335_v42 = vsel %vm7446_vm14, %v8331_v9, %v8316_v62  ;;  %v8398_v25 = vsel %vm7446_vm14, %v8394_v2, %v14190_v23 }
 0x8ab   : > { %v8443_v54 = vcombine.low %v8336_v14, %v8338_v16  ;;  %v8435_v37 = vcombine.low %v8335_v42, %v8337_v24  ;;  %8269 = vrot.lane.b32.xlu1 %v8261_v22, %s10168_s29  ;;  %v14992_v14 = vld [vmem:[#allocation30_spill] sm:$0xff]  ;;  %v8263_v2 = vcombine.high %v8261_v22, %v14951_v21 }
 0x8ac   : > { %v8426_v38 = vsel %vm7436_vm12, %v14976_v39, %v14992_v14 }
 0x8ad   : > { %v14342_v56 = vrot.slane %v8443_v54, %v14941_v12  ;;  %v8366_v11 = vpop.permute.xlu1 %8365  ;;  %v14345_v10 = vrot.slane %v8435_v37, %v14941_v12  ;;  %v8364_v18 = vpop.permute.xlu0 %8363  ;;  %v14993_v54 = vld [vmem:[#allocation31_spill] sm:$0xff]  ;;  %v8430_v39 = vsel %vm7441_vm13, %v8426_v38, %v14166_v59 }
 0x8ae   : > { %v8392_v27 = vsel %vm7441_vm13, %v8388_v46, %v8366_v11  ;;  %v8391_v16 = vsel %vm7441_vm13, %v8387_v53, %v8364_v18  ;;  %v8425_v23 = vsel %vm7436_vm12, %v14978_v19, %v14993_v54  ;;  %v14994_v37 = vld [vmem:[#allocation51_spill] sm:$0xff]  ;;  %v14995_v18 = vld [vmem:[#allocation50_spill] sm:$0xff] }
 0x8af   : > { %v8452_v15 = vcombine.high %v14345_v10, %v14342_v56  ;;  %8171 = vrot.lane.b32.xlu1 %v14348_v0, %s10168_s29  ;;  %v8423_v11 = vsel %vm7436_vm12, %v14982_v57, %v14994_v37  ;;  %v8424_v36 = vsel %vm7436_vm12, %v14980_v29, %v14995_v18  ;;  %v8429_v60 = vsel %vm7441_vm13, %v8425_v23, %v14171_v34 }
 0x8b0   : > { %v8428_v41 = vsel %vm7441_vm13, %v8424_v36, %v8318_v32  ;;  %v8434_v57 = vsel %vm7446_vm14, %v8430_v39, %v14199_v17  ;;  %v8427_v45 = vsel %vm7441_vm13, %v8423_v11, %v8316_v62  ;;  %v8433_v34 = vsel %vm7446_vm14, %v8429_v60, %v14204_v28 }
 0x8b1   : > { %v8378_v58 = vpop.permute.xlu1 %8377  ;;  %v8376_v7 = vpop.permute.xlu0 %8375  ;;  %v8466_v9 = vrot.slane %v8452_v15, %v14022_v44  ;;  %v8197_v15 = vcombine.low %v14286_v43, %v14283_v33  ;;  %v8246_v62 = vcombine.low %v14304_v63, %v14295_v5  ;;  %v8148_v28 = vcombine.low %v14298_v20, %v14301_v30 }
 0x8b2   : > { %v8396_v49 = vsel %vm7446_vm14, %v8392_v27, %v8378_v58  ;;  %v8395_v24 = vsel %vm7446_vm14, %v8391_v16, %v8376_v7  ;;  %v8451_v20 = vcombine.low %v14345_v10, %v14342_v56  ;;  %v8165_v16 = vcombine.high %v14348_v0, %v14951_v21 }
 0x8b3   : > { %v8492_v42 = vcombine.low %v8396_v49, %v8398_v25  ;;  %v8484_v6 = vcombine.low %v8395_v24, %v8397_v1  ;;  %8474 = vrot.lane.b32.xlu0 %v8466_v9, %s10168_s29  ;;  %v14417_v40 = vrot.slane %v8197_v15, %v14022_v44  ;;  %v14420_v33 = vrot.slane %v8246_v62, %v14022_v44  ;;  %v14996_v62 = vld [vmem:[#allocation8_spill] sm:$0xff] }
 0x8b4   : > { %v14441_v27 = vrot.slane %v8451_v20, %v14022_v44  ;;  %v8468_v49 = vcombine.high %v8466_v9, %v14951_v21  ;;  %v8214_v0 = vcombine.high %v14307_v52, %v14951_v21 }
 0x8b5   : > { %v8499_v19 = vrot.slane %v8492_v42, %v14941_v12  ;;  %v8414_v4 = vpop.permute.xlu1 %8413  ;;  %v8491_v29 = vrot.slane %v8484_v6, %v14941_v12  ;;  %v8412_v47 = vpop.permute.xlu0 %8411  ;;  %v8213_v63 = vcombine.high %v14417_v40, %v14951_v21  ;;  %v8262_v22 = vcombine.high %v14420_v33, %v14951_v21 }
 0x8b6   : > { %v8432_v26 = vsel %vm7446_vm14, %v8428_v41, %v8414_v4  ;;  %v8431_v59 = vsel %vm7446_vm14, %v8427_v45, %v8412_v47  ;;  %v8467_v7 = vcombine.high %v14441_v27, %v14951_v21  ;;  %v10171_v6 = vmov 1966171168  }
 0x8b7   : > { %v8541_v8 = vcombine.low %v8432_v26, %v8434_v57  ;;  %v8501_v32 = vcombine.high %v8491_v29, %v8499_v19  ;;  %v8533_v46 = vcombine.low %v8431_v59, %v8433_v34  ;;  %v8500_v43 = vcombine.low %v8491_v29, %v8499_v19 }
 0x8b8   : > { %v8586_v52 = vunpack.c.l.s4 %v10171_v6 }
 0x8b9   : > { %v8548_v17 = vrot.slane %v8541_v8, %v14941_v12  ;;  %v8540_v50 = vrot.slane %v8533_v46, %v14941_v12  ;;  %v8515_v48 = vrot.slane %v8501_v32, %v14022_v44  ;;  %v14427_v12 = vrot.slane %v8148_v28, %v14022_v44 }
 0x8ba   : > { %v14432_v30 = vrot.slane %v8500_v43, %v14022_v44 }
 0x8bb   : > { %v8550_v53 = vcombine.high %v8540_v50, %v8548_v17  ;;  %8523 = vrot.lane.b32.xlu1 %v8515_v48, %s10168_s29  ;;  %v8549_v58 = vcombine.low %v8540_v50, %v8548_v17  ;;  %v8164_v10 = vcombine.high %v14427_v12, %v14951_v21  ;;  %v8517_v38 = vcombine.high %v8515_v48, %v14951_v21 }
 0x8bc   : > { %v8516_v56 = vcombine.high %v14432_v30, %v14951_v21 }
 0x8bd   : > { %v8564_v5 = vrot.slane %v8550_v53, %v14022_v44  ;;  %v14450_v25 = vrot.slane %v8549_v58, %v14022_v44 }
 0x8bf   : > { %8273 = vrot.lane.b32.xlu1 %v8263_v2, %s10170_s16  ;;  %8572 = vrot.lane.b32.xlu0 %v8564_v5, %s10168_s29  ;;  %v8565_v14 = vcombine.high %v14450_v25, %v14951_v21  ;;  %v8566_v44 = vcombine.high %v8564_v5, %v14951_v21  ;;  %v8587_v21 = vunpack.c.0.s8 %v8586_v52  ;;  %s10090_s29 = scalar_lea.vmem %s14704_s26, 768 }
 0x8c0   : > { %p10091_p11 = scmp.ne.s32.totalorder %s14704_s26, %s10090_s29 }
 0x8c1   : > { %v14475_v45 = vsub.s32 %v8587_v21, %v14878_v13 }
 0x8c2   : > { %p10092_p12 = pnand %p10091_p11, %p10261_p5 }
 0x8c3   : > { %8216 = vrot.lane.b32.xlu1 %v8213_v63, %s10169_s14  ;;  %8265 = vrot.lane.b32.xlu0 %v8262_v22, %s10169_s14 }
 0x8c4   : > { %p10093_p13 = pneg %p10092_p12 }
 0x8c7   : > { %8519 = vrot.lane.b32.xlu1 %v8516_v56, %s10169_s14  ;;  %8167 = vrot.lane.b32.xlu0 %v8164_v10, %s10169_s14 }
 0x8cb   : > { %8175 = vrot.lane.b32.xlu1 %v8165_v16, %s10170_s16  ;;  %8470 = vrot.lane.b32.xlu0 %v8467_v7, %s10169_s14 }
 0x8cf   : > { %8478 = vrot.lane.b32.xlu1 %v8468_v49, %s10170_s16  ;;  %8568 = vrot.lane.b32.xlu0 %v8565_v14, %s10169_s14 }
 0x8d3   : > { %8576 = vrot.lane.b32.xlu1 %v8566_v44, %s10170_s16  ;;  %8224 = vrot.lane.b32.xlu0 %v8214_v0, %s10170_s16 }
 0x8d7   : > { %8527 = vrot.lane.b32.xlu0 %v8517_v38, %s10170_s16  ;;  %s10172_s16 = smov [#allocation3]  }
 0x8d8   : > { %s10094_s22 = sshll.u32 %s10172_s16, 4  ;;  %s10095_s22 = int_to_ptr.vmem [resolvable:$false] %s10094_s22 }
 0x8d9   : > { %s10096_s25 = scalar_lea.vmem %s10095_s22, 1536  ;;  %p10097_p0 = scmp.lt.s32.totalorder %s14704_s26, %s10095_s22 }
 0x8da   : > { %p10098_p1 = scmp.lt.s32.totalorder %s10096_s25, %s10090_s29 }
 0x8dc   : > { %p10099_p2 = por %p10098_p1, %p10097_p0 }
 0x8de   : > { %p10100_p3 = pnand %p10099_p2, %p10093_p13 }
 0x8e5   : > { %v7639_v9 = vpop.permute.xlu0 %7638 }
 0x8e9   : > { %v7893_v1 = vpop.permute.xlu0 %7892  ;;  %v7688_v24 = vpop.permute.xlu1 %7687 }
 0x8ed   : > { %v7991_v42 = vpop.permute.xlu0 %7990  ;;  %v7587_v54 = vpop.permute.xlu1 %7586 }
 0x8f1   : > { %v7684_v23 = vpop.permute.xlu0 %7683  ;;  %v7942_v37 = vpop.permute.xlu1 %7941 }
 0x8f5   : > { %v7692_v11 = vpop.permute.xlu0 %7691  ;;  %v7635_v18 = vpop.permute.xlu1 %7634 }
 0x8f6   : > { %v7645_v60 = vsel %vm7593_vm15, %v14138_v51, %v7635_v18 }
 0x8f7   : > { %v7646_v19 = vsel %vm7595_vm0, %v7645_v60, %v7639_v9  ;;  %v7694_v9 = vsel %vm7593_vm15, %v14128_v31, %v7684_v23 }
 0x8f9   : > { %v7583_v36 = vpop.permute.xlu0 %7582  ;;  %v7643_v41 = vpop.permute.xlu1 %7642 }
 0x8fa   : > { %v7647_v4 = vsel %vm7597_vm1, %v7646_v19, %v7643_v41 }
 0x8fb   : > { %v8615_v47 = vrot.slane %v7647_v4, %v14475_v45 }
 0x8fd   : > { %v7591_v39 = vpop.permute.xlu0 %7590  ;;  %v8616_v8 = vcombine.high %v8615_v47, %v8615_v47  ;;  %v8623_v32 = vrot.slane %v8615_v47, %v14475_v45  ;;  %v7889_v53 = vpop.permute.xlu1 %7888 }
 0x8fe   : > { %v7899_v14 = vsel %vm7593_vm15, %v14164_v35, %v7889_v53 }
 0x8ff   : > { %v8630_v13 = vrot.slane %v8616_v8, %v14475_v45  ;;  %v8631_v48 = vcombine.high %v8623_v32, %v8623_v32  ;;  %v7900_v44 = vsel %vm7595_vm0, %v7899_v14, %v7893_v1  ;;  %v7695_v1 = vsel %vm7595_vm0, %v7694_v9, %v7688_v24 }
 0x901   : > { %v7938_v57 = vpop.permute.xlu0 %7937  ;;  %v8632_v20 = vcombine.high %v8630_v13, %v8630_v13  ;;  %v7897_v10 = vpop.permute.xlu1 %7896 }
 0x902   : > { %v7948_v29 = vsel %vm7593_vm15, %v14176_v55, %v7938_v57  ;;  %v7901_v0 = vsel %vm7597_vm1, %v7900_v44, %v7897_v10 }
 0x903   : > { %v7949_v51 = vsel %vm7595_vm0, %v7948_v29, %v7942_v37  ;;  %v7594_v37 = vsel %vm7593_vm15, %v14157_v61, %v7583_v36  ;;  %v8678_v52 = vrot.slane %v7901_v0, %v14475_v45 }
 0x904   : > { %v7596_v60 = vsel %vm7595_vm0, %v7594_v37, %v7587_v54 }
 0x905   : > { %v7946_v26 = vpop.permute.xlu0 %7945  ;;  %v7987_v16 = vpop.permute.xlu1 %7986  ;;  %v7598_v31 = vsel %vm7597_vm1, %v7596_v60, %v7591_v39  ;;  %v8679_v36 = vcombine.high %v8678_v52, %v8678_v52  ;;  %v8686_v4 = vrot.slane %v8678_v52, %v14475_v45 }
 0x906   : > { %v7950_v34 = vsel %vm7597_vm1, %v7949_v51, %v7946_v26  ;;  %v7997_v38 = vsel %vm7593_vm15, %v14188_v3, %v7987_v16  ;;  %v7696_v3 = vsel %vm7597_vm1, %v7695_v1, %v7692_v11 }
 0x907   : > { %v8702_v59 = vrot.slane %v7950_v34, %v14475_v45  ;;  %v7998_v35 = vsel %vm7595_vm0, %v7997_v38, %v7991_v42  ;;  %v8639_v19 = vrot.slane %v7696_v3, %v14475_v45  ;;  %v8591_v42 = vrot.slane %v7598_v31, %v14475_v45 }
 0x908   : > { %v8693_v11 = vrot.slane %v8679_v36, %v14475_v45  ;;  %v8694_v8 = vcombine.high %v8686_v4, %v8686_v4 }
 0x909   : > { %v8703_v46 = vcombine.high %v8702_v59, %v8702_v59  ;;  %v8710_v15 = vrot.slane %v8702_v59, %v14475_v45  ;;  %v7995_v7 = vpop.permute.xlu1 %7994  ;;  %v8640_v39 = vcombine.high %v8639_v19, %v8639_v19  ;;  %v8592_v29 = vcombine.high %v8591_v42, %v8591_v42 }
 0x90a   : > { %v7999_v21 = vsel %vm7597_vm1, %v7998_v35, %v7995_v7  ;;  %v8647_v51 = vrot.slane %v8639_v19, %v14475_v45  ;;  %v8901_v53 = vrot.slane %v8693_v11, %v14996_v62  ;;  %v8905_v10 = vrot.slane %v8694_v8, %v14996_v62 }
 0x90b   : > { %v8717_v17 = vrot.slane %v8703_v46, %v14475_v45  ;;  %v8718_v55 = vcombine.high %v8710_v15, %v8710_v15  ;;  %v8913_v50 = vrot.slane %v8710_v15, %v14996_v62  ;;  %v8726_v41 = vrot.slane %v7999_v21, %v14475_v45 }
 0x90d   : > { %v8719_v28 = vcombine.high %v8717_v17, %v8717_v17  ;;  %v8917_v43 = vrot.slane %v8717_v17, %v14996_v62  ;;  %v8921_v2 = vrot.slane %v8718_v55, %v14996_v62  ;;  %v14491_v5 = vsel %vm9074_vm2, %v8623_v32, %v8913_v50 }
 0x90e   : > { %v8727_v57 = vcombine.high %v8726_v41, %v8726_v41  ;;  %v8734_v34 = vrot.slane %v8726_v41, %v14475_v45  ;;  %v8695_v32 = vcombine.high %v8693_v11, %v8693_v11  ;;  %v8599_v17 = vrot.slane %v8591_v42, %v14475_v45 }
 0x90f   : > { %v8925_v63 = vrot.slane %v8719_v28, %v14996_v62  ;;  %v14495_v22 = vsel %vm9074_vm2, %v8630_v13, %v8917_v43  ;;  %v14498_v58 = vsel %vm9074_vm2, %v8631_v48, %v8921_v2  ;;  %v8654_v13 = vrot.slane %v8640_v39, %v14475_v45 }
 0x910   : > { %v8741_v46 = vrot.slane %v8727_v57, %v14475_v45  ;;  %v8606_v55 = vrot.slane %v8592_v29, %v14475_v45  ;;  %v8897_v48 = vrot.slane %v8686_v4, %v14996_v62  ;;  %v8742_v2 = vcombine.high %v8734_v34, %v8734_v34 }
 0x911   : > { %v14501_v56 = vsel %vm9074_vm2, %v8632_v20, %v8925_v63  ;;  %v8655_v63 = vcombine.high %v8647_v51, %v8647_v51  ;;  %v8909_v16 = vrot.slane %v8695_v32, %v14996_v62  ;;  %v8607_v14 = vcombine.high %v8599_v17, %v8599_v17 }
 0x912   : > { %v8743_v7 = vcombine.high %v8741_v46, %v8741_v46  ;;  %v8608_v44 = vcombine.high %v8606_v55, %v8606_v55  ;;  %v8929_v0 = vrot.slane %v8734_v34, %v14996_v62  ;;  %v9075_v38 = vsel %vm9074_vm2, %v8599_v17, %v8897_v48 }
 0x913   : > { %v14553_v9 = vsel %vm9074_vm2, %v8606_v55, %v8901_v53  ;;  %v8933_v1 = vrot.slane %v8741_v46, %v14996_v62  ;;  %v8937_v60 = vrot.slane %v8742_v2, %v14996_v62  ;;  %v9077_v31 = vsel %vm9074_vm2, %v8607_v14, %v8905_v10 }
 0x914   : > { %v9078_v36 = vsel %vm9074_vm2, %v8608_v44, %v8909_v16  ;;  %v8941_v41 = vrot.slane %v8743_v7, %v14996_v62 }
 0x915   : > { %v9085_v34 = vsel %vm9074_vm2, %v8655_v63, %v8937_v60 }
 0x919   : > { %v14513_v18 = vpop.permute.xlu0 %8220 }
 0x91d   : > { %v8270_v49 = vpop.permute.xlu1 %8269 }
 0x921   : > { %v8172_v6 = vpop.permute.xlu1 %8171 }
 0x925   : > { %v14522_v23 = vpop.permute.xlu0 %8474 }
 0x92d   : > { %v14524_v61 = vpop.permute.xlu1 %8523 }
 0x931   : > { %v14529_v24 = vpop.permute.xlu0 %8572  ;;  %v8274_v54 = vpop.permute.xlu1 %8273 }
 0x935   : > { %v8266_v47 = vpop.permute.xlu0 %8265  ;;  %v8217_v26 = vpop.permute.xlu1 %8216 }
 0x936   : > { %v8276_v59 = vsel %vm7593_vm15, %v14420_v33, %v8266_v47 }
 0x937   : > { %v8277_v15 = vsel %vm7595_vm0, %v8276_v59, %v8270_v49  ;;  %v8656_v49 = vcombine.high %v8654_v13, %v8654_v13 }
 0x938   : > { %v8278_v50 = vsel %vm7597_vm1, %v8277_v15, %v8274_v54 }
 0x939   : > { %v8801_v33 = vrot.slane %v8278_v50, %v14475_v45  ;;  %v8168_v28 = vpop.permute.xlu0 %8167  ;;  %v8520_v43 = vpop.permute.xlu1 %8519 }
 0x93a   : > { %v8178_v20 = vsel %vm7593_vm15, %v14427_v12, %v8168_v28  ;;  %v8530_v54 = vsel %vm7593_vm15, %v14432_v30, %v8520_v43 }
 0x93b   : > { %v8802_v37 = vcombine.high %v8801_v33, %v8801_v33  ;;  %v8179_v12 = vsel %vm7595_vm0, %v8178_v20, %v8172_v6  ;;  %v14566_v6 = vsel %vm9074_vm2, %v8647_v51, %v8929_v0  ;;  %v14569_v42 = vrot.slane %v8801_v33, %v14475_v45 }
 0x93c   : > { %v9084_v51 = vsel %vm9074_vm2, %v8654_v13, %v8933_v1 }
 0x93d   : > { %v8471_v52 = vpop.permute.xlu0 %8470  ;;  %v8176_v35 = vpop.permute.xlu1 %8175  ;;  %v14576_v4 = vrot.slane %v8802_v37, %v14475_v45  ;;  %v8989_v46 = vrot.slane %v14569_v42, %v14996_v62 }
 0x93e   : > { %v8481_v21 = vsel %vm7593_vm15, %v14441_v27, %v8471_v52  ;;  %v8180_v3 = vsel %vm7597_vm1, %v8179_v12, %v8176_v35  ;;  %v8227_v27 = vsel %vm7593_vm15, %v14417_v40, %v8217_v26  ;;  %v14587_v26 = vsel %vm9074_vm2, %v8656_v49, %v8941_v41 }
 0x93f   : > { %v8753_v19 = vrot.slane %v8180_v3, %v14475_v45  ;;  %v8482_v29 = vsel %vm7595_vm0, %v8481_v21, %v14522_v23  ;;  %v8817_v23 = vcombine.high %v14569_v42, %v14569_v42  ;;  %v8228_v15 = vsel %vm7595_vm0, %v8227_v27, %v14513_v18 }
 0x940   : > { %v8818_v13 = vcombine.high %v14576_v4, %v14576_v4 }
 0x941   : > { %v8754_v11 = vcombine.high %v8753_v19, %v8753_v19  ;;  %v8761_v57 = vrot.slane %v8753_v19, %v14475_v45  ;;  %v8569_v39 = vpop.permute.xlu0 %8568  ;;  %v8479_v47 = vpop.permute.xlu1 %8478  ;;  %v8997_v49 = vrot.slane %v8817_v23, %v14996_v62 }
 0x942   : > { %v8579_v40 = vsel %vm7593_vm15, %v14450_v25, %v8569_v39  ;;  %v8483_v30 = vsel %vm7597_vm1, %v8482_v29, %v8479_v47  ;;  %v8531_v25 = vsel %vm7595_vm0, %v8530_v54, %v14524_v61  ;;  %v8993_v61 = vrot.slane %v14576_v4, %v14996_v62 }
 0x943   : > { %v8768_v59 = vrot.slane %v8754_v11, %v14475_v45  ;;  %v8769_v8 = vcombine.high %v8761_v57, %v8761_v57  ;;  %v8828_v32 = vrot.slane %v8483_v30, %v14475_v45  ;;  %v8957_v55 = vrot.slane %v8761_v57, %v14996_v62 }
 0x944   : > { %v8580_v48 = vsel %vm7595_vm0, %v8579_v40, %v14529_v24  ;;  %v9001_v42 = vrot.slane %v8818_v13, %v14996_v62  ;;  %v9095_v4 = vsel %vm6391_vm11, %v14566_v6, %v8989_v46  ;;  %v9096_v39 = vsel %vm6391_vm11, %v9084_v51, %v8993_v61 }
 0x945   : > { %v8770_v17 = vcombine.high %v8768_v59, %v8768_v59  ;;  %v8225_v50 = vpop.permute.xlu0 %8224  ;;  %v8577_v53 = vpop.permute.xlu1 %8576  ;;  %v8829_v33 = vcombine.high %v8828_v32, %v8828_v32  ;;  %v8836_v28 = vrot.slane %v8828_v32, %v14475_v45  ;;  %v8961_v2 = vrot.slane %v8768_v59, %v14996_v62 }
 0x946   : > { %v8229_v43 = vsel %vm7597_vm1, %v8228_v15, %v8225_v50  ;;  %v8581_v18 = vsel %vm7597_vm1, %v8580_v48, %v8577_v53  ;;  %v8965_v20 = vrot.slane %v8769_v8, %v14996_v62  ;;  %v9087_v44 = vsel %vm6391_vm11, %v9075_v38, %v8957_v55 }
 0x947   : > { %v8777_v63 = vrot.slane %v8229_v43, %v14475_v45  ;;  %v8843_v10 = vrot.slane %v8829_v33, %v14475_v45  ;;  %v8844_v24 = vcombine.high %v8836_v28, %v8836_v28  ;;  %v9017_v16 = vrot.slane %v8836_v28, %v14996_v62 }
 0x948   : > { %v8876_v7 = vrot.slane %v8581_v18, %v14475_v45  ;;  %v8969_v14 = vrot.slane %v8770_v17, %v14996_v62  ;;  %v9088_v1 = vsel %vm6391_vm11, %v14553_v9, %v8961_v2  ;;  %v9089_v60 = vsel %vm6391_vm11, %v9077_v31, %v8965_v20 }
 0x949   : > { %v8778_v0 = vcombine.high %v8777_v63, %v8777_v63  ;;  %v8845_v37 = vcombine.high %v8843_v10, %v8843_v10  ;;  %v9021_v52 = vrot.slane %v8843_v10, %v14996_v62  ;;  %v9025_v12 = vrot.slane %v8844_v24, %v14996_v62  ;;  %v8528_v54 = vpop.permute.xlu0 %8527 }
 0x94a   : > { %v9100_v35 = vsel %vm9099_vm3, %v9087_v44, %v9017_v16  ;;  %v8785_v21 = vrot.slane %v8777_v63, %v14475_v45  ;;  %v8877_v19 = vcombine.high %v8876_v7, %v8876_v7  ;;  %v9090_v27 = vsel %vm6391_vm11, %v9078_v36, %v8969_v14 }
 0x94b   : > { %10047 = vtanh.f32 %v9100_v35  ;;  %v9029_v3 = vrot.slane %v8845_v37, %v14996_v62  ;;  %v9101_v38 = vsel %vm9099_vm3, %v9088_v1, %v9021_v52  ;;  %v9102_v41 = vsel %vm9099_vm3, %v9089_v60, %v9025_v12 }
 0x94c   : > { %10049 = vtanh.f32 %v9101_v38  ;;  %v8792_v9 = vrot.slane %v8778_v0, %v14475_v45  ;;  %v8884_v11 = vrot.slane %v8876_v7, %v14475_v45  ;;  %v8793_v57 = vcombine.high %v8785_v21, %v8785_v21 }
 0x94d   : > { %v9103_v31 = vsel %vm9099_vm3, %v9090_v27, %v9029_v3  ;;  %10051 = vtanh.f32 %v9102_v41  ;;  %v9097_v36 = vsel %vm6391_vm11, %v9085_v34, %v8997_v49  ;;  %v8891_v29 = vrot.slane %v8877_v19, %v14475_v45 }
 0x94e   : > { %10053 = vtanh.f32 %v9103_v31  ;;  %v8892_v47 = vcombine.high %v8884_v11, %v8884_v11  ;;  %v9049_v40 = vrot.slane %v8884_v11, %v14996_v62  ;;  %v8532_v30 = vsel %vm7597_vm1, %v8531_v25, %v8528_v54 }
 0x94f   : > { %v8794_v59 = vcombine.high %v8792_v9, %v8792_v9  ;;  %v8973_v8 = vrot.slane %v8785_v21, %v14996_v62  ;;  %v9098_v6 = vsel %vm6391_vm11, %v14587_v26, %v9001_v42  ;;  %v8852_v32 = vrot.slane %v8532_v30, %v14475_v45 }
 0x950   : > { %v8893_v51 = vcombine.high %v8891_v29, %v8891_v29  ;;  %v9053_v34 = vrot.slane %v8891_v29, %v14996_v62  ;;  %v9057_v23 = vrot.slane %v8892_v47, %v14996_v62  ;;  %v9108_v46 = vsel %vm9099_vm3, %v9095_v4, %v9049_v40 }
 0x951   : > { %v8977_v15 = vrot.slane %v8792_v9, %v14996_v62  ;;  %10055 = vtanh.f32 %v9108_v46  ;;  %v8853_v25 = vcombine.high %v8852_v32, %v8852_v32  ;;  %v8860_v13 = vrot.slane %v8852_v32, %v14475_v45 }
 0x952   : > { %v8981_v17 = vrot.slane %v8793_v57, %v14996_v62  ;;  %v9061_v26 = vrot.slane %v8893_v51, %v14996_v62  ;;  %v9109_v55 = vsel %vm9099_vm3, %v9096_v39, %v9053_v34  ;;  %v9110_v50 = vsel %vm9099_vm3, %v9097_v36, %v9057_v23 }
 0x953   : > { %10057 = vtanh.f32 %v9109_v55  ;;  %v8867_v48 = vrot.slane %v8853_v25, %v14475_v45  ;;  %v8868_v53 = vcombine.high %v8860_v13, %v8860_v13  ;;  %v9033_v33 = vrot.slane %v8860_v13, %v14996_v62 }
 0x954   : > { %v8985_v28 = vrot.slane %v8794_v59, %v14996_v62  ;;  %v9091_v43 = vsel %vm6391_vm11, %v14491_v5, %v8973_v8  ;;  %v9111_v18 = vsel %vm9099_vm3, %v9098_v6, %v9061_v26  ;;  %10059 = vtanh.f32 %v9110_v50 }
 0x955   : > { %10061 = vtanh.f32 %v9111_v18  ;;  %v8869_v61 = vcombine.high %v8867_v48, %v8867_v48  ;;  %v9037_v2 = vrot.slane %v8867_v48, %v14996_v62  ;;  %v9041_v20 = vrot.slane %v8868_v53, %v14996_v62 }
 0x956   : > { %v9092_v45 = vsel %vm6391_vm11, %v14495_v22, %v8977_v15  ;;  %v9093_v10 = vsel %vm6391_vm11, %v14498_v58, %v8981_v17  ;;  %v9104_v24 = vsel %vm9099_vm3, %v9091_v43, %v9033_v33  ;;  %v9094_v7 = vsel %vm6391_vm11, %v14501_v56, %v8985_v28 }
 0x957   : > { %v9045_v5 = vrot.slane %v8869_v61, %v14996_v62  ;;  %v9105_v16 = vsel %vm9099_vm3, %v9092_v45, %v9037_v2  ;;  %v9106_v22 = vsel %vm9099_vm3, %v9093_v10, %v9041_v20  ;;  %10063 = vtanh.f32 %v9104_v24 }
 0x958   : > { %v10048_v63 = vpop.eup %10047  ;;  %10065 = vtanh.f32 %v9105_v16 }
 0x959   : > { %9125 = vst.msk [vmem:[%s14669_s24] sm:$0xf] %vm9124_vm4, %v10048_v63  ;;  %v10050_v58 = vpop.eup %10049  ;;  %v9107_v62 = vsel %vm9099_vm3, %v9094_v7, %v9045_v5  ;;  %10067 = vtanh.f32 %v9106_v22 }
 0x95a   : > { %v10052_v49 = vpop.eup %10051  ;;  %9126 = vst.msk [vmem:[%s14669_s24 + $0x4] sm:$0xf] %vm9124_vm4, %v10050_v58  ;;  %10069 = vtanh.f32 %v9107_v62 }
 0x95b   : > { %v10054_v14 = vpop.eup %10053  ;;  %9127 = vst.msk [vmem:[%s14669_s24 + $0x8] sm:$0xf] %vm9124_vm4, %v10052_v49 }
 0x95c   : > { %9128 = vst.msk [vmem:[%s14669_s24 + $0xc] sm:$0xf] %vm9124_vm4, %v10054_v14 }
 0x95e   : > { %v10056_v56 = vpop.eup %10055 }
 0x95f   : > { %9133 = vst.msk [vmem:[%s14669_s24 + $0x20] sm:$0xf] %vm9124_vm4, %v10056_v56 }
 0x960   : > { %v10058_v44 = vpop.eup %10057 }
 0x961   : > { %v10060_v0 = vpop.eup %10059  ;;  %9134 = vst.msk [vmem:[%s14669_s24 + $0x24] sm:$0xf] %vm9124_vm4, %v10058_v44 }
 0x962   : > { %v10062_v37 = vpop.eup %10061  ;;  %9135 = vst.msk [vmem:[%s14669_s24 + $0x28] sm:$0xf] %vm9124_vm4, %v10060_v0 }
 0x963   : > { %9136 = vst.msk [vmem:[%s14669_s24 + $0x2c] sm:$0xf] %vm9124_vm4, %v10062_v37 }
 0x964   : > { %v10064_v52 = vpop.eup %10063 }
 0x965   : > { %v10066_v12 = vpop.eup %10065  ;;  %9129 = vst.msk [vmem:[%s14669_s24 + $0x10] sm:$0xf] %vm9124_vm4, %v10064_v52 }
 0x966   : > { %v10068_v35 = vpop.eup %10067  ;;  %9130 = vst.msk [vmem:[%s14669_s24 + $0x14] sm:$0xf] %vm9124_vm4, %v10066_v12 }
 0x967   : > { %v10070_v1 = vpop.eup %10069  ;;  %9131 = vst.msk [vmem:[%s14669_s24 + $0x18] sm:$0xf] %vm9124_vm4, %v10068_v35 }
 0x968   : > { %9132 = vst.msk [vmem:[%s14669_s24 + $0x1c] sm:$0xf] %vm9124_vm4, %v10070_v1 }
 0x969   : > { %10103 = shalt.err (!%p10100_p3)
}
 0x96a   : > { %s10104_s24 = scalar_lea.hbm %s14702_s23, 768  ;;  %s10108_s28 = scalar_lea.hbm %s14761_s9, 1536 }
 0x96b   : > { %p10105_p4 = scmp.ne.s32.totalorder %s14702_s23, %s10104_s24  ;;  %p10109_p9 = scmp.lt.s32.totalorder %s14702_s23, %s14761_s9 }
 0x96c   : > { %p10110_p10 = scmp.lt.s32.totalorder %s10108_s28, %s10104_s24 }
 0x96d   : > { %p10106_p7 = pnand %p10105_p4, %p10261_p5 }
 0x96e   : > { %p10111_p11 = por %p10110_p10, %p10109_p9 }
 0x96f   : > { %p10107_p8 = pneg %p10106_p7 }
 0x971   : > { %p10112_p12 = pnand %p10111_p11, %p10107_p8 }
 0x973   : > { %10115 = shalt.err (!%p10112_p12)
}
 0x974   : > { %s14997_s29 = smov 64  }
 0x975   : > { %9828 = dma.vmem_to_hbm [thread:$0]  (%p10261_p5), %s14704_s26, 768, %s14702_s23, %s9138_s13, %s14997_s29, %s14997_s29, %s10169_s14  }
 0x976 PF: > { %p9834_p13 = scmp.ge.s32.totalorder %s10150_s12, 2  ;;  %s9166_s22 = sand.u32 1, %s10138_s30  }
 0x977   : > { %s9167_s17 = scalar_lea.sflag [#allocation4], %s9166_s22 }
 0x978   : > { %p9831_p0 = pnand %p9834_p13, %p10265_p6 }
 0x97a   : > { %p9832_p1 = pneg %p9831_p0 }
 0x97c   : > { %10133 = dma.done.wait (%p9832_p1), %s9167_s17, 768  }
 0x97d   : > { %10135 = vsyncadd (%p9832_p1), %s9167_s17, 4294966528  ;;  %p19_p2 = scmp.ge.s32.totalorder %s10248_s15, 4   ;;  %s14998_s30 = smov %s10142_s10 }
 0x97e   : > { %s14999_s10 = smov %s10146_s11  ;;  %s15000_s11 = smov %s10259_s18 }
 0x97f   : > { %s15001_s12 = smov %s10248_s15  ;;  %21 = sbr.rel (!%p19_p2) target bundleno = 3 (0x3), region = 94 }
 0x984   :  { %9172 = vsyncpa [#allocation4], 1 }
 0x985   :  { %9174 = vsyncpa [#allocation4 + $0x1], 1 }

</bundles_post_ra>
